<compile_context>
chip_gen: v6e
topology: v6e:2x2x1
jax: 0.10.0
libtpu: 0.0.40
codegen_flags: <defaults>
</compile_context>

<pallas_src>
import functools

import jax
import jax.numpy as jnp
from jax import lax
from jax.experimental import pallas as pl
from jax.experimental.pallas import tpu as pltpu

NF = 16           # nf in SIANet.__init__
C_IN = 1          # init_conv1 = OneConv_cdc(1, nf - 1)
C_OUT = NF - 1    # 15
THETA = 0.7
NEG_SLOPE = 0.1   # LeakyReLU(0.1)
KH = KW = 3

_ROW_PAD = 8      # sublane offset of the tile inside the halo scratch (keeps the big store aligned)


def _init_conv_cdc_kernel(w_ref, b_ref, xc_ref, xt_ref, xb_ref, out_ref, xpad_ref,
                          *, TH, W, compute_dtype):
    """Folded Conv2d_cd (plain 3x3 conv + bias) + LeakyReLU(0.1) + concat([x, act], ch).

    Refs per grid step (bi, hi):
      w_ref  : (C_OUT*9,) SMEM   theta-folded 3x3 weights (f32 scalars)
      b_ref  : (C_OUT,)   SMEM   theta-folded bias (f32 scalars)
      xc_ref : (1, TH, W) VMEM   current row-tile of the input
      xt_ref : (1, 8, W)  VMEM   8-row block just above the tile (row 7 = top halo row)
      xb_ref : (1, 8, W)  VMEM   8-row block just below the tile (row 0 = bottom halo row)
      out_ref: (1, 16, TH, W)    channel 0 = x, channels 1.. = activation (out_dtype)
      xpad_ref: (TH+16, W) VMEM f32 scratch holding the halo-extended tile
    """
    h = pl.program_id(1)
    n_h = pl.num_programs(1)
    R0 = _ROW_PAD

    x_tile = xc_ref[0]                                   # (TH, W) f32
    # concat([x, act], dim=1): channel 0 is the input itself
    out_ref[0, 0, :, :] = x_tile.astype(out_ref.dtype)

    # --- assemble the halo-extended tile in the VMEM scratch ----------------
    # rows [R0, R0+TH) = tile (sublane-aligned store); row R0-1 = single top halo
    # row; row R0+TH = single bottom halo row. Only the halo rows actually read
    # are copied, and zero/copy is gated with pl.when (no vector selects).
    xpad_ref[R0:R0 + TH, :] = x_tile

    @pl.when(h > 0)
    def _():
        xpad_ref[R0 - 1:R0, :] = xt_ref[0, 7:8, :]

    @pl.when(h == 0)
    def _():
        xpad_ref[R0 - 1:R0, :] = jnp.zeros((1, W), jnp.float32)

    @pl.when(h < n_h - 1)
    def _():
        xpad_ref[R0 + TH:R0 + TH + 1, :] = xb_ref[0, 0:1, :]

    @pl.when(h == n_h - 1)
    def _():
        xpad_ref[R0 + TH:R0 + TH + 1, :] = jnp.zeros((1, W), jnp.float32)

    # --- hoist the 9 shifted taps: 3 aligned row loads + 6 XLU rolls --------
    # Each tap is loaded/derived exactly once and reused by all C_OUT channels.
    lane = lax.broadcasted_iota(jnp.int32, (TH, W), 1)
    not_left = lane >= 1          # kw=0 reads column j-1 -> zero at the left image edge
    not_right = lane <= W - 2     # kw=2 reads column j+1 -> zero at the right image edge

    taps = []
    for kh in range(KH):
        t_mid = xpad_ref[R0 - 1 + kh:R0 - 1 + kh + TH, :]            # (TH, W), lane-aligned
        t_left = jnp.where(not_left, pltpu.roll(t_mid, 1, axis=1), 0.0)
        t_right = jnp.where(not_right, pltpu.roll(t_mid, W - 1, axis=1), 0.0)
        for t in (t_left, t_mid, t_right):
            taps.append(t.astype(compute_dtype))

    # --- channel loop: plain 3x3 conv + bias + LeakyReLU(0.1) ---------------
    # theta/bias already folded into (w_ref, b_ref). compute_dtype=bf16 halves the
    # binding VPU work on v6e/v7x; on the memory-bound v5e it is neutral.
    # TODO(synk): optionally route the 9x15 contraction through the idle MXU
    #             (stack taps as (9, TH*W)); benchmark against this bf16-VPU path.
    for o in range(C_OUT):
        acc = taps[0] * w_ref[o * 9].astype(compute_dtype) + b_ref[o].astype(compute_dtype)
        for k in range(1, KH * KW):
            acc = acc + taps[k] * w_ref[o * 9 + k].astype(compute_dtype)
        # LeakyReLU(0.1) == max(x, 0.1*x): 2 VALU ops instead of cmp + mul + select
        out_ref[0, o + 1, :, :] = jnp.maximum(acc, NEG_SLOPE * acc).astype(out_ref.dtype)


def _pick_tile_h(B, H, W, out_bytes, *, min_steps=8, vmem_target=20 * 1024 * 1024):
    """Largest row-tile (multiple of 8, divisor of H) that keeps the per-step working
    set under ~20 MiB (safe on every generation incl. v7x's 64 MiB physical VMEM) while
    still giving >= min_steps grid steps for pipeline overlap when the input allows it."""
    cands = [th for th in range(8, H + 1, 8) if H % th == 0]

    def vmem_bytes(th):
        return (2 * NF * th * W * out_bytes        # double-buffered output block
                + 2 * th * W * 4                   # double-buffered input tile
                + 4 * 8 * W * 4                    # two double-buffered 8-row halo blocks
                + (th + 2 * _ROW_PAD) * W * 4)     # halo-assembly scratch

    fits = [th for th in cands if vmem_bytes(th) <= vmem_target] or [cands[0]]
    deep = [th for th in fits if B * (H // th) >= min_steps]
    return max(deep) if deep else max(fits)


def sianet_init_conv(x, w, b, *, tile_h=None,
                     out_dtype=jnp.bfloat16, compute_dtype=jnp.bfloat16):
    """OneConv_cdc(1, nf-1): Conv2d_cd(3x3,pad=1,bias,theta=0.7) + LeakyReLU(0.1) + concat.

    x: (B, 1, H, W); w: (15, 1, 3, 3); b: (15,)  ->  (B, 16, H, W) in out_dtype.
    out_dtype / compute_dtype default to bf16 per the perf review; pass float32 for the
    bit-faithful path.
    """
    B, c, H, W = x.shape
    assert c == C_IN
    out_bytes = jnp.dtype(out_dtype).itemsize

    x2 = x[:, 0].astype(jnp.float32)                      # (B, H, W)

    # Pad H to a multiple of 8 and W to a multiple of 128 (lane-dense stores).
    # Zero right/bottom padding reproduces the conv's own zero padding for the kept
    # rows/cols, so slicing the output afterwards is exact.
    Hp = -(-H // 8) * 8
    Wp = -(-W // 128) * 128
    if (Hp, Wp) != (H, W):
        x2 = jnp.pad(x2, ((0, 0), (0, Hp - H), (0, Wp - W)))

    TH = _pick_tile_h(B, Hp, Wp, out_bytes) if tile_h is None else tile_h
    assert Hp % TH == 0 and TH % 8 == 0
    n_h = Hp // TH
    tb = TH // 8          # number of 8-row blocks per tile (for the halo index maps)
    nb = Hp // 8          # number of 8-row blocks in the (padded) image

    # Fold theta and bias into the conv weights at trace time:
    #   out = conv3x3(x, w) + b - theta*(sum(w)*x + b)
    #       = conv3x3(x, w_eff) + (1-theta)*b,  with w_eff[center] = w[center] - theta*sum(w)
    w32 = w.astype(jnp.float32)
    ksum = w32.sum(axis=(1, 2, 3))                        # (C_OUT,)
    w_eff = w32[:, 0].at[:, 1, 1].add(-THETA * ksum)      # (C_OUT, 3, 3)
    wflat = w_eff.reshape(C_OUT * KH * KW)
    b_eff = (1.0 - THETA) * b.astype(jnp.float32)

    kernel = functools.partial(_init_conv_cdc_kernel, TH=TH, W=Wp, compute_dtype=compute_dtype)

    out = pl.pallas_call(
        kernel,
        out_shape=jax.ShapeDtypeStruct((B, NF, Hp, Wp), out_dtype),
        grid=(B, n_h),
        in_specs=[
            pl.BlockSpec(memory_space=pltpu.MemorySpace.SMEM),    # folded weights (scalars)
            pl.BlockSpec(memory_space=pltpu.MemorySpace.SMEM),    # folded bias (scalars)
            # current row-tile
            pl.BlockSpec((1, TH, Wp), lambda bi, hi: (bi, hi, 0)),
            # 8-row block just above the tile (clamped at the image top; zeroed in-kernel)
            pl.BlockSpec((1, 8, Wp), lambda bi, hi: (bi, jnp.maximum(hi * tb - 1, 0), 0)),
            # 8-row block just below the tile (clamped at the image bottom; zeroed in-kernel)
            pl.BlockSpec((1, 8, Wp), lambda bi, hi: (bi, jnp.minimum((hi + 1) * tb, nb - 1), 0)),
        ],
        out_specs=pl.BlockSpec((1, NF, TH, Wp), lambda bi, hi: (bi, 0, hi, 0)),
        scratch_shapes=[pltpu.VMEM((TH + 2 * _ROW_PAD, Wp), jnp.float32)],
        compiler_params=pltpu.CompilerParams(
            # TODO(synk): on v7x, verify both TensorCores pick up the (B, n_h) grid; if one
            #             TC idles in the profile, switch the leading axis to CORE_PARALLEL.
            dimension_semantics=("parallel", "parallel"),
            vmem_limit_bytes=32 * 1024 * 1024),
        cost_estimate=pl.CostEstimate(
            flops=2 * KH * KW * C_OUT * B * Hp * Wp,
            transcendentals=0,
            bytes_accessed=B * Hp * Wp * 4 + B * NF * Hp * Wp * out_bytes),
    )(wflat, b_eff, x2, x2, x2)

    if (Hp, Wp) != (H, W):
        out = out[:, :, :H, :W]
    return out


def ref_forward(x, w, b):
    """Pure-JAX reference of OneConv_cdc (Conv2d_cd + LeakyReLU + concat), f32."""
    dn = ("NCHW", "OIHW", "NCHW")
    out_normal = lax.conv_general_dilated(
        x, w, window_strides=(1, 1), padding=((1, 1), (1, 1)), dimension_numbers=dn
    ) + b[None, :, None, None]
    kd = w.sum(axis=(2, 3))[:, :, None, None]             # (C_OUT, C_IN, 1, 1)
    out_diff = lax.conv_general_dilated(
        x, kd, window_strides=(1, 1), padding=((0, 0), (0, 0)), dimension_numbers=dn
    ) + b[None, :, None, None]
    res = out_normal - THETA * out_diff
    act = jnp.where(res > 0, res, NEG_SLOPE * res)
    return jnp.concatenate([x, act], axis=1)


if __name__ == "__main__":
    key = jax.random.PRNGKey(0)
    kx, kwt, kb = jax.random.split(key, 3)

    B, H, W = 2, 128, 128                                  # lane-dense W (multiple of 128)
    x = jax.random.normal(kx, (B, C_IN, H, W), dtype=jnp.float32)

    # Deterministic init mimicking PyTorch Conv2d default (uniform in +-1/sqrt(fan_in), fan_in=9)
    bound = 1.0 / (C_IN * KH * KW) ** 0.5
    w = jax.random.uniform(kwt, (C_OUT, C_IN, KH, KW), jnp.float32, -bound, bound)
    b = jax.random.uniform(kb, (C_OUT,), jnp.float32, -bound, bound)

    ref = jax.block_until_ready(ref_forward(x, w, b))

    # Bit-faithful path (f32 compute + f32 output): tight check of fold / halo / edge logic.
    # tile_h=64 exercises the multi-tile halo exchange; None uses the auto-sized tile.
    for th in (64, None):
        out = jax.block_until_ready(
            sianet_init_conv(x, w, b, tile_h=th,
                             out_dtype=jnp.float32, compute_dtype=jnp.float32))
        assert out.shape == (B, NF, H, W), out.shape
        if not jnp.allclose(out, ref, atol=1e-5, rtol=1e-5):
            raise AssertionError(f"f32 Pallas kernel does not match JAX reference (tile_h={th})")

    # Default fast path (bf16 compute + bf16 output, per perf review): loose sanity check
    # against the f32 reference (numerics change flagged by the review).
    out_fast = jax.block_until_ready(sianet_init_conv(x, w, b))
    assert out_fast.shape == (B, NF, H, W) and out_fast.dtype == jnp.bfloat16
    max_err = float(jnp.max(jnp.abs(out_fast.astype(jnp.float32) - ref)))
    if max_err > 0.2:
        raise AssertionError(f"bf16 Pallas kernel deviates too much from reference: {max_err}")

    print("KERNEL_OK")
</pallas_src>

<mosaic_0001>
module attributes {stable_mosaic.version = 11 : i64} {
  func.func @_init_conv_cdc_kernel(%arg0: i32, %arg1: i32, %arg2: memref<135xf32, #tpu.memory_space<smem>>, %arg3: memref<15xf32, #tpu.memory_space<smem>>, %arg4: memref<1x64x128xf32, #tpu.memory_space<vmem>>, %arg5: memref<1x8x128xf32, #tpu.memory_space<vmem>>, %arg6: memref<1x8x128xf32, #tpu.memory_space<vmem>>, %arg7: memref<1x16x64x128xf32, #tpu.memory_space<vmem>>, %arg8: memref<80x128xf32, #tpu.memory_space<vmem>>) attributes {dimension_semantics = [#tpu.dimension_semantics<parallel>, #tpu.dimension_semantics<parallel>], iteration_bounds = array<i64: 2, 2>, scalar_prefetch = 0 : i64, scratch_operands = 1 : i64, tpu.core_type = #tpu.core_type<tc>, window_params = [{transform_indices = @transform_0, window_bounds = array<i64: 135>}, {transform_indices = @transform_1, window_bounds = array<i64: 15>}, {transform_indices = @transform_2, window_bounds = array<i64: 1, 64, 128>}, {transform_indices = @transform_3, window_bounds = array<i64: 1, 8, 128>}, {transform_indices = @transform_4, window_bounds = array<i64: 1, 8, 128>}, {transform_indices = @transform_5, window_bounds = array<i64: 1, 16, 64, 128>}]} {
    %c0 = arith.constant 0 : index
    %c0_0 = arith.constant 0 : index
    %c0_1 = arith.constant 0 : index
    %0 = vector.load %arg4[%c0, %c0_0, %c0_1] : memref<1x64x128xf32, #tpu.memory_space<vmem>>, vector<1x64x128xf32>
    %1 = vector.shape_cast %0 : vector<1x64x128xf32> to vector<64x128xf32>
    %c0_2 = arith.constant 0 : index
    %c0_3 = arith.constant 0 : index
    %c0_4 = arith.constant 0 : index
    %c0_5 = arith.constant 0 : index
    %2 = vector.load %arg7[%c0_2, %c0_3, %c0_4, %c0_5] : memref<1x16x64x128xf32, #tpu.memory_space<vmem>>, vector<1x1x64x128xf32>
    %3 = vector.shape_cast %2 : vector<1x1x64x128xf32> to vector<64x128xf32>
    %4 = vector.shape_cast %1 : vector<64x128xf32> to vector<1x1x64x128xf32>
    tpu.vector_store %arg7[%c0_2, %c0_3, %c0_4, %c0_5], %4 {strides = array<i32>} : memref<1x16x64x128xf32, #tpu.memory_space<vmem>>, vector<1x1x64x128xf32>,
    %c8 = arith.constant 8 : index
    %c0_6 = arith.constant 0 : index
    %5 = vector.load %arg8[%c8, %c0_6] : memref<80x128xf32, #tpu.memory_space<vmem>>, vector<64x128xf32>
    tpu.vector_store %arg8[%c8, %c0_6], %1 {strides = array<i32>} : memref<80x128xf32, #tpu.memory_space<vmem>>, vector<64x128xf32>,
    %c0_i32 = arith.constant 0 : i32
    %6 = arith.cmpi sgt, %arg1, %c0_i32 : i32
    %7 = arith.extui %6 : i1 to i32
    %c0_i32_7 = arith.constant 0 : i32
    %8 = arith.cmpi ne, %7, %c0_i32_7 : i32
    scf.if %8 {
      %c0_122 = arith.constant 0 : index
      %c7_123 = arith.constant 7 : index
      %c0_124 = arith.constant 0 : index
      %704 = vector.load %arg5[%c0_122, %c7_123, %c0_124] : memref<1x8x128xf32, #tpu.memory_space<vmem>>, vector<1x1x128xf32>
      %705 = vector.shape_cast %704 : vector<1x1x128xf32> to vector<1x128xf32>
      %c7_125 = arith.constant 7 : index
      %c0_126 = arith.constant 0 : index
      %706 = vector.load %arg8[%c7_125, %c0_126] : memref<80x128xf32, #tpu.memory_space<vmem>>, vector<1x128xf32>
      tpu.vector_store %arg8[%c7_125, %c0_126], %705 {strides = array<i32>} : memref<80x128xf32, #tpu.memory_space<vmem>>, vector<1x128xf32>,
    } else {
    }
    %c0_i32_8 = arith.constant 0 : i32
    %9 = arith.cmpi eq, %arg1, %c0_i32_8 : i32
    %10 = arith.extui %9 : i1 to i32
    %c0_i32_9 = arith.constant 0 : i32
    %11 = arith.cmpi ne, %10, %c0_i32_9 : i32
    scf.if %11 {
      %cst_122 = arith.constant 0.000000e+00 : f32
      %704 = vector.broadcast %cst_122 : f32 to vector<1x128xf32>
      %c7_123 = arith.constant 7 : index
      %c0_124 = arith.constant 0 : index
      %705 = vector.load %arg8[%c7_123, %c0_124] : memref<80x128xf32, #tpu.memory_space<vmem>>, vector<1x128xf32>
      tpu.vector_store %arg8[%c7_123, %c0_124], %704 {strides = array<i32>} : memref<80x128xf32, #tpu.memory_space<vmem>>, vector<1x128xf32>,
    } else {
    }
    %c1_i32 = arith.constant 1 : i32
    %12 = arith.cmpi slt, %arg1, %c1_i32 : i32
    %13 = arith.extui %12 : i1 to i32
    %c0_i32_10 = arith.constant 0 : i32
    %14 = arith.cmpi ne, %13, %c0_i32_10 : i32
    scf.if %14 {
      %c0_122 = arith.constant 0 : index
      %c0_123 = arith.constant 0 : index
      %c0_124 = arith.constant 0 : index
      %704 = vector.load %arg6[%c0_122, %c0_123, %c0_124] : memref<1x8x128xf32, #tpu.memory_space<vmem>>, vector<1x1x128xf32>
      %705 = vector.shape_cast %704 : vector<1x1x128xf32> to vector<1x128xf32>
      %c72_125 = arith.constant 72 : index
      %c0_126 = arith.constant 0 : index
      %706 = vector.load %arg8[%c72_125, %c0_126] : memref<80x128xf32, #tpu.memory_space<vmem>>, vector<1x128xf32>
      tpu.vector_store %arg8[%c72_125, %c0_126], %705 {strides = array<i32>} : memref<80x128xf32, #tpu.memory_space<vmem>>, vector<1x128xf32>,
    } else {
    }
    %c1_i32_11 = arith.constant 1 : i32
    %15 = arith.cmpi eq, %arg1, %c1_i32_11 : i32
    %16 = arith.extui %15 : i1 to i32
    %c0_i32_12 = arith.constant 0 : i32
    %17 = arith.cmpi ne, %16, %c0_i32_12 : i32
    scf.if %17 {
      %cst_122 = arith.constant 0.000000e+00 : f32
      %704 = vector.broadcast %cst_122 : f32 to vector<1x128xf32>
      %c72_123 = arith.constant 72 : index
      %c0_124 = arith.constant 0 : index
      %705 = vector.load %arg8[%c72_123, %c0_124] : memref<80x128xf32, #tpu.memory_space<vmem>>, vector<1x128xf32>
      tpu.vector_store %arg8[%c72_123, %c0_124], %704 {strides = array<i32>} : memref<80x128xf32, #tpu.memory_space<vmem>>, vector<1x128xf32>,
    } else {
    }
    %18 = tpu.iota {dimensions = array<i32: 1>} : vector<64x128xi32>
    %c1_i32_13 = arith.constant 1 : i32
    %19 = vector.broadcast %c1_i32_13 : i32 to vector<64x128xi32>
    %20 = arith.cmpi sge, %18, %19 : vector<64x128xi32>
    %c126_i32 = arith.constant 126 : i32
    %21 = vector.broadcast %c126_i32 : i32 to vector<64x128xi32>
    %22 = arith.cmpi sle, %18, %21 : vector<64x128xi32>
    %c7 = arith.constant 7 : index
    %c0_14 = arith.constant 0 : index
    %23 = vector.load %arg8[%c7, %c0_14] : memref<80x128xf32, #tpu.memory_space<vmem>>, vector<64x128xf32>
    %c1_i32_15 = arith.constant 1 : i32
    %24 = tpu.dynamic_rotate %23 by %c1_i32_15 dim 1 : vector<64x128xf32>, i32 -> vector<64x128xf32>
    %cst = arith.constant 0.000000e+00 : f32
    %25 = vector.broadcast %cst : f32 to vector<64x128xf32>
    %26 = arith.select %20, %24, %25 : vector<64x128xi1>, vector<64x128xf32>
    %c127_i32 = arith.constant 127 : i32
    %27 = tpu.dynamic_rotate %23 by %c127_i32 dim 1 : vector<64x128xf32>, i32 -> vector<64x128xf32>
    %cst_16 = arith.constant 0.000000e+00 : f32
    %28 = vector.broadcast %cst_16 : f32 to vector<64x128xf32>
    %29 = arith.select %22, %27, %28 : vector<64x128xi1>, vector<64x128xf32>
    %c8_17 = arith.constant 8 : index
    %c0_18 = arith.constant 0 : index
    %30 = vector.load %arg8[%c8_17, %c0_18] : memref<80x128xf32, #tpu.memory_space<vmem>>, vector<64x128xf32>
    %c1_i32_19 = arith.constant 1 : i32
    %31 = tpu.dynamic_rotate %30 by %c1_i32_19 dim 1 : vector<64x128xf32>, i32 -> vector<64x128xf32>
    %cst_20 = arith.constant 0.000000e+00 : f32
    %32 = vector.broadcast %cst_20 : f32 to vector<64x128xf32>
    %33 = arith.select %20, %31, %32 : vector<64x128xi1>, vector<64x128xf32>
    %c127_i32_21 = arith.constant 127 : i32
    %34 = tpu.dynamic_rotate %30 by %c127_i32_21 dim 1 : vector<64x128xf32>, i32 -> vector<64x128xf32>
    %cst_22 = arith.constant 0.000000e+00 : f32
    %35 = vector.broadcast %cst_22 : f32 to vector<64x128xf32>
    %36 = arith.select %22, %34, %35 : vector<64x128xi1>, vector<64x128xf32>
    %c9 = arith.constant 9 : index
    %c0_23 = arith.constant 0 : index
    %37 = vector.load %arg8[%c9, %c0_23] : memref<80x128xf32, #tpu.memory_space<vmem>>, vector<64x128xf32>
    %c1_i32_24 = arith.constant 1 : i32
    %38 = tpu.dynamic_rotate %37 by %c1_i32_24 dim 1 : vector<64x128xf32>, i32 -> vector<64x128xf32>
    %cst_25 = arith.constant 0.000000e+00 : f32
    %39 = vector.broadcast %cst_25 : f32 to vector<64x128xf32>
    %40 = arith.select %20, %38, %39 : vector<64x128xi1>, vector<64x128xf32>
    %c127_i32_26 = arith.constant 127 : i32
    %41 = tpu.dynamic_rotate %37 by %c127_i32_26 dim 1 : vector<64x128xf32>, i32 -> vector<64x128xf32>
    %cst_27 = arith.constant 0.000000e+00 : f32
    %42 = vector.broadcast %cst_27 : f32 to vector<64x128xf32>
    %43 = arith.select %22, %41, %42 : vector<64x128xi1>, vector<64x128xf32>
    %c0_28 = arith.constant 0 : index
    %44 = memref.load %arg2[%c0_28] : memref<135xf32, #tpu.memory_space<smem>>
    %45 = vector.broadcast %44 : f32 to vector<64x128xf32>
    %46 = arith.mulf %26, %45 : vector<64x128xf32>
    %c0_29 = arith.constant 0 : index
    %47 = memref.load %arg3[%c0_29] : memref<15xf32, #tpu.memory_space<smem>>
    %48 = vector.broadcast %47 : f32 to vector<64x128xf32>
    %49 = arith.addf %46, %48 : vector<64x128xf32>
    %c1 = arith.constant 1 : index
    %50 = memref.load %arg2[%c1] : memref<135xf32, #tpu.memory_space<smem>>
    %51 = vector.broadcast %50 : f32 to vector<64x128xf32>
    %52 = arith.mulf %23, %51 : vector<64x128xf32>
    %53 = arith.addf %49, %52 : vector<64x128xf32>
    %c2 = arith.constant 2 : index
    %54 = memref.load %arg2[%c2] : memref<135xf32, #tpu.memory_space<smem>>
    %55 = vector.broadcast %54 : f32 to vector<64x128xf32>
    %56 = arith.mulf %29, %55 : vector<64x128xf32>
    %57 = arith.addf %53, %56 : vector<64x128xf32>
    %c3 = arith.constant 3 : index
    %58 = memref.load %arg2[%c3] : memref<135xf32, #tpu.memory_space<smem>>
    %59 = vector.broadcast %58 : f32 to vector<64x128xf32>
    %60 = arith.mulf %33, %59 : vector<64x128xf32>
    %61 = arith.addf %57, %60 : vector<64x128xf32>
    %c4 = arith.constant 4 : index
    %62 = memref.load %arg2[%c4] : memref<135xf32, #tpu.memory_space<smem>>
    %63 = vector.broadcast %62 : f32 to vector<64x128xf32>
    %64 = arith.mulf %30, %63 : vector<64x128xf32>
    %65 = arith.addf %61, %64 : vector<64x128xf32>
    %c5 = arith.constant 5 : index
    %66 = memref.load %arg2[%c5] : memref<135xf32, #tpu.memory_space<smem>>
    %67 = vector.broadcast %66 : f32 to vector<64x128xf32>
    %68 = arith.mulf %36, %67 : vector<64x128xf32>
    %69 = arith.addf %65, %68 : vector<64x128xf32>
    %c6 = arith.constant 6 : index
    %70 = memref.load %arg2[%c6] : memref<135xf32, #tpu.memory_space<smem>>
    %71 = vector.broadcast %70 : f32 to vector<64x128xf32>
    %72 = arith.mulf %40, %71 : vector<64x128xf32>
    %73 = arith.addf %69, %72 : vector<64x128xf32>
    %c7_30 = arith.constant 7 : index
    %74 = memref.load %arg2[%c7_30] : memref<135xf32, #tpu.memory_space<smem>>
    %75 = vector.broadcast %74 : f32 to vector<64x128xf32>
    %76 = arith.mulf %37, %75 : vector<64x128xf32>
    %77 = arith.addf %73, %76 : vector<64x128xf32>
    %c8_31 = arith.constant 8 : index
    %78 = memref.load %arg2[%c8_31] : memref<135xf32, #tpu.memory_space<smem>>
    %79 = vector.broadcast %78 : f32 to vector<64x128xf32>
    %80 = arith.mulf %43, %79 : vector<64x128xf32>
    %81 = arith.addf %77, %80 : vector<64x128xf32>
    %cst_32 = arith.constant 1.000000e-01 : f32
    %82 = vector.broadcast %cst_32 : f32 to vector<64x128xf32>
    %83 = arith.mulf %82, %81 : vector<64x128xf32>
    %84 = arith.maximumf %81, %83 : vector<64x128xf32>
    %c0_33 = arith.constant 0 : index
    %c1_34 = arith.constant 1 : index
    %c0_35 = arith.constant 0 : index
    %c0_36 = arith.constant 0 : index
    %85 = vector.load %arg7[%c0_33, %c1_34, %c0_35, %c0_36] : memref<1x16x64x128xf32, #tpu.memory_space<vmem>>, vector<1x1x64x128xf32>
    %86 = vector.shape_cast %85 : vector<1x1x64x128xf32> to vector<64x128xf32>
    %87 = vector.shape_cast %84 : vector<64x128xf32> to vector<1x1x64x128xf32>
    tpu.vector_store %arg7[%c0_33, %c1_34, %c0_35, %c0_36], %87 {strides = array<i32>} : memref<1x16x64x128xf32, #tpu.memory_space<vmem>>, vector<1x1x64x128xf32>,
    %c9_37 = arith.constant 9 : index
    %88 = memref.load %arg2[%c9_37] : memref<135xf32, #tpu.memory_space<smem>>
    %89 = vector.broadcast %88 : f32 to vector<64x128xf32>
    %90 = arith.mulf %26, %89 : vector<64x128xf32>
    %c1_38 = arith.constant 1 : index
    %91 = memref.load %arg3[%c1_38] : memref<15xf32, #tpu.memory_space<smem>>
    %92 = vector.broadcast %91 : f32 to vector<64x128xf32>
    %93 = arith.addf %90, %92 : vector<64x128xf32>
    %c10 = arith.constant 10 : index
    %94 = memref.load %arg2[%c10] : memref<135xf32, #tpu.memory_space<smem>>
    %95 = vector.broadcast %94 : f32 to vector<64x128xf32>
    %96 = arith.mulf %23, %95 : vector<64x128xf32>
    %97 = arith.addf %93, %96 : vector<64x128xf32>
    %c11 = arith.constant 11 : index
    %98 = memref.load %arg2[%c11] : memref<135xf32, #tpu.memory_space<smem>>
    %99 = vector.broadcast %98 : f32 to vector<64x128xf32>
    %100 = arith.mulf %29, %99 : vector<64x128xf32>
    %101 = arith.addf %97, %100 : vector<64x128xf32>
    %c12 = arith.constant 12 : index
    %102 = memref.load %arg2[%c12] : memref<135xf32, #tpu.memory_space<smem>>
    %103 = vector.broadcast %102 : f32 to vector<64x128xf32>
    %104 = arith.mulf %33, %103 : vector<64x128xf32>
    %105 = arith.addf %101, %104 : vector<64x128xf32>
    %c13 = arith.constant 13 : index
    %106 = memref.load %arg2[%c13] : memref<135xf32, #tpu.memory_space<smem>>
    %107 = vector.broadcast %106 : f32 to vector<64x128xf32>
    %108 = arith.mulf %30, %107 : vector<64x128xf32>
    %109 = arith.addf %105, %108 : vector<64x128xf32>
    %c14 = arith.constant 14 : index
    %110 = memref.load %arg2[%c14] : memref<135xf32, #tpu.memory_space<smem>>
    %111 = vector.broadcast %110 : f32 to vector<64x128xf32>
    %112 = arith.mulf %36, %111 : vector<64x128xf32>
    %113 = arith.addf %109, %112 : vector<64x128xf32>
    %c15 = arith.constant 15 : index
    %114 = memref.load %arg2[%c15] : memref<135xf32, #tpu.memory_space<smem>>
    %115 = vector.broadcast %114 : f32 to vector<64x128xf32>
    %116 = arith.mulf %40, %115 : vector<64x128xf32>
    %117 = arith.addf %113, %116 : vector<64x128xf32>
    %c16 = arith.constant 16 : index
    %118 = memref.load %arg2[%c16] : memref<135xf32, #tpu.memory_space<smem>>
    %119 = vector.broadcast %118 : f32 to vector<64x128xf32>
    %120 = arith.mulf %37, %119 : vector<64x128xf32>
    %121 = arith.addf %117, %120 : vector<64x128xf32>
    %c17 = arith.constant 17 : index
    %122 = memref.load %arg2[%c17] : memref<135xf32, #tpu.memory_space<smem>>
    %123 = vector.broadcast %122 : f32 to vector<64x128xf32>
    %124 = arith.mulf %43, %123 : vector<64x128xf32>
    %125 = arith.addf %121, %124 : vector<64x128xf32>
    %cst_39 = arith.constant 1.000000e-01 : f32
    %126 = vector.broadcast %cst_39 : f32 to vector<64x128xf32>
    %127 = arith.mulf %126, %125 : vector<64x128xf32>
    %128 = arith.maximumf %125, %127 : vector<64x128xf32>
    %c0_40 = arith.constant 0 : index
    %c2_41 = arith.constant 2 : index
    %c0_42 = arith.constant 0 : index
    %c0_43 = arith.constant 0 : index
    %129 = vector.load %arg7[%c0_40, %c2_41, %c0_42, %c0_43] : memref<1x16x64x128xf32, #tpu.memory_space<vmem>>, vector<1x1x64x128xf32>
    %130 = vector.shape_cast %129 : vector<1x1x64x128xf32> to vector<64x128xf32>
    %131 = vector.shape_cast %128 : vector<64x128xf32> to vector<1x1x64x128xf32>
    tpu.vector_store %arg7[%c0_40, %c2_41, %c0_42, %c0_43], %131 {strides = array<i32>} : memref<1x16x64x128xf32, #tpu.memory_space<vmem>>, vector<1x1x64x128xf32>,
    %c18 = arith.constant 18 : index
    %132 = memref.load %arg2[%c18] : memref<135xf32, #tpu.memory_space<smem>>
    %133 = vector.broadcast %132 : f32 to vector<64x128xf32>
    %134 = arith.mulf %26, %133 : vector<64x128xf32>
    %c2_44 = arith.constant 2 : index
    %135 = memref.load %arg3[%c2_44] : memref<15xf32, #tpu.memory_space<smem>>
    %136 = vector.broadcast %135 : f32 to vector<64x128xf32>
    %137 = arith.addf %134, %136 : vector<64x128xf32>
    %c19 = arith.constant 19 : index
    %138 = memref.load %arg2[%c19] : memref<135xf32, #tpu.memory_space<smem>>
    %139 = vector.broadcast %138 : f32 to vector<64x128xf32>
    %140 = arith.mulf %23, %139 : vector<64x128xf32>
    %141 = arith.addf %137, %140 : vector<64x128xf32>
    %c20 = arith.constant 20 : index
    %142 = memref.load %arg2[%c20] : memref<135xf32, #tpu.memory_space<smem>>
    %143 = vector.broadcast %142 : f32 to vector<64x128xf32>
    %144 = arith.mulf %29, %143 : vector<64x128xf32>
    %145 = arith.addf %141, %144 : vector<64x128xf32>
    %c21 = arith.constant 21 : index
    %146 = memref.load %arg2[%c21] : memref<135xf32, #tpu.memory_space<smem>>
    %147 = vector.broadcast %146 : f32 to vector<64x128xf32>
    %148 = arith.mulf %33, %147 : vector<64x128xf32>
    %149 = arith.addf %145, %148 : vector<64x128xf32>
    %c22 = arith.constant 22 : index
    %150 = memref.load %arg2[%c22] : memref<135xf32, #tpu.memory_space<smem>>
    %151 = vector.broadcast %150 : f32 to vector<64x128xf32>
    %152 = arith.mulf %30, %151 : vector<64x128xf32>
    %153 = arith.addf %149, %152 : vector<64x128xf32>
    %c23 = arith.constant 23 : index
    %154 = memref.load %arg2[%c23] : memref<135xf32, #tpu.memory_space<smem>>
    %155 = vector.broadcast %154 : f32 to vector<64x128xf32>
    %156 = arith.mulf %36, %155 : vector<64x128xf32>
    %157 = arith.addf %153, %156 : vector<64x128xf32>
    %c24 = arith.constant 24 : index
    %158 = memref.load %arg2[%c24] : memref<135xf32, #tpu.memory_space<smem>>
    %159 = vector.broadcast %158 : f32 to vector<64x128xf32>
    %160 = arith.mulf %40, %159 : vector<64x128xf32>
    %161 = arith.addf %157, %160 : vector<64x128xf32>
    %c25 = arith.constant 25 : index
    %162 = memref.load %arg2[%c25] : memref<135xf32, #tpu.memory_space<smem>>
    %163 = vector.broadcast %162 : f32 to vector<64x128xf32>
    %164 = arith.mulf %37, %163 : vector<64x128xf32>
    %165 = arith.addf %161, %164 : vector<64x128xf32>
    %c26 = arith.constant 26 : index
    %166 = memref.load %arg2[%c26] : memref<135xf32, #tpu.memory_space<smem>>
    %167 = vector.broadcast %166 : f32 to vector<64x128xf32>
    %168 = arith.mulf %43, %167 : vector<64x128xf32>
    %169 = arith.addf %165, %168 : vector<64x128xf32>
    %cst_45 = arith.constant 1.000000e-01 : f32
    %170 = vector.broadcast %cst_45 : f32 to vector<64x128xf32>
    %171 = arith.mulf %170, %169 : vector<64x128xf32>
    %172 = arith.maximumf %169, %171 : vector<64x128xf32>
    %c0_46 = arith.constant 0 : index
    %c3_47 = arith.constant 3 : index
    %c0_48 = arith.constant 0 : index
    %c0_49 = arith.constant 0 : index
    %173 = vector.load %arg7[%c0_46, %c3_47, %c0_48, %c0_49] : memref<1x16x64x128xf32, #tpu.memory_space<vmem>>, vector<1x1x64x128xf32>
    %174 = vector.shape_cast %173 : vector<1x1x64x128xf32> to vector<64x128xf32>
    %175 = vector.shape_cast %172 : vector<64x128xf32> to vector<1x1x64x128xf32>
    tpu.vector_store %arg7[%c0_46, %c3_47, %c0_48, %c0_49], %175 {strides = array<i32>} : memref<1x16x64x128xf32, #tpu.memory_space<vmem>>, vector<1x1x64x128xf32>,
    %c27 = arith.constant 27 : index
    %176 = memref.load %arg2[%c27] : memref<135xf32, #tpu.memory_space<smem>>
    %177 = vector.broadcast %176 : f32 to vector<64x128xf32>
    %178 = arith.mulf %26, %177 : vector<64x128xf32>
    %c3_50 = arith.constant 3 : index
    %179 = memref.load %arg3[%c3_50] : memref<15xf32, #tpu.memory_space<smem>>
    %180 = vector.broadcast %179 : f32 to vector<64x128xf32>
    %181 = arith.addf %178, %180 : vector<64x128xf32>
    %c28 = arith.constant 28 : index
    %182 = memref.load %arg2[%c28] : memref<135xf32, #tpu.memory_space<smem>>
    %183 = vector.broadcast %182 : f32 to vector<64x128xf32>
    %184 = arith.mulf %23, %183 : vector<64x128xf32>
    %185 = arith.addf %181, %184 : vector<64x128xf32>
    %c29 = arith.constant 29 : index
    %186 = memref.load %arg2[%c29] : memref<135xf32, #tpu.memory_space<smem>>
    %187 = vector.broadcast %186 : f32 to vector<64x128xf32>
    %188 = arith.mulf %29, %187 : vector<64x128xf32>
    %189 = arith.addf %185, %188 : vector<64x128xf32>
    %c30 = arith.constant 30 : index
    %190 = memref.load %arg2[%c30] : memref<135xf32, #tpu.memory_space<smem>>
    %191 = vector.broadcast %190 : f32 to vector<64x128xf32>
    %192 = arith.mulf %33, %191 : vector<64x128xf32>
    %193 = arith.addf %189, %192 : vector<64x128xf32>
    %c31 = arith.constant 31 : index
    %194 = memref.load %arg2[%c31] : memref<135xf32, #tpu.memory_space<smem>>
    %195 = vector.broadcast %194 : f32 to vector<64x128xf32>
    %196 = arith.mulf %30, %195 : vector<64x128xf32>
    %197 = arith.addf %193, %196 : vector<64x128xf32>
    %c32 = arith.constant 32 : index
    %198 = memref.load %arg2[%c32] : memref<135xf32, #tpu.memory_space<smem>>
    %199 = vector.broadcast %198 : f32 to vector<64x128xf32>
    %200 = arith.mulf %36, %199 : vector<64x128xf32>
    %201 = arith.addf %197, %200 : vector<64x128xf32>
    %c33 = arith.constant 33 : index
    %202 = memref.load %arg2[%c33] : memref<135xf32, #tpu.memory_space<smem>>
    %203 = vector.broadcast %202 : f32 to vector<64x128xf32>
    %204 = arith.mulf %40, %203 : vector<64x128xf32>
    %205 = arith.addf %201, %204 : vector<64x128xf32>
    %c34 = arith.constant 34 : index
    %206 = memref.load %arg2[%c34] : memref<135xf32, #tpu.memory_space<smem>>
    %207 = vector.broadcast %206 : f32 to vector<64x128xf32>
    %208 = arith.mulf %37, %207 : vector<64x128xf32>
    %209 = arith.addf %205, %208 : vector<64x128xf32>
    %c35 = arith.constant 35 : index
    %210 = memref.load %arg2[%c35] : memref<135xf32, #tpu.memory_space<smem>>
    %211 = vector.broadcast %210 : f32 to vector<64x128xf32>
    %212 = arith.mulf %43, %211 : vector<64x128xf32>
    %213 = arith.addf %209, %212 : vector<64x128xf32>
    %cst_51 = arith.constant 1.000000e-01 : f32
    %214 = vector.broadcast %cst_51 : f32 to vector<64x128xf32>
    %215 = arith.mulf %214, %213 : vector<64x128xf32>
    %216 = arith.maximumf %213, %215 : vector<64x128xf32>
    %c0_52 = arith.constant 0 : index
    %c4_53 = arith.constant 4 : index
    %c0_54 = arith.constant 0 : index
    %c0_55 = arith.constant 0 : index
    %217 = vector.load %arg7[%c0_52, %c4_53, %c0_54, %c0_55] : memref<1x16x64x128xf32, #tpu.memory_space<vmem>>, vector<1x1x64x128xf32>
    %218 = vector.shape_cast %217 : vector<1x1x64x128xf32> to vector<64x128xf32>
    %219 = vector.shape_cast %216 : vector<64x128xf32> to vector<1x1x64x128xf32>
    tpu.vector_store %arg7[%c0_52, %c4_53, %c0_54, %c0_55], %219 {strides = array<i32>} : memref<1x16x64x128xf32, #tpu.memory_space<vmem>>, vector<1x1x64x128xf32>,
    %c36 = arith.constant 36 : index
    %220 = memref.load %arg2[%c36] : memref<135xf32, #tpu.memory_space<smem>>
    %221 = vector.broadcast %220 : f32 to vector<64x128xf32>
    %222 = arith.mulf %26, %221 : vector<64x128xf32>
    %c4_56 = arith.constant 4 : index
    %223 = memref.load %arg3[%c4_56] : memref<15xf32, #tpu.memory_space<smem>>
    %224 = vector.broadcast %223 : f32 to vector<64x128xf32>
    %225 = arith.addf %222, %224 : vector<64x128xf32>
    %c37 = arith.constant 37 : index
    %226 = memref.load %arg2[%c37] : memref<135xf32, #tpu.memory_space<smem>>
    %227 = vector.broadcast %226 : f32 to vector<64x128xf32>
    %228 = arith.mulf %23, %227 : vector<64x128xf32>
    %229 = arith.addf %225, %228 : vector<64x128xf32>
    %c38 = arith.constant 38 : index
    %230 = memref.load %arg2[%c38] : memref<135xf32, #tpu.memory_space<smem>>
    %231 = vector.broadcast %230 : f32 to vector<64x128xf32>
    %232 = arith.mulf %29, %231 : vector<64x128xf32>
    %233 = arith.addf %229, %232 : vector<64x128xf32>
    %c39 = arith.constant 39 : index
    %234 = memref.load %arg2[%c39] : memref<135xf32, #tpu.memory_space<smem>>
    %235 = vector.broadcast %234 : f32 to vector<64x128xf32>
    %236 = arith.mulf %33, %235 : vector<64x128xf32>
    %237 = arith.addf %233, %236 : vector<64x128xf32>
    %c40 = arith.constant 40 : index
    %238 = memref.load %arg2[%c40] : memref<135xf32, #tpu.memory_space<smem>>
    %239 = vector.broadcast %238 : f32 to vector<64x128xf32>
    %240 = arith.mulf %30, %239 : vector<64x128xf32>
    %241 = arith.addf %237, %240 : vector<64x128xf32>
    %c41 = arith.constant 41 : index
    %242 = memref.load %arg2[%c41] : memref<135xf32, #tpu.memory_space<smem>>
    %243 = vector.broadcast %242 : f32 to vector<64x128xf32>
    %244 = arith.mulf %36, %243 : vector<64x128xf32>
    %245 = arith.addf %241, %244 : vector<64x128xf32>
    %c42 = arith.constant 42 : index
    %246 = memref.load %arg2[%c42] : memref<135xf32, #tpu.memory_space<smem>>
    %247 = vector.broadcast %246 : f32 to vector<64x128xf32>
    %248 = arith.mulf %40, %247 : vector<64x128xf32>
    %249 = arith.addf %245, %248 : vector<64x128xf32>
    %c43 = arith.constant 43 : index
    %250 = memref.load %arg2[%c43] : memref<135xf32, #tpu.memory_space<smem>>
    %251 = vector.broadcast %250 : f32 to vector<64x128xf32>
    %252 = arith.mulf %37, %251 : vector<64x128xf32>
    %253 = arith.addf %249, %252 : vector<64x128xf32>
    %c44 = arith.constant 44 : index
    %254 = memref.load %arg2[%c44] : memref<135xf32, #tpu.memory_space<smem>>
    %255 = vector.broadcast %254 : f32 to vector<64x128xf32>
    %256 = arith.mulf %43, %255 : vector<64x128xf32>
    %257 = arith.addf %253, %256 : vector<64x128xf32>
    %cst_57 = arith.constant 1.000000e-01 : f32
    %258 = vector.broadcast %cst_57 : f32 to vector<64x128xf32>
    %259 = arith.mulf %258, %257 : vector<64x128xf32>
    %260 = arith.maximumf %257, %259 : vector<64x128xf32>
    %c0_58 = arith.constant 0 : index
    %c5_59 = arith.constant 5 : index
    %c0_60 = arith.constant 0 : index
    %c0_61 = arith.constant 0 : index
    %261 = vector.load %arg7[%c0_58, %c5_59, %c0_60, %c0_61] : memref<1x16x64x128xf32, #tpu.memory_space<vmem>>, vector<1x1x64x128xf32>
    %262 = vector.shape_cast %261 : vector<1x1x64x128xf32> to vector<64x128xf32>
    %263 = vector.shape_cast %260 : vector<64x128xf32> to vector<1x1x64x128xf32>
    tpu.vector_store %arg7[%c0_58, %c5_59, %c0_60, %c0_61], %263 {strides = array<i32>} : memref<1x16x64x128xf32, #tpu.memory_space<vmem>>, vector<1x1x64x128xf32>,
    %c45 = arith.constant 45 : index
    %264 = memref.load %arg2[%c45] : memref<135xf32, #tpu.memory_space<smem>>
    %265 = vector.broadcast %264 : f32 to vector<64x128xf32>
    %266 = arith.mulf %26, %265 : vector<64x128xf32>
    %c5_62 = arith.constant 5 : index
    %267 = memref.load %arg3[%c5_62] : memref<15xf32, #tpu.memory_space<smem>>
    %268 = vector.broadcast %267 : f32 to vector<64x128xf32>
    %269 = arith.addf %266, %268 : vector<64x128xf32>
    %c46 = arith.constant 46 : index
    %270 = memref.load %arg2[%c46] : memref<135xf32, #tpu.memory_space<smem>>
    %271 = vector.broadcast %270 : f32 to vector<64x128xf32>
    %272 = arith.mulf %23, %271 : vector<64x128xf32>
    %273 = arith.addf %269, %272 : vector<64x128xf32>
    %c47 = arith.constant 47 : index
    %274 = memref.load %arg2[%c47] : memref<135xf32, #tpu.memory_space<smem>>
    %275 = vector.broadcast %274 : f32 to vector<64x128xf32>
    %276 = arith.mulf %29, %275 : vector<64x128xf32>
    %277 = arith.addf %273, %276 : vector<64x128xf32>
    %c48 = arith.constant 48 : index
    %278 = memref.load %arg2[%c48] : memref<135xf32, #tpu.memory_space<smem>>
    %279 = vector.broadcast %278 : f32 to vector<64x128xf32>
    %280 = arith.mulf %33, %279 : vector<64x128xf32>
    %281 = arith.addf %277, %280 : vector<64x128xf32>
    %c49 = arith.constant 49 : index
    %282 = memref.load %arg2[%c49] : memref<135xf32, #tpu.memory_space<smem>>
    %283 = vector.broadcast %282 : f32 to vector<64x128xf32>
    %284 = arith.mulf %30, %283 : vector<64x128xf32>
    %285 = arith.addf %281, %284 : vector<64x128xf32>
    %c50 = arith.constant 50 : index
    %286 = memref.load %arg2[%c50] : memref<135xf32, #tpu.memory_space<smem>>
    %287 = vector.broadcast %286 : f32 to vector<64x128xf32>
    %288 = arith.mulf %36, %287 : vector<64x128xf32>
    %289 = arith.addf %285, %288 : vector<64x128xf32>
    %c51 = arith.constant 51 : index
    %290 = memref.load %arg2[%c51] : memref<135xf32, #tpu.memory_space<smem>>
    %291 = vector.broadcast %290 : f32 to vector<64x128xf32>
    %292 = arith.mulf %40, %291 : vector<64x128xf32>
    %293 = arith.addf %289, %292 : vector<64x128xf32>
    %c52 = arith.constant 52 : index
    %294 = memref.load %arg2[%c52] : memref<135xf32, #tpu.memory_space<smem>>
    %295 = vector.broadcast %294 : f32 to vector<64x128xf32>
    %296 = arith.mulf %37, %295 : vector<64x128xf32>
    %297 = arith.addf %293, %296 : vector<64x128xf32>
    %c53 = arith.constant 53 : index
    %298 = memref.load %arg2[%c53] : memref<135xf32, #tpu.memory_space<smem>>
    %299 = vector.broadcast %298 : f32 to vector<64x128xf32>
    %300 = arith.mulf %43, %299 : vector<64x128xf32>
    %301 = arith.addf %297, %300 : vector<64x128xf32>
    %cst_63 = arith.constant 1.000000e-01 : f32
    %302 = vector.broadcast %cst_63 : f32 to vector<64x128xf32>
    %303 = arith.mulf %302, %301 : vector<64x128xf32>
    %304 = arith.maximumf %301, %303 : vector<64x128xf32>
    %c0_64 = arith.constant 0 : index
    %c6_65 = arith.constant 6 : index
    %c0_66 = arith.constant 0 : index
    %c0_67 = arith.constant 0 : index
    %305 = vector.load %arg7[%c0_64, %c6_65, %c0_66, %c0_67] : memref<1x16x64x128xf32, #tpu.memory_space<vmem>>, vector<1x1x64x128xf32>
    %306 = vector.shape_cast %305 : vector<1x1x64x128xf32> to vector<64x128xf32>
    %307 = vector.shape_cast %304 : vector<64x128xf32> to vector<1x1x64x128xf32>
    tpu.vector_store %arg7[%c0_64, %c6_65, %c0_66, %c0_67], %307 {strides = array<i32>} : memref<1x16x64x128xf32, #tpu.memory_space<vmem>>, vector<1x1x64x128xf32>,
    %c54 = arith.constant 54 : index
    %308 = memref.load %arg2[%c54] : memref<135xf32, #tpu.memory_space<smem>>
    %309 = vector.broadcast %308 : f32 to vector<64x128xf32>
    %310 = arith.mulf %26, %309 : vector<64x128xf32>
    %c6_68 = arith.constant 6 : index
    %311 = memref.load %arg3[%c6_68] : memref<15xf32, #tpu.memory_space<smem>>
    %312 = vector.broadcast %311 : f32 to vector<64x128xf32>
    %313 = arith.addf %310, %312 : vector<64x128xf32>
    %c55 = arith.constant 55 : index
    %314 = memref.load %arg2[%c55] : memref<135xf32, #tpu.memory_space<smem>>
    %315 = vector.broadcast %314 : f32 to vector<64x128xf32>
    %316 = arith.mulf %23, %315 : vector<64x128xf32>
    %317 = arith.addf %313, %316 : vector<64x128xf32>
    %c56 = arith.constant 56 : index
    %318 = memref.load %arg2[%c56] : memref<135xf32, #tpu.memory_space<smem>>
    %319 = vector.broadcast %318 : f32 to vector<64x128xf32>
    %320 = arith.mulf %29, %319 : vector<64x128xf32>
    %321 = arith.addf %317, %320 : vector<64x128xf32>
    %c57 = arith.constant 57 : index
    %322 = memref.load %arg2[%c57] : memref<135xf32, #tpu.memory_space<smem>>
    %323 = vector.broadcast %322 : f32 to vector<64x128xf32>
    %324 = arith.mulf %33, %323 : vector<64x128xf32>
    %325 = arith.addf %321, %324 : vector<64x128xf32>
    %c58 = arith.constant 58 : index
    %326 = memref.load %arg2[%c58] : memref<135xf32, #tpu.memory_space<smem>>
    %327 = vector.broadcast %326 : f32 to vector<64x128xf32>
    %328 = arith.mulf %30, %327 : vector<64x128xf32>
    %329 = arith.addf %325, %328 : vector<64x128xf32>
    %c59 = arith.constant 59 : index
    %330 = memref.load %arg2[%c59] : memref<135xf32, #tpu.memory_space<smem>>
    %331 = vector.broadcast %330 : f32 to vector<64x128xf32>
    %332 = arith.mulf %36, %331 : vector<64x128xf32>
    %333 = arith.addf %329, %332 : vector<64x128xf32>
    %c60 = arith.constant 60 : index
    %334 = memref.load %arg2[%c60] : memref<135xf32, #tpu.memory_space<smem>>
    %335 = vector.broadcast %334 : f32 to vector<64x128xf32>
    %336 = arith.mulf %40, %335 : vector<64x128xf32>
    %337 = arith.addf %333, %336 : vector<64x128xf32>
    %c61 = arith.constant 61 : index
    %338 = memref.load %arg2[%c61] : memref<135xf32, #tpu.memory_space<smem>>
    %339 = vector.broadcast %338 : f32 to vector<64x128xf32>
    %340 = arith.mulf %37, %339 : vector<64x128xf32>
    %341 = arith.addf %337, %340 : vector<64x128xf32>
    %c62 = arith.constant 62 : index
    %342 = memref.load %arg2[%c62] : memref<135xf32, #tpu.memory_space<smem>>
    %343 = vector.broadcast %342 : f32 to vector<64x128xf32>
    %344 = arith.mulf %43, %343 : vector<64x128xf32>
    %345 = arith.addf %341, %344 : vector<64x128xf32>
    %cst_69 = arith.constant 1.000000e-01 : f32
    %346 = vector.broadcast %cst_69 : f32 to vector<64x128xf32>
    %347 = arith.mulf %346, %345 : vector<64x128xf32>
    %348 = arith.maximumf %345, %347 : vector<64x128xf32>
    %c0_70 = arith.constant 0 : index
    %c7_71 = arith.constant 7 : index
    %c0_72 = arith.constant 0 : index
    %c0_73 = arith.constant 0 : index
    %349 = vector.load %arg7[%c0_70, %c7_71, %c0_72, %c0_73] : memref<1x16x64x128xf32, #tpu.memory_space<vmem>>, vector<1x1x64x128xf32>
    %350 = vector.shape_cast %349 : vector<1x1x64x128xf32> to vector<64x128xf32>
    %351 = vector.shape_cast %348 : vector<64x128xf32> to vector<1x1x64x128xf32>
    tpu.vector_store %arg7[%c0_70, %c7_71, %c0_72, %c0_73], %351 {strides = array<i32>} : memref<1x16x64x128xf32, #tpu.memory_space<vmem>>, vector<1x1x64x128xf32>,
    %c63 = arith.constant 63 : index
    %352 = memref.load %arg2[%c63] : memref<135xf32, #tpu.memory_space<smem>>
    %353 = vector.broadcast %352 : f32 to vector<64x128xf32>
    %354 = arith.mulf %26, %353 : vector<64x128xf32>
    %c7_74 = arith.constant 7 : index
    %355 = memref.load %arg3[%c7_74] : memref<15xf32, #tpu.memory_space<smem>>
    %356 = vector.broadcast %355 : f32 to vector<64x128xf32>
    %357 = arith.addf %354, %356 : vector<64x128xf32>
    %c64 = arith.constant 64 : index
    %358 = memref.load %arg2[%c64] : memref<135xf32, #tpu.memory_space<smem>>
    %359 = vector.broadcast %358 : f32 to vector<64x128xf32>
    %360 = arith.mulf %23, %359 : vector<64x128xf32>
    %361 = arith.addf %357, %360 : vector<64x128xf32>
    %c65 = arith.constant 65 : index
    %362 = memref.load %arg2[%c65] : memref<135xf32, #tpu.memory_space<smem>>
    %363 = vector.broadcast %362 : f32 to vector<64x128xf32>
    %364 = arith.mulf %29, %363 : vector<64x128xf32>
    %365 = arith.addf %361, %364 : vector<64x128xf32>
    %c66 = arith.constant 66 : index
    %366 = memref.load %arg2[%c66] : memref<135xf32, #tpu.memory_space<smem>>
    %367 = vector.broadcast %366 : f32 to vector<64x128xf32>
    %368 = arith.mulf %33, %367 : vector<64x128xf32>
    %369 = arith.addf %365, %368 : vector<64x128xf32>
    %c67 = arith.constant 67 : index
    %370 = memref.load %arg2[%c67] : memref<135xf32, #tpu.memory_space<smem>>
    %371 = vector.broadcast %370 : f32 to vector<64x128xf32>
    %372 = arith.mulf %30, %371 : vector<64x128xf32>
    %373 = arith.addf %369, %372 : vector<64x128xf32>
    %c68 = arith.constant 68 : index
    %374 = memref.load %arg2[%c68] : memref<135xf32, #tpu.memory_space<smem>>
    %375 = vector.broadcast %374 : f32 to vector<64x128xf32>
    %376 = arith.mulf %36, %375 : vector<64x128xf32>
    %377 = arith.addf %373, %376 : vector<64x128xf32>
    %c69 = arith.constant 69 : index
    %378 = memref.load %arg2[%c69] : memref<135xf32, #tpu.memory_space<smem>>
    %379 = vector.broadcast %378 : f32 to vector<64x128xf32>
    %380 = arith.mulf %40, %379 : vector<64x128xf32>
    %381 = arith.addf %377, %380 : vector<64x128xf32>
    %c70 = arith.constant 70 : index
    %382 = memref.load %arg2[%c70] : memref<135xf32, #tpu.memory_space<smem>>
    %383 = vector.broadcast %382 : f32 to vector<64x128xf32>
    %384 = arith.mulf %37, %383 : vector<64x128xf32>
    %385 = arith.addf %381, %384 : vector<64x128xf32>
    %c71 = arith.constant 71 : index
    %386 = memref.load %arg2[%c71] : memref<135xf32, #tpu.memory_space<smem>>
    %387 = vector.broadcast %386 : f32 to vector<64x128xf32>
    %388 = arith.mulf %43, %387 : vector<64x128xf32>
    %389 = arith.addf %385, %388 : vector<64x128xf32>
    %cst_75 = arith.constant 1.000000e-01 : f32
    %390 = vector.broadcast %cst_75 : f32 to vector<64x128xf32>
    %391 = arith.mulf %390, %389 : vector<64x128xf32>
    %392 = arith.maximumf %389, %391 : vector<64x128xf32>
    %c0_76 = arith.constant 0 : index
    %c8_77 = arith.constant 8 : index
    %c0_78 = arith.constant 0 : index
    %c0_79 = arith.constant 0 : index
    %393 = vector.load %arg7[%c0_76, %c8_77, %c0_78, %c0_79] : memref<1x16x64x128xf32, #tpu.memory_space<vmem>>, vector<1x1x64x128xf32>
    %394 = vector.shape_cast %393 : vector<1x1x64x128xf32> to vector<64x128xf32>
    %395 = vector.shape_cast %392 : vector<64x128xf32> to vector<1x1x64x128xf32>
    tpu.vector_store %arg7[%c0_76, %c8_77, %c0_78, %c0_79], %395 {strides = array<i32>} : memref<1x16x64x128xf32, #tpu.memory_space<vmem>>, vector<1x1x64x128xf32>,
    %c72 = arith.constant 72 : index
    %396 = memref.load %arg2[%c72] : memref<135xf32, #tpu.memory_space<smem>>
    %397 = vector.broadcast %396 : f32 to vector<64x128xf32>
    %398 = arith.mulf %26, %397 : vector<64x128xf32>
    %c8_80 = arith.constant 8 : index
    %399 = memref.load %arg3[%c8_80] : memref<15xf32, #tpu.memory_space<smem>>
    %400 = vector.broadcast %399 : f32 to vector<64x128xf32>
    %401 = arith.addf %398, %400 : vector<64x128xf32>
    %c73 = arith.constant 73 : index
    %402 = memref.load %arg2[%c73] : memref<135xf32, #tpu.memory_space<smem>>
    %403 = vector.broadcast %402 : f32 to vector<64x128xf32>
    %404 = arith.mulf %23, %403 : vector<64x128xf32>
    %405 = arith.addf %401, %404 : vector<64x128xf32>
    %c74 = arith.constant 74 : index
    %406 = memref.load %arg2[%c74] : memref<135xf32, #tpu.memory_space<smem>>
    %407 = vector.broadcast %406 : f32 to vector<64x128xf32>
    %408 = arith.mulf %29, %407 : vector<64x128xf32>
    %409 = arith.addf %405, %408 : vector<64x128xf32>
    %c75 = arith.constant 75 : index
    %410 = memref.load %arg2[%c75] : memref<135xf32, #tpu.memory_space<smem>>
    %411 = vector.broadcast %410 : f32 to vector<64x128xf32>
    %412 = arith.mulf %33, %411 : vector<64x128xf32>
    %413 = arith.addf %409, %412 : vector<64x128xf32>
    %c76 = arith.constant 76 : index
    %414 = memref.load %arg2[%c76] : memref<135xf32, #tpu.memory_space<smem>>
    %415 = vector.broadcast %414 : f32 to vector<64x128xf32>
    %416 = arith.mulf %30, %415 : vector<64x128xf32>
    %417 = arith.addf %413, %416 : vector<64x128xf32>
    %c77 = arith.constant 77 : index
    %418 = memref.load %arg2[%c77] : memref<135xf32, #tpu.memory_space<smem>>
    %419 = vector.broadcast %418 : f32 to vector<64x128xf32>
    %420 = arith.mulf %36, %419 : vector<64x128xf32>
    %421 = arith.addf %417, %420 : vector<64x128xf32>
    %c78 = arith.constant 78 : index
    %422 = memref.load %arg2[%c78] : memref<135xf32, #tpu.memory_space<smem>>
    %423 = vector.broadcast %422 : f32 to vector<64x128xf32>
    %424 = arith.mulf %40, %423 : vector<64x128xf32>
    %425 = arith.addf %421, %424 : vector<64x128xf32>
    %c79 = arith.constant 79 : index
    %426 = memref.load %arg2[%c79] : memref<135xf32, #tpu.memory_space<smem>>
    %427 = vector.broadcast %426 : f32 to vector<64x128xf32>
    %428 = arith.mulf %37, %427 : vector<64x128xf32>
    %429 = arith.addf %425, %428 : vector<64x128xf32>
    %c80 = arith.constant 80 : index
    %430 = memref.load %arg2[%c80] : memref<135xf32, #tpu.memory_space<smem>>
    %431 = vector.broadcast %430 : f32 to vector<64x128xf32>
    %432 = arith.mulf %43, %431 : vector<64x128xf32>
    %433 = arith.addf %429, %432 : vector<64x128xf32>
    %cst_81 = arith.constant 1.000000e-01 : f32
    %434 = vector.broadcast %cst_81 : f32 to vector<64x128xf32>
    %435 = arith.mulf %434, %433 : vector<64x128xf32>
    %436 = arith.maximumf %433, %435 : vector<64x128xf32>
    %c0_82 = arith.constant 0 : index
    %c9_83 = arith.constant 9 : index
    %c0_84 = arith.constant 0 : index
    %c0_85 = arith.constant 0 : index
    %437 = vector.load %arg7[%c0_82, %c9_83, %c0_84, %c0_85] : memref<1x16x64x128xf32, #tpu.memory_space<vmem>>, vector<1x1x64x128xf32>
    %438 = vector.shape_cast %437 : vector<1x1x64x128xf32> to vector<64x128xf32>
    %439 = vector.shape_cast %436 : vector<64x128xf32> to vector<1x1x64x128xf32>
    tpu.vector_store %arg7[%c0_82, %c9_83, %c0_84, %c0_85], %439 {strides = array<i32>} : memref<1x16x64x128xf32, #tpu.memory_space<vmem>>, vector<1x1x64x128xf32>,
    %c81 = arith.constant 81 : index
    %440 = memref.load %arg2[%c81] : memref<135xf32, #tpu.memory_space<smem>>
    %441 = vector.broadcast %440 : f32 to vector<64x128xf32>
    %442 = arith.mulf %26, %441 : vector<64x128xf32>
    %c9_86 = arith.constant 9 : index
    %443 = memref.load %arg3[%c9_86] : memref<15xf32, #tpu.memory_space<smem>>
    %444 = vector.broadcast %443 : f32 to vector<64x128xf32>
    %445 = arith.addf %442, %444 : vector<64x128xf32>
    %c82 = arith.constant 82 : index
    %446 = memref.load %arg2[%c82] : memref<135xf32, #tpu.memory_space<smem>>
    %447 = vector.broadcast %446 : f32 to vector<64x128xf32>
    %448 = arith.mulf %23, %447 : vector<64x128xf32>
    %449 = arith.addf %445, %448 : vector<64x128xf32>
    %c83 = arith.constant 83 : index
    %450 = memref.load %arg2[%c83] : memref<135xf32, #tpu.memory_space<smem>>
    %451 = vector.broadcast %450 : f32 to vector<64x128xf32>
    %452 = arith.mulf %29, %451 : vector<64x128xf32>
    %453 = arith.addf %449, %452 : vector<64x128xf32>
    %c84 = arith.constant 84 : index
    %454 = memref.load %arg2[%c84] : memref<135xf32, #tpu.memory_space<smem>>
    %455 = vector.broadcast %454 : f32 to vector<64x128xf32>
    %456 = arith.mulf %33, %455 : vector<64x128xf32>
    %457 = arith.addf %453, %456 : vector<64x128xf32>
    %c85 = arith.constant 85 : index
    %458 = memref.load %arg2[%c85] : memref<135xf32, #tpu.memory_space<smem>>
    %459 = vector.broadcast %458 : f32 to vector<64x128xf32>
    %460 = arith.mulf %30, %459 : vector<64x128xf32>
    %461 = arith.addf %457, %460 : vector<64x128xf32>
    %c86 = arith.constant 86 : index
    %462 = memref.load %arg2[%c86] : memref<135xf32, #tpu.memory_space<smem>>
    %463 = vector.broadcast %462 : f32 to vector<64x128xf32>
    %464 = arith.mulf %36, %463 : vector<64x128xf32>
    %465 = arith.addf %461, %464 : vector<64x128xf32>
    %c87 = arith.constant 87 : index
    %466 = memref.load %arg2[%c87] : memref<135xf32, #tpu.memory_space<smem>>
    %467 = vector.broadcast %466 : f32 to vector<64x128xf32>
    %468 = arith.mulf %40, %467 : vector<64x128xf32>
    %469 = arith.addf %465, %468 : vector<64x128xf32>
    %c88 = arith.constant 88 : index
    %470 = memref.load %arg2[%c88] : memref<135xf32, #tpu.memory_space<smem>>
    %471 = vector.broadcast %470 : f32 to vector<64x128xf32>
    %472 = arith.mulf %37, %471 : vector<64x128xf32>
    %473 = arith.addf %469, %472 : vector<64x128xf32>
    %c89 = arith.constant 89 : index
    %474 = memref.load %arg2[%c89] : memref<135xf32, #tpu.memory_space<smem>>
    %475 = vector.broadcast %474 : f32 to vector<64x128xf32>
    %476 = arith.mulf %43, %475 : vector<64x128xf32>
    %477 = arith.addf %473, %476 : vector<64x128xf32>
    %cst_87 = arith.constant 1.000000e-01 : f32
    %478 = vector.broadcast %cst_87 : f32 to vector<64x128xf32>
    %479 = arith.mulf %478, %477 : vector<64x128xf32>
    %480 = arith.maximumf %477, %479 : vector<64x128xf32>
    %c0_88 = arith.constant 0 : index
    %c10_89 = arith.constant 10 : index
    %c0_90 = arith.constant 0 : index
    %c0_91 = arith.constant 0 : index
    %481 = vector.load %arg7[%c0_88, %c10_89, %c0_90, %c0_91] : memref<1x16x64x128xf32, #tpu.memory_space<vmem>>, vector<1x1x64x128xf32>
    %482 = vector.shape_cast %481 : vector<1x1x64x128xf32> to vector<64x128xf32>
    %483 = vector.shape_cast %480 : vector<64x128xf32> to vector<1x1x64x128xf32>
    tpu.vector_store %arg7[%c0_88, %c10_89, %c0_90, %c0_91], %483 {strides = array<i32>} : memref<1x16x64x128xf32, #tpu.memory_space<vmem>>, vector<1x1x64x128xf32>,
    %c90 = arith.constant 90 : index
    %484 = memref.load %arg2[%c90] : memref<135xf32, #tpu.memory_space<smem>>
    %485 = vector.broadcast %484 : f32 to vector<64x128xf32>
    %486 = arith.mulf %26, %485 : vector<64x128xf32>
    %c10_92 = arith.constant 10 : index
    %487 = memref.load %arg3[%c10_92] : memref<15xf32, #tpu.memory_space<smem>>
    %488 = vector.broadcast %487 : f32 to vector<64x128xf32>
    %489 = arith.addf %486, %488 : vector<64x128xf32>
    %c91 = arith.constant 91 : index
    %490 = memref.load %arg2[%c91] : memref<135xf32, #tpu.memory_space<smem>>
    %491 = vector.broadcast %490 : f32 to vector<64x128xf32>
    %492 = arith.mulf %23, %491 : vector<64x128xf32>
    %493 = arith.addf %489, %492 : vector<64x128xf32>
    %c92 = arith.constant 92 : index
    %494 = memref.load %arg2[%c92] : memref<135xf32, #tpu.memory_space<smem>>
    %495 = vector.broadcast %494 : f32 to vector<64x128xf32>
    %496 = arith.mulf %29, %495 : vector<64x128xf32>
    %497 = arith.addf %493, %496 : vector<64x128xf32>
    %c93 = arith.constant 93 : index
    %498 = memref.load %arg2[%c93] : memref<135xf32, #tpu.memory_space<smem>>
    %499 = vector.broadcast %498 : f32 to vector<64x128xf32>
    %500 = arith.mulf %33, %499 : vector<64x128xf32>
    %501 = arith.addf %497, %500 : vector<64x128xf32>
    %c94 = arith.constant 94 : index
    %502 = memref.load %arg2[%c94] : memref<135xf32, #tpu.memory_space<smem>>
    %503 = vector.broadcast %502 : f32 to vector<64x128xf32>
    %504 = arith.mulf %30, %503 : vector<64x128xf32>
    %505 = arith.addf %501, %504 : vector<64x128xf32>
    %c95 = arith.constant 95 : index
    %506 = memref.load %arg2[%c95] : memref<135xf32, #tpu.memory_space<smem>>
    %507 = vector.broadcast %506 : f32 to vector<64x128xf32>
    %508 = arith.mulf %36, %507 : vector<64x128xf32>
    %509 = arith.addf %505, %508 : vector<64x128xf32>
    %c96 = arith.constant 96 : index
    %510 = memref.load %arg2[%c96] : memref<135xf32, #tpu.memory_space<smem>>
    %511 = vector.broadcast %510 : f32 to vector<64x128xf32>
    %512 = arith.mulf %40, %511 : vector<64x128xf32>
    %513 = arith.addf %509, %512 : vector<64x128xf32>
    %c97 = arith.constant 97 : index
    %514 = memref.load %arg2[%c97] : memref<135xf32, #tpu.memory_space<smem>>
    %515 = vector.broadcast %514 : f32 to vector<64x128xf32>
    %516 = arith.mulf %37, %515 : vector<64x128xf32>
    %517 = arith.addf %513, %516 : vector<64x128xf32>
    %c98 = arith.constant 98 : index
    %518 = memref.load %arg2[%c98] : memref<135xf32, #tpu.memory_space<smem>>
    %519 = vector.broadcast %518 : f32 to vector<64x128xf32>
    %520 = arith.mulf %43, %519 : vector<64x128xf32>
    %521 = arith.addf %517, %520 : vector<64x128xf32>
    %cst_93 = arith.constant 1.000000e-01 : f32
    %522 = vector.broadcast %cst_93 : f32 to vector<64x128xf32>
    %523 = arith.mulf %522, %521 : vector<64x128xf32>
    %524 = arith.maximumf %521, %523 : vector<64x128xf32>
    %c0_94 = arith.constant 0 : index
    %c11_95 = arith.constant 11 : index
    %c0_96 = arith.constant 0 : index
    %c0_97 = arith.constant 0 : index
    %525 = vector.load %arg7[%c0_94, %c11_95, %c0_96, %c0_97] : memref<1x16x64x128xf32, #tpu.memory_space<vmem>>, vector<1x1x64x128xf32>
    %526 = vector.shape_cast %525 : vector<1x1x64x128xf32> to vector<64x128xf32>
    %527 = vector.shape_cast %524 : vector<64x128xf32> to vector<1x1x64x128xf32>
    tpu.vector_store %arg7[%c0_94, %c11_95, %c0_96, %c0_97], %527 {strides = array<i32>} : memref<1x16x64x128xf32, #tpu.memory_space<vmem>>, vector<1x1x64x128xf32>,
    %c99 = arith.constant 99 : index
    %528 = memref.load %arg2[%c99] : memref<135xf32, #tpu.memory_space<smem>>
    %529 = vector.broadcast %528 : f32 to vector<64x128xf32>
    %530 = arith.mulf %26, %529 : vector<64x128xf32>
    %c11_98 = arith.constant 11 : index
    %531 = memref.load %arg3[%c11_98] : memref<15xf32, #tpu.memory_space<smem>>
    %532 = vector.broadcast %531 : f32 to vector<64x128xf32>
    %533 = arith.addf %530, %532 : vector<64x128xf32>
    %c100 = arith.constant 100 : index
    %534 = memref.load %arg2[%c100] : memref<135xf32, #tpu.memory_space<smem>>
    %535 = vector.broadcast %534 : f32 to vector<64x128xf32>
    %536 = arith.mulf %23, %535 : vector<64x128xf32>
    %537 = arith.addf %533, %536 : vector<64x128xf32>
    %c101 = arith.constant 101 : index
    %538 = memref.load %arg2[%c101] : memref<135xf32, #tpu.memory_space<smem>>
    %539 = vector.broadcast %538 : f32 to vector<64x128xf32>
    %540 = arith.mulf %29, %539 : vector<64x128xf32>
    %541 = arith.addf %537, %540 : vector<64x128xf32>
    %c102 = arith.constant 102 : index
    %542 = memref.load %arg2[%c102] : memref<135xf32, #tpu.memory_space<smem>>
    %543 = vector.broadcast %542 : f32 to vector<64x128xf32>
    %544 = arith.mulf %33, %543 : vector<64x128xf32>
    %545 = arith.addf %541, %544 : vector<64x128xf32>
    %c103 = arith.constant 103 : index
    %546 = memref.load %arg2[%c103] : memref<135xf32, #tpu.memory_space<smem>>
    %547 = vector.broadcast %546 : f32 to vector<64x128xf32>
    %548 = arith.mulf %30, %547 : vector<64x128xf32>
    %549 = arith.addf %545, %548 : vector<64x128xf32>
    %c104 = arith.constant 104 : index
    %550 = memref.load %arg2[%c104] : memref<135xf32, #tpu.memory_space<smem>>
    %551 = vector.broadcast %550 : f32 to vector<64x128xf32>
    %552 = arith.mulf %36, %551 : vector<64x128xf32>
    %553 = arith.addf %549, %552 : vector<64x128xf32>
    %c105 = arith.constant 105 : index
    %554 = memref.load %arg2[%c105] : memref<135xf32, #tpu.memory_space<smem>>
    %555 = vector.broadcast %554 : f32 to vector<64x128xf32>
    %556 = arith.mulf %40, %555 : vector<64x128xf32>
    %557 = arith.addf %553, %556 : vector<64x128xf32>
    %c106 = arith.constant 106 : index
    %558 = memref.load %arg2[%c106] : memref<135xf32, #tpu.memory_space<smem>>
    %559 = vector.broadcast %558 : f32 to vector<64x128xf32>
    %560 = arith.mulf %37, %559 : vector<64x128xf32>
    %561 = arith.addf %557, %560 : vector<64x128xf32>
    %c107 = arith.constant 107 : index
    %562 = memref.load %arg2[%c107] : memref<135xf32, #tpu.memory_space<smem>>
    %563 = vector.broadcast %562 : f32 to vector<64x128xf32>
    %564 = arith.mulf %43, %563 : vector<64x128xf32>
    %565 = arith.addf %561, %564 : vector<64x128xf32>
    %cst_99 = arith.constant 1.000000e-01 : f32
    %566 = vector.broadcast %cst_99 : f32 to vector<64x128xf32>
    %567 = arith.mulf %566, %565 : vector<64x128xf32>
    %568 = arith.maximumf %565, %567 : vector<64x128xf32>
    %c0_100 = arith.constant 0 : index
    %c12_101 = arith.constant 12 : index
    %c0_102 = arith.constant 0 : index
    %c0_103 = arith.constant 0 : index
    %569 = vector.load %arg7[%c0_100, %c12_101, %c0_102, %c0_103] : memref<1x16x64x128xf32, #tpu.memory_space<vmem>>, vector<1x1x64x128xf32>
    %570 = vector.shape_cast %569 : vector<1x1x64x128xf32> to vector<64x128xf32>
    %571 = vector.shape_cast %568 : vector<64x128xf32> to vector<1x1x64x128xf32>
    tpu.vector_store %arg7[%c0_100, %c12_101, %c0_102, %c0_103], %571 {strides = array<i32>} : memref<1x16x64x128xf32, #tpu.memory_space<vmem>>, vector<1x1x64x128xf32>,
    %c108 = arith.constant 108 : index
    %572 = memref.load %arg2[%c108] : memref<135xf32, #tpu.memory_space<smem>>
    %573 = vector.broadcast %572 : f32 to vector<64x128xf32>
    %574 = arith.mulf %26, %573 : vector<64x128xf32>
    %c12_104 = arith.constant 12 : index
    %575 = memref.load %arg3[%c12_104] : memref<15xf32, #tpu.memory_space<smem>>
    %576 = vector.broadcast %575 : f32 to vector<64x128xf32>
    %577 = arith.addf %574, %576 : vector<64x128xf32>
    %c109 = arith.constant 109 : index
    %578 = memref.load %arg2[%c109] : memref<135xf32, #tpu.memory_space<smem>>
    %579 = vector.broadcast %578 : f32 to vector<64x128xf32>
    %580 = arith.mulf %23, %579 : vector<64x128xf32>
    %581 = arith.addf %577, %580 : vector<64x128xf32>
    %c110 = arith.constant 110 : index
    %582 = memref.load %arg2[%c110] : memref<135xf32, #tpu.memory_space<smem>>
    %583 = vector.broadcast %582 : f32 to vector<64x128xf32>
    %584 = arith.mulf %29, %583 : vector<64x128xf32>
    %585 = arith.addf %581, %584 : vector<64x128xf32>
    %c111 = arith.constant 111 : index
    %586 = memref.load %arg2[%c111] : memref<135xf32, #tpu.memory_space<smem>>
    %587 = vector.broadcast %586 : f32 to vector<64x128xf32>
    %588 = arith.mulf %33, %587 : vector<64x128xf32>
    %589 = arith.addf %585, %588 : vector<64x128xf32>
    %c112 = arith.constant 112 : index
    %590 = memref.load %arg2[%c112] : memref<135xf32, #tpu.memory_space<smem>>
    %591 = vector.broadcast %590 : f32 to vector<64x128xf32>
    %592 = arith.mulf %30, %591 : vector<64x128xf32>
    %593 = arith.addf %589, %592 : vector<64x128xf32>
    %c113 = arith.constant 113 : index
    %594 = memref.load %arg2[%c113] : memref<135xf32, #tpu.memory_space<smem>>
    %595 = vector.broadcast %594 : f32 to vector<64x128xf32>
    %596 = arith.mulf %36, %595 : vector<64x128xf32>
    %597 = arith.addf %593, %596 : vector<64x128xf32>
    %c114 = arith.constant 114 : index
    %598 = memref.load %arg2[%c114] : memref<135xf32, #tpu.memory_space<smem>>
    %599 = vector.broadcast %598 : f32 to vector<64x128xf32>
    %600 = arith.mulf %40, %599 : vector<64x128xf32>
    %601 = arith.addf %597, %600 : vector<64x128xf32>
    %c115 = arith.constant 115 : index
    %602 = memref.load %arg2[%c115] : memref<135xf32, #tpu.memory_space<smem>>
    %603 = vector.broadcast %602 : f32 to vector<64x128xf32>
    %604 = arith.mulf %37, %603 : vector<64x128xf32>
    %605 = arith.addf %601, %604 : vector<64x128xf32>
    %c116 = arith.constant 116 : index
    %606 = memref.load %arg2[%c116] : memref<135xf32, #tpu.memory_space<smem>>
    %607 = vector.broadcast %606 : f32 to vector<64x128xf32>
    %608 = arith.mulf %43, %607 : vector<64x128xf32>
    %609 = arith.addf %605, %608 : vector<64x128xf32>
    %cst_105 = arith.constant 1.000000e-01 : f32
    %610 = vector.broadcast %cst_105 : f32 to vector<64x128xf32>
    %611 = arith.mulf %610, %609 : vector<64x128xf32>
    %612 = arith.maximumf %609, %611 : vector<64x128xf32>
    %c0_106 = arith.constant 0 : index
    %c13_107 = arith.constant 13 : index
    %c0_108 = arith.constant 0 : index
    %c0_109 = arith.constant 0 : index
    %613 = vector.load %arg7[%c0_106, %c13_107, %c0_108, %c0_109] : memref<1x16x64x128xf32, #tpu.memory_space<vmem>>, vector<1x1x64x128xf32>
    %614 = vector.shape_cast %613 : vector<1x1x64x128xf32> to vector<64x128xf32>
    %615 = vector.shape_cast %612 : vector<64x128xf32> to vector<1x1x64x128xf32>
    tpu.vector_store %arg7[%c0_106, %c13_107, %c0_108, %c0_109], %615 {strides = array<i32>} : memref<1x16x64x128xf32, #tpu.memory_space<vmem>>, vector<1x1x64x128xf32>,
    %c117 = arith.constant 117 : index
    %616 = memref.load %arg2[%c117] : memref<135xf32, #tpu.memory_space<smem>>
    %617 = vector.broadcast %616 : f32 to vector<64x128xf32>
    %618 = arith.mulf %26, %617 : vector<64x128xf32>
    %c13_110 = arith.constant 13 : index
    %619 = memref.load %arg3[%c13_110] : memref<15xf32, #tpu.memory_space<smem>>
    %620 = vector.broadcast %619 : f32 to vector<64x128xf32>
    %621 = arith.addf %618, %620 : vector<64x128xf32>
    %c118 = arith.constant 118 : index
    %622 = memref.load %arg2[%c118] : memref<135xf32, #tpu.memory_space<smem>>
    %623 = vector.broadcast %622 : f32 to vector<64x128xf32>
    %624 = arith.mulf %23, %623 : vector<64x128xf32>
    %625 = arith.addf %621, %624 : vector<64x128xf32>
    %c119 = arith.constant 119 : index
    %626 = memref.load %arg2[%c119] : memref<135xf32, #tpu.memory_space<smem>>
    %627 = vector.broadcast %626 : f32 to vector<64x128xf32>
    %628 = arith.mulf %29, %627 : vector<64x128xf32>
    %629 = arith.addf %625, %628 : vector<64x128xf32>
    %c120 = arith.constant 120 : index
    %630 = memref.load %arg2[%c120] : memref<135xf32, #tpu.memory_space<smem>>
    %631 = vector.broadcast %630 : f32 to vector<64x128xf32>
    %632 = arith.mulf %33, %631 : vector<64x128xf32>
    %633 = arith.addf %629, %632 : vector<64x128xf32>
    %c121 = arith.constant 121 : index
    %634 = memref.load %arg2[%c121] : memref<135xf32, #tpu.memory_space<smem>>
    %635 = vector.broadcast %634 : f32 to vector<64x128xf32>
    %636 = arith.mulf %30, %635 : vector<64x128xf32>
    %637 = arith.addf %633, %636 : vector<64x128xf32>
    %c122 = arith.constant 122 : index
    %638 = memref.load %arg2[%c122] : memref<135xf32, #tpu.memory_space<smem>>
    %639 = vector.broadcast %638 : f32 to vector<64x128xf32>
    %640 = arith.mulf %36, %639 : vector<64x128xf32>
    %641 = arith.addf %637, %640 : vector<64x128xf32>
    %c123 = arith.constant 123 : index
    %642 = memref.load %arg2[%c123] : memref<135xf32, #tpu.memory_space<smem>>
    %643 = vector.broadcast %642 : f32 to vector<64x128xf32>
    %644 = arith.mulf %40, %643 : vector<64x128xf32>
    %645 = arith.addf %641, %644 : vector<64x128xf32>
    %c124 = arith.constant 124 : index
    %646 = memref.load %arg2[%c124] : memref<135xf32, #tpu.memory_space<smem>>
    %647 = vector.broadcast %646 : f32 to vector<64x128xf32>
    %648 = arith.mulf %37, %647 : vector<64x128xf32>
    %649 = arith.addf %645, %648 : vector<64x128xf32>
    %c125 = arith.constant 125 : index
    %650 = memref.load %arg2[%c125] : memref<135xf32, #tpu.memory_space<smem>>
    %651 = vector.broadcast %650 : f32 to vector<64x128xf32>
    %652 = arith.mulf %43, %651 : vector<64x128xf32>
    %653 = arith.addf %649, %652 : vector<64x128xf32>
    %cst_111 = arith.constant 1.000000e-01 : f32
    %654 = vector.broadcast %cst_111 : f32 to vector<64x128xf32>
    %655 = arith.mulf %654, %653 : vector<64x128xf32>
    %656 = arith.maximumf %653, %655 : vector<64x128xf32>
    %c0_112 = arith.constant 0 : index
    %c14_113 = arith.constant 14 : index
    %c0_114 = arith.constant 0 : index
    %c0_115 = arith.constant 0 : index
    %657 = vector.load %arg7[%c0_112, %c14_113, %c0_114, %c0_115] : memref<1x16x64x128xf32, #tpu.memory_space<vmem>>, vector<1x1x64x128xf32>
    %658 = vector.shape_cast %657 : vector<1x1x64x128xf32> to vector<64x128xf32>
    %659 = vector.shape_cast %656 : vector<64x128xf32> to vector<1x1x64x128xf32>
    tpu.vector_store %arg7[%c0_112, %c14_113, %c0_114, %c0_115], %659 {strides = array<i32>} : memref<1x16x64x128xf32, #tpu.memory_space<vmem>>, vector<1x1x64x128xf32>,
    %c126 = arith.constant 126 : index
    %660 = memref.load %arg2[%c126] : memref<135xf32, #tpu.memory_space<smem>>
    %661 = vector.broadcast %660 : f32 to vector<64x128xf32>
    %662 = arith.mulf %26, %661 : vector<64x128xf32>
    %c14_116 = arith.constant 14 : index
    %663 = memref.load %arg3[%c14_116] : memref<15xf32, #tpu.memory_space<smem>>
    %664 = vector.broadcast %663 : f32 to vector<64x128xf32>
    %665 = arith.addf %662, %664 : vector<64x128xf32>
    %c127 = arith.constant 127 : index
    %666 = memref.load %arg2[%c127] : memref<135xf32, #tpu.memory_space<smem>>
    %667 = vector.broadcast %666 : f32 to vector<64x128xf32>
    %668 = arith.mulf %23, %667 : vector<64x128xf32>
    %669 = arith.addf %665, %668 : vector<64x128xf32>
    %c128 = arith.constant 128 : index
    %670 = memref.load %arg2[%c128] : memref<135xf32, #tpu.memory_space<smem>>
    %671 = vector.broadcast %670 : f32 to vector<64x128xf32>
    %672 = arith.mulf %29, %671 : vector<64x128xf32>
    %673 = arith.addf %669, %672 : vector<64x128xf32>
    %c129 = arith.constant 129 : index
    %674 = memref.load %arg2[%c129] : memref<135xf32, #tpu.memory_space<smem>>
    %675 = vector.broadcast %674 : f32 to vector<64x128xf32>
    %676 = arith.mulf %33, %675 : vector<64x128xf32>
    %677 = arith.addf %673, %676 : vector<64x128xf32>
    %c130 = arith.constant 130 : index
    %678 = memref.load %arg2[%c130] : memref<135xf32, #tpu.memory_space<smem>>
    %679 = vector.broadcast %678 : f32 to vector<64x128xf32>
    %680 = arith.mulf %30, %679 : vector<64x128xf32>
    %681 = arith.addf %677, %680 : vector<64x128xf32>
    %c131 = arith.constant 131 : index
    %682 = memref.load %arg2[%c131] : memref<135xf32, #tpu.memory_space<smem>>
    %683 = vector.broadcast %682 : f32 to vector<64x128xf32>
    %684 = arith.mulf %36, %683 : vector<64x128xf32>
    %685 = arith.addf %681, %684 : vector<64x128xf32>
    %c132 = arith.constant 132 : index
    %686 = memref.load %arg2[%c132] : memref<135xf32, #tpu.memory_space<smem>>
    %687 = vector.broadcast %686 : f32 to vector<64x128xf32>
    %688 = arith.mulf %40, %687 : vector<64x128xf32>
    %689 = arith.addf %685, %688 : vector<64x128xf32>
    %c133 = arith.constant 133 : index
    %690 = memref.load %arg2[%c133] : memref<135xf32, #tpu.memory_space<smem>>
    %691 = vector.broadcast %690 : f32 to vector<64x128xf32>
    %692 = arith.mulf %37, %691 : vector<64x128xf32>
    %693 = arith.addf %689, %692 : vector<64x128xf32>
    %c134 = arith.constant 134 : index
    %694 = memref.load %arg2[%c134] : memref<135xf32, #tpu.memory_space<smem>>
    %695 = vector.broadcast %694 : f32 to vector<64x128xf32>
    %696 = arith.mulf %43, %695 : vector<64x128xf32>
    %697 = arith.addf %693, %696 : vector<64x128xf32>
    %cst_117 = arith.constant 1.000000e-01 : f32
    %698 = vector.broadcast %cst_117 : f32 to vector<64x128xf32>
    %699 = arith.mulf %698, %697 : vector<64x128xf32>
    %700 = arith.maximumf %697, %699 : vector<64x128xf32>
    %c0_118 = arith.constant 0 : index
    %c15_119 = arith.constant 15 : index
    %c0_120 = arith.constant 0 : index
    %c0_121 = arith.constant 0 : index
    %701 = vector.load %arg7[%c0_118, %c15_119, %c0_120, %c0_121] : memref<1x16x64x128xf32, #tpu.memory_space<vmem>>, vector<1x1x64x128xf32>
    %702 = vector.shape_cast %701 : vector<1x1x64x128xf32> to vector<64x128xf32>
    %703 = vector.shape_cast %700 : vector<64x128xf32> to vector<1x1x64x128xf32>
    tpu.vector_store %arg7[%c0_118, %c15_119, %c0_120, %c0_121], %703 {strides = array<i32>} : memref<1x16x64x128xf32, #tpu.memory_space<vmem>>, vector<1x1x64x128xf32>,
    return
  }
  func.func @transform_0(%arg0: i32, %arg1: i32) -> i32 {
    %c0_i32 = arith.constant 0 : i32
    %c0_i32_0 = arith.constant 0 : i32
    return %c0_i32 : i32
  }
  func.func @transform_1(%arg0: i32, %arg1: i32) -> i32 {
    %c0_i32 = arith.constant 0 : i32
    %c0_i32_0 = arith.constant 0 : i32
    return %c0_i32 : i32
  }
  func.func @transform_2(%arg0: i32, %arg1: i32) -> (i32, i32, i32) {
    %c0_i32 = arith.constant 0 : i32
    %c0_i32_0 = arith.constant 0 : i32
    return %arg0, %arg1, %c0_i32 : i32, i32, i32
  }
  func.func @transform_3(%arg0: i32, %arg1: i32) -> (i32, i32, i32) {
    %c8_i32 = arith.constant 8 : i32
    %0 = arith.muli %arg1, %c8_i32 : i32
    %c1_i32 = arith.constant 1 : i32
    %1 = arith.subi %0, %c1_i32 : i32
    %c0_i32 = arith.constant 0 : i32
    %2 = arith.maxsi %1, %c0_i32 : i32
    %c0_i32_0 = arith.constant 0 : i32
    %c0_i32_1 = arith.constant 0 : i32
    return %arg0, %2, %c0_i32_0 : i32, i32, i32
  }
  func.func @transform_4(%arg0: i32, %arg1: i32) -> (i32, i32, i32) {
    %c1_i32 = arith.constant 1 : i32
    %0 = arith.addi %arg1, %c1_i32 : i32
    %c8_i32 = arith.constant 8 : i32
    %1 = arith.muli %0, %c8_i32 : i32
    %c15_i32 = arith.constant 15 : i32
    %2 = arith.minsi %1, %c15_i32 : i32
    %c0_i32 = arith.constant 0 : i32
    %c0_i32_0 = arith.constant 0 : i32
    return %arg0, %2, %c0_i32 : i32, i32, i32
  }
  func.func @transform_5(%arg0: i32, %arg1: i32) -> (i32, i32, i32, i32) {
    %c0_i32 = arith.constant 0 : i32
    %c0_i32_0 = arith.constant 0 : i32
    %c0_i32_1 = arith.constant 0 : i32
    return %arg0, %c0_i32, %arg1, %c0_i32_0 : i32, i32, i32, i32
  }
}

</mosaic_0001>

<bundles_post_ra>
// kernel: tpu_custom_call.1
= control target key start
LH: loop header
LB: loop body
LE: loop exit
PB: predicated region body
PF: predicated region fallthrough
CT: control target
= control target key end

     0   :  { %s9543_s0 = inlined_call_operand.hbm [shape: f32[135], index: 0, kind: input, shape index: {}]   ;;  %s9544_s1 = inlined_call_operand.hbm [shape: f32[15], index: 1, kind: input, shape index: {}]   ;;  %s9545_s2 = inlined_call_operand.hbm [shape: f32[2,128,128], index: 2, kind: input, shape index: {}]   ;;  %s9546_s3 = inlined_call_operand.hbm [shape: f32[2,128,128], index: 3, kind: input, shape index: {}]   ;;  %s9547_s4 = inlined_call_operand.hbm [shape: f32[2,128,128], index: 4, kind: input, shape index: {}]   ;;  %s9548_s5 = inlined_call_operand.hbm [shape: f32[2,16,128,128], index: 5, kind: output, shape index: {}]  }
   0x1   :  { %9637 = sst [smem:[#allocation281_spill]] %s9543_s0 }
   0x2   :  { %9638 = sst [smem:[#allocation282_spill]] %s9544_s1 }
   0x3   :  { %9639 = sst [smem:[#allocation283_spill]] %s9545_s2 }
   0x4   :  { %9640 = sst [smem:[#allocation284_spill]] %s9546_s3 }
   0x5   :  { %9641 = sst [smem:[#allocation285_spill]] %s9547_s4 }
   0x6   :  { %9642 = sst [smem:[#allocation286_spill]] %s9548_s5 }
   0x7   :  { %10 = vsyncpa [#allocation6], 0 }
   0x8   :  { %11 = vsyncpa [#allocation8], 0 }
   0x9   :  { %12 = vsyncpa [#allocation4], 0 }
   0xa   :  { %14 = vsyncpa [#allocation4 + $0x1], 0 }
   0xb   :  { %15 = vsyncpa [#allocation11], 0 }
   0xc   :  { %17 = vsyncpa [#allocation11 + $0x1], 0 }
   0xd   :  { %18 = vsyncpa [#allocation5], 0 }
   0xe   :  { %20 = vsyncpa [#allocation5 + $0x1], 0  ;;  %s4446_s18 = smov 0   ;;  %s4448_s19 = smov 0  }
   0xf   :  { %s4450_s20 = smov 0   ;;  %s4452_s21 = smov 0  }
  0x10   :  { %s4454_s22 = smov 0   ;;  %s4456_s23 = smov 0  }
  0x11   :  { %s4458_s24 = smov 0   ;;  %s4460_s25 = smov 0  }
  0x12   :  { %s4462_s26 = smov 0   ;;  %s4464_s27 = smov 0  }
  0x13   :  { %s4466_s28 = smov 0   ;;  %s4468_s29 = smov 0  }
  0x14   :  { %s4470_s30 = smov 0   ;;  %s4472_s6 = smov 0  }
  0x15 LB: > { %9643 = sst [smem:[#allocation22_spill]] %s4345_s18  ;;  %s35_s7 = sadd.s32 1, %s4389_s29  ;;  %s4397_s6 = sphi %s4472_s6, %s26_s6   ;;  %s4393_s30 = sphi %s4470_s30, %s11093_s30   ;;  %s4389_s29 = sphi %s4468_s29, %s11092_s29   ;;  %s4385_s28 = sphi %s4466_s28, %s11091_s28   ;;  %s4381_s27 = sphi %s4464_s27, %s11090_s27   ;;  %s4377_s26 = sphi %s4462_s26, %s11089_s26   ;;  %s4373_s25 = sphi %s4460_s25, %s11088_s25   ;;  %s4369_s24 = sphi %s4458_s24, %s11087_s24   ;;  %s4365_s23 = sphi %s4456_s23, %s11086_s23   ;;  %s4361_s22 = sphi %s4454_s22, %s11085_s22   ;;  %s4357_s21 = sphi %s4452_s21, %s11084_s21   ;;  %s4353_s20 = sphi %s4450_s20, %s11083_s20   ;;  %s4349_s19 = sphi %s4448_s19, %s11082_s19   ;;  %s4345_s18 = sphi %s4446_s18, %s11081_s18  }
  0x16   : > { %9644 = sst [smem:[#allocation23_spill]] %s4349_s19  ;;  %s38_s8 = sadd.s32 1, %s4393_s30 }
  0x17   : > { %9645 = sst [smem:[#allocation24_spill]] %s4353_s20  ;;  %p36_p0 = scmp.ge.s32.totalorder %s35_s7, 2 }
  0x18   : > { %9646 = sst [smem:[#allocation25_spill]] %s4361_s22  ;;  %p9559_p1 = scmp.eq.s32.totalorder %s4397_s6, 0 }
  0x19   : > { %9647 = sst [smem:[#allocation26_spill]] %s4365_s23  ;;  %s4520_s9 = sshll.u32 %s4389_s29, 3 }
  0x1a   : > { %9648 = sst [smem:[#allocation27_spill]] %s4369_s24  ;;  %s125_s10 = sadd.s32 1, %s4365_s23 }
  0x1b   : > { %9649 = sst [smem:[#allocation28_spill]] %s4373_s25  ;;  %s11095_s7 = smov (%p36_p0, %s35_s7), 0 }
  0x1c   : > { %9650 = sst [smem:[#allocation29_spill]] %s4377_s26  ;;  %s11097_s8 = smov (!%p36_p0, %s38_s8), %s4393_s30 }
  0x1d   : > { %9651 = sst [smem:[#allocation30_spill]] %s4381_s27  ;;  %s85_s11 = ssub.s32 %s4389_s29, %s11095_s7 }
  0x1e   : > { %9652 = sst [smem:[#allocation31_spill]] %s4385_s28  ;;  %s3651_s12 = sadd.s32 4294967295, %s4520_s9 }
  0x1f   : > { %9653 = sst [smem:[#allocation32_spill]] %s4389_s29  ;;  %p40_p2 = scmp.ge.s32.totalorder %s11097_s8, 2 }
  0x20   : > { %9654 = sst [smem:[#allocation33_spill]] %s4393_s30  ;;  %p114_p3 = scmp.gt.s32.totalorder %s3651_s12, 0 }
  0x21   : > { %9655 = sst [smem:[#allocation34_spill]] %s4397_s6  ;;  %s3652_s13 = sshll.u32 %s11095_s7, 3 }
  0x22   : > { %9656 = sst [smem:[#allocation35_spill]] %s11095_s7  ;;  %p132_p4 = scmp.ne.s32.totalorder %s4365_s23, %s4361_s22 }
  0x23   : > { %s11099_s8 = smov (%p40_p2, %s11097_s8), 0  ;;  %s11101_s12 = smov (!%p114_p3, %s3651_s12), 0 }
  0x24   : > { %9657 = sst [smem:[#allocation36_spill]] %s11099_s8  ;;  %s4536_s14 = ssub.s32 %s4393_s30, %s11099_s8 }
  0x25   : > { %s3653_s15 = sadd.s32 4294967295, %s3652_s13  ;;  %s4539_s16 = sor.u32 %s85_s11, %s4536_s14 }
  0x26   : > { %p118_p5 = scmp.gt.s32.totalorder %s3653_s15, 0  ;;  %p87_p6 = scmp.eq.s32.totalorder %s4539_s16, 0 }
  0x27   : > { %p4544_p7 = por %p132_p4, %p9559_p1  ;;  %p138_p8 = scmp.ne.s32.totalorder %s4361_s22, %s4357_s21 }
  0x28   : > { %s11103_s15 = smov (!%p118_p5, %s3653_s15), 0  ;;  %s4550_s8 = sadd.s32 8, %s3652_s13 }
  0x29   : > { %9659 = sst [smem:[#allocation37_spill]] %s4550_s8  ;;  %s121_s7 = ssub.s32 %s11101_s12, %s11103_s15 }
  0x2a   : > { %s122_s11 = sor.u32 %s121_s7, %s4536_s14  ;;  %p9556_p11 = scmp.lt.s32.totalorder %s4397_s6, 4 }
  0x2b   : > { %p123_p10 = scmp.eq.s32.totalorder %s122_s11, 0  ;;  %s4556_s29 = sshll.u32 %s4393_s30, 4 }
  0x2c   : > { %s267_s5 = sand.u32 1, %s4397_s6   ;;  %s254_s27 = sadd.s32 %s4556_s29, %s4520_s9 }
  0x2d   : > { %s4560_s28 = scalar_select %p123_p10, %s4365_s23, %s125_s10  }
  0x2e   : > { %s269_s4 = sand.u32 1, %s4365_s23   ;;  %s280_s18 = sadd.s32 %s4556_s29, %s11101_s12 }
  0x2f   : > { %9660 = sst [smem:[#allocation38_spill]] %s4560_s28  ;;  %s3664_s13 = sshll.u32 %s269_s4, 3 }
  0x30   : > { %s3668_s19 = sshll.u32 %s280_s18, 7  ;;  %s9661_s3 = sld [smem:[#allocation284_spill]] }
  0x31   : > { %s271_s8 = scalar_lea.vmem [#allocation10], %s3664_s13  ;;  %p4573_p12 = pnand %p9556_p11, %p4544_p7 }
  0x32   : > { %s284_s7 = sshll.u32 %s271_s8, 4  ;;  %s4577_s10 = scalar_lea.sflag [#allocation11], %s267_s5  ;;  %s285_s7 = int_to_ptr.vmem [resolvable:$true] %s284_s7 }
  0x33   : > { %p4159_p13 = pneg %p4573_p12  ;;  %s4170_s4 = scalar_lea.vmem %s285_s7, 128 }
  0x34   : > { %p4171_p0 = scmp.ne.s32.totalorder %s285_s7, %s4170_s4  ;;  %s4399_s18 = smov [#allocation10]  }
  0x36   : > { %s282_s2 = scalar_lea.hbm %s9661_s3, %s3668_s19  ;;  %p4173_p2 = pnand %p4171_p0, %p4159_p13 }
  0x37   : > { %s4175_s19 = sshll.u32 %s4399_s18, 4  ;;  %s4176_s19 = int_to_ptr.vmem [resolvable:$false] %s4175_s19 }
  0x38   : > { %p4174_p3 = pneg %p4173_p2  ;;  %s4177_s20 = scalar_lea.vmem %s4176_s19, 256 }
  0x39   : > { %p4178_p4 = scmp.lt.s32.totalorder %s285_s7, %s4176_s19  ;;  %p4179_p5 = scmp.lt.s32.totalorder %s4177_s20, %s4170_s4 }
  0x3b   : > { %p4180_p7 = por %p4179_p5, %p4178_p4 }
  0x3d   : > { %p4181_p10 = pnand %p4180_p7, %p4174_p3 }
  0x3f   : > { %4184 = shalt.err (!%p4181_p10)
}
  0x40   : > { %3999 = dma.hbm_to_vmem [thread:$0]  (!%p4573_p12), %s282_s2, 128, %s285_s7, %s4577_s10  }
  0x41   : > { %s4585_s5 = sadd.s32 4294967295, %s4397_s6   ;;  %p3656_p13 = scmp.ge.s32.totalorder %s4397_s6, 1 }
  0x42   : > { %p9558_p0 = scmp.eq.s32.totalorder %s4585_s5, 0  ;;  %p200_p2 = scmp.eq.s32.totalorder %s4585_s5, 3 }
  0x43   : > { %p213_p3 = scmp.lt.s32.totalorder %s4397_s6, 5  ;;  %s3649_s12 = sadd.s32 4294967294, %s4397_s6  }
  0x44   : > { %p4596_p4 = por %p138_p8, %p9558_p0  ;;  %s89_s17 = sadd.s32 1, %s4377_s26 }
  0x45   : > { %p4600_p12 = pnand %p3656_p13, %p213_p3  ;;  %p96_p10 = scmp.ne.s32.totalorder %s4377_s26, %s4373_s25 }
  0x46   : > { %s4400_s21 = smov [#allocation3]   ;;  %s9665_s0 = sld [smem:[#allocation281_spill]] }
  0x47   : > { %p3986_p5 = pneg %p4600_p12  ;;  %s4401_s7 = smov [#allocation7]  }
  0x48   : > { %s9666_s1 = sld [smem:[#allocation282_spill]]  ;;  %p98_p8 = por %p9559_p1, %p96_p10 }
  0x49   : > { %p3987_p7 = pnand %p3986_p5, %p9558_p0  ;;  %p102_p13 = scmp.ne.s32.totalorder %s4373_s25, %s4369_s24 }
  0x4a   : > { %s4621_s18 = scalar_select %p87_p6, %s4377_s26, %s89_s17  }
  0x4b   : > { %p4629_p3 = por %p200_p2, %p96_p10  ;;  %p206_p5 = scmp.eq.s32.totalorder %s3649_s12, 3 }
  0x4c   : > { %3989 = dma.hbm_to_smem (!%p3987_p7), %s9665_s0, 32, %s4400_s21, [#allocation6]  }
  0x4d   : > { %9667 = sst [smem:[#allocation39_spill]] %s4621_s18  ;;  %p4635_p9 = por %p9558_p0, %p102_p13 }
  0x4e   : > { %3992 = dma.hbm_to_smem (!%p3987_p7), %s9666_s1, 16, %s4401_s7, [#allocation8]  }
  0x4f   : > { %s9668_s19 = scalar_select %p4629_p3, 1, 0 }
  0x50   : > { %s244_s21 = sand.u32 1, %s4377_s26   ;;  %p4640_p11 = por %p206_p5, %p102_p13 }
  0x51   : > { %9669 = sst [smem:[#allocation40_spill]] %s9668_s19  ;;  %s3660_s16 = sshll.u32 %s244_s21, 6 }
  0x52   : > { %s9671_s13 = scalar_select %p4640_p11, 1, 0 }
  0x53   : > { %s3663_s17 = sshll.u32 %s254_s27, 7  ;;  %s9673_s11 = sld [smem:[#allocation283_spill]] }
  0x54   : > { %9672 = sst [smem:[#allocation41_spill]] %s9671_s13  ;;  %s248_s0 = scalar_lea.vmem [#allocation9], %s3660_s16 }
  0x55   : > { %s257_s1 = sshll.u32 %s248_s0, 4  ;;  %p9674_p6 = scmp.lt.s32.totalorder %s4397_s6, 4  ;;  %s258_s1 = int_to_ptr.vmem [resolvable:$true] %s257_s1 }
  0x56   : > { %s245_s3 = scalar_lea.sflag [#allocation4], %s244_s21  ;;  %s4220_s30 = scalar_lea.vmem %s258_s1, 1024 }
  0x57   : > { %p4652_p2 = pnand %p9674_p6, %p98_p8  ;;  %p4221_p10 = scmp.ne.s32.totalorder %s258_s1, %s4220_s30 }
  0x58   : > { %s4402_s27 = smov [#allocation9]  }
  0x59   : > { %s256_s4 = scalar_lea.hbm %s9673_s11, %s3663_s17  ;;  %p4209_p7 = pneg %p4652_p2 }
  0x5a   : > { %s4225_s18 = sshll.u32 %s4402_s27, 4  ;;  %s4226_s18 = int_to_ptr.vmem [resolvable:$false] %s4225_s18 }
  0x5b   : > { %p4223_p13 = pnand %p4221_p10, %p4209_p7  ;;  %s4227_s17 = scalar_lea.vmem %s4226_s18, 2048 }
  0x5c   : > { %p4228_p0 = scmp.lt.s32.totalorder %s258_s1, %s4226_s18  ;;  %p4229_p1 = scmp.lt.s32.totalorder %s4227_s17, %s4220_s30 }
  0x5d   : > { %p4224_p5 = pneg %p4223_p13 }
  0x5e   : > { %p4230_p11 = por %p4229_p1, %p4228_p0 }
  0x60   : > { %p4231_p8 = pnand %p4230_p11, %p4224_p5 }
  0x62   : > { %4234 = shalt.err (!%p4231_p8)
}
  0x63   : > { %s4403_s0 = smov 128   ;;  %s9676_s16 = sld [smem:[#allocation24_spill]] }
  0x64   : > { %s9677_s21 = sld [smem:[#allocation23_spill]]  ;;  %s4404_s11 = smov 8  }
  0x65   : > { %s9678_s15 = sld [smem:[#allocation37_spill]]  ;;  %s3959_s30 = sadd.s32 8, %s4520_s9 }
  0x66   : > { %s9679_s7 = sld [smem:[#allocation22_spill]]  ;;  %p150_p1 = scmp.lt.s32.totalorder %s3959_s30, 15 }
  0x67   : > { %3996 = dma.hbm_to_vmem [thread:$0]  (!%p4652_p2), %s256_s4, 1024, %s258_s1, %s245_s3, %s4403_s0, %s4403_s0, %s4404_s11  }
  0x68   : > { %s11107_s30 = smov (!%p150_p1, %s3959_s30), 15  ;;  %p9681_p6 = scmp.eq.s32.totalorder %s4397_s6, 0 }
  0x69   : > { %s161_s18 = sadd.s32 1, %s9676_s16  ;;  %s293_s12 = sand.u32 1, %s9676_s16  }
  0x6a   : > { %p168_p11 = scmp.ne.s32.totalorder %s9676_s16, %s9677_s21  ;;  %p9683_p2 = scmp.eq.s32.totalorder %s4585_s5, 0 }
  0x6b   : > { %p9680_p0 = scmp.lt.s32.totalorder %s9678_s15, 15  ;;  %s3669_s3 = sshll.u32 %s293_s12, 3 }
  0x6c   : > { %p4669_p7 = por %p168_p11, %p9681_p6  ;;  %p174_p10 = scmp.ne.s32.totalorder %s9677_s21, %s9679_s7 }
  0x6d   : > { %s11105_s15 = smov (!%p9680_p0, %s9678_s15), 15  ;;  %s304_s9 = sadd.s32 %s4556_s29, %s11107_s30 }
  0x6e   : > { %s157_s17 = ssub.s32 %s11107_s30, %s11105_s15  ;;  %p4679_p13 = por %p174_p10, %p9683_p2 }
  0x6f   : > { %s158_s26 = sor.u32 %s157_s17, %s4536_s14  ;;  %s3672_s4 = sshll.u32 %s304_s9, 7 }
  0x70   : > { %s9684_s1 = scalar_select %p4679_p13, 1, 0 }
  0x71   : > { %p159_p5 = scmp.eq.s32.totalorder %s158_s26, 0  ;;  %s295_s0 = scalar_lea.vmem [#allocation12], %s3669_s3 }
  0x72   : > { %s308_s11 = sshll.u32 %s295_s0, 4  ;;  %s9686_s13 = sld [smem:[#allocation285_spill]]  ;;  %s309_s11 = int_to_ptr.vmem [resolvable:$true] %s308_s11 }
  0x73   : > { %s11109_s16 = smov (!%p159_p5, %s9676_s16), %s161_s18  ;;  %p9687_p8 = scmp.lt.s32.totalorder %s4397_s6, 4 }
  0x74   : > { %9685 = sst [smem:[#allocation42_spill]] %s11109_s16  ;;  %s4248_s26 = scalar_lea.vmem %s309_s11, 128 }
  0x75   : > { %p4694_p1 = pnand %p9687_p8, %p4669_p7  ;;  %p4249_p0 = scmp.ne.s32.totalorder %s309_s11, %s4248_s26 }
  0x76   : > { %s4405_s29 = smov [#allocation12]  }
  0x77   : > { %p4237_p11 = pneg %p4694_p1  ;;  %s4253_s15 = sshll.u32 %s4405_s29, 4  ;;  %s4254_s15 = int_to_ptr.vmem [resolvable:$false] %s4253_s15 }
  0x78   : > { %s306_s21 = scalar_lea.hbm %s9686_s13, %s3672_s4  ;;  %s4255_s7 = scalar_lea.vmem %s4254_s15, 256 }
  0x79   : > { %p4251_p6 = pnand %p4249_p0, %p4237_p11  ;;  %p4256_p2 = scmp.lt.s32.totalorder %s309_s11, %s4254_s15 }
  0x7a   : > { %p4257_p5 = scmp.lt.s32.totalorder %s4255_s7, %s4248_s26 }
  0x7b   : > { %p4252_p10 = pneg %p4251_p6 }
  0x7c   : > { %p4258_p3 = por %p4257_p5, %p4256_p2 }
  0x7e   : > { %p4259_p13 = pnand %p4258_p3, %p4252_p10 }
  0x80   : > { %4262 = shalt.err (!%p4259_p13)
}
  0x81   : > { %4002 = dma.hbm_to_vmem [thread:$0]  (!%p4694_p1), %s306_s21, 128, %s309_s11, %s4577_s10  }
  0x82   : > { %317 = sbr.rel (%p4600_p12) target bundleno = 1033 (0x409), region = 40 }
  0x87   : > { %p9689_p7 = scmp.eq.s32.totalorder %s4585_s5, 0 }
  0x89   : > { %4320 = dma.done.wait (%p9689_p7), [#allocation6], 32   ;;  %p9690_p8 = pmov %p9689_p7 }
  0x8a   : > { %p9691_p11 = pmov %p9689_p7 }
  0x8b   : > { %4322 = vsyncadd (%p9690_p8), [#allocation6], 4294967264 }
  0x8c   : > { %4324 = dma.done.wait (%p9691_p11), [#allocation8], 16   ;;  %p9692_p0 = pmov %p9689_p7 }
  0x8d   : > { %s4714_s23 = sand.u32 1, %s4373_s25  }
  0x8e   : > { %4326 = vsyncadd (%p9692_p0), [#allocation8], 4294967280  ;;  %9693 = sst [smem:[#allocation43_spill]] %s4714_s23  ;;  %s3676_s28 = sshll.u32 %s4714_s23, 6 }
  0x8f   : > { %s328_s10 = scalar_lea.sflag [#allocation4], %s4714_s23  ;;  %s4718_s8 = scalar_lea.vmem [#allocation9], %s3676_s28 }
  0x90   : > { %4328 = dma.done.wait (%p4635_p9), %s328_s10, 1024  }
  0x91   : > { %4330 = vsyncadd (%p4635_p9), %s328_s10, 4294966272  ;;  %s336_s13 = sand.u32 1, %s4585_s5   ;;  %s338_s30 = sand.u32 1, %s4361_s22  }
  0x92   : > { %s4726_s18 = sshll.u32 %s338_s30, 3  ;;  %s337_s27 = scalar_lea.sflag [#allocation11], %s336_s13 }
  0x93   : > { %s340_s17 = scalar_lea.vmem [#allocation10], %s4726_s18 }
  0x94   : > { %4332 = dma.done.wait (%p4596_p4), %s337_s27, 128  }
  0x95   : > { %4334 = vsyncadd (%p4596_p4), %s337_s27, 4294967168  ;;  %s9694_s12 = sld [smem:[#allocation23_spill]]  ;;  %p9695_p9 = scmp.ne.s32.totalorder %s9684_s1, 0 }
  0x9b   : > { %s347_s3 = sand.u32 1, %s9694_s12  }
  0x9c   : > { %s4734_s20 = sshll.u32 %s347_s3, 3 }
  0x9d   : > { %s349_s9 = scalar_lea.vmem [#allocation12], %s4734_s20 }
  0x9e   : > { %4336 = dma.done.wait (%p9695_p9), %s337_s27, 128  }
  0x9f   : > { %4338 = vsyncadd (%p9695_p9), %s337_s27, 4294967168 }
  0xa0   : > { %354 = sfence }
  0xa1   : > { %s3679_s5 = sshll.u32 %s4714_s23, 10  ;;  %v397_v0 = vld [vmem:[%s4718_s8] sm:$0xff]  ;;  %v398_v1 = vld [vmem:[%s4718_s8 + $0x8] sm:$0xff]  ;;  %v399_v2 = vld [vmem:[%s4718_s8 + $0x10] sm:$0xff]  ;;  %s9697_s1 = sld [smem:[#allocation30_spill]] }
  0xa2   : > { %413 = vst [vmem:[#allocation2 + $0x8] sm:$0xff] %v397_v0  ;;  %414 = vst [vmem:[#allocation2 + $0x10] sm:$0xff] %v398_v1  ;;  %v400_v3 = vld [vmem:[%s4718_s8 + $0x18] sm:$0xff]  ;;  %v401_v4 = vld [vmem:[%s4718_s8 + $0x20] sm:$0xff]  ;;  %s4748_s2 = scalar_lea.vmem [#allocation13], %s3679_s5 }
  0xa3   : > { %415 = vst [vmem:[#allocation2 + $0x18] sm:$0xff] %v399_v2  ;;  %v402_v5 = vld [vmem:[%s4718_s8 + $0x28] sm:$0xff]  ;;  %9696 = sst [smem:[#allocation44_spill]] %s4748_s2  ;;  %405 = vst [vmem:[%s4748_s2] sm:$0xff] %v397_v0  ;;  %v403_v6 = vld [vmem:[%s4718_s8 + $0x30] sm:$0xff] }
  0xa4   : > { %406 = vst [vmem:[%s4748_s2 + $0x8] sm:$0xff] %v398_v1  ;;  %407 = vst [vmem:[%s4748_s2 + $0x10] sm:$0xff] %v399_v2  ;;  %v404_v7 = vld [vmem:[%s4718_s8 + $0x38] sm:$0xff] }
  0xa5   : > { %408 = vst [vmem:[%s4748_s2 + $0x18] sm:$0xff] %v400_v3  ;;  %416 = vst [vmem:[#allocation2 + $0x20] sm:$0xff] %v400_v3 }
  0xa6   : > { %409 = vst [vmem:[%s4748_s2 + $0x20] sm:$0xff] %v401_v4  ;;  %417 = vst [vmem:[#allocation2 + $0x28] sm:$0xff] %v401_v4 }
  0xa7   : > { %410 = vst [vmem:[%s4748_s2 + $0x28] sm:$0xff] %v402_v5  ;;  %418 = vst [vmem:[#allocation2 + $0x30] sm:$0xff] %v402_v5  ;;  %p3680_p4 = scmp.le.s32.totalorder %s9697_s1, 0 }
  0xa8   : > { %411 = vst [vmem:[%s4748_s2 + $0x30] sm:$0xff] %v403_v6  ;;  %419 = vst [vmem:[#allocation2 + $0x38] sm:$0xff] %v403_v6 }
  0xa9   : > { %412 = vst [vmem:[%s4748_s2 + $0x38] sm:$0xff] %v404_v7  ;;  %420 = vst [vmem:[#allocation2 + $0x40] sm:$0xff] %v404_v7  ;;  %424 = sbr.rel (%p3680_p4) target bundleno = 176 (0xb0), region = 64 }
  0xae   : > { %v425_v8 = vld [vmem:[%s340_s17 + $0x7] sm:$0x1] }
  0xaf   : > { %426 = vst [vmem:[#allocation2 + $0x7] sm:$0x1] %v425_v8 }
  0xb0 PF: > { %s9698_s4 = sld [smem:[#allocation30_spill]] }
  0xb6   : > { %p3681_p12 = scmp.ne.s32.totalorder %s9698_s4, 0 }
  0xb8   : > { %430 = sbr.rel (%p3681_p12) target bundleno = 191 (0xbf), region = 68 }
  0xbd   : > { %v4406_v9 = vmov 0.0  }
  0xbe   : > { %431 = vst [vmem:[#allocation2 + $0x7] sm:$0x1] %v4406_v9 }
  0xbf PF: > { %s9699_s0 = sld [smem:[#allocation30_spill]] }
  0xc5   : > { %p3682_p3 = scmp.ge.s32.totalorder %s9699_s0, 1 }
  0xc7   : > { %435 = sbr.rel (%p3682_p3) target bundleno = 206 (0xce), region = 72 }
  0xcc   : > { %v436_v10 = vld [vmem:[%s349_s9] sm:$0x1] }
  0xcd   : > { %437 = vst [vmem:[#allocation2 + $0x48] sm:$0x1] %v436_v10 }
  0xce PF: > { %s9700_s11 = sld [smem:[#allocation30_spill]] }
  0xd4   : > { %p3683_p13 = scmp.ne.s32.totalorder %s9700_s11, 1 }
  0xd6   : > { %441 = sbr.rel (%p3683_p13) target bundleno = 221 (0xdd), region = 76 }
  0xdb   : > { %v4407_v11 = vmov 0.0  }
  0xdc   : > { %442 = vst [vmem:[#allocation2 + $0x48] sm:$0x1] %v4407_v11 }
  0xdd PF: > { %v4768_v12 = vld [vmem:[#allocation2 + $0x17] sm:$0xff]  ;;  %v4770_v13 = vld [vmem:[#allocation2 + $0x7] sm:$0xff]  ;;  %s9565_s21 = smov 1   ;;  %v4776_v14 = vld [vmem:[#allocation2 + $0x1f] sm:$0xff]  ;;  %s9577_s14 = smov 127   ;;  %v443_v50 = vlaneseq }
  0xde   : > { %459 = vrot.lane.b32.xlu1 %v4768_v12, %s9565_s21  ;;  %455 = vrot.lane.b32.xlu0 %v4770_v13, %s9565_s21  ;;  %v4778_v15 = vld [vmem:[#allocation2 + $0xf] sm:$0xff]  ;;  %v4786_v17 = vld [vmem:[#allocation2 + $0x27] sm:$0xff]  ;;  %v454_v18 = vld [vmem:[#allocation2 + $0x3f] sm:$0xff]  ;;  %s4808_s26 = sld [smem:[#allocation3]] }
  0xdf   : > { %v4784_v16 = vld [vmem:[#allocation2 + $0x2f] sm:$0xff]  ;;  %v453_v19 = vld [vmem:[#allocation2 + $0x37] sm:$0xff]  ;;  %s4812_s29 = sld [smem:[#allocation7]]  ;;  %v506_v22 = vld [vmem:[#allocation2 + $0x20] sm:$0xff]  ;;  %v5038_v1 = vand.u32 127, %v443_v50 }
  0xe0   : > { %v504_v20 = vld [vmem:[#allocation2 + $0x10] sm:$0xff]  ;;  %v503_v21 = vld [vmem:[#allocation2 + $0x8] sm:$0xff]  ;;  %v505_v23 = vld [vmem:[#allocation2 + $0x18] sm:$0xff]  ;;  %s4814_s15 = sld [smem:[#allocation3 + $0x9]] }
  0xe1   : > { %s4816_s7 = sld [smem:[#allocation7 + $0x1]]  ;;  %v508_v24 = vld [vmem:[#allocation2 + $0x30] sm:$0xff]  ;;  %v507_v25 = vld [vmem:[#allocation2 + $0x28] sm:$0xff]  ;;  %v510_v26 = vld [vmem:[#allocation2 + $0x40] sm:$0xff]  ;;  %9734 = vst [vmem:[#allocation62_spill] sm:$0xff] %v5038_v1  ;;  %vm445_vm0 = vcmp.ge.s32.totalorder %v5038_v1, 1 }
  0xe2   : > { %461 = vrot.lane.b32.xlu1 %v4776_v14, %s9565_s21  ;;  %457 = vrot.lane.b32.xlu0 %v4778_v15, %s9565_s21  ;;  %s4818_s28 = sld [smem:[#allocation3 + $0x12]]  ;;  %v509_v27 = vld [vmem:[#allocation2 + $0x38] sm:$0xff]  ;;  %v559_v29 = vld [vmem:[#allocation2 + $0x9] sm:$0xff]  ;;  %v562_v30 = vld [vmem:[#allocation2 + $0x21] sm:$0xff]  ;;  %vm446_vm1 = vcmp.le.s32.totalorder %v5038_v1, 126 }
  0xe3   : > { %s4822_s10 = sld [smem:[#allocation7 + $0x2]]  ;;  %v560_v28 = vld [vmem:[#allocation2 + $0x11] sm:$0xff]  ;;  %v561_v31 = vld [vmem:[#allocation2 + $0x19] sm:$0xff]  ;;  %v4906_v33 = vld [vmem:[#allocation2 + $0x29] sm:$0xff] }
  0xe4   : > { %s4824_s8 = sld [smem:[#allocation3 + $0x1b]]  ;;  %v4904_v32 = vld [vmem:[#allocation2 + $0x31] sm:$0xff]  ;;  %v4920_v34 = vld [vmem:[#allocation2 + $0x41] sm:$0xff]  ;;  %v4922_v35 = vld [vmem:[#allocation2 + $0x39] sm:$0xff]  ;;  %v4937_v36 = vstv %s4808_s26 }
  0xe5   : > { %s4826_s13 = sld [smem:[#allocation7 + $0x3]]  ;;  %v4940_v37 = vstv %s4812_s29  ;;  %s9719_s29 = smov 127  }
  0xe6   : > { %465 = vrot.lane.b32.xlu1 %v4784_v16, %s9565_s21  ;;  %463 = vrot.lane.b32.xlu0 %v4786_v17, %s9565_s21  ;;  %s4828_s30 = sld [smem:[#allocation3 + $0x24]]  ;;  %v4943_v38 = vstv %s4814_s15 }
  0xe7   : > { %s4832_s18 = sld [smem:[#allocation7 + $0x4]]  ;;  %v4946_v39 = vstv %s4816_s7 }
  0xe8   : > { %s4834_s27 = sld [smem:[#allocation3 + $0x2d]]  ;;  %v4951_v40 = vstv %s4818_s28 }
  0xe9   : > { %s4836_s17 = sld [smem:[#allocation7 + $0x5]]  ;;  %v4954_v41 = vstv %s4822_s10 }
  0xea   : > { %469 = vrot.lane.b32.xlu1 %v454_v18, %s9565_s21  ;;  %467 = vrot.lane.b32.xlu0 %v453_v19, %s9565_s21  ;;  %s4838_s12 = sld [smem:[#allocation3 + $0x36]]  ;;  %v4957_v42 = vstv %s4824_s8 }
  0xeb   : > { %s4842_s3 = sld [smem:[#allocation7 + $0x6]]  ;;  %v4960_v43 = vstv %s4826_s13 }
  0xec   : > { %s4844_s20 = sld [smem:[#allocation3 + $0x3f]]  ;;  %v4965_v44 = vstv %s4828_s30 }
  0xed   : > { %s4846_s9 = sld [smem:[#allocation7 + $0x7]]  ;;  %v4968_v45 = vstv %s4832_s18 }
  0xee   : > { %481 = vrot.lane.b32.xlu1 %v4778_v15, %s9577_s14  ;;  %479 = vrot.lane.b32.xlu0 %v4770_v13, %s9577_s14  ;;  %s4848_s5 = sld [smem:[#allocation3 + $0x48]]  ;;  %v4971_v46 = vstv %s4834_s27 }
  0xef   : > { %s4852_s1 = sld [smem:[#allocation7 + $0x8]]  ;;  %v4974_v47 = vstv %s4836_s17 }
  0xf0   : > { %s4854_s4 = sld [smem:[#allocation3 + $0x51]]  ;;  %v4981_v48 = vstv %s4838_s12 }
  0xf1   : > { %s4856_s0 = sld [smem:[#allocation7 + $0x9]]  ;;  %v4984_v49 = vstv %s4842_s3 }
  0xf2   : > { %485 = vrot.lane.b32.xlu1 %v4776_v14, %s9577_s14  ;;  %483 = vrot.lane.b32.xlu0 %v4768_v12, %s9577_s14  ;;  %s4858_s11 = sld [smem:[#allocation3 + $0x5a]]  ;;  %v4989_v51 = vstv %s4844_s20 }
  0xf3   : > { %s4864_s25 = sld [smem:[#allocation3 + $0x63]]  ;;  %v4992_v52 = vstv %s4846_s9 }
  0xf4   : > { %s4866_s22 = sld [smem:[#allocation7 + $0xb]]  ;;  %v4995_v53 = vstv %s4848_s5 }
  0xf5   : > { %s4868_s16 = sld [smem:[#allocation3 + $0x6c]]  ;;  %v4998_v54 = vstv %s4852_s1 }
  0xf6   : > { %489 = vrot.lane.b32.xlu1 %v4784_v16, %s9577_s14  ;;  %487 = vrot.lane.b32.xlu0 %v4786_v17, %s9577_s14  ;;  %s4872_s24 = sld [smem:[#allocation7 + $0xc]]  ;;  %v5003_v55 = vstv %s4854_s4 }
  0xf7   : > { %s4874_s6 = sld [smem:[#allocation3 + $0x75]]  ;;  %v5006_v56 = vstv %s4856_s0 }
  0xf8   : > { %s4876_s19 = sld [smem:[#allocation7 + $0xd]]  ;;  %v5009_v57 = vstv %s4858_s11 }
  0xf9   : > { %9701 = sst [smem:[#allocation45_spill]] %s4864_s25 }
  0xfa   : > { %493 = vrot.lane.b32.xlu1 %v454_v18, %s9577_s14  ;;  %491 = vrot.lane.b32.xlu0 %v453_v19, %s9577_s14  ;;  %9702 = sst [smem:[#allocation46_spill]] %s4866_s22 }
  0xfb   : > { %9703 = sst [smem:[#allocation47_spill]] %s4868_s16 }
  0xfc   : > { %9704 = sst [smem:[#allocation48_spill]] %s4872_s24  ;;  %s9709_s24 = smov 1  }
  0xfd   : > { %s4878_s23 = sld [smem:[#allocation3 + $0x7e]]  ;;  %v5033_v63 = vstv %s4874_s6 }
  0xfe   : > { %513 = vrot.lane.b32.xlu1 %v504_v20, %s9565_s21  ;;  %511 = vrot.lane.b32.xlu0 %v503_v21, %s9565_s21  ;;  %9705 = sst [smem:[#allocation49_spill]] %s4876_s19 }
  0xff   : > { %s4882_s2 = sld [smem:[#allocation7 + $0xe]] }
 0x100   : > { %s4884_s16 = sld [smem:[#allocation3 + $0x1]] }
 0x101   : > { %s4886_s22 = sld [smem:[#allocation3 + $0xa]] }
 0x102   : > { %517 = vrot.lane.b32.xlu1 %v506_v22, %s9565_s21  ;;  %515 = vrot.lane.b32.xlu0 %v505_v23, %s9565_s21  ;;  %s4888_s25 = sld [smem:[#allocation3 + $0x13]] }
 0x103   : > { %9706 = sst [smem:[#allocation50_spill]] %s4878_s23 }
 0x104   : > { %s4892_s19 = sld [smem:[#allocation3 + $0x1c]] }
 0x105   : > { %9707 = sst [smem:[#allocation51_spill]] %s4882_s2 }
 0x106   : > { %521 = vrot.lane.b32.xlu1 %v508_v24, %s9565_s21  ;;  %519 = vrot.lane.b32.xlu0 %v507_v25, %s9565_s21  ;;  %s4894_s23 = sld [smem:[#allocation3 + $0x25]]  ;;  %v5049_v4 = vstv %s4884_s16 }
 0x107   : > { %9708 = sst [smem:[#allocation52_spill]] %s4886_s22  ;;  %9736 = vst [vmem:[#allocation63_spill] sm:$0xff] %v5049_v4 }
 0x108   : > { %s4898_s2 = sld [smem:[#allocation3 + $0x37]]  ;;  %v5057_v6 = vstv %s4888_s25 }
 0x109   : > { %s4902_s22 = sld [smem:[#allocation3 + $0x40]]  ;;  %9739 = vst [vmem:[#allocation65_spill] sm:$0xff] %v5057_v6 }
 0x10a   : > { %525 = vrot.lane.b32.xlu1 %v510_v26, %s9565_s21  ;;  %523 = vrot.lane.b32.xlu0 %v509_v27, %s9565_s21  ;;  %s4862_s21 = sld [smem:[#allocation7 + $0xa]] }
 0x10b   : > { %9710 = sst [smem:[#allocation53_spill]] %s4892_s19 }
 0x10c   : > { %9711 = sst [smem:[#allocation54_spill]] %s4894_s23 }
 0x10d   : > { %s4908_s19 = sld [smem:[#allocation3 + $0x49]] }
 0x10e   : > { %537 = vrot.lane.b32.xlu1 %v504_v20, %s9577_s14  ;;  %535 = vrot.lane.b32.xlu0 %v503_v21, %s9577_s14  ;;  %s4910_s23 = sld [smem:[#allocation3 + $0x52]]  ;;  %v5071_v10 = vstv %s4898_s2 }
 0x10f   : > { %9713 = sst [smem:[#allocation56_spill]] %s4902_s22  ;;  %9743 = vst [vmem:[#allocation69_spill] sm:$0xff] %v5071_v10 }
 0x110   : > { %s4918_s22 = sld [smem:[#allocation3 + $0x64]]  ;;  %v5012_v58 = vstv %s4862_s21 }
 0x111   : > { %s4976_s26 = sld [smem:[#allocation3 + $0x26]] }
 0x112   : > { %541 = vrot.lane.b32.xlu1 %v506_v22, %s9577_s14  ;;  %539 = vrot.lane.b32.xlu0 %v505_v23, %s9577_s14  ;;  %s9720_s15 = sld [smem:[#allocation45_spill]]  ;;  %v5098_v22 = vmul.f32 %v5049_v4, %v4778_v15 }
 0x113   : > { %9714 = sst [smem:[#allocation57_spill]] %s4908_s19 }
 0x114   : > { %9715 = sst [smem:[#allocation58_spill]] %s4910_s23 }
 0x115   : > { %s4924_s23 = sld [smem:[#allocation3 + $0x6d]] }
 0x116   : > { %545 = vrot.lane.b32.xlu1 %v508_v24, %s9577_s14  ;;  %543 = vrot.lane.b32.xlu0 %v507_v25, %s9577_s14  ;;  %9717 = sst [smem:[#allocation60_spill]] %s4918_s22 }
 0x117   : > { %s4928_s19 = sld [smem:[#allocation3 + $0x2]] }
 0x118   : > { %s4934_s22 = sld [smem:[#allocation3 + $0xb]]  ;;  %v5017_v59 = vstv %s9720_s15 }
 0x119   : > { %s9721_s7 = sld [smem:[#allocation46_spill]] }
 0x11a   : > { %549 = vrot.lane.b32.xlu1 %v510_v26, %s9577_s14  ;;  %547 = vrot.lane.b32.xlu0 %v509_v27, %s9577_s14  ;;  %s4896_s14 = sld [smem:[#allocation3 + $0x2e]]  ;;  %v5114_v26 = vmul.f32 %v5057_v6, %v4778_v15 }
 0x11b   : > { %s9722_s28 = sld [smem:[#allocation47_spill]]  ;;  %v5105_v24 = vstv %s4924_s23 }
 0x11c   : > { %s9723_s10 = sld [smem:[#allocation48_spill]]  ;;  %9750 = vst [vmem:[#allocation75_spill] sm:$0xff] %v5105_v24 }
 0x11d   : > { %9718 = sst [smem:[#allocation61_spill]] %s4928_s19 }
 0x11e   : > { %569 = vrot.lane.b32.xlu1 %v560_v28, %s9709_s24  ;;  %567 = vrot.lane.b32.xlu0 %v559_v29, %s9709_s24  ;;  %s4948_s19 = sld [smem:[#allocation3 + $0x14]] }
 0x11f   : > { %s4986_s8 = sld [smem:[#allocation3 + $0x2f]]  ;;  %v5020_v60 = vstv %s9721_s7 }
 0x120   : > { %9712 = sst [smem:[#allocation55_spill]] %s4896_s14 }
 0x121   : > { %s4912_s14 = sld [smem:[#allocation3 + $0x5b]]  ;;  %v5023_v61 = vstv %s9722_s28 }
 0x122   : > { %573 = vrot.lane.b32.xlu1 %v562_v30, %s9709_s24  ;;  %571 = vrot.lane.b32.xlu0 %v561_v31, %s9709_s24  ;;  %s9724_s13 = sld [smem:[#allocation49_spill]]  ;;  %v5026_v62 = vstv %s9723_s10 }
 0x123   : > { %s5000_s30 = sld [smem:[#allocation3 + $0x38]] }
 0x124   : > { %s9725_s18 = sld [smem:[#allocation50_spill]] }
 0x125   : > { %s9726_s27 = sld [smem:[#allocation51_spill]] }
 0x126   : > { %577 = vrot.lane.b32.xlu1 %v4904_v32, %s9709_s24  ;;  %575 = vrot.lane.b32.xlu0 %v4906_v33, %s9709_s24  ;;  %s9727_s17 = sld [smem:[#allocation52_spill]] }
 0x127   : > { %9716 = sst [smem:[#allocation59_spill]] %s4912_s14 }
 0x128   : > { %s4926_s14 = sld [smem:[#allocation3 + $0x76]]  ;;  %v5036_v0 = vstv %s9724_s13 }
 0x129   : > { %s5014_s12 = sld [smem:[#allocation3 + $0x41]] }
 0x12a   : > { %581 = vrot.lane.b32.xlu1 %v4920_v34, %s9709_s24  ;;  %579 = vrot.lane.b32.xlu0 %v4922_v35, %s9709_s24  ;;  %s4962_s24 = sld [smem:[#allocation3 + $0x1d]]  ;;  %v5043_v2 = vstv %s9725_s18 }
 0x12b   : > { %s9728_s3 = sld [smem:[#allocation53_spill]]  ;;  %v5046_v3 = vstv %s9726_s27 }
 0x12c   : > { %s9729_s20 = sld [smem:[#allocation54_spill]]  ;;  %v5052_v5 = vstv %s9727_s17 }
 0x12d   : > { %s9730_s9 = sld [smem:[#allocation55_spill]]  ;;  %9738 = vst [vmem:[#allocation64_spill] sm:$0xff] %v5052_v5  ;;  %v5102_v23 = vmul.f32 %v5052_v5, %v4778_v15 }
 0x12e   : > { %593 = vrot.lane.b32.xlu1 %v560_v28, %s9719_s29  ;;  %591 = vrot.lane.b32.xlu0 %v559_v29, %s9719_s29  ;;  %s5028_s5 = sld [smem:[#allocation3 + $0x4a]]  ;;  %v5108_v25 = vstv %s4926_s14 }
 0x12f   : > { %s9731_s21 = sld [smem:[#allocation56_spill]]  ;;  %9751 = vst [vmem:[#allocation76_spill] sm:$0xff] %v5108_v25 }
 0x130   : > { %s9732_s1 = sld [smem:[#allocation57_spill]] }
 0x131   : > { %s9733_s4 = sld [smem:[#allocation58_spill]]  ;;  %v5060_v7 = vstv %s9728_s3 }
 0x132   : > { %597 = vrot.lane.b32.xlu1 %v562_v30, %s9719_s29  ;;  %595 = vrot.lane.b32.xlu0 %v561_v31, %s9719_s29  ;;  %s5040_s0 = sld [smem:[#allocation3 + $0x53]]  ;;  %9740 = vst [vmem:[#allocation66_spill] sm:$0xff] %v5060_v7  ;;  %v5063_v8 = vstv %s9729_s20  ;;  %v5118_v27 = vmul.f32 %v5060_v7, %v4778_v15  ;;  %v5135_v31 = vmul.f32 %v5071_v10, %v4778_v15 }
 0x133   : > { %s9735_s11 = sld [smem:[#allocation59_spill]]  ;;  %9741 = vst [vmem:[#allocation67_spill] sm:$0xff] %v5063_v8  ;;  %v5066_v9 = vstv %s9730_s9  ;;  %v5127_v29 = vmul.f32 %v5063_v8, %v4778_v15 }
 0x134   : > { %s9737_s15 = sld [smem:[#allocation60_spill]]  ;;  %9742 = vst [vmem:[#allocation68_spill] sm:$0xff] %v5066_v9  ;;  %9752 = vst [vmem:[#allocation77_spill] sm:$0xff] %v5118_v27  ;;  %v5131_v30 = vmul.f32 %v5066_v9, %v4778_v15  ;;  %v5171_v27 = vstv %s4976_s26 }
 0x135   : > { %s5054_s6 = sld [smem:[#allocation3 + $0x5c]]  ;;  %v5074_v11 = vstv %s9731_s21  ;;  %9753 = vst [vmem:[#allocation78_spill] sm:$0xff] %v5127_v29  ;;  %9755 = vst [vmem:[#allocation80_spill] sm:$0xff] %v5135_v31  ;;  %v5156_v31 = vstv %s4962_s24 }
 0x136   : > { %s5068_s7 = sld [smem:[#allocation3 + $0x65]]  ;;  %9744 = vst [vmem:[#allocation70_spill] sm:$0xff] %v5074_v11  ;;  %v5077_v18 = vstv %s9732_s1  ;;  %601 = vrot.lane.b32.xlu1 %v4904_v32, %s9719_s29  ;;  %599 = vrot.lane.b32.xlu0 %v4906_v33, %s9719_s29  ;;  %9754 = vst [vmem:[#allocation79_spill] sm:$0xff] %v5131_v30  ;;  %v5138_v32 = vstv %s4934_s22  ;;  %v5145_v50 = vmul.f32 %v5074_v11, %v4778_v15 }
 0x137   : > { %s9745_s16 = sld [smem:[#allocation61_spill]]  ;;  %9746 = vst [vmem:[#allocation71_spill] sm:$0xff] %v5077_v18  ;;  %v5080_v19 = vstv %s9733_s4  ;;  %9756 = vst [vmem:[#allocation81_spill] sm:$0xff] %v5138_v32  ;;  %v5141_v33 = vstv %s4948_s19  ;;  %v5149_v29 = vmul.f32 %v5077_v18, %v4778_v15 }
 0x138   : > { %9747 = vst [vmem:[#allocation72_spill] sm:$0xff] %v5080_v19  ;;  %s5082_s25 = sld [smem:[#allocation3 + $0x6e]]  ;;  %9757 = vst [vmem:[#allocation82_spill] sm:$0xff] %v5141_v33  ;;  %v5160_v30 = vmul.f32 %v5080_v19, %v4778_v15 }
 0x139   : > { %v5089_v20 = vstv %s9735_s11  ;;  %s5094_s2 = sld [smem:[#allocation3 + $0x77]]  ;;  %9758 = vst [vmem:[#allocation83_spill] sm:$0xff] %v5145_v50  ;;  %9759 = vst [vmem:[#allocation84_spill] sm:$0xff] %v5149_v29  ;;  %v5168_v29 = vmul.f32 %v5049_v4, %v4770_v13 }
 0x13a   : > { %9748 = vst [vmem:[#allocation73_spill] sm:$0xff] %v5089_v20  ;;  %v5092_v21 = vstv %s9737_s15  ;;  %s5110_s28 = sld [smem:[#allocation3 + $0x7f]]  ;;  %605 = vrot.lane.b32.xlu1 %v4920_v34, %s9719_s29  ;;  %603 = vrot.lane.b32.xlu0 %v4922_v35, %s9719_s29  ;;  %9760 = vst [vmem:[#allocation85_spill] sm:$0xff] %v5156_v31  ;;  %v5164_v50 = vmul.f32 %v5089_v20, %v4778_v15  ;;  %v5174_v34 = vstv %s4986_s8 }
 0x13b   : > { %9749 = vst [vmem:[#allocation74_spill] sm:$0xff] %v5092_v21  ;;  %s5123_s10 = sld [smem:[#allocation3 + $0x80]]  ;;  %9761 = vst [vmem:[#allocation86_spill] sm:$0xff] %v5160_v30  ;;  %v5178_v35 = vmul.f32 %v5092_v21, %v4778_v15  ;;  %v5182_v30 = vmul.f32 %v5105_v24, %v4778_v15  ;;  %v5188_v31 = vstv %s5014_s12  ;;  %v5201_v33 = vstv %s5054_s6 }
 0x13c   : > { %9762 = vst [vmem:[#allocation87_spill] sm:$0xff] %v5164_v50  ;;  %9763 = vst [vmem:[#allocation88_spill] sm:$0xff] %v5168_v29  ;;  %v5185_v50 = vstv %s5000_s30  ;;  %v5191_v29 = vstv %s5028_s5  ;;  %s6539_s22 = sld [smem:[#allocation3 + $0x3]] }
 0x13d   : > { %v5121_v28 = vstv %s9745_s16  ;;  %9764 = vst [vmem:[#allocation89_spill] sm:$0xff] %v5171_v27  ;;  %9765 = vst [vmem:[#allocation90_spill] sm:$0xff] %v5174_v34  ;;  %v5195_v34 = vmul.f32 %v5108_v25, %v4778_v15  ;;  %v5198_v27 = vstv %s5040_s0  ;;  %s6546_s19 = sld [smem:[#allocation3 + $0xc]] }
 0x13e   : > { %9766 = vst [vmem:[#allocation91_spill] sm:$0xff] %v5178_v35  ;;  %9767 = vst [vmem:[#allocation92_spill] sm:$0xff] %v5182_v30  ;;  %v5205_v35 = vmul.f32 %v5052_v5, %v4770_v13  ;;  %v5209_v30 = vmul.f32 %v5057_v6, %v4770_v13  ;;  %s6553_s23 = sld [smem:[#allocation3 + $0x15]] }
 0x13f   : > { %9768 = vst [vmem:[#allocation93_spill] sm:$0xff] %v5185_v50  ;;  %9769 = vst [vmem:[#allocation94_spill] sm:$0xff] %v5188_v31  ;;  %v5212_v50 = vstv %s5068_s7  ;;  %s6560_s14 = sld [smem:[#allocation3 + $0x1e]] }
 0x140   : > { %9770 = vst [vmem:[#allocation95_spill] sm:$0xff] %v5191_v29  ;;  %9771 = vst [vmem:[#allocation96_spill] sm:$0xff] %v5195_v34  ;;  %v5216_v29 = vmul.f32 %v5060_v7, %v4770_v13  ;;  %v5220_v34 = vmul.f32 %v5063_v8, %v4770_v13  ;;  %v5233_v31 = vstv %s5110_s28  ;;  %s6568_s24 = sld [smem:[#allocation3 + $0x27]] }
 0x141   : > { %9772 = vst [vmem:[#allocation97_spill] sm:$0xff] %v5198_v27  ;;  %9773 = vst [vmem:[#allocation98_spill] sm:$0xff] %v5201_v33  ;;  %v5224_v33 = vmul.f32 %v5066_v9, %v4770_v13  ;;  %v5227_v27 = vstv %s5082_s25  ;;  %s6574_s26 = sld [smem:[#allocation3 + $0x30]] }
 0x142   : > { %9774 = vst [vmem:[#allocation99_spill] sm:$0xff] %v5205_v35  ;;  %9775 = vst [vmem:[#allocation100_spill] sm:$0xff] %v5209_v30  ;;  %v5230_v35 = vstv %s5094_s2  ;;  %v5237_v30 = vmul.f32 %v5071_v10, %v4770_v13  ;;  %s6580_s29 = sld [smem:[#allocation3 + $0x39]] }
 0x143   : > { %9776 = vst [vmem:[#allocation101_spill] sm:$0xff] %v5212_v50  ;;  %9777 = vst [vmem:[#allocation102_spill] sm:$0xff] %v5216_v29  ;;  %v5240_v50 = vstv %s5123_s10  ;;  %v5244_v29 = vmul.f32 %v5074_v11, %v4770_v13  ;;  %s6587_s8 = sld [smem:[#allocation3 + $0x42]] }
 0x144   : > { %9778 = vst [vmem:[#allocation103_spill] sm:$0xff] %v5220_v34  ;;  %9779 = vst [vmem:[#allocation104_spill] sm:$0xff] %v5224_v33  ;;  %v5248_v34 = vmul.f32 %v5077_v18, %v4770_v13  ;;  %v5252_v33 = vmul.f32 %v5080_v19, %v4770_v13  ;;  %s6593_s13 = sld [smem:[#allocation3 + $0x4b]] }
 0x145   : > { %9780 = vst [vmem:[#allocation105_spill] sm:$0xff] %v5227_v27  ;;  %9781 = vst [vmem:[#allocation106_spill] sm:$0xff] %v5230_v35  ;;  %v5256_v35 = vmul.f32 %v5233_v31, %v4778_v15  ;;  %v5276_v15 = vmul.f32 %v5233_v31, %v4770_v13  ;;  %s6599_s30 = sld [smem:[#allocation3 + $0x54]] }
 0x146   : > { %9782 = vst [vmem:[#allocation107_spill] sm:$0xff] %v5233_v31  ;;  %9783 = vst [vmem:[#allocation108_spill] sm:$0xff] %v5237_v30  ;;  %v5260_v30 = vmul.f32 %v5089_v20, %v4770_v13  ;;  %s6607_s18 = sld [smem:[#allocation3 + $0x5d]] }
 0x147   : > { %9784 = vst [vmem:[#allocation109_spill] sm:$0xff] %v5240_v50  ;;  %9785 = vst [vmem:[#allocation110_spill] sm:$0xff] %v5244_v29  ;;  %v5264_v50 = vmul.f32 %v5092_v21, %v4770_v13  ;;  %v5268_v29 = vmul.f32 %v5105_v24, %v4770_v13  ;;  %s6615_s27 = sld [smem:[#allocation3 + $0x66]] }
 0x148   : > { %9786 = vst [vmem:[#allocation111_spill] sm:$0xff] %v5248_v34  ;;  %9787 = vst [vmem:[#allocation112_spill] sm:$0xff] %v5252_v33  ;;  %v5272_v34 = vmul.f32 %v5108_v25, %v4770_v13  ;;  %v5280_v33 = vmul.f32 %v5049_v4, %v4776_v14  ;;  %v5296_v13 = vmul.f32 %v5063_v8, %v4776_v14  ;;  %s6622_s17 = sld [smem:[#allocation3 + $0x6f]] }
 0x149   : > { %9788 = vst [vmem:[#allocation113_spill] sm:$0xff] %v5256_v35  ;;  %9789 = vst [vmem:[#allocation114_spill] sm:$0xff] %v5260_v30  ;;  %v5284_v30 = vmul.f32 %v5052_v5, %v4776_v14  ;;  %s6629_s12 = sld [smem:[#allocation3 + $0x78]] }
 0x14a   : > { %9790 = vst [vmem:[#allocation115_spill] sm:$0xff] %v5264_v50  ;;  %9791 = vst [vmem:[#allocation116_spill] sm:$0xff] %v5268_v29  ;;  %v5288_v50 = vmul.f32 %v5057_v6, %v4776_v14  ;;  %v5292_v29 = vmul.f32 %v5060_v7, %v4776_v14  ;;  %s6637_s3 = sld [smem:[#allocation3 + $0x81]] }
 0x14b   : > { %9792 = vst [vmem:[#allocation117_spill] sm:$0xff] %v5272_v34  ;;  %9793 = vst [vmem:[#allocation118_spill] sm:$0xff] %v5276_v15  ;;  %v5300_v15 = vmul.f32 %v5066_v9, %v4776_v14  ;;  %s6993_s20 = sld [smem:[#allocation3 + $0x4]] }
 0x14c   : > { %9794 = vst [vmem:[#allocation119_spill] sm:$0xff] %v5280_v33  ;;  %9795 = vst [vmem:[#allocation120_spill] sm:$0xff] %v5284_v30  ;;  %v5304_v33 = vmul.f32 %v5071_v10, %v4776_v14  ;;  %v5308_v30 = vmul.f32 %v5074_v11, %v4776_v14  ;;  %s7000_s9 = sld [smem:[#allocation3 + $0xd]] }
 0x14d   : > { %9796 = vst [vmem:[#allocation121_spill] sm:$0xff] %v5288_v50  ;;  %9797 = vst [vmem:[#allocation122_spill] sm:$0xff] %v5292_v29  ;;  %v5312_v50 = vmul.f32 %v5077_v18, %v4776_v14  ;;  %v5316_v29 = vmul.f32 %v5080_v19, %v4776_v14  ;;  %s7014_s5 = sld [smem:[#allocation3 + $0x16]] }
 0x14e   : > { %9798 = vst [vmem:[#allocation123_spill] sm:$0xff] %v5296_v13  ;;  %9799 = vst [vmem:[#allocation124_spill] sm:$0xff] %v5300_v15  ;;  %v5320_v13 = vmul.f32 %v5089_v20, %v4776_v14  ;;  %v5324_v15 = vmul.f32 %v5092_v21, %v4776_v14  ;;  %s7026_s21 = sld [smem:[#allocation3 + $0x1f]] }
 0x14f   : > { %9800 = vst [vmem:[#allocation125_spill] sm:$0xff] %v5304_v33  ;;  %9801 = vst [vmem:[#allocation126_spill] sm:$0xff] %v5308_v30  ;;  %v5328_v33 = vmul.f32 %v5105_v24, %v4776_v14  ;;  %v5332_v30 = vmul.f32 %v5108_v25, %v4776_v14  ;;  %s7032_s1 = sld [smem:[#allocation3 + $0x28]] }
 0x150   : > { %9802 = vst [vmem:[#allocation127_spill] sm:$0xff] %v5312_v50  ;;  %9803 = vst [vmem:[#allocation128_spill] sm:$0xff] %v5316_v29  ;;  %v5337_v29 = vmul.f32 %v5233_v31, %v4776_v14  ;;  %v5357_v14 = vmul.f32 %v5063_v8, %v4768_v12  ;;  %s7040_s4 = sld [smem:[#allocation3 + $0x31]] }
 0x151   : > { %9804 = vst [vmem:[#allocation129_spill] sm:$0xff] %v5320_v13  ;;  %9805 = vst [vmem:[#allocation130_spill] sm:$0xff] %v5324_v15  ;;  %v5341_v13 = vmul.f32 %v5049_v4, %v4768_v12  ;;  %v5345_v15 = vmul.f32 %v5052_v5, %v4768_v12  ;;  %s7054_s0 = sld [smem:[#allocation3 + $0x3a]] }
 0x152   : > { %9806 = vst [vmem:[#allocation131_spill] sm:$0xff] %v5328_v33  ;;  %9807 = vst [vmem:[#allocation132_spill] sm:$0xff] %v5332_v30  ;;  %v5349_v33 = vmul.f32 %v5057_v6, %v4768_v12  ;;  %v5353_v30 = vmul.f32 %v5060_v7, %v4768_v12  ;;  %s7066_s11 = sld [smem:[#allocation3 + $0x43]] }
 0x153   : > { %9808 = vst [vmem:[#allocation133_spill] sm:$0xff] %v5337_v29  ;;  %9809 = vst [vmem:[#allocation134_spill] sm:$0xff] %v5341_v13  ;;  %v5361_v29 = vmul.f32 %v5066_v9, %v4768_v12  ;;  %v5365_v13 = vmul.f32 %v5071_v10, %v4768_v12  ;;  %s7072_s15 = sld [smem:[#allocation3 + $0x5]] }
 0x154   : > { %9810 = vst [vmem:[#allocation135_spill] sm:$0xff] %v5345_v15  ;;  %9811 = vst [vmem:[#allocation136_spill] sm:$0xff] %v5349_v33  ;;  %v5369_v15 = vmul.f32 %v5074_v11, %v4768_v12  ;;  %v5373_v33 = vmul.f32 %v5077_v18, %v4768_v12  ;;  %s7081_s6 = sld [smem:[#allocation3 + $0xe]] }
 0x155   : > { %9812 = vst [vmem:[#allocation137_spill] sm:$0xff] %v5353_v30  ;;  %9813 = vst [vmem:[#allocation138_spill] sm:$0xff] %v5357_v14  ;;  %v5377_v30 = vmul.f32 %v5080_v19, %v4768_v12  ;;  %v5381_v14 = vmul.f32 %v5089_v20, %v4768_v12  ;;  %s7095_s7 = sld [smem:[#allocation3 + $0x17]] }
 0x156   : > { %9814 = vst [vmem:[#allocation139_spill] sm:$0xff] %v5361_v29  ;;  %9815 = vst [vmem:[#allocation140_spill] sm:$0xff] %v5365_v13  ;;  %v5385_v29 = vmul.f32 %v5092_v21, %v4768_v12  ;;  %v5389_v13 = vmul.f32 %v5105_v24, %v4768_v12  ;;  %s7105_s16 = sld [smem:[#allocation3 + $0x20]] }
 0x157   : > { %9816 = vst [vmem:[#allocation141_spill] sm:$0xff] %v5369_v15  ;;  %9817 = vst [vmem:[#allocation142_spill] sm:$0xff] %v5373_v33  ;;  %v5393_v15 = vmul.f32 %v5108_v25, %v4768_v12  ;;  %v5397_v33 = vmul.f32 %v5233_v31, %v4768_v12  ;;  %v5417_v12 = vmul.f32 %v5063_v8, %v4784_v16  ;;  %s7111_s25 = sld [smem:[#allocation3 + $0x29]] }
 0x158   : > { %9818 = vst [vmem:[#allocation143_spill] sm:$0xff] %v5377_v30  ;;  %9819 = vst [vmem:[#allocation144_spill] sm:$0xff] %v5381_v14  ;;  %v5401_v30 = vmul.f32 %v5049_v4, %v4784_v16  ;;  %v5405_v14 = vmul.f32 %v5052_v5, %v4784_v16  ;;  %s7121_s2 = sld [smem:[#allocation3 + $0x32]] }
 0x159   : > { %9820 = vst [vmem:[#allocation145_spill] sm:$0xff] %v5385_v29  ;;  %9821 = vst [vmem:[#allocation146_spill] sm:$0xff] %v5389_v13  ;;  %v5409_v29 = vmul.f32 %v5057_v6, %v4784_v16  ;;  %v5413_v13 = vmul.f32 %v5060_v7, %v4784_v16  ;;  %s7135_s28 = sld [smem:[#allocation3 + $0x3b]] }
 0x15a   : > { %9822 = vst [vmem:[#allocation147_spill] sm:$0xff] %v5393_v15  ;;  %9823 = vst [vmem:[#allocation148_spill] sm:$0xff] %v5397_v33  ;;  %v5421_v33 = vmul.f32 %v5066_v9, %v4784_v16  ;;  %s7145_s10 = sld [smem:[#allocation3 + $0x44]] }
 0x15b   : > { %9824 = vst [vmem:[#allocation149_spill] sm:$0xff] %v5401_v30  ;;  %9825 = vst [vmem:[#allocation150_spill] sm:$0xff] %v5405_v14  ;;  %v5425_v30 = vmul.f32 %v5071_v10, %v4784_v16  ;;  %v5429_v14 = vmul.f32 %v5074_v11, %v4784_v16 }
 0x15c   : > { %9826 = vst [vmem:[#allocation151_spill] sm:$0xff] %v5409_v29  ;;  %9827 = vst [vmem:[#allocation152_spill] sm:$0xff] %v5413_v13  ;;  %v5433_v29 = vmul.f32 %v5077_v18, %v4784_v16  ;;  %v5437_v13 = vmul.f32 %v5080_v19, %v4784_v16 }
 0x15d   : > { %9828 = vst [vmem:[#allocation153_spill] sm:$0xff] %v5417_v12  ;;  %9829 = vst [vmem:[#allocation154_spill] sm:$0xff] %v5421_v33  ;;  %v5441_v12 = vmul.f32 %v5089_v20, %v4784_v16  ;;  %v5445_v33 = vmul.f32 %v5092_v21, %v4784_v16 }
 0x15e   : > { %9830 = vst [vmem:[#allocation155_spill] sm:$0xff] %v5425_v30  ;;  %9831 = vst [vmem:[#allocation156_spill] sm:$0xff] %v5429_v14  ;;  %v5449_v30 = vmul.f32 %v5105_v24, %v4784_v16  ;;  %v5453_v14 = vmul.f32 %v5108_v25, %v4784_v16 }
 0x15f   : > { %9832 = vst [vmem:[#allocation157_spill] sm:$0xff] %v5433_v29  ;;  %9833 = vst [vmem:[#allocation158_spill] sm:$0xff] %v5437_v13  ;;  %v5457_v29 = vmul.f32 %v5233_v31, %v4784_v16  ;;  %v5461_v13 = vmul.f32 %v5049_v4, %v4786_v17  ;;  %v5477_v16 = vmul.f32 %v5063_v8, %v4786_v17 }
 0x160   : > { %9834 = vst [vmem:[#allocation159_spill] sm:$0xff] %v5441_v12  ;;  %9835 = vst [vmem:[#allocation160_spill] sm:$0xff] %v5445_v33  ;;  %v5465_v12 = vmul.f32 %v5052_v5, %v4786_v17  ;;  %v5469_v33 = vmul.f32 %v5057_v6, %v4786_v17  ;;  %v5481_v4 = vmul.f32 %v5066_v9, %v4786_v17 }
 0x161   : > { %9836 = vst [vmem:[#allocation161_spill] sm:$0xff] %v5449_v30  ;;  %9837 = vst [vmem:[#allocation162_spill] sm:$0xff] %v5453_v14  ;;  %v5473_v30 = vmul.f32 %v5060_v7, %v4786_v17  ;;  %v5485_v5 = vmul.f32 %v5071_v10, %v4786_v17  ;;  %v5489_v6 = vmul.f32 %v5074_v11, %v4786_v17 }
 0x162   : > { %9838 = vst [vmem:[#allocation163_spill] sm:$0xff] %v5457_v29  ;;  %9839 = vst [vmem:[#allocation164_spill] sm:$0xff] %v5461_v13  ;;  %v5493_v7 = vmul.f32 %v5077_v18, %v4786_v17  ;;  %v5497_v8 = vmul.f32 %v5080_v19, %v4786_v17  ;;  %v5501_v9 = vmul.f32 %v5089_v20, %v4786_v17 }
 0x163   : > { %9840 = vst [vmem:[#allocation165_spill] sm:$0xff] %v5465_v12  ;;  %9841 = vst [vmem:[#allocation166_spill] sm:$0xff] %v5469_v33  ;;  %v456_v33 = vpop.permute.xlu0 %455  ;;  %v5505_v10 = vmul.f32 %v5092_v21, %v4786_v17  ;;  %v5509_v11 = vmul.f32 %v5105_v24, %v4786_v17  ;;  %v5517_v19 = vmul.f32 %v5108_v25, %v4786_v17 }
 0x164   : > { %9842 = vst [vmem:[#allocation167_spill] sm:$0xff] %v5473_v30  ;;  %9843 = vst [vmem:[#allocation168_spill] sm:$0xff] %v5477_v16  ;;  %v460_v30 = vpop.permute.xlu1 %459  ;;  %v5521_v20 = vmul.f32 %v5233_v31, %v4786_v17 }
 0x165   : > { %9844 = vst [vmem:[#allocation169_spill] sm:$0xff] %v5481_v4  ;;  %9845 = vst [vmem:[#allocation170_spill] sm:$0xff] %v5485_v5  ;;  %v473_v18 = vsel %vm445_vm0, %v460_v30, 0.0 }
 0x166   : > { %9846 = vst [vmem:[#allocation171_spill] sm:$0xff] %v5489_v6  ;;  %9847 = vst [vmem:[#allocation172_spill] sm:$0xff] %v5493_v7  ;;  %v471_v7 = vsel %vm445_vm0, %v456_v33, 0.0  ;;  %v619_v21 = vmul.f32 %v4937_v36, %v473_v18  ;;  %v997_v24 = vmul.f32 %v4951_v40, %v473_v18  ;;  %v1375_v30 = vmul.f32 %v4965_v44, %v473_v18 }
 0x167   : > { %9848 = vst [vmem:[#allocation173_spill] sm:$0xff] %v5497_v8  ;;  %9849 = vst [vmem:[#allocation174_spill] sm:$0xff] %v5501_v9  ;;  %v1564_v33 = vmul.f32 %v4971_v46, %v473_v18  ;;  %v1753_v9 = vmul.f32 %v4981_v48, %v473_v18  ;;  %v1942_v25 = vmul.f32 %v4989_v51, %v473_v18 }
 0x168   : > { %9850 = vst [vmem:[#allocation175_spill] sm:$0xff] %v5505_v10  ;;  %9851 = vst [vmem:[#allocation176_spill] sm:$0xff] %v5509_v11  ;;  %v808_v10 = vmul.f32 %v4943_v38, %v473_v18  ;;  %v1186_v11 = vmul.f32 %v4957_v42, %v473_v18  ;;  %v5538_v31 = vadd.f32 %v4954_v41, %v997_v24 }
 0x169   : > { %9852 = vst [vmem:[#allocation177_spill] sm:$0xff] %v5517_v19  ;;  %9853 = vst [vmem:[#allocation178_spill] sm:$0xff] %v5521_v20  ;;  %v5532_v19 = vadd.f32 %v4940_v37, %v619_v21  ;;  %v5544_v8 = vadd.f32 %v4968_v45, %v1375_v30  ;;  %v5547_v6 = vadd.f32 %v4974_v47, %v1564_v33 }
 0x16a   : > { %v5535_v17 = vadd.f32 %v4946_v39, %v808_v10  ;;  %9856 = vst [vmem:[#allocation181_spill] sm:$0xff] %v5538_v31  ;;  %v5541_v20 = vadd.f32 %v4960_v43, %v1186_v11  ;;  %v5550_v5 = vadd.f32 %v4984_v49, %v1753_v9  ;;  %v5553_v21 = vadd.f32 %v4992_v52, %v1942_v25 }
 0x16b   : > { %9854 = vst [vmem:[#allocation179_spill] sm:$0xff] %v5532_v19  ;;  %9858 = vst [vmem:[#allocation183_spill] sm:$0xff] %v5544_v8  ;;  %v2131_v10 = vmul.f32 %v4995_v53, %v473_v18  ;;  %v2320_v24 = vmul.f32 %v5003_v55, %v473_v18  ;;  %v2509_v4 = vmul.f32 %v5009_v57, %v473_v18 }
 0x16c   : > { %9855 = vst [vmem:[#allocation180_spill] sm:$0xff] %v5535_v17  ;;  %9857 = vst [vmem:[#allocation182_spill] sm:$0xff] %v5541_v20  ;;  %v2698_v11 = vmul.f32 %v5017_v59, %v473_v18  ;;  %v2887_v30 = vmul.f32 %v5023_v61, %v473_v18  ;;  %v3076_v16 = vmul.f32 %v5033_v63, %v473_v18 }
 0x16d   : > { %9859 = vst [vmem:[#allocation184_spill] sm:$0xff] %v5547_v6  ;;  %9860 = vst [vmem:[#allocation185_spill] sm:$0xff] %v5550_v5  ;;  %v3265_v33 = vmul.f32 %v5043_v2, %v473_v18  ;;  %v617_v9 = vmul.f32 %v4937_v36, %v471_v7  ;;  %v5564_v12 = vadd.f32 %v4998_v54, %v2131_v10 }
 0x16e   : > { %9861 = vst [vmem:[#allocation186_spill] sm:$0xff] %v5553_v21  ;;  %v5567_v25 = vadd.f32 %v5006_v56, %v2320_v24  ;;  %v5570_v13 = vadd.f32 %v5012_v58, %v2509_v4  ;;  %v5573_v29 = vadd.f32 %v5020_v60, %v2698_v11  ;;  %v5576_v14 = vadd.f32 %v5026_v62, %v2887_v30 }
 0x16f   : > { %9862 = vst [vmem:[#allocation187_spill] sm:$0xff] %v5564_v12  ;;  %v5579_v15 = vadd.f32 %v5036_v0, %v3076_v16  ;;  %v5582_v18 = vadd.f32 %v5046_v3, %v3265_v33  ;;  %v5585_v10 = vadd.f32 %v4940_v37, %v617_v9  ;;  %v806_v24 = vmul.f32 %v4943_v38, %v471_v7  ;;  %v458_v12 = vpop.permute.xlu0 %457 }
 0x170   : > { %9863 = vst [vmem:[#allocation188_spill] sm:$0xff] %v5567_v25  ;;  %9864 = vst [vmem:[#allocation189_spill] sm:$0xff] %v5570_v13  ;;  %v995_v4 = vmul.f32 %v4951_v40, %v471_v7  ;;  %v1184_v13 = vmul.f32 %v4957_v42, %v471_v7  ;;  %v1373_v11 = vmul.f32 %v4965_v44, %v471_v7  ;;  %v462_v25 = vpop.permute.xlu1 %461 }
 0x171   : > { %9865 = vst [vmem:[#allocation190_spill] sm:$0xff] %v5573_v29  ;;  %9866 = vst [vmem:[#allocation191_spill] sm:$0xff] %v5576_v14  ;;  %v1562_v30 = vmul.f32 %v4971_v46, %v471_v7  ;;  %v1751_v14 = vmul.f32 %v4981_v48, %v471_v7  ;;  %v1940_v16 = vmul.f32 %v4989_v51, %v471_v7 }
 0x172   : > { %9867 = vst [vmem:[#allocation192_spill] sm:$0xff] %v5579_v15  ;;  %9868 = vst [vmem:[#allocation193_spill] sm:$0xff] %v5582_v18  ;;  %v2129_v33 = vmul.f32 %v4995_v53, %v471_v7  ;;  %v5596_v18 = vadd.f32 %v4946_v39, %v806_v24  ;;  %v5599_v9 = vadd.f32 %v4954_v41, %v995_v4 }
 0x173   : > { %9869 = vst [vmem:[#allocation194_spill] sm:$0xff] %v5585_v10  ;;  %v5602_v15 = vadd.f32 %v4960_v43, %v1184_v13  ;;  %v5605_v29 = vadd.f32 %v4968_v45, %v1373_v11  ;;  %v5608_v21 = vadd.f32 %v4974_v47, %v1562_v30  ;;  %v5611_v5 = vadd.f32 %v4984_v49, %v1751_v14 }
 0x174   : > { %9870 = vst [vmem:[#allocation195_spill] sm:$0xff] %v5596_v18  ;;  %9871 = vst [vmem:[#allocation196_spill] sm:$0xff] %v5599_v9  ;;  %v5614_v24 = vadd.f32 %v4992_v52, %v1940_v16  ;;  %v5617_v4 = vadd.f32 %v4998_v54, %v2129_v33  ;;  %v2318_v13 = vmul.f32 %v5003_v55, %v471_v7  ;;  %v474_v14 = vsel %vm445_vm0, %v462_v25, 0.0 }
 0x175   : > { %9872 = vst [vmem:[#allocation197_spill] sm:$0xff] %v5602_v15  ;;  %9873 = vst [vmem:[#allocation198_spill] sm:$0xff] %v5605_v29  ;;  %v2507_v6 = vmul.f32 %v5009_v57, %v471_v7  ;;  %v2696_v11 = vmul.f32 %v5017_v59, %v471_v7  ;;  %v2885_v8 = vmul.f32 %v5023_v61, %v471_v7  ;;  %v472_v16 = vsel %vm445_vm0, %v458_v12, 0.0 }
 0x176   : > { %9874 = vst [vmem:[#allocation199_spill] sm:$0xff] %v5608_v21  ;;  %9875 = vst [vmem:[#allocation200_spill] sm:$0xff] %v5611_v5  ;;  %v3074_v30 = vmul.f32 %v5033_v63, %v471_v7  ;;  %v3263_v20 = vmul.f32 %v5043_v2, %v471_v7  ;;  %v5630_v33 = vadd.f32 %v5006_v56, %v2318_v13 }
 0x177   : > { %9876 = vst [vmem:[#allocation201_spill] sm:$0xff] %v5614_v24  ;;  %9877 = vst [vmem:[#allocation202_spill] sm:$0xff] %v5617_v4  ;;  %v5633_v31 = vadd.f32 %v5012_v58, %v2507_v6  ;;  %v5636_v17 = vadd.f32 %v5020_v60, %v2696_v11  ;;  %v5639_v19 = vadd.f32 %v5026_v62, %v2885_v8 }
 0x178   : > { %9878 = vst [vmem:[#allocation203_spill] sm:$0xff] %v5630_v33  ;;  %v5642_v7 = vadd.f32 %v5036_v0, %v3074_v30  ;;  %v5645_v25 = vadd.f32 %v5046_v3, %v3263_v20  ;;  %v620_v12 = vmul.f32 %v4937_v36, %v474_v14  ;;  %v809_v13 = vmul.f32 %v4943_v38, %v474_v14  ;;  %v464_v33 = vpop.permute.xlu0 %463 }
 0x179   : > { %9879 = vst [vmem:[#allocation204_spill] sm:$0xff] %v5633_v31  ;;  %9880 = vst [vmem:[#allocation205_spill] sm:$0xff] %v5636_v17  ;;  %v998_v50 = vmul.f32 %v4951_v40, %v474_v14  ;;  %v1187_v6 = vmul.f32 %v4957_v42, %v474_v14  ;;  %v1376_v11 = vmul.f32 %v4965_v44, %v474_v14  ;;  %v475_v29 = vsel %vm445_vm0, %v464_v33, 0.0 }
 0x17a   : > { %9881 = vst [vmem:[#allocation206_spill] sm:$0xff] %v5639_v19  ;;  %9882 = vst [vmem:[#allocation207_spill] sm:$0xff] %v5642_v7  ;;  %v1565_v34 = vmul.f32 %v4971_v46, %v474_v14  ;;  %v5654_v8 = vadd.f32 %v4940_v37, %v620_v12  ;;  %v5657_v30 = vadd.f32 %v4946_v39, %v809_v13 }
 0x17b   : > { %9883 = vst [vmem:[#allocation208_spill] sm:$0xff] %v5645_v25  ;;  %v1754_v20 = vmul.f32 %v4981_v48, %v474_v14  ;;  %v1943_v25 = vmul.f32 %v4989_v51, %v474_v14  ;;  %v5662_v7 = vadd.f32 %v4954_v41, %v998_v50  ;;  %v5665_v19 = vadd.f32 %v4960_v43, %v1187_v6 }
 0x17c   : > { %9884 = vst [vmem:[#allocation209_spill] sm:$0xff] %v5654_v8  ;;  %9885 = vst [vmem:[#allocation210_spill] sm:$0xff] %v5657_v30  ;;  %v5668_v17 = vadd.f32 %v4968_v45, %v1376_v11  ;;  %v5671_v31 = vadd.f32 %v4974_v47, %v1565_v34  ;;  %v2132_v30 = vmul.f32 %v4995_v53, %v474_v14 }
 0x17d   : > { %9886 = vst [vmem:[#allocation211_spill] sm:$0xff] %v5662_v7  ;;  %9887 = vst [vmem:[#allocation212_spill] sm:$0xff] %v5665_v19  ;;  %v5674_v12 = vadd.f32 %v4984_v49, %v1754_v20  ;;  %v5677_v13 = vadd.f32 %v4992_v52, %v1943_v25  ;;  %v2321_v50 = vmul.f32 %v5003_v55, %v474_v14 }
 0x17e   : > { %9888 = vst [vmem:[#allocation213_spill] sm:$0xff] %v5668_v17  ;;  %9889 = vst [vmem:[#allocation214_spill] sm:$0xff] %v5671_v31  ;;  %v2510_v7 = vmul.f32 %v5009_v57, %v474_v14  ;;  %v2699_v6 = vmul.f32 %v5017_v59, %v474_v14  ;;  %v2888_v11 = vmul.f32 %v5023_v61, %v474_v14 }
 0x17f   : > { %9890 = vst [vmem:[#allocation215_spill] sm:$0xff] %v5674_v12  ;;  %9891 = vst [vmem:[#allocation216_spill] sm:$0xff] %v5677_v13  ;;  %v3077_v17 = vmul.f32 %v5033_v63, %v474_v14  ;;  %v5686_v34 = vadd.f32 %v4998_v54, %v2132_v30  ;;  %v5689_v20 = vadd.f32 %v5006_v56, %v2321_v50 }
 0x180   : > { %v3266_v25 = vmul.f32 %v5043_v2, %v474_v14  ;;  %v618_v13 = vmul.f32 %v4937_v36, %v472_v16  ;;  %v5694_v12 = vadd.f32 %v5012_v58, %v2510_v7  ;;  %v5697_v31 = vadd.f32 %v5020_v60, %v2699_v6 }
 0x181   : > { %9892 = vst [vmem:[#allocation217_spill] sm:$0xff] %v5686_v34  ;;  %9893 = vst [vmem:[#allocation218_spill] sm:$0xff] %v5689_v20  ;;  %v5700_v19 = vadd.f32 %v5026_v62, %v2888_v11  ;;  %v5703_v8 = vadd.f32 %v5036_v0, %v3077_v17  ;;  %v807_v14 = vmul.f32 %v4943_v38, %v472_v16 }
 0x182   : > { %9894 = vst [vmem:[#allocation219_spill] sm:$0xff] %v5694_v12  ;;  %9895 = vst [vmem:[#allocation220_spill] sm:$0xff] %v5697_v31  ;;  %v5706_v30 = vadd.f32 %v5046_v3, %v3266_v25  ;;  %v5709_v50 = vadd.f32 %v4940_v37, %v618_v13  ;;  %v996_v7 = vmul.f32 %v4951_v40, %v472_v16 }
 0x183   : > { %9896 = vst [vmem:[#allocation221_spill] sm:$0xff] %v5700_v19  ;;  %9897 = vst [vmem:[#allocation222_spill] sm:$0xff] %v5703_v8  ;;  %v1185_v12 = vmul.f32 %v4957_v42, %v472_v16  ;;  %v1374_v6 = vmul.f32 %v4965_v44, %v472_v16  ;;  %v1563_v11 = vmul.f32 %v4971_v46, %v472_v16 }
 0x184   : > { %9898 = vst [vmem:[#allocation223_spill] sm:$0xff] %v5706_v30  ;;  %v1752_v19 = vmul.f32 %v4981_v48, %v472_v16  ;;  %v5718_v17 = vadd.f32 %v4946_v39, %v807_v14  ;;  %v5721_v25 = vadd.f32 %v4954_v41, %v996_v7  ;;  %v1941_v13 = vmul.f32 %v4989_v51, %v472_v16  ;;  %v466_v14 = vpop.permute.xlu1 %465 }
 0x185   : > { %v2130_v30 = vmul.f32 %v4995_v53, %v472_v16  ;;  %v5726_v8 = vadd.f32 %v4960_v43, %v1185_v12  ;;  %v5729_v31 = vadd.f32 %v4968_v45, %v1374_v6  ;;  %v5732_v20 = vadd.f32 %v4974_v47, %v1563_v11 }
 0x186   : > { %v5735_v34 = vadd.f32 %v4984_v49, %v1752_v19  ;;  %v5738_v7 = vadd.f32 %v4992_v52, %v1941_v13  ;;  %v2319_v12 = vmul.f32 %v5003_v55, %v472_v16  ;;  %v2508_v24 = vmul.f32 %v5009_v57, %v472_v16 }
 0x187   : > { %v5741_v4 = vadd.f32 %v4998_v54, %v2130_v30  ;;  %v2697_v6 = vmul.f32 %v5017_v59, %v472_v16  ;;  %v2886_v11 = vmul.f32 %v5023_v61, %v472_v16  ;;  %v3075_v5 = vmul.f32 %v5033_v63, %v472_v16 }
 0x188   : > { %v3264_v19 = vmul.f32 %v5043_v2, %v472_v16  ;;  %v5750_v21 = vadd.f32 %v5006_v56, %v2319_v12  ;;  %v5753_v13 = vadd.f32 %v5012_v58, %v2508_v24  ;;  %v476_v30 = vsel %vm445_vm0, %v466_v14, 0.0 }
 0x189   : > { %v5760_v15 = vadd.f32 %v5020_v60, %v2697_v6  ;;  %v5763_v9 = vadd.f32 %v5026_v62, %v2886_v11  ;;  %v5766_v16 = vadd.f32 %v5036_v0, %v3075_v5  ;;  %v622_v24 = vmul.f32 %v4937_v36, %v476_v30 }
 0x18a   : > { %v5769_v12 = vadd.f32 %v5046_v3, %v3264_v19  ;;  %v811_v18 = vmul.f32 %v4943_v38, %v476_v30  ;;  %v1000_v14 = vmul.f32 %v4951_v40, %v476_v30  ;;  %v1189_v33 = vmul.f32 %v4957_v42, %v476_v30 }
 0x18b   : > { %9899 = vst [vmem:[#allocation224_spill] sm:$0xff] %v5760_v15  ;;  %9900 = vst [vmem:[#allocation225_spill] sm:$0xff] %v5763_v9  ;;  %v1378_v6 = vmul.f32 %v4965_v44, %v476_v30  ;;  %v1567_v10 = vmul.f32 %v4971_v46, %v476_v30  ;;  %v1756_v11 = vmul.f32 %v4981_v48, %v476_v30 }
 0x18c   : > { %9901 = vst [vmem:[#allocation226_spill] sm:$0xff] %v5766_v16  ;;  %9902 = vst [vmem:[#allocation227_spill] sm:$0xff] %v5769_v12  ;;  %v1945_v5 = vmul.f32 %v4989_v51, %v476_v30  ;;  %v5780_v35 = vadd.f32 %v4940_v37, %v622_v24  ;;  %v5783_v19 = vadd.f32 %v4946_v39, %v811_v18 }
 0x18d   : > { %v5786_v12 = vadd.f32 %v4954_v41, %v1000_v14  ;;  %v5789_v16 = vadd.f32 %v4960_v43, %v1189_v33  ;;  %v5792_v27 = vadd.f32 %v4968_v45, %v1378_v6  ;;  %v5795_v9 = vadd.f32 %v4974_v47, %v1567_v10 }
 0x18e   : > { %9903 = vst [vmem:[#allocation228_spill] sm:$0xff] %v5780_v35  ;;  %9904 = vst [vmem:[#allocation229_spill] sm:$0xff] %v5783_v19  ;;  %v5798_v15 = vadd.f32 %v4984_v49, %v1756_v11  ;;  %v5801_v24 = vadd.f32 %v4992_v52, %v1945_v5  ;;  %v2134_v18 = vmul.f32 %v4995_v53, %v476_v30 }
 0x18f   : > { %9905 = vst [vmem:[#allocation230_spill] sm:$0xff] %v5786_v12  ;;  %9906 = vst [vmem:[#allocation231_spill] sm:$0xff] %v5789_v16  ;;  %v2323_v14 = vmul.f32 %v5003_v55, %v476_v30  ;;  %v2512_v12 = vmul.f32 %v5009_v57, %v476_v30  ;;  %v2701_v33 = vmul.f32 %v5017_v59, %v476_v30 }
 0x190   : > { %9907 = vst [vmem:[#allocation232_spill] sm:$0xff] %v5792_v27  ;;  %9908 = vst [vmem:[#allocation233_spill] sm:$0xff] %v5795_v9  ;;  %v2890_v6 = vmul.f32 %v5023_v61, %v476_v30  ;;  %v3079_v27 = vmul.f32 %v5033_v63, %v476_v30  ;;  %v3268_v10 = vmul.f32 %v5043_v2, %v476_v30 }
 0x191   : > { %9909 = vst [vmem:[#allocation234_spill] sm:$0xff] %v5798_v15  ;;  %9910 = vst [vmem:[#allocation235_spill] sm:$0xff] %v5801_v24  ;;  %v621_v11 = vmul.f32 %v4937_v36, %v475_v29  ;;  %v5812_v15 = vadd.f32 %v4998_v54, %v2134_v18  ;;  %v5815_v5 = vadd.f32 %v5006_v56, %v2323_v14 }
 0x192   : > { %v5818_v24 = vadd.f32 %v5012_v58, %v2512_v12  ;;  %v5821_v9 = vadd.f32 %v5020_v60, %v2701_v33  ;;  %v5824_v16 = vadd.f32 %v5026_v62, %v2890_v6  ;;  %v5827_v19 = vadd.f32 %v5036_v0, %v3079_v27 }
 0x193   : > { %9911 = vst [vmem:[#allocation236_spill] sm:$0xff] %v5812_v15  ;;  %9912 = vst [vmem:[#allocation237_spill] sm:$0xff] %v5815_v5  ;;  %v5830_v30 = vadd.f32 %v5046_v3, %v3268_v10  ;;  %v5833_v18 = vadd.f32 %v4940_v37, %v621_v11  ;;  %v810_v14 = vmul.f32 %v4943_v38, %v475_v29  ;;  %v468_v5 = vpop.permute.xlu0 %467 }
 0x194   : > { %9913 = vst [vmem:[#allocation238_spill] sm:$0xff] %v5818_v24  ;;  %9914 = vst [vmem:[#allocation239_spill] sm:$0xff] %v5821_v9  ;;  %v999_v12 = vmul.f32 %v4951_v40, %v475_v29  ;;  %v1188_v24 = vmul.f32 %v4957_v42, %v475_v29  ;;  %v1377_v33 = vmul.f32 %v4965_v44, %v475_v29  ;;  %v470_v9 = vpop.permute.xlu1 %469 }
 0x195   : > { %9915 = vst [vmem:[#allocation240_spill] sm:$0xff] %v5824_v16  ;;  %9916 = vst [vmem:[#allocation241_spill] sm:$0xff] %v5827_v19  ;;  %v1566_v6 = vmul.f32 %v4971_v46, %v475_v29  ;;  %v1755_v16 = vmul.f32 %v4981_v48, %v475_v29  ;;  %v1944_v27 = vmul.f32 %v4989_v51, %v475_v29 }
 0x196   : > { %9917 = vst [vmem:[#allocation242_spill] sm:$0xff] %v5830_v30  ;;  %9918 = vst [vmem:[#allocation243_spill] sm:$0xff] %v5833_v18  ;;  %v2133_v10 = vmul.f32 %v4995_v53, %v475_v29  ;;  %v5844_v30 = vadd.f32 %v4946_v39, %v810_v14  ;;  %v5847_v11 = vadd.f32 %v4954_v41, %v999_v12 }
 0x197   : > { %v5850_v18 = vadd.f32 %v4960_v43, %v1188_v24  ;;  %v5853_v19 = vadd.f32 %v4968_v45, %v1377_v33  ;;  %v5856_v15 = vadd.f32 %v4974_v47, %v1566_v6  ;;  %v5859_v35 = vadd.f32 %v4984_v49, %v1755_v16 }
 0x198   : > { %9919 = vst [vmem:[#allocation244_spill] sm:$0xff] %v5847_v11  ;;  %v5862_v14 = vadd.f32 %v4992_v52, %v1944_v27  ;;  %v5865_v12 = vadd.f32 %v4998_v54, %v2133_v10  ;;  %v2322_v24 = vmul.f32 %v5003_v55, %v475_v29  ;;  %v2700_v33 = vmul.f32 %v5017_v59, %v475_v29 }
 0x199   : > { %9920 = vst [vmem:[#allocation245_spill] sm:$0xff] %v5850_v18  ;;  %9921 = vst [vmem:[#allocation246_spill] sm:$0xff] %v5853_v19  ;;  %v2511_v18 = vmul.f32 %v5009_v57, %v475_v29  ;;  %v2889_v19 = vmul.f32 %v5023_v61, %v475_v29  ;;  %v3078_v6 = vmul.f32 %v5033_v63, %v475_v29  ;;  %v478_v16 = vsel %vm445_vm0, %v470_v9, 0.0 }
 0x19a   : > { %9922 = vst [vmem:[#allocation247_spill] sm:$0xff] %v5856_v15  ;;  %9923 = vst [vmem:[#allocation248_spill] sm:$0xff] %v5859_v35  ;;  %v3267_v15 = vmul.f32 %v5043_v2, %v475_v29  ;;  %v477_v27 = vsel %vm445_vm0, %v468_v5, 0.0  ;;  %v5878_v10 = vadd.f32 %v5006_v56, %v2322_v24  ;;  %v624_v5 = vmul.f32 %v4937_v36, %v478_v16 }
 0x19b   : > { %9924 = vst [vmem:[#allocation249_spill] sm:$0xff] %v5862_v14  ;;  %9925 = vst [vmem:[#allocation250_spill] sm:$0xff] %v5865_v12  ;;  %v5881_v12 = vadd.f32 %v5012_v58, %v2511_v18  ;;  %v5884_v14 = vadd.f32 %v5020_v60, %v2700_v33  ;;  %v5887_v35 = vadd.f32 %v5026_v62, %v2889_v19 }
 0x19c   : > { %9926 = vst [vmem:[#allocation251_spill] sm:$0xff] %v5878_v10  ;;  %v5890_v29 = vadd.f32 %v5036_v0, %v3078_v6  ;;  %v5893_v9 = vadd.f32 %v5046_v3, %v3267_v15  ;;  %v813_v24 = vmul.f32 %v4943_v38, %v478_v16  ;;  %v1002_v10 = vmul.f32 %v4951_v40, %v478_v16 }
 0x19d   : > { %9927 = vst [vmem:[#allocation252_spill] sm:$0xff] %v5881_v12  ;;  %9928 = vst [vmem:[#allocation253_spill] sm:$0xff] %v5884_v14  ;;  %v1191_v18 = vmul.f32 %v4957_v42, %v478_v16  ;;  %v1380_v33 = vmul.f32 %v4965_v44, %v478_v16  ;;  %v1569_v14 = vmul.f32 %v4971_v46, %v478_v16 }
 0x19e   : > { %9929 = vst [vmem:[#allocation254_spill] sm:$0xff] %v5887_v35  ;;  %9930 = vst [vmem:[#allocation255_spill] sm:$0xff] %v5890_v29  ;;  %v5902_v19 = vadd.f32 %v4940_v37, %v624_v5  ;;  %v5905_v6 = vadd.f32 %v4946_v39, %v813_v24  ;;  %v1758_v15 = vmul.f32 %v4981_v48, %v478_v16 }
 0x19f   : > { %9931 = vst [vmem:[#allocation256_spill] sm:$0xff] %v5893_v9  ;;  %v1947_v9 = vmul.f32 %v4989_v51, %v478_v16  ;;  %v5910_v29 = vadd.f32 %v4954_v41, %v1002_v10  ;;  %v5913_v35 = vadd.f32 %v4960_v43, %v1191_v18  ;;  %v5916_v12 = vadd.f32 %v4968_v45, %v1380_v33 }
 0x1a0   : > { %9932 = vst [vmem:[#allocation257_spill] sm:$0xff] %v5902_v19  ;;  %9933 = vst [vmem:[#allocation258_spill] sm:$0xff] %v5905_v6  ;;  %v5919_v11 = vadd.f32 %v4974_v47, %v1569_v14  ;;  %v5923_v5 = vadd.f32 %v4984_v49, %v1758_v15  ;;  %v2136_v10 = vmul.f32 %v4995_v53, %v478_v16 }
 0x1a1   : > { %9934 = vst [vmem:[#allocation259_spill] sm:$0xff] %v5910_v29  ;;  %9935 = vst [vmem:[#allocation260_spill] sm:$0xff] %v5913_v35  ;;  %v5926_v24 = vadd.f32 %v4992_v52, %v1947_v9  ;;  %v2325_v29 = vmul.f32 %v5003_v55, %v478_v16  ;;  %v2514_v18 = vmul.f32 %v5009_v57, %v478_v16 }
 0x1a2   : > { %9936 = vst [vmem:[#allocation261_spill] sm:$0xff] %v5916_v12  ;;  %9937 = vst [vmem:[#allocation262_spill] sm:$0xff] %v5919_v11  ;;  %v2703_v33 = vmul.f32 %v5017_v59, %v478_v16  ;;  %v2892_v12 = vmul.f32 %v5023_v61, %v478_v16  ;;  %v3081_v14 = vmul.f32 %v5033_v63, %v478_v16 }
 0x1a3   : > { %9938 = vst [vmem:[#allocation263_spill] sm:$0xff] %v5923_v5  ;;  %9939 = vst [vmem:[#allocation264_spill] sm:$0xff] %v5926_v24  ;;  %v5935_v11 = vadd.f32 %v4998_v54, %v2136_v10  ;;  %v5938_v15 = vadd.f32 %v5006_v56, %v2325_v29  ;;  %v3270_v9 = vmul.f32 %v5043_v2, %v478_v16 }
 0x1a4   : > { %v623_v24 = vmul.f32 %v4937_v36, %v477_v27  ;;  %v5943_v5 = vadd.f32 %v5012_v58, %v2514_v18  ;;  %v5946_v35 = vadd.f32 %v5020_v60, %v2703_v33  ;;  %v5949_v6 = vadd.f32 %v5026_v62, %v2892_v12 }
 0x1a5   : > { %v5952_v19 = vadd.f32 %v5036_v0, %v3081_v14  ;;  %v5955_v10 = vadd.f32 %v5046_v3, %v3270_v9  ;;  %v812_v36 = vmul.f32 %v4943_v38, %v477_v27  ;;  %v1001_v16 = vmul.f32 %v4951_v40, %v477_v27 }
 0x1a6   : > { %9940 = vst [vmem:[#allocation265_spill] sm:$0xff] %v5949_v6  ;;  %v5958_v29 = vadd.f32 %v4940_v37, %v623_v24  ;;  %v1190_v18 = vmul.f32 %v4957_v42, %v477_v27  ;;  %v1379_v33 = vmul.f32 %v4965_v44, %v477_v27  ;;  %v1568_v12 = vmul.f32 %v4971_v46, %v477_v27 }
 0x1a7   : > { %v1757_v6 = vmul.f32 %v4981_v48, %v477_v27  ;;  %v5967_v14 = vadd.f32 %v4946_v39, %v812_v36  ;;  %v5970_v9 = vadd.f32 %v4954_v41, %v1001_v16  ;;  %v1946_v37 = vmul.f32 %v4989_v51, %v477_v27  ;;  %v482_v39 = vpop.permute.xlu1 %481 }
 0x1a8   : > { %9941 = vst [vmem:[#allocation266_spill] sm:$0xff] %v5958_v29  ;;  %v2135_v38 = vmul.f32 %v4995_v53, %v477_v27  ;;  %v5975_v40 = vadd.f32 %v4960_v43, %v1190_v18  ;;  %v5978_v42 = vadd.f32 %v4968_v45, %v1379_v33  ;;  %v5981_v44 = vadd.f32 %v4974_v47, %v1568_v12  ;;  %v9963_v33 = vld [vmem:[#allocation79_spill] sm:$0xff] }
 0x1a9   : > { %9942 = vst [vmem:[#allocation267_spill] sm:$0xff] %v5967_v14  ;;  %9943 = vst [vmem:[#allocation268_spill] sm:$0xff] %v5970_v9  ;;  %v5984_v46 = vadd.f32 %v4984_v49, %v1757_v6  ;;  %v5987_v41 = vadd.f32 %v4992_v52, %v1946_v37  ;;  %v2324_v51 = vmul.f32 %v5003_v55, %v477_v27  ;;  %v9966_v37 = vld [vmem:[#allocation90_spill] sm:$0xff]  ;;  %v10241_v9 = vld [vmem:[#allocation259_spill] sm:$0xff] }
 0x1aa   : > { %9944 = vst [vmem:[#allocation269_spill] sm:$0xff] %v5975_v40  ;;  %9945 = vst [vmem:[#allocation270_spill] sm:$0xff] %v5978_v42  ;;  %v5990_v48 = vadd.f32 %v4998_v54, %v2135_v38  ;;  %v2513_v43 = vmul.f32 %v5009_v57, %v477_v27  ;;  %v2702_v45 = vmul.f32 %v5017_v59, %v477_v27  ;;  %v496_v54 = vsel %vm446_vm1, %v482_v39, 0.0  ;;  %v9967_v38 = vld [vmem:[#allocation80_spill] sm:$0xff] }
 0x1ab   : > { %9946 = vst [vmem:[#allocation271_spill] sm:$0xff] %v5981_v44  ;;  %9947 = vst [vmem:[#allocation272_spill] sm:$0xff] %v5984_v46  ;;  %v2891_v53 = vmul.f32 %v5023_v61, %v477_v27  ;;  %v3080_v47 = vmul.f32 %v5033_v63, %v477_v27  ;;  %v3269_v49 = vmul.f32 %v5043_v2, %v477_v27  ;;  %v10240_v46 = vld [vmem:[#allocation258_spill] sm:$0xff] }
 0x1ac   : > { %9948 = vst [vmem:[#allocation273_spill] sm:$0xff] %v5987_v41  ;;  %9949 = vst [vmem:[#allocation274_spill] sm:$0xff] %v5990_v48  ;;  %v5999_v6 = vadd.f32 %v5006_v56, %v2324_v51  ;;  %v6002_v52 = vadd.f32 %v5012_v58, %v2513_v43  ;;  %v646_v55 = vadd.f32 %v5098_v22, %v5709_v50  ;;  %v9956_v22 = vld [vmem:[#allocation82_spill] sm:$0xff]  ;;  %v10239_v48 = vld [vmem:[#allocation257_spill] sm:$0xff] }
 0x1ad   : > { %v6009_v57 = vadd.f32 %v5020_v60, %v2702_v45  ;;  %v6012_v59 = vadd.f32 %v5026_v62, %v2891_v53  ;;  %v6015_v61 = vadd.f32 %v5036_v0, %v3080_v47  ;;  %v6018_v56 = vadd.f32 %v5046_v3, %v3269_v49  ;;  %v9957_v62 = vld [vmem:[#allocation77_spill] sm:$0xff]  ;;  %v9959_v3 = vld [vmem:[#allocation78_spill] sm:$0xff]  ;;  %v9970_v45 = vld [vmem:[#allocation83_spill] sm:$0xff] }
 0x1ae   : > { %9950 = vst [vmem:[#allocation275_spill] sm:$0xff] %v5999_v6  ;;  %9951 = vst [vmem:[#allocation276_spill] sm:$0xff] %v6002_v52  ;;  %v656_v58 = vmul.f32 %v5121_v28, %v496_v54  ;;  %v835_v63 = vadd.f32 %v5102_v23, %v5718_v17  ;;  %v845_v2 = vmul.f32 %v5138_v32, %v496_v54  ;;  %v9958_v0 = vld [vmem:[#allocation85_spill] sm:$0xff]  ;;  %v9971_v47 = vld [vmem:[#allocation94_spill] sm:$0xff] }
 0x1af   : > { %9952 = vst [vmem:[#allocation277_spill] sm:$0xff] %v6009_v57  ;;  %9953 = vst [vmem:[#allocation278_spill] sm:$0xff] %v6012_v59  ;;  %v1024_v60 = vadd.f32 %v5114_v26, %v5721_v25  ;;  %v1034_v50 = vmul.f32 %v9956_v22, %v496_v54  ;;  %v1213_v27 = vadd.f32 %v9957_v62, %v5726_v8  ;;  %v9962_v23 = vld [vmem:[#allocation89_spill] sm:$0xff]  ;;  %v10238_v57 = vld [vmem:[#allocation107_spill] sm:$0xff] }
 0x1b0   : > { %9954 = vst [vmem:[#allocation279_spill] sm:$0xff] %v6015_v61  ;;  %9955 = vst [vmem:[#allocation280_spill] sm:$0xff] %v6018_v56  ;;  %v1223_v24 = vmul.f32 %v9958_v0, %v496_v54  ;;  %v1402_v36 = vadd.f32 %v9959_v3, %v5729_v31  ;;  %v6032_v16 = vadd.f32 %v656_v58, %v646_v55  ;;  %v9969_v31 = vld [vmem:[#allocation93_spill] sm:$0xff]  ;;  %v10235_v56 = vld [vmem:[#allocation74_spill] sm:$0xff] }
 0x1b1   : > { %v6034_v18 = vadd.f32 %v845_v2, %v835_v63  ;;  %v1412_v17 = vmul.f32 %v9962_v23, %v496_v54  ;;  %v1591_v12 = vadd.f32 %v9963_v33, %v5732_v20  ;;  %v6039_v26 = vadd.f32 %v1034_v50, %v1024_v60  ;;  %v9973_v20 = vld [vmem:[#allocation84_spill] sm:$0xff]  ;;  %v9974_v63 = vld [vmem:[#allocation95_spill] sm:$0xff]  ;;  %v9975_v60 = vld [vmem:[#allocation86_spill] sm:$0xff] }
 0x1b2   : > { %9960 = vst [vmem:[#allocation82_spill] sm:$0xff] %v6032_v16  ;;  %v6041_v25 = vadd.f32 %v1223_v24, %v1213_v27  ;;  %v1601_v8 = vmul.f32 %v9966_v37, %v496_v54  ;;  %v1780_v39 = vadd.f32 %v9967_v38, %v5735_v34  ;;  %v1790_v43 = vmul.f32 %v9969_v31, %v496_v54  ;;  %v9978_v27 = vld [vmem:[#allocation97_spill] sm:$0xff]  ;;  %v10237_v61 = vld [vmem:[#allocation76_spill] sm:$0xff] }
 0x1b3   : > { %9961 = vst [vmem:[#allocation77_spill] sm:$0xff] %v6034_v18  ;;  %9964 = vst [vmem:[#allocation85_spill] sm:$0xff] %v6039_v26  ;;  %v6046_v51 = vadd.f32 %v1412_v17, %v1402_v36  ;;  %v1969_v53 = vadd.f32 %v9970_v45, %v5738_v7  ;;  %v1979_v49 = vmul.f32 %v9971_v47, %v496_v54  ;;  %v9979_v7 = vld [vmem:[#allocation87_spill] sm:$0xff]  ;;  %v9981_v17 = vld [vmem:[#allocation98_spill] sm:$0xff] }
 0x1b4   : > { %9965 = vst [vmem:[#allocation78_spill] sm:$0xff] %v6041_v25  ;;  %v6052_v55 = vadd.f32 %v1601_v8, %v1591_v12  ;;  %v2158_v58 = vadd.f32 %v9973_v20, %v5741_v4  ;;  %v2168_v2 = vmul.f32 %v9974_v63, %v496_v54  ;;  %v2347_v50 = vadd.f32 %v9975_v60, %v5750_v21  ;;  %v9982_v12 = vld [vmem:[#allocation224_spill] sm:$0xff]  ;;  %v9983_v4 = vld [vmem:[#allocation91_spill] sm:$0xff]  ;;  %v9984_v38 = vld [vmem:[#allocation101_spill] sm:$0xff]  ;;  %v480_v20 = vpop.permute.xlu0 %479 }
 0x1b5   : > { %9968 = vst [vmem:[#allocation79_spill] sm:$0xff] %v6046_v51  ;;  %v6059_v34 = vadd.f32 %v1790_v43, %v1780_v39  ;;  %v6061_v62 = vadd.f32 %v1979_v49, %v1969_v53  ;;  %v2357_v24 = vmul.f32 %v9978_v27, %v496_v54  ;;  %v2536_v3 = vadd.f32 %v9979_v7, %v5753_v13  ;;  %v9986_v39 = vld [vmem:[#allocation225_spill] sm:$0xff]  ;;  %v9987_v43 = vld [vmem:[#allocation92_spill] sm:$0xff]  ;;  %v9993_v7 = vld [vmem:[#allocation106_spill] sm:$0xff] }
 0x1b6   : > { %9972 = vst [vmem:[#allocation90_spill] sm:$0xff] %v6052_v55  ;;  %v6066_v36 = vadd.f32 %v2168_v2, %v2158_v58  ;;  %v2546_v33 = vmul.f32 %v9981_v17, %v496_v54  ;;  %v2725_v8 = vadd.f32 %v9983_v4, %v9982_v12  ;;  %v2735_v45 = vmul.f32 %v9984_v38, %v496_v54  ;;  %v9988_v49 = vld [vmem:[#allocation105_spill] sm:$0xff]  ;;  %v9994_v12 = vld [vmem:[#allocation227_spill] sm:$0xff]  ;;  %v10231_v18 = vld [vmem:[#allocation70_spill] sm:$0xff] }
 0x1b7   : > { %9976 = vst [vmem:[#allocation80_spill] sm:$0xff] %v6059_v34  ;;  %9977 = vst [vmem:[#allocation93_spill] sm:$0xff] %v6061_v62  ;;  %v6072_v21 = vadd.f32 %v2357_v24, %v2347_v50  ;;  %v2914_v53 = vadd.f32 %v9987_v43, %v9986_v39  ;;  %v2924_v60 = vmul.f32 %v9988_v49, %v496_v54  ;;  %v9989_v62 = vld [vmem:[#allocation226_spill] sm:$0xff]  ;;  %v9990_v34 = vld [vmem:[#allocation96_spill] sm:$0xff]  ;;  %v495_v39 = vsel %vm446_vm1, %v480_v20, 0.0 }
 0x1b8   : > { %9980 = vst [vmem:[#allocation83_spill] sm:$0xff] %v6066_v36  ;;  %v3103_v13 = vadd.f32 %v9990_v34, %v9989_v62  ;;  %v6079_v58 = vadd.f32 %v2546_v33, %v2536_v3  ;;  %v6081_v2 = vadd.f32 %v2735_v45, %v2725_v8  ;;  %v3113_v36 = vmul.f32 %v9993_v7, %v496_v54  ;;  %v9995_v4 = vld [vmem:[#allocation113_spill] sm:$0xff]  ;;  %v9998_v43 = vld [vmem:[#allocation194_spill] sm:$0xff]  ;;  %v10001_v3 = vld [vmem:[#allocation195_spill] sm:$0xff] }
 0x1b9   : > { %9985 = vst [vmem:[#allocation94_spill] sm:$0xff] %v6072_v21  ;;  %v3292_v55 = vadd.f32 %v9995_v4, %v9994_v12  ;;  %v6086_v51 = vadd.f32 %v2924_v60, %v2914_v53  ;;  %v9997_v50 = vld [vmem:[#allocation109_spill] sm:$0xff]  ;;  %v9999_v21 = vld [vmem:[#allocation88_spill] sm:$0xff]  ;;  %v655_v62 = vmul.f32 %v5121_v28, %v495_v39  ;;  %v10002_v33 = vld [vmem:[#allocation99_spill] sm:$0xff]  ;;  %v844_v45 = vmul.f32 %v5138_v32, %v495_v39 }
 0x1ba   : > { %9991 = vst [vmem:[#allocation84_spill] sm:$0xff] %v6079_v58  ;;  %9992 = vst [vmem:[#allocation95_spill] sm:$0xff] %v6081_v2  ;;  %v3302_v24 = vmul.f32 %v9997_v50, %v496_v54  ;;  %v645_v25 = vadd.f32 %v9999_v21, %v9998_v43  ;;  %v6093_v34 = vadd.f32 %v3113_v36, %v3103_v13  ;;  %v10004_v53 = vld [vmem:[#allocation196_spill] sm:$0xff]  ;;  %v10006_v20 = vld [vmem:[#allocation197_spill] sm:$0xff] }
 0x1bb   : > { %9996 = vst [vmem:[#allocation86_spill] sm:$0xff] %v6086_v51  ;;  %v834_v8 = vadd.f32 %v10002_v33, %v10001_v3  ;;  %v10005_v60 = vld [vmem:[#allocation100_spill] sm:$0xff]  ;;  %v1033_v4 = vmul.f32 %v9956_v22, %v495_v39  ;;  %v10007_v51 = vld [vmem:[#allocation102_spill] sm:$0xff]  ;;  %v1222_v13 = vmul.f32 %v9958_v0, %v495_v39  ;;  %v10011_v3 = vld [vmem:[#allocation103_spill] sm:$0xff] }
 0x1bc   : > { %10000 = vst [vmem:[#allocation97_spill] sm:$0xff] %v6093_v34  ;;  %v6099_v12 = vadd.f32 %v3302_v24, %v3292_v55  ;;  %v1023_v54 = vadd.f32 %v10005_v60, %v10004_v53  ;;  %v1212_v2 = vadd.f32 %v10007_v51, %v10006_v20  ;;  %v6106_v21 = vadd.f32 %v655_v62, %v645_v25  ;;  %v10010_v43 = vld [vmem:[#allocation198_spill] sm:$0xff]  ;;  %v10013_v24 = vld [vmem:[#allocation199_spill] sm:$0xff]  ;;  %v10014_v53 = vld [vmem:[#allocation104_spill] sm:$0xff] }
 0x1bd   : > { %v6108_v36 = vadd.f32 %v844_v45, %v834_v8  ;;  %v1401_v33 = vadd.f32 %v10011_v3, %v10010_v43  ;;  %v1411_v55 = vmul.f32 %v9962_v23, %v495_v39  ;;  %v1590_v60 = vadd.f32 %v10014_v53, %v10013_v24  ;;  %v10016_v25 = vld [vmem:[#allocation200_spill] sm:$0xff]  ;;  %v10018_v45 = vld [vmem:[#allocation201_spill] sm:$0xff]  ;;  %v10019_v20 = vld [vmem:[#allocation110_spill] sm:$0xff] }
 0x1be   : > { %10003 = vst [vmem:[#allocation87_spill] sm:$0xff] %v6099_v12  ;;  %10008 = vst [vmem:[#allocation98_spill] sm:$0xff] %v6106_v21  ;;  %v6113_v34 = vadd.f32 %v1033_v4, %v1023_v54  ;;  %v1600_v12 = vmul.f32 %v9966_v37, %v495_v39  ;;  %v6119_v58 = vadd.f32 %v1222_v13, %v1212_v2  ;;  %v10017_v51 = vld [vmem:[#allocation108_spill] sm:$0xff]  ;;  %v10022_v3 = vld [vmem:[#allocation202_spill] sm:$0xff] }
 0x1bf   : > { %10009 = vst [vmem:[#allocation224_spill] sm:$0xff] %v6108_v36  ;;  %v1779_v62 = vadd.f32 %v10017_v51, %v10016_v25  ;;  %v1789_v8 = vmul.f32 %v9969_v31, %v495_v39  ;;  %v1968_v36 = vadd.f32 %v10019_v20, %v10018_v45  ;;  %v6126_v43 = vadd.f32 %v1411_v55, %v1401_v33  ;;  %v10023_v24 = vld [vmem:[#allocation111_spill] sm:$0xff]  ;;  %v10026_v25 = vld [vmem:[#allocation112_spill] sm:$0xff]  ;;  %v10029_v55 = vld [vmem:[#allocation114_spill] sm:$0xff] }
 0x1c0   : > { %10012 = vst [vmem:[#allocation91_spill] sm:$0xff] %v6113_v34  ;;  %10015 = vst [vmem:[#allocation101_spill] sm:$0xff] %v6119_v58  ;;  %v6128_v54 = vadd.f32 %v1600_v12, %v1590_v60  ;;  %v1978_v4 = vmul.f32 %v9971_v47, %v495_v39  ;;  %v2157_v53 = vadd.f32 %v10023_v24, %v10022_v3  ;;  %v10025_v13 = vld [vmem:[#allocation203_spill] sm:$0xff]  ;;  %v10028_v33 = vld [vmem:[#allocation204_spill] sm:$0xff]  ;;  %v486_v3 = vpop.permute.xlu1 %485 }
 0x1c1   : > { %10020 = vst [vmem:[#allocation225_spill] sm:$0xff] %v6126_v43  ;;  %v6133_v34 = vadd.f32 %v1789_v8, %v1779_v62  ;;  %v2167_v2 = vmul.f32 %v9974_v63, %v495_v39  ;;  %v2346_v51 = vadd.f32 %v10026_v25, %v10025_v13  ;;  %v2356_v58 = vmul.f32 %v9978_v27, %v495_v39  ;;  %v10030_v45 = vld [vmem:[#allocation205_spill] sm:$0xff]  ;;  %v10031_v20 = vld [vmem:[#allocation115_spill] sm:$0xff]  ;;  %v10034_v13 = vld [vmem:[#allocation206_spill] sm:$0xff] }
 0x1c2   : > { %10021 = vst [vmem:[#allocation92_spill] sm:$0xff] %v6128_v54  ;;  %v6139_v21 = vadd.f32 %v1978_v4, %v1968_v36  ;;  %v2535_v12 = vadd.f32 %v10029_v55, %v10028_v33  ;;  %v2545_v60 = vmul.f32 %v9981_v17, %v495_v39  ;;  %v2724_v54 = vadd.f32 %v10031_v20, %v10030_v45  ;;  %v10035_v25 = vld [vmem:[#allocation116_spill] sm:$0xff]  ;;  %v10037_v33 = vld [vmem:[#allocation207_spill] sm:$0xff]  ;;  %v10038_v55 = vld [vmem:[#allocation117_spill] sm:$0xff] }
 0x1c3   : > { %10024 = vst [vmem:[#allocation105_spill] sm:$0xff] %v6133_v34  ;;  %v6146_v62 = vadd.f32 %v2167_v2, %v2157_v53  ;;  %v6148_v8 = vadd.f32 %v2356_v58, %v2346_v51  ;;  %v2734_v24 = vmul.f32 %v9984_v38, %v495_v39  ;;  %v2913_v34 = vadd.f32 %v10035_v25, %v10034_v13  ;;  %v10040_v53 = vld [vmem:[#allocation208_spill] sm:$0xff]  ;;  %v10041_v2 = vld [vmem:[#allocation118_spill] sm:$0xff]  ;;  %v10045_v25 = vld [vmem:[#allocation119_spill] sm:$0xff] }
 0x1c4   : > { %10027 = vst [vmem:[#allocation226_spill] sm:$0xff] %v6139_v21  ;;  %v6153_v36 = vadd.f32 %v2545_v60, %v2535_v12  ;;  %v2923_v4 = vmul.f32 %v9988_v49, %v495_v39  ;;  %v3102_v21 = vadd.f32 %v10038_v55, %v10037_v33  ;;  %v3112_v43 = vmul.f32 %v9993_v7, %v495_v39  ;;  %v10044_v60 = vld [vmem:[#allocation209_spill] sm:$0xff] }
 0x1c5   : > { %10032 = vst [vmem:[#allocation96_spill] sm:$0xff] %v6146_v62  ;;  %10033 = vst [vmem:[#allocation106_spill] sm:$0xff] %v6148_v8  ;;  %v6159_v45 = vadd.f32 %v2734_v24, %v2724_v54  ;;  %v3291_v58 = vadd.f32 %v10041_v2, %v10040_v53  ;;  %v3301_v51 = vmul.f32 %v9997_v50, %v495_v39  ;;  %v498_v20 = vsel %vm446_vm1, %v486_v3, 0.0  ;;  %v10047_v54 = vld [vmem:[#allocation210_spill] sm:$0xff]  ;;  %v10048_v24 = vld [vmem:[#allocation120_spill] sm:$0xff] }
 0x1c6   : > { %10036 = vst [vmem:[#allocation227_spill] sm:$0xff] %v6153_v36  ;;  %v6166_v13 = vadd.f32 %v2923_v4, %v2913_v34  ;;  %v6168_v12 = vadd.f32 %v3112_v43, %v3102_v21  ;;  %v648_v36 = vadd.f32 %v10045_v25, %v10044_v60  ;;  %v658_v33 = vmul.f32 %v5121_v28, %v498_v20  ;;  %v10049_v39 = vld [vmem:[#allocation211_spill] sm:$0xff]  ;;  %v10050_v2 = vld [vmem:[#allocation121_spill] sm:$0xff]  ;;  %v10052_v21 = vld [vmem:[#allocation212_spill] sm:$0xff] }
 0x1c7   : > { %10039 = vst [vmem:[#allocation113_spill] sm:$0xff] %v6159_v45  ;;  %v6173_v55 = vadd.f32 %v3301_v51, %v3291_v58  ;;  %v837_v45 = vadd.f32 %v10048_v24, %v10047_v54  ;;  %v847_v53 = vmul.f32 %v5138_v32, %v498_v20  ;;  %v1026_v8 = vadd.f32 %v10050_v2, %v10049_v39  ;;  %v10053_v43 = vld [vmem:[#allocation122_spill] sm:$0xff]  ;;  %v10055_v58 = vld [vmem:[#allocation213_spill] sm:$0xff]  ;;  %v10056_v51 = vld [vmem:[#allocation123_spill] sm:$0xff] }
 0x1c8   : > { %10042 = vst [vmem:[#allocation109_spill] sm:$0xff] %v6166_v13  ;;  %10043 = vst [vmem:[#allocation194_spill] sm:$0xff] %v6168_v12  ;;  %v6180_v3 = vadd.f32 %v658_v33, %v648_v36  ;;  %v1036_v34 = vmul.f32 %v9956_v22, %v498_v20  ;;  %v1215_v4 = vadd.f32 %v10053_v43, %v10052_v21  ;;  %v10057_v24 = vld [vmem:[#allocation214_spill] sm:$0xff]  ;;  %v10058_v12 = vld [vmem:[#allocation124_spill] sm:$0xff] }
 0x1c9   : > { %10046 = vst [vmem:[#allocation88_spill] sm:$0xff] %v6173_v55  ;;  %v1225_v60 = vmul.f32 %v9958_v0, %v498_v20  ;;  %v6186_v25 = vadd.f32 %v847_v53, %v837_v45  ;;  %v1404_v55 = vadd.f32 %v10056_v51, %v10055_v58  ;;  %v1414_v54 = vmul.f32 %v9962_v23, %v498_v20  ;;  %v10061_v2 = vld [vmem:[#allocation215_spill] sm:$0xff]  ;;  %v10062_v21 = vld [vmem:[#allocation125_spill] sm:$0xff]  ;;  %v10064_v53 = vld [vmem:[#allocation216_spill] sm:$0xff] }
 0x1ca   : > { %10051 = vst [vmem:[#allocation195_spill] sm:$0xff] %v6180_v3  ;;  %v1593_v13 = vadd.f32 %v10058_v12, %v10057_v24  ;;  %v6193_v39 = vadd.f32 %v1036_v34, %v1026_v8  ;;  %v1603_v33 = vmul.f32 %v9966_v37, %v498_v20  ;;  %v1782_v43 = vadd.f32 %v10062_v21, %v10061_v2  ;;  %v10065_v58 = vld [vmem:[#allocation126_spill] sm:$0xff]  ;;  %v10067_v8 = vld [vmem:[#allocation217_spill] sm:$0xff]  ;;  %v10068_v12 = vld [vmem:[#allocation127_spill] sm:$0xff] }
 0x1cb   : > { %10054 = vst [vmem:[#allocation99_spill] sm:$0xff] %v6186_v25  ;;  %v6195_v36 = vadd.f32 %v1225_v60, %v1215_v4  ;;  %v6200_v3 = vadd.f32 %v1414_v54, %v1404_v55  ;;  %v1792_v45 = vmul.f32 %v9969_v31, %v498_v20  ;;  %v1971_v51 = vadd.f32 %v10065_v58, %v10064_v53  ;;  %v10069_v60 = vld [vmem:[#allocation218_spill] sm:$0xff]  ;;  %v10070_v24 = vld [vmem:[#allocation128_spill] sm:$0xff]  ;;  %v10073_v21 = vld [vmem:[#allocation219_spill] sm:$0xff] }
 0x1cc   : > { %10059 = vst [vmem:[#allocation196_spill] sm:$0xff] %v6193_v39  ;;  %v1981_v25 = vmul.f32 %v9971_v47, %v498_v20  ;;  %v6206_v62 = vadd.f32 %v1603_v33, %v1593_v13  ;;  %v2160_v34 = vadd.f32 %v10068_v12, %v10067_v8  ;;  %v2170_v4 = vmul.f32 %v9974_v63, %v498_v20  ;;  %v10074_v53 = vld [vmem:[#allocation129_spill] sm:$0xff]  ;;  %v10076_v33 = vld [vmem:[#allocation220_spill] sm:$0xff]  ;;  %v10077_v8 = vld [vmem:[#allocation130_spill] sm:$0xff]  ;;  %v484_v39 = vpop.permute.xlu0 %483 }
 0x1cd   : > { %10060 = vst [vmem:[#allocation100_spill] sm:$0xff] %v6195_v36  ;;  %10063 = vst [vmem:[#allocation197_spill] sm:$0xff] %v6200_v3  ;;  %v2349_v36 = vadd.f32 %v10070_v24, %v10069_v60  ;;  %v6213_v2 = vadd.f32 %v1792_v45, %v1782_v43  ;;  %v2359_v54 = vmul.f32 %v9978_v27, %v498_v20  ;;  %v10079_v43 = vld [vmem:[#allocation221_spill] sm:$0xff]  ;;  %v10081_v24 = vld [vmem:[#allocation222_spill] sm:$0xff] }
 0x1ce   : > { %10066 = vst [vmem:[#allocation102_spill] sm:$0xff] %v6206_v62  ;;  %v6215_v55 = vadd.f32 %v1981_v25, %v1971_v51  ;;  %v2538_v58 = vadd.f32 %v10074_v53, %v10073_v21  ;;  %v6220_v3 = vadd.f32 %v2170_v4, %v2160_v34  ;;  %v2548_v13 = vmul.f32 %v9981_v17, %v498_v20  ;;  %v10080_v25 = vld [vmem:[#allocation131_spill] sm:$0xff] }
 0x1cf   : > { %10071 = vst [vmem:[#allocation198_spill] sm:$0xff] %v6213_v2  ;;  %v2727_v12 = vadd.f32 %v10077_v8, %v10076_v33  ;;  %v2737_v62 = vmul.f32 %v9984_v38, %v498_v20  ;;  %v6226_v60 = vadd.f32 %v2359_v54, %v2349_v36  ;;  %v2916_v45 = vadd.f32 %v10080_v25, %v10079_v43  ;;  %v10085_v33 = vld [vmem:[#allocation223_spill] sm:$0xff]  ;;  %v10086_v8 = vld [vmem:[#allocation133_spill] sm:$0xff]  ;;  %v10089_v25 = vld [vmem:[#allocation134_spill] sm:$0xff] }
 0x1d0   : > { %10072 = vst [vmem:[#allocation103_spill] sm:$0xff] %v6215_v55  ;;  %10075 = vst [vmem:[#allocation199_spill] sm:$0xff] %v6220_v3  ;;  %v2926_v51 = vmul.f32 %v9988_v49, %v498_v20  ;;  %v10082_v55 = vld [vmem:[#allocation132_spill] sm:$0xff]  ;;  %v6233_v34 = vadd.f32 %v2548_v13, %v2538_v58  ;;  %v3115_v53 = vmul.f32 %v9993_v7, %v498_v20  ;;  %v497_v54 = vsel %vm446_vm1, %v484_v39, 0.0  ;;  %v10088_v43 = vld [vmem:[#allocation179_spill] sm:$0xff] }
 0x1d1   : > { %10078 = vst [vmem:[#allocation104_spill] sm:$0xff] %v6226_v60  ;;  %v3105_v21 = vadd.f32 %v10082_v55, %v10081_v24  ;;  %v6235_v4 = vadd.f32 %v2737_v62, %v2727_v12  ;;  %v3294_v3 = vadd.f32 %v10086_v8, %v10085_v33  ;;  %v3304_v36 = vmul.f32 %v9997_v50, %v498_v20  ;;  %v10091_v58 = vld [vmem:[#allocation180_spill] sm:$0xff]  ;;  %v10092_v13 = vld [vmem:[#allocation135_spill] sm:$0xff]  ;;  %v10096_v39 = vld [vmem:[#allocation182_spill] sm:$0xff] }
 0x1d2   : > { %10083 = vst [vmem:[#allocation200_spill] sm:$0xff] %v6233_v34  ;;  %v6240_v2 = vadd.f32 %v2926_v51, %v2916_v45  ;;  %v647_v60 = vadd.f32 %v10089_v25, %v10088_v43  ;;  %v657_v62 = vmul.f32 %v5121_v28, %v497_v54  ;;  %v836_v12 = vadd.f32 %v10092_v13, %v10091_v58  ;;  %v10094_v45 = vld [vmem:[#allocation181_spill] sm:$0xff]  ;;  %v10095_v51 = vld [vmem:[#allocation136_spill] sm:$0xff]  ;;  %v10100_v25 = vld [vmem:[#allocation183_spill] sm:$0xff] }
 0x1d3   : > { %10084 = vst [vmem:[#allocation108_spill] sm:$0xff] %v6235_v4  ;;  %v6247_v55 = vadd.f32 %v3115_v53, %v3105_v21  ;;  %v846_v24 = vmul.f32 %v5138_v32, %v497_v54  ;;  %v6253_v33 = vadd.f32 %v3304_v36, %v3294_v3  ;;  %v1025_v20 = vadd.f32 %v10095_v51, %v10094_v45  ;;  %v10101_v58 = vld [vmem:[#allocation138_spill] sm:$0xff]  ;;  %v10103_v36 = vld [vmem:[#allocation184_spill] sm:$0xff]  ;;  %v10104_v45 = vld [vmem:[#allocation139_spill] sm:$0xff] }
 0x1d4   : > { %10087 = vst [vmem:[#allocation201_spill] sm:$0xff] %v6240_v2  ;;  %v1035_v8 = vmul.f32 %v9956_v22, %v497_v54  ;;  %v10097_v2 = vld [vmem:[#allocation137_spill] sm:$0xff]  ;;  %v6260_v43 = vadd.f32 %v657_v62, %v647_v60  ;;  %v1224_v53 = vmul.f32 %v9958_v0, %v497_v54  ;;  %v1403_v13 = vadd.f32 %v10101_v58, %v10100_v25  ;;  %v10107_v60 = vld [vmem:[#allocation140_spill] sm:$0xff]  ;;  %v10112_v58 = vld [vmem:[#allocation187_spill] sm:$0xff] }
 0x1d5   : > { %10090 = vst [vmem:[#allocation110_spill] sm:$0xff] %v6247_v55  ;;  %10093 = vst [vmem:[#allocation202_spill] sm:$0xff] %v6253_v33  ;;  %v1214_v4 = vadd.f32 %v10097_v2, %v10096_v39  ;;  %v6262_v21 = vadd.f32 %v846_v24, %v836_v12  ;;  %v1413_v3 = vmul.f32 %v9962_v23, %v497_v54  ;;  %v10106_v2 = vld [vmem:[#allocation185_spill] sm:$0xff]  ;;  %v10108_v24 = vld [vmem:[#allocation186_spill] sm:$0xff] }
 0x1d6   : > { %10098 = vst [vmem:[#allocation111_spill] sm:$0xff] %v6260_v43  ;;  %v6267_v55 = vadd.f32 %v1035_v8, %v1025_v20  ;;  %v1592_v51 = vadd.f32 %v10104_v45, %v10103_v36  ;;  %v1602_v33 = vmul.f32 %v9966_v37, %v497_v54  ;;  %v1781_v62 = vadd.f32 %v10107_v60, %v10106_v2  ;;  %v10109_v39 = vld [vmem:[#allocation141_spill] sm:$0xff]  ;;  %v10113_v36 = vld [vmem:[#allocation142_spill] sm:$0xff]  ;;  %v10116_v2 = vld [vmem:[#allocation143_spill] sm:$0xff] }
 0x1d7   : > { %10099 = vst [vmem:[#allocation203_spill] sm:$0xff] %v6262_v21  ;;  %v6273_v34 = vadd.f32 %v1224_v53, %v1214_v4  ;;  %v1791_v12 = vmul.f32 %v9969_v31, %v497_v54  ;;  %v1970_v21 = vadd.f32 %v10109_v39, %v10108_v24  ;;  %v6280_v25 = vadd.f32 %v1413_v3, %v1403_v13  ;;  %v10115_v53 = vld [vmem:[#allocation188_spill] sm:$0xff]  ;;  %v10118_v13 = vld [vmem:[#allocation189_spill] sm:$0xff]  ;;  %v10120_v24 = vld [vmem:[#allocation190_spill] sm:$0xff] }
 0x1d8   : > { %10102 = vst [vmem:[#allocation112_spill] sm:$0xff] %v6267_v55  ;;  %v6282_v20 = vadd.f32 %v1602_v33, %v1592_v51  ;;  %v1980_v8 = vmul.f32 %v9971_v47, %v497_v54  ;;  %v2159_v45 = vadd.f32 %v10113_v36, %v10112_v58  ;;  %v2169_v4 = vmul.f32 %v9974_v63, %v497_v54  ;;  %v10119_v3 = vld [vmem:[#allocation144_spill] sm:$0xff]  ;;  %v10121_v39 = vld [vmem:[#allocation145_spill] sm:$0xff]  ;;  %v490_v58 = vpop.permute.xlu1 %489 }
 0x1d9   : > { %10105 = vst [vmem:[#allocation204_spill] sm:$0xff] %v6273_v34  ;;  %10110 = vst [vmem:[#allocation114_spill] sm:$0xff] %v6280_v25  ;;  %v6287_v55 = vadd.f32 %v1791_v12, %v1781_v62  ;;  %v2348_v60 = vadd.f32 %v10116_v2, %v10115_v53  ;;  %v2358_v34 = vmul.f32 %v9978_v27, %v497_v54  ;;  %v10124_v53 = vld [vmem:[#allocation191_spill] sm:$0xff]  ;;  %v10125_v2 = vld [vmem:[#allocation146_spill] sm:$0xff] }
 0x1da   : > { %10111 = vst [vmem:[#allocation205_spill] sm:$0xff] %v6282_v20  ;;  %v6293_v43 = vadd.f32 %v1980_v8, %v1970_v21  ;;  %v2537_v33 = vadd.f32 %v10119_v3, %v10118_v13  ;;  %v2547_v51 = vmul.f32 %v9981_v17, %v497_v54  ;;  %v2726_v20 = vadd.f32 %v10121_v39, %v10120_v24  ;;  %v10127_v13 = vld [vmem:[#allocation192_spill] sm:$0xff]  ;;  %v10128_v3 = vld [vmem:[#allocation147_spill] sm:$0xff] }
 0x1db   : > { %10114 = vst [vmem:[#allocation115_spill] sm:$0xff] %v6287_v55  ;;  %v6300_v62 = vadd.f32 %v2169_v4, %v2159_v45  ;;  %v6302_v12 = vadd.f32 %v2358_v34, %v2348_v60  ;;  %v2736_v36 = vmul.f32 %v9984_v38, %v497_v54  ;;  %v2915_v55 = vadd.f32 %v10125_v2, %v10124_v53  ;;  %v10130_v45 = vld [vmem:[#allocation193_spill] sm:$0xff]  ;;  %v10131_v4 = vld [vmem:[#allocation148_spill] sm:$0xff] }
 0x1dc   : > { %10117 = vst [vmem:[#allocation206_spill] sm:$0xff] %v6293_v43  ;;  %v6307_v21 = vadd.f32 %v2547_v51, %v2537_v33  ;;  %v2925_v8 = vmul.f32 %v9988_v49, %v497_v54  ;;  %v3104_v43 = vadd.f32 %v10128_v3, %v10127_v13  ;;  %v3114_v25 = vmul.f32 %v9993_v7, %v497_v54  ;;  %v10134_v51 = vld [vmem:[#allocation228_spill] sm:$0xff]  ;;  %v10135_v2 = vld [vmem:[#allocation149_spill] sm:$0xff] }
 0x1dd   : > { %10122 = vst [vmem:[#allocation116_spill] sm:$0xff] %v6300_v62  ;;  %10123 = vst [vmem:[#allocation207_spill] sm:$0xff] %v6302_v12  ;;  %v6313_v24 = vadd.f32 %v2736_v36, %v2726_v20  ;;  %v3293_v34 = vadd.f32 %v10131_v4, %v10130_v45  ;;  %v3303_v60 = vmul.f32 %v9997_v50, %v497_v54  ;;  %v500_v39 = vsel %vm446_vm1, %v490_v58, 0.0  ;;  %v10137_v20 = vld [vmem:[#allocation229_spill] sm:$0xff]  ;;  %v10138_v36 = vld [vmem:[#allocation150_spill] sm:$0xff] }
 0x1de   : > { %10126 = vst [vmem:[#allocation117_spill] sm:$0xff] %v6307_v21  ;;  %v6320_v53 = vadd.f32 %v2925_v8, %v2915_v55  ;;  %v6322_v33 = vadd.f32 %v3114_v25, %v3104_v43  ;;  %v650_v21 = vadd.f32 %v10135_v2, %v10134_v51  ;;  %v660_v13 = vmul.f32 %v5121_v28, %v500_v39  ;;  %v10139_v54 = vld [vmem:[#allocation230_spill] sm:$0xff]  ;;  %v10140_v4 = vld [vmem:[#allocation151_spill] sm:$0xff]  ;;  %v10143_v25 = vld [vmem:[#allocation152_spill] sm:$0xff] }
 0x1df   : > { %10129 = vst [vmem:[#allocation208_spill] sm:$0xff] %v6313_v24  ;;  %v6327_v3 = vadd.f32 %v3303_v60, %v3293_v34  ;;  %v839_v24 = vadd.f32 %v10138_v36, %v10137_v20  ;;  %v849_v45 = vmul.f32 %v5138_v32, %v500_v39  ;;  %v1028_v12 = vadd.f32 %v10140_v4, %v10139_v54  ;;  %v10142_v43 = vld [vmem:[#allocation231_spill] sm:$0xff]  ;;  %v10145_v34 = vld [vmem:[#allocation232_spill] sm:$0xff]  ;;  %v10146_v60 = vld [vmem:[#allocation153_spill] sm:$0xff] }
 0x1e0   : > { %10132 = vst [vmem:[#allocation118_spill] sm:$0xff] %v6320_v53  ;;  %10133 = vst [vmem:[#allocation209_spill] sm:$0xff] %v6322_v33  ;;  %v6334_v58 = vadd.f32 %v660_v13, %v650_v21  ;;  %v1038_v55 = vmul.f32 %v9956_v22, %v500_v39  ;;  %v1217_v8 = vadd.f32 %v10143_v25, %v10142_v43  ;;  %v10147_v36 = vld [vmem:[#allocation233_spill] sm:$0xff]  ;;  %v10148_v33 = vld [vmem:[#allocation154_spill] sm:$0xff] }
 0x1e1   : > { %10136 = vst [vmem:[#allocation119_spill] sm:$0xff] %v6327_v3  ;;  %v1227_v51 = vmul.f32 %v9958_v0, %v500_v39  ;;  %v6340_v2 = vadd.f32 %v849_v45, %v839_v24  ;;  %v1406_v3 = vadd.f32 %v10146_v60, %v10145_v34  ;;  %v1416_v20 = vmul.f32 %v9962_v23, %v500_v39  ;;  %v10151_v4 = vld [vmem:[#allocation234_spill] sm:$0xff]  ;;  %v10152_v43 = vld [vmem:[#allocation155_spill] sm:$0xff]  ;;  %v10155_v34 = vld [vmem:[#allocation156_spill] sm:$0xff] }
 0x1e2   : > { %10141 = vst [vmem:[#allocation210_spill] sm:$0xff] %v6334_v58  ;;  %v1595_v53 = vadd.f32 %v10148_v33, %v10147_v36  ;;  %v6347_v54 = vadd.f32 %v1038_v55, %v1028_v12  ;;  %v1605_v13 = vmul.f32 %v9966_v37, %v500_v39  ;;  %v1784_v25 = vadd.f32 %v10152_v43, %v10151_v4  ;;  %v10154_v45 = vld [vmem:[#allocation235_spill] sm:$0xff]  ;;  %v10157_v12 = vld [vmem:[#allocation236_spill] sm:$0xff]  ;;  %v10158_v33 = vld [vmem:[#allocation157_spill] sm:$0xff] }
 0x1e3   : > { %10144 = vst [vmem:[#allocation120_spill] sm:$0xff] %v6340_v2  ;;  %v6349_v21 = vadd.f32 %v1227_v51, %v1217_v8  ;;  %v6354_v58 = vadd.f32 %v1416_v20, %v1406_v3  ;;  %v1794_v24 = vmul.f32 %v9969_v31, %v500_v39  ;;  %v1973_v60 = vadd.f32 %v10155_v34, %v10154_v45  ;;  %v10159_v51 = vld [vmem:[#allocation237_spill] sm:$0xff]  ;;  %v10160_v36 = vld [vmem:[#allocation158_spill] sm:$0xff]  ;;  %v10164_v45 = vld [vmem:[#allocation159_spill] sm:$0xff] }
 0x1e4   : > { %10149 = vst [vmem:[#allocation211_spill] sm:$0xff] %v6347_v54  ;;  %v1983_v2 = vmul.f32 %v9971_v47, %v500_v39  ;;  %v6360_v62 = vadd.f32 %v1605_v13, %v1595_v53  ;;  %v2162_v55 = vadd.f32 %v10158_v33, %v10157_v12  ;;  %v2172_v8 = vmul.f32 %v9974_v63, %v500_v39  ;;  %v10163_v43 = vld [vmem:[#allocation238_spill] sm:$0xff]  ;;  %v10166_v13 = vld [vmem:[#allocation239_spill] sm:$0xff]  ;;  %v10167_v12 = vld [vmem:[#allocation160_spill] sm:$0xff]  ;;  %v488_v54 = vpop.permute.xlu0 %487 }
 0x1e5   : > { %10150 = vst [vmem:[#allocation121_spill] sm:$0xff] %v6349_v21  ;;  %10153 = vst [vmem:[#allocation212_spill] sm:$0xff] %v6354_v58  ;;  %v2351_v21 = vadd.f32 %v10160_v36, %v10159_v51  ;;  %v6367_v4 = vadd.f32 %v1794_v24, %v1784_v25  ;;  %v2361_v20 = vmul.f32 %v9978_v27, %v500_v39  ;;  %v10169_v25 = vld [vmem:[#allocation240_spill] sm:$0xff]  ;;  %v10171_v36 = vld [vmem:[#allocation241_spill] sm:$0xff] }
 0x1e6   : > { %10156 = vst [vmem:[#allocation122_spill] sm:$0xff] %v6360_v62  ;;  %v6369_v3 = vadd.f32 %v1983_v2, %v1973_v60  ;;  %v2540_v34 = vadd.f32 %v10164_v45, %v10163_v43  ;;  %v6374_v58 = vadd.f32 %v2172_v8, %v2162_v55  ;;  %v2550_v53 = vmul.f32 %v9981_v17, %v500_v39  ;;  %v10170_v2 = vld [vmem:[#allocation161_spill] sm:$0xff] }
 0x1e7   : > { %10161 = vst [vmem:[#allocation213_spill] sm:$0xff] %v6367_v4  ;;  %v2729_v33 = vadd.f32 %v10167_v12, %v10166_v13  ;;  %v2739_v62 = vmul.f32 %v9984_v38, %v500_v39  ;;  %v6380_v51 = vadd.f32 %v2361_v20, %v2351_v21  ;;  %v2918_v24 = vadd.f32 %v10170_v2, %v10169_v25  ;;  %v10175_v13 = vld [vmem:[#allocation242_spill] sm:$0xff]  ;;  %v10176_v12 = vld [vmem:[#allocation163_spill] sm:$0xff]  ;;  %v10179_v2 = vld [vmem:[#allocation164_spill] sm:$0xff] }
 0x1e8   : > { %10162 = vst [vmem:[#allocation123_spill] sm:$0xff] %v6369_v3  ;;  %10165 = vst [vmem:[#allocation214_spill] sm:$0xff] %v6374_v58  ;;  %v2928_v60 = vmul.f32 %v9988_v49, %v500_v39  ;;  %v10172_v3 = vld [vmem:[#allocation162_spill] sm:$0xff]  ;;  %v6387_v55 = vadd.f32 %v2550_v53, %v2540_v34  ;;  %v3117_v45 = vmul.f32 %v9993_v7, %v500_v39  ;;  %v499_v20 = vsel %vm446_vm1, %v488_v54, 0.0  ;;  %v10178_v25 = vld [vmem:[#allocation243_spill] sm:$0xff] }
 0x1e9   : > { %10168 = vst [vmem:[#allocation124_spill] sm:$0xff] %v6380_v51  ;;  %v3107_v43 = vadd.f32 %v10172_v3, %v10171_v36  ;;  %v6389_v8 = vadd.f32 %v2739_v62, %v2729_v33  ;;  %v3296_v58 = vadd.f32 %v10176_v12, %v10175_v13  ;;  %v3306_v21 = vmul.f32 %v9997_v50, %v500_v39  ;;  %v10181_v34 = vld [vmem:[#allocation165_spill] sm:$0xff]  ;;  %v10186_v12 = vld [vmem:[#allocation167_spill] sm:$0xff] }
 0x1ea   : > { %10173 = vst [vmem:[#allocation215_spill] sm:$0xff] %v6387_v55  ;;  %v6394_v4 = vadd.f32 %v2928_v60, %v2918_v24  ;;  %v649_v51 = vadd.f32 %v10179_v2, %v10178_v25  ;;  %v659_v62 = vmul.f32 %v5121_v28, %v499_v20  ;;  %v838_v53 = vadd.f32 %v10181_v34, %v5844_v30  ;;  %v10183_v24 = vld [vmem:[#allocation244_spill] sm:$0xff]  ;;  %v10184_v60 = vld [vmem:[#allocation166_spill] sm:$0xff]  ;;  %v10185_v54 = vld [vmem:[#allocation245_spill] sm:$0xff] }
 0x1eb   : > { %10174 = vst [vmem:[#allocation125_spill] sm:$0xff] %v6389_v8  ;;  %v6401_v3 = vadd.f32 %v3117_v45, %v3107_v43  ;;  %v848_v33 = vmul.f32 %v5138_v32, %v499_v20  ;;  %v6407_v36 = vadd.f32 %v3306_v21, %v3296_v58  ;;  %v1027_v39 = vadd.f32 %v10184_v60, %v10183_v24  ;;  %v10189_v2 = vld [vmem:[#allocation246_spill] sm:$0xff]  ;;  %v10190_v30 = vld [vmem:[#allocation168_spill] sm:$0xff]  ;;  %v10192_v21 = vld [vmem:[#allocation247_spill] sm:$0xff] }
 0x1ec   : > { %10177 = vst [vmem:[#allocation216_spill] sm:$0xff] %v6394_v4  ;;  %v1037_v13 = vmul.f32 %v9956_v22, %v499_v20  ;;  %v1216_v4 = vadd.f32 %v10186_v12, %v10185_v54  ;;  %v6414_v25 = vadd.f32 %v659_v62, %v649_v51  ;;  %v1226_v45 = vmul.f32 %v9958_v0, %v499_v20  ;;  %v10193_v24 = vld [vmem:[#allocation169_spill] sm:$0xff]  ;;  %v10195_v51 = vld [vmem:[#allocation248_spill] sm:$0xff]  ;;  %v10196_v62 = vld [vmem:[#allocation170_spill] sm:$0xff] }
 0x1ed   : > { %10180 = vst [vmem:[#allocation126_spill] sm:$0xff] %v6401_v3  ;;  %10182 = vst [vmem:[#allocation217_spill] sm:$0xff] %v6407_v36  ;;  %v6416_v43 = vadd.f32 %v848_v33, %v838_v53  ;;  %v1405_v34 = vadd.f32 %v10190_v30, %v10189_v2  ;;  %v1415_v58 = vmul.f32 %v9962_v23, %v499_v20  ;;  %v10197_v54 = vld [vmem:[#allocation249_spill] sm:$0xff]  ;;  %v10198_v12 = vld [vmem:[#allocation171_spill] sm:$0xff] }
 0x1ee   : > { %10187 = vst [vmem:[#allocation127_spill] sm:$0xff] %v6414_v25  ;;  %v6421_v3 = vadd.f32 %v1037_v13, %v1027_v39  ;;  %v1594_v60 = vadd.f32 %v10193_v24, %v10192_v21  ;;  %v1604_v36 = vmul.f32 %v9966_v37, %v499_v20  ;;  %v6427_v8 = vadd.f32 %v1226_v45, %v1216_v4  ;;  %v10201_v30 = vld [vmem:[#allocation250_spill] sm:$0xff]  ;;  %v10202_v21 = vld [vmem:[#allocation172_spill] sm:$0xff]  ;;  %v10204_v45 = vld [vmem:[#allocation251_spill] sm:$0xff] }
 0x1ef   : > { %10188 = vst [vmem:[#allocation218_spill] sm:$0xff] %v6416_v43  ;;  %v1783_v53 = vadd.f32 %v10196_v62, %v10195_v51  ;;  %v1793_v33 = vmul.f32 %v9969_v31, %v499_v20  ;;  %v1972_v43 = vadd.f32 %v10198_v12, %v10197_v54  ;;  %v6434_v2 = vadd.f32 %v1415_v58, %v1405_v34  ;;  %v10205_v51 = vld [vmem:[#allocation173_spill] sm:$0xff]  ;;  %v10207_v34 = vld [vmem:[#allocation252_spill] sm:$0xff]  ;;  %v10208_v58 = vld [vmem:[#allocation174_spill] sm:$0xff] }
 0x1f0   : > { %10191 = vst [vmem:[#allocation128_spill] sm:$0xff] %v6421_v3  ;;  %10194 = vst [vmem:[#allocation219_spill] sm:$0xff] %v6427_v8  ;;  %v6436_v39 = vadd.f32 %v1604_v36, %v1594_v60  ;;  %v1982_v13 = vmul.f32 %v9971_v47, %v499_v20  ;;  %v2161_v24 = vadd.f32 %v10202_v21, %v10201_v30  ;;  %v10209_v54 = vld [vmem:[#allocation253_spill] sm:$0xff]  ;;  %v10210_v12 = vld [vmem:[#allocation175_spill] sm:$0xff] }
 0x1f1   : > { %10199 = vst [vmem:[#allocation129_spill] sm:$0xff] %v6434_v2  ;;  %v6441_v3 = vadd.f32 %v1793_v33, %v1783_v53  ;;  %v2171_v4 = vmul.f32 %v9974_v63, %v499_v20  ;;  %v2350_v62 = vadd.f32 %v10205_v51, %v10204_v45  ;;  %v2360_v8 = vmul.f32 %v9978_v27, %v499_v20  ;;  %v10213_v21 = vld [vmem:[#allocation254_spill] sm:$0xff]  ;;  %v10214_v45 = vld [vmem:[#allocation176_spill] sm:$0xff]  ;;  %v10230_v55 = vld [vmem:[#allocation69_spill] sm:$0xff] }
 0x1f2   : > { %10200 = vst [vmem:[#allocation220_spill] sm:$0xff] %v6436_v39  ;;  %v6447_v25 = vadd.f32 %v1982_v13, %v1972_v43  ;;  %v2539_v36 = vadd.f32 %v10208_v58, %v10207_v34  ;;  %v2549_v60 = vmul.f32 %v9981_v17, %v499_v20  ;;  %v2728_v39 = vadd.f32 %v10210_v12, %v10209_v54  ;;  %v10216_v13 = vld [vmem:[#allocation255_spill] sm:$0xff]  ;;  %v10217_v34 = vld [vmem:[#allocation177_spill] sm:$0xff] }
 0x1f3   : > { %10203 = vst [vmem:[#allocation130_spill] sm:$0xff] %v6441_v3  ;;  %v6454_v30 = vadd.f32 %v2171_v4, %v2161_v24  ;;  %v6456_v53 = vadd.f32 %v2360_v8, %v2350_v62  ;;  %v2738_v33 = vmul.f32 %v9984_v38, %v499_v20  ;;  %v2917_v51 = vadd.f32 %v10214_v45, %v10213_v21  ;;  %v10219_v24 = vld [vmem:[#allocation256_spill] sm:$0xff]  ;;  %v10220_v4 = vld [vmem:[#allocation178_spill] sm:$0xff]  ;;  %v10221_v12 = vld [vmem:[#allocation63_spill] sm:$0xff] }
 0x1f4   : > { %10206 = vst [vmem:[#allocation221_spill] sm:$0xff] %v6447_v25  ;;  %v6461_v3 = vadd.f32 %v2549_v60, %v2539_v36  ;;  %v2927_v43 = vmul.f32 %v9988_v49, %v499_v20  ;;  %v3106_v58 = vadd.f32 %v10217_v34, %v10216_v13  ;;  %v3116_v25 = vmul.f32 %v9993_v7, %v499_v20  ;;  %v4139_v54 = vld [vmem:[#allocation2 + $0x3f] sm:$0xff] }
 0x1f5   : > { %10211 = vst [vmem:[#allocation131_spill] sm:$0xff] %v6454_v30  ;;  %10212 = vst [vmem:[#allocation222_spill] sm:$0xff] %v6456_v53  ;;  %v6467_v2 = vadd.f32 %v2738_v33, %v2728_v39  ;;  %v3295_v8 = vadd.f32 %v10220_v4, %v10219_v24  ;;  %v3305_v62 = vmul.f32 %v9997_v50, %v499_v20  ;;  %v10224_v60 = vld [vmem:[#allocation64_spill] sm:$0xff]  ;;  %v10227_v39 = vld [vmem:[#allocation66_spill] sm:$0xff]  ;;  %v494_v20 = vpop.permute.xlu1 %493 }
 0x1f6   : > { %10215 = vst [vmem:[#allocation132_spill] sm:$0xff] %v6461_v3  ;;  %v644_v53 = vmul.f32 %v4139_v54, %v10221_v12  ;;  %v6473_v21 = vadd.f32 %v2927_v43, %v2917_v51  ;;  %v6475_v36 = vadd.f32 %v3116_v25, %v3106_v58  ;;  %v833_v45 = vmul.f32 %v4139_v54, %v10224_v60  ;;  %v10225_v3 = vld [vmem:[#allocation65_spill] sm:$0xff]  ;;  %v10229_v24 = vld [vmem:[#allocation68_spill] sm:$0xff]  ;;  %v10232_v43 = vld [vmem:[#allocation71_spill] sm:$0xff] }
 0x1f7   : > { %10218 = vst [vmem:[#allocation223_spill] sm:$0xff] %v6467_v2  ;;  %v1022_v13 = vmul.f32 %v4139_v54, %v10225_v3  ;;  %v6479_v34 = vadd.f32 %v3305_v62, %v3295_v8  ;;  %v1211_v33 = vmul.f32 %v4139_v54, %v10227_v39  ;;  %v10228_v2 = vld [vmem:[#allocation67_spill] sm:$0xff]  ;;  %v1589_v4 = vmul.f32 %v4139_v54, %v10229_v24  ;;  %v10233_v58 = vld [vmem:[#allocation72_spill] sm:$0xff] }
 0x1f8   : > { %10222 = vst [vmem:[#allocation133_spill] sm:$0xff] %v6473_v21  ;;  %10223 = vst [vmem:[#allocation179_spill] sm:$0xff] %v6475_v36  ;;  %v1400_v30 = vmul.f32 %v4139_v54, %v10228_v2  ;;  %v1778_v26 = vmul.f32 %v4139_v54, %v10230_v55  ;;  %v1967_v51 = vmul.f32 %v4139_v54, %v10231_v18  ;;  %v10234_v21 = vld [vmem:[#allocation73_spill] sm:$0xff]  ;;  %v10236_v62 = vld [vmem:[#allocation75_spill] sm:$0xff]  ;;  %v502_v6 = vsel %vm446_vm1, %v494_v20, 0.0 }
 0x1f9   : > { %10226 = vst [vmem:[#allocation134_spill] sm:$0xff] %v6479_v34  ;;  %v2156_v25 = vmul.f32 %v4139_v54, %v10232_v43  ;;  %v2345_v36 = vmul.f32 %v4139_v54, %v10233_v58  ;;  %v2534_v16 = vmul.f32 %v4139_v54, %v10234_v21  ;;  %v2723_v8 = vmul.f32 %v4139_v54, %v10235_v56 }
 0x1fa   : > { %v2912_v34 = vmul.f32 %v4139_v54, %v10236_v62  ;;  %v3101_v59 = vmul.f32 %v4139_v54, %v10237_v61  ;;  %v3290_v52 = vmul.f32 %v4139_v54, %v10238_v57  ;;  %v652_v41 = vadd.f32 %v644_v53, %v10239_v48  ;;  %v10242_v62 = vld [vmem:[#allocation260_spill] sm:$0xff]  ;;  %v10243_v54 = vld [vmem:[#allocation261_spill] sm:$0xff]  ;;  %v10244_v53 = vld [vmem:[#allocation262_spill] sm:$0xff] }
 0x1fb   : > { %v841_v44 = vadd.f32 %v833_v45, %v10240_v46  ;;  %v662_v42 = vmul.f32 %v5121_v28, %v502_v6  ;;  %v851_v40 = vmul.f32 %v5138_v32, %v502_v6  ;;  %v1030_v14 = vadd.f32 %v1022_v13, %v10241_v9 }
 0x1fc   : > { %v1040_v29 = vmul.f32 %v9956_v22, %v502_v6  ;;  %v1219_v56 = vadd.f32 %v1211_v33, %v10242_v62  ;;  %v1229_v61 = vmul.f32 %v9958_v0, %v502_v6  ;;  %v1408_v57 = vadd.f32 %v1400_v30, %v10243_v54  ;;  %v10245_v33 = vld [vmem:[#allocation263_spill] sm:$0xff]  ;;  %v10246_v54 = vld [vmem:[#allocation264_spill] sm:$0xff] }
 0x1fd   : > { %v1418_v20 = vmul.f32 %v9962_v23, %v502_v6  ;;  %v6505_v1 = vadd.f32 %v662_v42, %v652_v41  ;;  %v6507_v48 = vadd.f32 %v851_v40, %v841_v44  ;;  %v1597_v45 = vadd.f32 %v1589_v4, %v10244_v53 }
 0x1fe   : > { %v6509_v46 = vadd.f32 %v1040_v29, %v1030_v14  ;;  %v6512_v32 = vadd.f32 %v1229_v61, %v1219_v56  ;;  %v1607_v13 = vmul.f32 %v9966_v37, %v502_v6  ;;  %v1786_v62 = vadd.f32 %v1778_v26, %v10245_v33 }
 0x1ff   : > { %v6514_v9 = vadd.f32 %v1418_v20, %v1408_v57  ;;  %v1796_v30 = vmul.f32 %v9969_v31, %v502_v6  ;;  %v1975_v23 = vadd.f32 %v1967_v51, %v10246_v54  ;;  %v1985_v42 = vmul.f32 %v9971_v47, %v502_v6 }
 0x200   : > { %v2164_v40 = vadd.f32 %v2156_v25, %v5935_v11  ;;  %v6522_v29 = vadd.f32 %v1607_v13, %v1597_v45  ;;  %v2174_v14 = vmul.f32 %v9974_v63, %v502_v6  ;;  %v2353_v44 = vadd.f32 %v2345_v36, %v5938_v15  ;;  %v10247_v36 = vld [vmem:[#allocation265_spill] sm:$0xff]  ;;  %v4140_v13 = vld [vmem:[#allocation2 + $0x37] sm:$0xff] }
 0x201   : > { %v2363_v41 = vmul.f32 %v9978_v27, %v502_v6  ;;  %v6527_v57 = vadd.f32 %v1796_v30, %v1786_v62  ;;  %v6529_v61 = vadd.f32 %v1985_v42, %v1975_v23  ;;  %v2542_v56 = vadd.f32 %v2534_v16, %v5943_v5 }
 0x202   : > { %v2552_v26 = vmul.f32 %v9981_v17, %v502_v6  ;;  %v6533_v4 = vadd.f32 %v2174_v14, %v2164_v40  ;;  %v2731_v11 = vadd.f32 %v2723_v8, %v5946_v35  ;;  %v2741_v25 = vmul.f32 %v9984_v38, %v502_v6 }
 0x203   : > { %v6535_v51 = vadd.f32 %v2363_v41, %v2353_v44  ;;  %v2920_v20 = vadd.f32 %v2912_v34, %v10247_v36  ;;  %v2930_v23 = vmul.f32 %v9988_v49, %v502_v6  ;;  %v3109_v5 = vadd.f32 %v3101_v59, %v5952_v19  ;;  %v10250_v44 = vld [vmem:[#allocation76_spill] sm:$0xff]  ;;  %v10251_v41 = vld [vmem:[#allocation107_spill] sm:$0xff] }
 0x204   : > { %v6541_v15 = vadd.f32 %v2552_v26, %v2542_v56  ;;  %v6548_v16 = vadd.f32 %v2741_v25, %v2731_v11  ;;  %v3119_v53 = vmul.f32 %v9993_v7, %v502_v6  ;;  %v3298_v35 = vadd.f32 %v3290_v52, %v5955_v10  ;;  %v492_v52 = vpop.permute.xlu0 %491  ;;  %v10255_v25 = vld [vmem:[#allocation81_spill] sm:$0xff] }
 0x205   : > { %v3308_v8 = vmul.f32 %v9997_v50, %v502_v6  ;;  %v6555_v45 = vadd.f32 %v2930_v23, %v2920_v20  ;;  %v643_v34 = vmul.f32 %v4140_v13, %v10221_v12  ;;  %v832_v33 = vmul.f32 %v4140_v13, %v10224_v60  ;;  %v10256_v20 = vld [vmem:[#allocation268_spill] sm:$0xff] }
 0x206   : > { %v1021_v19 = vmul.f32 %v4140_v13, %v10225_v3  ;;  %v6562_v59 = vadd.f32 %v3119_v53, %v3109_v5  ;;  %v1210_v10 = vmul.f32 %v4140_v13, %v10227_v39  ;;  %v1399_v6 = vmul.f32 %v4140_v13, %v10228_v2  ;;  %v10248_v39 = vld [vmem:[#allocation74_spill] sm:$0xff]  ;;  %v10249_v2 = vld [vmem:[#allocation75_spill] sm:$0xff]  ;;  %v10257_v53 = vld [vmem:[#allocation269_spill] sm:$0xff] }
 0x207   : > { %v6564_v62 = vadd.f32 %v3308_v8, %v3298_v35  ;;  %v1588_v30 = vmul.f32 %v4140_v13, %v10229_v24  ;;  %v1777_v12 = vmul.f32 %v4140_v13, %v10230_v55  ;;  %v1966_v60 = vmul.f32 %v4140_v13, %v10231_v18 }
 0x208   : > { %v2155_v3 = vmul.f32 %v4140_v13, %v10232_v43  ;;  %v2344_v54 = vmul.f32 %v4140_v13, %v10233_v58  ;;  %v2533_v42 = vmul.f32 %v4140_v13, %v10234_v21  ;;  %v2722_v40 = vmul.f32 %v4140_v13, %v10248_v39  ;;  %v10253_v43 = vld [vmem:[#allocation266_spill] sm:$0xff]  ;;  %v10254_v21 = vld [vmem:[#allocation267_spill] sm:$0xff] }
 0x209   : > { %v2911_v14 = vmul.f32 %v4140_v13, %v10249_v2  ;;  %v3100_v24 = vmul.f32 %v4140_v13, %v10250_v44  ;;  %v3289_v55 = vmul.f32 %v4140_v13, %v10251_v41  ;;  %v501_v18 = vsel %vm446_vm1, %v492_v52, 0.0  ;;  %v10258_v13 = vld [vmem:[#allocation270_spill] sm:$0xff]  ;;  %v10260_v2 = vld [vmem:[#allocation271_spill] sm:$0xff] }
 0x20a   : > { %v651_v26 = vadd.f32 %v643_v34, %v10253_v43  ;;  %v661_v58 = vmul.f32 %v5121_v28, %v501_v18  ;;  %v840_v11 = vadd.f32 %v832_v33, %v10254_v21  ;;  %v850_v36 = vmul.f32 %v10255_v25, %v501_v18  ;;  %v10259_v33 = vld [vmem:[#allocation89_spill] sm:$0xff] }
 0x20b   : > { %v1029_v23 = vadd.f32 %v1021_v19, %v10256_v20  ;;  %v1039_v5 = vmul.f32 %v9956_v22, %v501_v18  ;;  %v1218_v35 = vadd.f32 %v1210_v10, %v10257_v53  ;;  %v1228_v8 = vmul.f32 %v9958_v0, %v501_v18  ;;  %v10261_v10 = vld [vmem:[#allocation272_spill] sm:$0xff] }
 0x20c   : > { %v1407_v34 = vadd.f32 %v1399_v6, %v10258_v13  ;;  %v6601_v52 = vadd.f32 %v661_v58, %v651_v26  ;;  %v6603_v28 = vadd.f32 %v850_v36, %v840_v11  ;;  %v1417_v39 = vmul.f32 %v10259_v33, %v501_v18  ;;  %v10262_v26 = vld [vmem:[#allocation273_spill] sm:$0xff]  ;;  %v10263_v11 = vld [vmem:[#allocation274_spill] sm:$0xff]  ;;  %v10264_v36 = vld [vmem:[#allocation275_spill] sm:$0xff] }
 0x20d   : > { %v1596_v19 = vadd.f32 %v1588_v30, %v10260_v2  ;;  %v6609_v44 = vadd.f32 %v1039_v5, %v1029_v23  ;;  %v6611_v22 = vadd.f32 %v1228_v8, %v1218_v35  ;;  %v1606_v0 = vmul.f32 %v9966_v37, %v501_v18  ;;  %v10269_v13 = vld [vmem:[#allocation279_spill] sm:$0xff] }
 0x20e   : > { %v1785_v6 = vadd.f32 %v1777_v12, %v10261_v10  ;;  %v6617_v41 = vadd.f32 %v1417_v39, %v1407_v34  ;;  %v1795_v43 = vmul.f32 %v9969_v31, %v501_v18  ;;  %v1974_v58 = vadd.f32 %v1966_v60, %v10262_v26  ;;  %v10265_v60 = vld [vmem:[#allocation276_spill] sm:$0xff]  ;;  %v514_v10 = vpop.permute.xlu1 %513 }
 0x20f   : > { %v1984_v30 = vmul.f32 %v9971_v47, %v501_v18  ;;  %v6624_v21 = vadd.f32 %v1606_v0, %v1596_v19  ;;  %v2163_v25 = vadd.f32 %v2155_v3, %v10263_v11  ;;  %v2173_v37 = vmul.f32 %v9974_v63, %v501_v18  ;;  %v10266_v3 = vld [vmem:[#allocation277_spill] sm:$0xff] }
 0x210   : > { %v2352_v12 = vadd.f32 %v2344_v54, %v10264_v36  ;;  %v6631_v20 = vadd.f32 %v1795_v43, %v1785_v6  ;;  %v2362_v31 = vmul.f32 %v9978_v27, %v501_v18  ;;  %v2541_v47 = vadd.f32 %v2533_v42, %v10265_v60  ;;  %v10268_v27 = vld [vmem:[#allocation278_spill] sm:$0xff] }
 0x211   : > { %v6633_v23 = vadd.f32 %v1984_v30, %v1974_v58  ;;  %v6639_v5 = vadd.f32 %v2173_v37, %v2163_v25  ;;  %v2551_v63 = vmul.f32 %v9981_v17, %v501_v18  ;;  %v2730_v54 = vadd.f32 %v2722_v40, %v10266_v3 }
 0x212   : > { %v2740_v53 = vmul.f32 %v9984_v38, %v501_v18  ;;  %v6644_v35 = vadd.f32 %v2362_v31, %v2352_v12  ;;  %v2919_v8 = vadd.f32 %v2911_v14, %v10268_v27  ;;  %v2929_v42 = vmul.f32 %v9988_v49, %v501_v18  ;;  %v10272_v38 = vld [vmem:[#allocation280_spill] sm:$0xff] }
 0x213   : > { %v3108_v34 = vadd.f32 %v3100_v24, %v10269_v13  ;;  %v6649_v33 = vadd.f32 %v2551_v63, %v2541_v47  ;;  %v3118_v40 = vmul.f32 %v9993_v7, %v501_v18  ;;  %v3297_v39 = vadd.f32 %v3289_v55, %v10272_v38  ;;  %v10278_v13 = vld [vmem:[#allocation77_spill] sm:$0xff] }
 0x214   : > { %10267 = vst [vmem:[#allocation180_spill] sm:$0xff] %v6644_v35  ;;  %v6651_v17 = vadd.f32 %v2740_v53, %v2730_v54  ;;  %v6655_v2 = vadd.f32 %v2929_v42, %v2919_v8  ;;  %v3307_v49 = vmul.f32 %v9997_v50, %v501_v18  ;;  %v6659_v14 = vstv %s6539_s22  ;;  %v10276_v8 = vld [vmem:[#allocation82_spill] sm:$0xff]  ;;  %s7151_s22 = sld [smem:[#allocation3 + $0x4c]] }
 0x215   : > { %10270 = vst [vmem:[#allocation135_spill] sm:$0xff] %v6649_v33  ;;  %v6662_v24 = vstv %s6546_s19  ;;  %v6664_v19 = vadd.f32 %v3118_v40, %v3108_v34  ;;  %v6667_v0 = vstv %s6553_s23  ;;  %v6670_v7 = vstv %s6560_s14  ;;  %v10280_v40 = vld [vmem:[#allocation85_spill] sm:$0xff]  ;;  %v10288_v33 = vld [vmem:[#allocation80_spill] sm:$0xff]  ;;  %s7162_s19 = sld [smem:[#allocation3 + $0x4d]] }
 0x216   : > { %10271 = vst [vmem:[#allocation181_spill] sm:$0xff] %v6651_v17  ;;  %10273 = vst [vmem:[#allocation136_spill] sm:$0xff] %v6655_v2  ;;  %v6673_v55 = vstv %s6568_s24  ;;  %v6675_v6 = vadd.f32 %v3307_v49, %v3297_v39  ;;  %v6678_v43 = vstv %s6574_s26  ;;  %v6681_v50 = vstv %s6580_s29  ;;  %v10282_v39 = vld [vmem:[#allocation78_spill] sm:$0xff]  ;;  %s7176_s23 = sld [smem:[#allocation3 + $0x55]] }
 0x217   : > { %10274 = vst [vmem:[#allocation182_spill] sm:$0xff] %v6664_v19  ;;  %v6684_v18 = vstv %s6587_s8  ;;  %v6687_v26 = vstv %s6593_s13  ;;  %v6690_v58 = vstv %s6599_s30  ;;  %v6693_v30 = vstv %s6607_s18  ;;  %v10286_v2 = vld [vmem:[#allocation90_spill] sm:$0xff]  ;;  %s7184_s14 = sld [smem:[#allocation3 + $0x56]] }
 0x218   : > { %10275 = vst [vmem:[#allocation137_spill] sm:$0xff] %v6675_v6  ;;  %v6696_v11 = vstv %s6615_s27  ;;  %v6699_v25 = vstv %s6622_s17  ;;  %v6702_v37 = vstv %s6629_s12  ;;  %v6705_v36 = vstv %s6637_s3  ;;  %v10284_v6 = vld [vmem:[#allocation79_spill] sm:$0xff]  ;;  %s7190_s24 = sld [smem:[#allocation3 + $0x5e]] }
 0x219   : > { %v528_v12 = vsel %vm445_vm0, %v514_v10, 0.0  ;;  %v512_v10 = vpop.permute.xlu0 %511  ;;  %s7202_s26 = sld [smem:[#allocation3 + $0x5f]] }
 0x21a   : > { %v674_v31 = vmul.f32 %v6659_v14, %v528_v12  ;;  %v863_v60 = vmul.f32 %v6662_v24, %v528_v12  ;;  %v1052_v47 = vmul.f32 %v6667_v0, %v528_v12  ;;  %v1241_v63 = vmul.f32 %v6670_v7, %v528_v12  ;;  %s7216_s29 = sld [smem:[#allocation3 + $0x67]] }
 0x21b   : > { %v1430_v3 = vmul.f32 %v6673_v55, %v528_v12  ;;  %v1619_v54 = vmul.f32 %v6678_v43, %v528_v12  ;;  %v1808_v53 = vmul.f32 %v6681_v50, %v528_v12  ;;  %v1997_v27 = vmul.f32 %v6684_v18, %v528_v12  ;;  %s7224_s8 = sld [smem:[#allocation3 + $0x68]] }
 0x21c   : > { %v6718_v42 = vadd.f32 %v674_v31, %v10276_v8  ;;  %v6721_v34 = vadd.f32 %v863_v60, %v10278_v13  ;;  %v6724_v38 = vadd.f32 %v1052_v47, %v10280_v40  ;;  %v6727_v49 = vadd.f32 %v1241_v63, %v10282_v39  ;;  %v10290_v31 = vld [vmem:[#allocation93_spill] sm:$0xff]  ;;  %v10296_v39 = vld [vmem:[#allocation84_spill] sm:$0xff]  ;;  %s7230_s13 = sld [smem:[#allocation3 + $0x70]] }
 0x21d   : > { %v6730_v19 = vadd.f32 %v1430_v3, %v10284_v6  ;;  %v6733_v17 = vadd.f32 %v1619_v54, %v10286_v2  ;;  %v6736_v35 = vadd.f32 %v1808_v53, %v10288_v33  ;;  %v6739_v8 = vadd.f32 %v1997_v27, %v10290_v31  ;;  %v10292_v54 = vld [vmem:[#allocation83_spill] sm:$0xff]  ;;  %v10294_v27 = vld [vmem:[#allocation94_spill] sm:$0xff]  ;;  %s7244_s30 = sld [smem:[#allocation3 + $0x71]] }
 0x21e   : > { %10277 = vst [vmem:[#allocation183_spill] sm:$0xff] %v6718_v42  ;;  %10279 = vst [vmem:[#allocation138_spill] sm:$0xff] %v6721_v34  ;;  %v2186_v60 = vmul.f32 %v6687_v26, %v528_v12  ;;  %v2375_v47 = vmul.f32 %v6690_v58, %v528_v12  ;;  %v2564_v63 = vmul.f32 %v6693_v30, %v528_v12  ;;  %v527_v33 = vsel %vm445_vm0, %v512_v10, 0.0  ;;  %s7258_s18 = sld [smem:[#allocation3 + $0x79]] }
 0x21f   : > { %10281 = vst [vmem:[#allocation184_spill] sm:$0xff] %v6724_v38  ;;  %10283 = vst [vmem:[#allocation139_spill] sm:$0xff] %v6727_v49  ;;  %v2753_v13 = vmul.f32 %v6696_v11, %v528_v12  ;;  %v2942_v6 = vmul.f32 %v6699_v25, %v528_v12  ;;  %v3131_v3 = vmul.f32 %v6702_v37, %v528_v12  ;;  %v10302_v49 = vld [vmem:[#allocation97_spill] sm:$0xff]  ;;  %v10304_v38 = vld [vmem:[#allocation87_spill] sm:$0xff]  ;;  %s7270_s27 = sld [smem:[#allocation3 + $0x7a]] }
 0x220   : > { %10285 = vst [vmem:[#allocation185_spill] sm:$0xff] %v6730_v19  ;;  %10287 = vst [vmem:[#allocation140_spill] sm:$0xff] %v6733_v17  ;;  %v3320_v2 = vmul.f32 %v6705_v36, %v528_v12  ;;  %v6751_v53 = vadd.f32 %v2186_v60, %v10292_v54  ;;  %v6754_v40 = vadd.f32 %v2375_v47, %v10294_v27  ;;  %v10300_v17 = vld [vmem:[#allocation86_spill] sm:$0xff]  ;;  %s7282_s17 = sld [smem:[#allocation3 + $0x82]] }
 0x221   : > { %10289 = vst [vmem:[#allocation186_spill] sm:$0xff] %v6736_v35  ;;  %10291 = vst [vmem:[#allocation141_spill] sm:$0xff] %v6739_v8  ;;  %v6757_v31 = vadd.f32 %v2564_v63, %v10296_v39  ;;  %v10298_v8 = vld [vmem:[#allocation95_spill] sm:$0xff]  ;;  %v6763_v19 = vadd.f32 %v2942_v6, %v10300_v17  ;;  %v6766_v12 = vadd.f32 %v3131_v3, %v10302_v49  ;;  %v10308_v6 = vld [vmem:[#allocation224_spill] sm:$0xff]  ;;  %s7292_s12 = sld [smem:[#allocation3 + $0x83]] }
 0x222   : > { %10293 = vst [vmem:[#allocation187_spill] sm:$0xff] %v6751_v53  ;;  %10295 = vst [vmem:[#allocation142_spill] sm:$0xff] %v6754_v40  ;;  %v6760_v35 = vadd.f32 %v2753_v13, %v10298_v8  ;;  %v6769_v10 = vadd.f32 %v3320_v2, %v10304_v38  ;;  %v673_v60 = vmul.f32 %v6659_v14, %v527_v33  ;;  %v10306_v13 = vld [vmem:[#allocation98_spill] sm:$0xff]  ;;  %v10310_v2 = vld [vmem:[#allocation91_spill] sm:$0xff]  ;;  %s7874_s3 = sld [smem:[#allocation3 + $0x6]] }
 0x223   : > { %10297 = vst [vmem:[#allocation188_spill] sm:$0xff] %v6757_v31  ;;  %10301 = vst [vmem:[#allocation189_spill] sm:$0xff] %v6763_v19  ;;  %v862_v47 = vmul.f32 %v6662_v24, %v527_v33  ;;  %v1051_v54 = vmul.f32 %v6667_v0, %v527_v33  ;;  %v1240_v63 = vmul.f32 %v6670_v7, %v527_v33  ;;  %v10314_v19 = vld [vmem:[#allocation225_spill] sm:$0xff]  ;;  %v10320_v53 = vld [vmem:[#allocation226_spill] sm:$0xff] }
 0x224   : > { %10299 = vst [vmem:[#allocation143_spill] sm:$0xff] %v6760_v35  ;;  %10303 = vst [vmem:[#allocation144_spill] sm:$0xff] %v6766_v12  ;;  %v1429_v8 = vmul.f32 %v6673_v55, %v527_v33  ;;  %v6777_v27 = vadd.f32 %v673_v60, %v10306_v13  ;;  %v1618_v17 = vmul.f32 %v6678_v43, %v527_v33  ;;  %v518_v60 = vpop.permute.xlu1 %517  ;;  %v10316_v13 = vld [vmem:[#allocation92_spill] sm:$0xff]  ;;  %v10318_v31 = vld [vmem:[#allocation105_spill] sm:$0xff] }
 0x225   : > { %10305 = vst [vmem:[#allocation190_spill] sm:$0xff] %v6769_v10  ;;  %v1807_v49 = vmul.f32 %v6681_v50, %v527_v33  ;;  %v1996_v38 = vmul.f32 %v6684_v18, %v527_v33  ;;  %v6783_v3 = vadd.f32 %v862_v47, %v10308_v6  ;;  %v6786_v39 = vadd.f32 %v1051_v54, %v10310_v2  ;;  %v10312_v10 = vld [vmem:[#allocation101_spill] sm:$0xff]  ;;  %v10326_v2 = vld [vmem:[#allocation227_spill] sm:$0xff] }
 0x226   : > { %10307 = vst [vmem:[#allocation145_spill] sm:$0xff] %v6777_v27  ;;  %v6789_v12 = vadd.f32 %v1240_v63, %v10312_v10  ;;  %v6792_v35 = vadd.f32 %v1429_v8, %v10314_v19  ;;  %v6795_v27 = vadd.f32 %v1618_v17, %v10316_v13  ;;  %v2185_v47 = vmul.f32 %v6687_v26, %v527_v33  ;;  %v10322_v8 = vld [vmem:[#allocation96_spill] sm:$0xff] }
 0x227   : > { %10309 = vst [vmem:[#allocation191_spill] sm:$0xff] %v6783_v3  ;;  %10311 = vst [vmem:[#allocation146_spill] sm:$0xff] %v6786_v39  ;;  %v6798_v40 = vadd.f32 %v1807_v49, %v10318_v31  ;;  %v6801_v34 = vadd.f32 %v1996_v38, %v10320_v53  ;;  %v2374_v54 = vmul.f32 %v6690_v58, %v527_v33  ;;  %v530_v53 = vsel %vm445_vm0, %v518_v60, 0.0  ;;  %v10324_v49 = vld [vmem:[#allocation106_spill] sm:$0xff]  ;;  %v10378_v39 = vld [vmem:[#allocation115_spill] sm:$0xff] }
 0x228   : > { %10313 = vst [vmem:[#allocation192_spill] sm:$0xff] %v6789_v12  ;;  %10315 = vst [vmem:[#allocation147_spill] sm:$0xff] %v6792_v35  ;;  %v2563_v10 = vmul.f32 %v6693_v30, %v527_v33  ;;  %v2752_v63 = vmul.f32 %v6696_v11, %v527_v33  ;;  %v2941_v19 = vmul.f32 %v6699_v25, %v527_v33  ;;  %v10408_v3 = vld [vmem:[#allocation213_spill] sm:$0xff] }
 0x229   : > { %10317 = vst [vmem:[#allocation193_spill] sm:$0xff] %v6795_v27  ;;  %10319 = vst [vmem:[#allocation148_spill] sm:$0xff] %v6798_v40  ;;  %v6809_v6 = vadd.f32 %v2185_v47, %v10322_v8  ;;  %v3130_v17 = vmul.f32 %v6702_v37, %v527_v33  ;;  %v3319_v31 = vmul.f32 %v6705_v36, %v527_v33  ;;  %v10330_v27 = vld [vmem:[#allocation109_spill] sm:$0xff]  ;;  %v10332_v47 = vld [vmem:[#allocation194_spill] sm:$0xff] }
 0x22a   : > { %10321 = vst [vmem:[#allocation228_spill] sm:$0xff] %v6801_v34  ;;  %v6816_v38 = vadd.f32 %v2374_v54, %v10324_v49  ;;  %v6819_v13 = vadd.f32 %v2563_v10, %v10326_v2  ;;  %v10328_v34 = vld [vmem:[#allocation113_spill] sm:$0xff]  ;;  %v6825_v35 = vadd.f32 %v2941_v19, %v10330_v27  ;;  %v676_v60 = vmul.f32 %v6659_v14, %v530_v53  ;;  %v10336_v27 = vld [vmem:[#allocation195_spill] sm:$0xff] }
 0x22b   : > { %10323 = vst [vmem:[#allocation149_spill] sm:$0xff] %v6809_v6  ;;  %v6822_v40 = vadd.f32 %v2752_v63, %v10328_v34  ;;  %v6828_v8 = vadd.f32 %v3130_v17, %v10332_v47  ;;  %v10334_v6 = vld [vmem:[#allocation88_spill] sm:$0xff]  ;;  %v865_v54 = vmul.f32 %v6662_v24, %v530_v53  ;;  %v1054_v49 = vmul.f32 %v6667_v0, %v530_v53  ;;  %v10338_v17 = vld [vmem:[#allocation99_spill] sm:$0xff] }
 0x22c   : > { %10325 = vst [vmem:[#allocation229_spill] sm:$0xff] %v6816_v38  ;;  %10327 = vst [vmem:[#allocation150_spill] sm:$0xff] %v6819_v13  ;;  %v6831_v33 = vadd.f32 %v3319_v31, %v10334_v6  ;;  %v1243_v10 = vmul.f32 %v6670_v7, %v530_v53  ;;  %v1432_v34 = vmul.f32 %v6673_v55, %v530_v53  ;;  %v10340_v47 = vld [vmem:[#allocation196_spill] sm:$0xff]  ;;  %v10346_v38 = vld [vmem:[#allocation102_spill] sm:$0xff] }
 0x22d   : > { %10329 = vst [vmem:[#allocation230_spill] sm:$0xff] %v6822_v40  ;;  %10331 = vst [vmem:[#allocation151_spill] sm:$0xff] %v6825_v35  ;;  %v1621_v63 = vmul.f32 %v6678_v43, %v530_v53  ;;  %v6840_v19 = vadd.f32 %v676_v60, %v10336_v27  ;;  %v6843_v2 = vadd.f32 %v865_v54, %v10338_v17  ;;  %v10344_v40 = vld [vmem:[#allocation197_spill] sm:$0xff]  ;;  %v516_v60 = vpop.permute.xlu0 %515  ;;  %v10348_v27 = vld [vmem:[#allocation198_spill] sm:$0xff] }
 0x22e   : > { %10333 = vst [vmem:[#allocation231_spill] sm:$0xff] %v6828_v8  ;;  %10335 = vst [vmem:[#allocation152_spill] sm:$0xff] %v6831_v33  ;;  %v1810_v6 = vmul.f32 %v6681_v50, %v530_v53  ;;  %v1999_v31 = vmul.f32 %v6684_v18, %v530_v53  ;;  %v6848_v33 = vadd.f32 %v1054_v49, %v10340_v47  ;;  %v10342_v8 = vld [vmem:[#allocation100_spill] sm:$0xff]  ;;  %v10350_v17 = vld [vmem:[#allocation103_spill] sm:$0xff] }
 0x22f   : > { %10337 = vst [vmem:[#allocation232_spill] sm:$0xff] %v6840_v19  ;;  %10339 = vst [vmem:[#allocation153_spill] sm:$0xff] %v6843_v2  ;;  %v6851_v35 = vadd.f32 %v1243_v10, %v10342_v8  ;;  %v6854_v13 = vadd.f32 %v1432_v34, %v10344_v40  ;;  %v6857_v12 = vadd.f32 %v1621_v63, %v10346_v38  ;;  %v10352_v34 = vld [vmem:[#allocation199_spill] sm:$0xff] }
 0x230   : > { %10341 = vst [vmem:[#allocation233_spill] sm:$0xff] %v6848_v33  ;;  %v6860_v54 = vadd.f32 %v1810_v6, %v10348_v27  ;;  %v6863_v2 = vadd.f32 %v1999_v31, %v10350_v17  ;;  %v2188_v19 = vmul.f32 %v6687_v26, %v530_v53  ;;  %v2377_v49 = vmul.f32 %v6690_v58, %v530_v53  ;;  %v10354_v6 = vld [vmem:[#allocation104_spill] sm:$0xff]  ;;  %v10362_v33 = vld [vmem:[#allocation110_spill] sm:$0xff] }
 0x231   : > { %10343 = vst [vmem:[#allocation154_spill] sm:$0xff] %v6851_v35  ;;  %10345 = vst [vmem:[#allocation234_spill] sm:$0xff] %v6854_v13  ;;  %v2566_v8 = vmul.f32 %v6693_v30, %v530_v53  ;;  %v2755_v10 = vmul.f32 %v6696_v11, %v530_v53  ;;  %v2944_v40 = vmul.f32 %v6699_v25, %v530_v53  ;;  %v529_v27 = vsel %vm445_vm0, %v516_v60, 0.0  ;;  %v10356_v17 = vld [vmem:[#allocation200_spill] sm:$0xff]  ;;  %v10360_v13 = vld [vmem:[#allocation201_spill] sm:$0xff] }
 0x232   : > { %10347 = vst [vmem:[#allocation155_spill] sm:$0xff] %v6857_v12  ;;  %10349 = vst [vmem:[#allocation235_spill] sm:$0xff] %v6860_v54  ;;  %v3133_v38 = vmul.f32 %v6702_v37, %v530_v53  ;;  %v6872_v63 = vadd.f32 %v2188_v19, %v10352_v34  ;;  %v6875_v47 = vadd.f32 %v2377_v49, %v10354_v6  ;;  %v10358_v54 = vld [vmem:[#allocation108_spill] sm:$0xff]  ;;  %v10364_v34 = vld [vmem:[#allocation202_spill] sm:$0xff] }
 0x233   : > { %10351 = vst [vmem:[#allocation156_spill] sm:$0xff] %v6863_v2  ;;  %v3322_v31 = vmul.f32 %v6705_v36, %v530_v53  ;;  %v6881_v2 = vadd.f32 %v2566_v8, %v10356_v17  ;;  %v6884_v12 = vadd.f32 %v2755_v10, %v10358_v54  ;;  %v6887_v35 = vadd.f32 %v2944_v40, %v10360_v13  ;;  %v10366_v40 = vld [vmem:[#allocation111_spill] sm:$0xff]  ;;  %v10370_v17 = vld [vmem:[#allocation112_spill] sm:$0xff] }
 0x234   : > { %10353 = vst [vmem:[#allocation236_spill] sm:$0xff] %v6872_v63  ;;  %10355 = vst [vmem:[#allocation157_spill] sm:$0xff] %v6875_v47  ;;  %v6890_v19 = vadd.f32 %v3133_v38, %v10362_v33  ;;  %v675_v53 = vmul.f32 %v6659_v14, %v529_v27  ;;  %v864_v6 = vmul.f32 %v6662_v24, %v529_v27  ;;  %v10368_v38 = vld [vmem:[#allocation203_spill] sm:$0xff]  ;;  %v10376_v47 = vld [vmem:[#allocation205_spill] sm:$0xff] }
 0x235   : > { %10357 = vst [vmem:[#allocation237_spill] sm:$0xff] %v6881_v2  ;;  %10359 = vst [vmem:[#allocation158_spill] sm:$0xff] %v6884_v12  ;;  %v6893_v49 = vadd.f32 %v3322_v31, %v10364_v34  ;;  %v1053_v60 = vmul.f32 %v6667_v0, %v529_v27  ;;  %v1242_v8 = vmul.f32 %v6670_v7, %v529_v27  ;;  %v10374_v12 = vld [vmem:[#allocation114_spill] sm:$0xff] }
 0x236   : > { %10361 = vst [vmem:[#allocation238_spill] sm:$0xff] %v6887_v35  ;;  %10363 = vst [vmem:[#allocation159_spill] sm:$0xff] %v6890_v19  ;;  %v1431_v54 = vmul.f32 %v6673_v55, %v529_v27  ;;  %v1620_v10 = vmul.f32 %v6678_v43, %v529_v27  ;;  %v1809_v13 = vmul.f32 %v6681_v50, %v529_v27  ;;  %v10372_v19 = vld [vmem:[#allocation204_spill] sm:$0xff] }
 0x237   : > { %10365 = vst [vmem:[#allocation239_spill] sm:$0xff] %v6893_v49  ;;  %v6903_v33 = vadd.f32 %v675_v53, %v10366_v40  ;;  %v6906_v31 = vadd.f32 %v864_v6, %v10368_v38  ;;  %v6909_v34 = vadd.f32 %v1053_v60, %v10370_v17  ;;  %v1998_v49 = vmul.f32 %v6684_v18, %v529_v27  ;;  %v522_v40 = vpop.permute.xlu1 %521  ;;  %v10380_v6 = vld [vmem:[#allocation206_spill] sm:$0xff] }
 0x238   : > { %v6913_v35 = vadd.f32 %v1242_v8, %v10372_v19  ;;  %v6916_v2 = vadd.f32 %v1431_v54, %v10374_v12  ;;  %v6919_v63 = vadd.f32 %v1620_v10, %v10376_v47  ;;  %v6922_v53 = vadd.f32 %v1809_v13, %v10378_v39  ;;  %v10382_v39 = vld [vmem:[#allocation116_spill] sm:$0xff]  ;;  %v10384_v13 = vld [vmem:[#allocation207_spill] sm:$0xff] }
 0x239   : > { %10367 = vst [vmem:[#allocation160_spill] sm:$0xff] %v6903_v33  ;;  %10369 = vst [vmem:[#allocation240_spill] sm:$0xff] %v6906_v31  ;;  %v6925_v38 = vadd.f32 %v1998_v49, %v10380_v6  ;;  %v2187_v60 = vmul.f32 %v6687_v26, %v529_v27  ;;  %v2376_v17 = vmul.f32 %v6690_v58, %v529_v27  ;;  %v10386_v6 = vld [vmem:[#allocation117_spill] sm:$0xff] }
 0x23a   : > { %10371 = vst [vmem:[#allocation161_spill] sm:$0xff] %v6909_v34  ;;  %10373 = vst [vmem:[#allocation241_spill] sm:$0xff] %v6913_v35  ;;  %v2565_v19 = vmul.f32 %v6693_v30, %v529_v27  ;;  %v2754_v8 = vmul.f32 %v6696_v11, %v529_v27  ;;  %v2943_v12 = vmul.f32 %v6699_v25, %v529_v27  ;;  %v10390_v35 = vld [vmem:[#allocation118_spill] sm:$0xff]  ;;  %v10392_v31 = vld [vmem:[#allocation209_spill] sm:$0xff] }
 0x23b   : > { %10375 = vst [vmem:[#allocation162_spill] sm:$0xff] %v6916_v2  ;;  %10377 = vst [vmem:[#allocation242_spill] sm:$0xff] %v6919_v63  ;;  %v3132_v47 = vmul.f32 %v6702_v37, %v529_v27  ;;  %v3321_v54 = vmul.f32 %v6705_v36, %v529_v27  ;;  %v6935_v10 = vadd.f32 %v2187_v60, %v10382_v39  ;;  %v10388_v63 = vld [vmem:[#allocation208_spill] sm:$0xff]  ;;  %v10394_v60 = vld [vmem:[#allocation119_spill] sm:$0xff] }
 0x23c   : > { %10379 = vst [vmem:[#allocation163_spill] sm:$0xff] %v6922_v53  ;;  %10381 = vst [vmem:[#allocation243_spill] sm:$0xff] %v6925_v38  ;;  %v6938_v49 = vadd.f32 %v2376_v17, %v10384_v13  ;;  %v6941_v38 = vadd.f32 %v2565_v19, %v10386_v6  ;;  %v532_v53 = vsel %vm445_vm0, %v522_v40, 0.0  ;;  %v6946_v2 = vadd.f32 %v2754_v8, %v10388_v63 }
 0x23d   : > { %10383 = vst [vmem:[#allocation164_spill] sm:$0xff] %v6935_v10  ;;  %v6949_v34 = vadd.f32 %v2943_v12, %v10390_v35  ;;  %v6952_v27 = vadd.f32 %v3132_v47, %v10392_v31  ;;  %v6955_v39 = vadd.f32 %v3321_v54, %v10394_v60  ;;  %v678_v17 = vmul.f32 %v6659_v14, %v532_v53  ;;  %v10396_v12 = vld [vmem:[#allocation210_spill] sm:$0xff]  ;;  %v10398_v54 = vld [vmem:[#allocation120_spill] sm:$0xff]  ;;  %v10400_v60 = vld [vmem:[#allocation211_spill] sm:$0xff] }
 0x23e   : > { %10385 = vst [vmem:[#allocation165_spill] sm:$0xff] %v6938_v49  ;;  %10387 = vst [vmem:[#allocation244_spill] sm:$0xff] %v6941_v38  ;;  %v867_v19 = vmul.f32 %v6662_v24, %v532_v53  ;;  %v1056_v13 = vmul.f32 %v6667_v0, %v532_v53  ;;  %v1245_v40 = vmul.f32 %v6670_v7, %v532_v53  ;;  %v10404_v38 = vld [vmem:[#allocation212_spill] sm:$0xff]  ;;  %v10406_v10 = vld [vmem:[#allocation122_spill] sm:$0xff] }
 0x23f   : > { %10389 = vst [vmem:[#allocation166_spill] sm:$0xff] %v6946_v2  ;;  %10391 = vst [vmem:[#allocation245_spill] sm:$0xff] %v6949_v34  ;;  %v1434_v63 = vmul.f32 %v6673_v55, %v532_v53  ;;  %v1623_v8 = vmul.f32 %v6678_v43, %v532_v53  ;;  %v1812_v35 = vmul.f32 %v6681_v50, %v532_v53  ;;  %v520_v2 = vpop.permute.xlu0 %519 }
 0x240   : > { %10393 = vst [vmem:[#allocation167_spill] sm:$0xff] %v6952_v27  ;;  %10395 = vst [vmem:[#allocation246_spill] sm:$0xff] %v6955_v39  ;;  %v2001_v31 = vmul.f32 %v6684_v18, %v532_v53  ;;  %v6966_v47 = vadd.f32 %v678_v17, %v10396_v12  ;;  %v6969_v6 = vadd.f32 %v867_v19, %v10398_v54  ;;  %v10402_v27 = vld [vmem:[#allocation121_spill] sm:$0xff]  ;;  %v10410_v17 = vld [vmem:[#allocation123_spill] sm:$0xff] }
 0x241   : > { %v6972_v39 = vadd.f32 %v1056_v13, %v10400_v60  ;;  %v6975_v34 = vadd.f32 %v1245_v40, %v10402_v27  ;;  %v6978_v49 = vadd.f32 %v1434_v63, %v10404_v38  ;;  %v6981_v33 = vadd.f32 %v1623_v8, %v10406_v10  ;;  %v10412_v8 = vld [vmem:[#allocation214_spill] sm:$0xff]  ;;  %v10416_v60 = vld [vmem:[#allocation215_spill] sm:$0xff] }
 0x242   : > { %10397 = vst [vmem:[#allocation168_spill] sm:$0xff] %v6966_v47  ;;  %10399 = vst [vmem:[#allocation247_spill] sm:$0xff] %v6969_v6  ;;  %v6984_v42 = vadd.f32 %v1812_v35, %v10408_v3  ;;  %v6987_v12 = vadd.f32 %v2001_v31, %v10410_v17  ;;  %v2190_v19 = vmul.f32 %v6687_v26, %v532_v53  ;;  %v531_v63 = vsel %vm445_vm0, %v520_v2, 0.0  ;;  %v10414_v31 = vld [vmem:[#allocation124_spill] sm:$0xff]  ;;  %v10422_v2 = vld [vmem:[#allocation126_spill] sm:$0xff] }
 0x243   : > { %10401 = vst [vmem:[#allocation169_spill] sm:$0xff] %v6972_v39  ;;  %10403 = vst [vmem:[#allocation248_spill] sm:$0xff] %v6975_v34  ;;  %v2379_v13 = vmul.f32 %v6690_v58, %v532_v53  ;;  %v2568_v27 = vmul.f32 %v6693_v30, %v532_v53  ;;  %v2757_v40 = vmul.f32 %v6696_v11, %v532_v53  ;;  %v10424_v34 = vld [vmem:[#allocation217_spill] sm:$0xff] }
 0x244   : > { %10405 = vst [vmem:[#allocation170_spill] sm:$0xff] %v6978_v49  ;;  %10407 = vst [vmem:[#allocation249_spill] sm:$0xff] %v6981_v33  ;;  %v2946_v38 = vmul.f32 %v6699_v25, %v532_v53  ;;  %v3135_v10 = vmul.f32 %v6702_v37, %v532_v53  ;;  %v3324_v3 = vmul.f32 %v6705_v36, %v532_v53  ;;  %v10420_v53 = vld [vmem:[#allocation216_spill] sm:$0xff]  ;;  %v10498_v39 = vld [vmem:[#allocation185_spill] sm:$0xff] }
 0x245   : > { %10409 = vst [vmem:[#allocation171_spill] sm:$0xff] %v6984_v42  ;;  %10411 = vst [vmem:[#allocation250_spill] sm:$0xff] %v6987_v12  ;;  %v7003_v35 = vadd.f32 %v2190_v19, %v10412_v8  ;;  %v7006_v54 = vadd.f32 %v2379_v13, %v10414_v31  ;;  %v7009_v17 = vadd.f32 %v2568_v27, %v10416_v60  ;;  %v10418_v12 = vld [vmem:[#allocation125_spill] sm:$0xff]  ;;  %v10428_v60 = vld [vmem:[#allocation218_spill] sm:$0xff] }
 0x246   : > { %v7012_v42 = vadd.f32 %v2757_v40, %v10418_v12  ;;  %v7017_v33 = vadd.f32 %v2946_v38, %v10420_v53  ;;  %v7020_v49 = vadd.f32 %v3135_v10, %v10422_v2  ;;  %v7023_v19 = vadd.f32 %v3324_v3, %v10424_v34  ;;  %v10426_v38 = vld [vmem:[#allocation127_spill] sm:$0xff]  ;;  %v10430_v2 = vld [vmem:[#allocation128_spill] sm:$0xff] }
 0x247   : > { %10413 = vst [vmem:[#allocation172_spill] sm:$0xff] %v7003_v35  ;;  %10415 = vst [vmem:[#allocation251_spill] sm:$0xff] %v7006_v54  ;;  %v677_v13 = vmul.f32 %v6659_v14, %v531_v63  ;;  %v866_v27 = vmul.f32 %v6662_v24, %v531_v63  ;;  %v1055_v12 = vmul.f32 %v6667_v0, %v531_v63  ;;  %v10438_v54 = vld [vmem:[#allocation130_spill] sm:$0xff] }
 0x248   : > { %10417 = vst [vmem:[#allocation173_spill] sm:$0xff] %v7009_v17  ;;  %10419 = vst [vmem:[#allocation252_spill] sm:$0xff] %v7012_v42  ;;  %v1244_v40 = vmul.f32 %v6670_v7, %v531_v63  ;;  %v1433_v8 = vmul.f32 %v6673_v55, %v531_v63  ;;  %v1622_v34 = vmul.f32 %v6678_v43, %v531_v63  ;;  %v10434_v42 = vld [vmem:[#allocation129_spill] sm:$0xff] }
 0x249   : > { %10421 = vst [vmem:[#allocation174_spill] sm:$0xff] %v7017_v33  ;;  %10423 = vst [vmem:[#allocation253_spill] sm:$0xff] %v7020_v49  ;;  %v7035_v10 = vadd.f32 %v677_v13, %v10426_v38  ;;  %v1811_v3 = vmul.f32 %v6681_v50, %v531_v63  ;;  %v2000_v31 = vmul.f32 %v6684_v18, %v531_v63  ;;  %v10432_v49 = vld [vmem:[#allocation219_spill] sm:$0xff]  ;;  %v526_v38 = vpop.permute.xlu1 %525 }
 0x24a   : > { %10425 = vst [vmem:[#allocation175_spill] sm:$0xff] %v7023_v19  ;;  %v7043_v53 = vadd.f32 %v866_v27, %v10428_v60  ;;  %v7046_v19 = vadd.f32 %v1055_v12, %v10430_v2  ;;  %v7049_v33 = vadd.f32 %v1244_v40, %v10432_v49  ;;  %v7052_v13 = vadd.f32 %v1433_v8, %v10434_v42  ;;  %v10440_v27 = vld [vmem:[#allocation221_spill] sm:$0xff]  ;;  %v10444_v2 = vld [vmem:[#allocation222_spill] sm:$0xff] }
 0x24b   : > { %10427 = vst [vmem:[#allocation254_spill] sm:$0xff] %v7035_v10  ;;  %v10436_v10 = vld [vmem:[#allocation220_spill] sm:$0xff]  ;;  %v7060_v35 = vadd.f32 %v1811_v3, %v10438_v54  ;;  %v7063_v60 = vadd.f32 %v2000_v31, %v10440_v27  ;;  %v2189_v12 = vmul.f32 %v6687_v26, %v531_v63  ;;  %v2378_v49 = vmul.f32 %v6690_v58, %v531_v63 }
 0x24c   : > { %10429 = vst [vmem:[#allocation176_spill] sm:$0xff] %v7043_v53  ;;  %10431 = vst [vmem:[#allocation255_spill] sm:$0xff] %v7046_v19  ;;  %v7057_v17 = vadd.f32 %v1622_v34, %v10436_v10  ;;  %v2567_v42 = vmul.f32 %v6693_v30, %v531_v63  ;;  %v2756_v40 = vmul.f32 %v6696_v11, %v531_v63  ;;  %v10442_v10 = vld [vmem:[#allocation131_spill] sm:$0xff]  ;;  %v534_v31 = vsel %vm445_vm0, %v526_v38, 0.0  ;;  %v10454_v38 = vld [vmem:[#allocation134_spill] sm:$0xff] }
 0x24d   : > { %10433 = vst [vmem:[#allocation177_spill] sm:$0xff] %v7049_v33  ;;  %10435 = vst [vmem:[#allocation256_spill] sm:$0xff] %v7052_v13  ;;  %v2945_v8 = vmul.f32 %v6699_v25, %v531_v63  ;;  %v7075_v54 = vadd.f32 %v2189_v12, %v10442_v10  ;;  %v3134_v34 = vmul.f32 %v6702_v37, %v531_v63  ;;  %v10450_v12 = vld [vmem:[#allocation133_spill] sm:$0xff] }
 0x24e   : > { %10437 = vst [vmem:[#allocation178_spill] sm:$0xff] %v7057_v17  ;;  %10439 = vst [vmem:[#allocation63_spill] sm:$0xff] %v7060_v35  ;;  %v3323_v3 = vmul.f32 %v6705_v36, %v531_v63  ;;  %v7084_v27 = vadd.f32 %v2378_v49, %v10444_v2  ;;  %v10448_v17 = vld [vmem:[#allocation223_spill] sm:$0xff]  ;;  %v680_v49 = vmul.f32 %v6659_v14, %v534_v31 }
 0x24f   : > { %10441 = vst [vmem:[#allocation64_spill] sm:$0xff] %v7063_v60  ;;  %10443 = vst [vmem:[#allocation65_spill] sm:$0xff] %v7075_v54  ;;  %v10446_v60 = vld [vmem:[#allocation132_spill] sm:$0xff]  ;;  %v7090_v13 = vadd.f32 %v2756_v40, %v10448_v17  ;;  %v7093_v10 = vadd.f32 %v2945_v8, %v10450_v12  ;;  %v10452_v63 = vld [vmem:[#allocation179_spill] sm:$0xff]  ;;  %v869_v2 = vmul.f32 %v6662_v24, %v534_v31 }
 0x250   : > { %10445 = vst [vmem:[#allocation66_spill] sm:$0xff] %v7084_v27  ;;  %v7087_v35 = vadd.f32 %v2567_v42, %v10446_v60  ;;  %v7098_v54 = vadd.f32 %v3134_v34, %v10452_v63  ;;  %v7101_v33 = vadd.f32 %v3323_v3, %v10454_v38  ;;  %v1058_v17 = vmul.f32 %v6667_v0, %v534_v31  ;;  %v10496_v27 = vld [vmem:[#allocation139_spill] sm:$0xff] }
 0x251   : > { %10449 = vst [vmem:[#allocation68_spill] sm:$0xff] %v7090_v13  ;;  %10451 = vst [vmem:[#allocation69_spill] sm:$0xff] %v7093_v10  ;;  %v1247_v60 = vmul.f32 %v6670_v7, %v534_v31  ;;  %v1436_v42 = vmul.f32 %v6673_v55, %v534_v31  ;;  %v1625_v40 = vmul.f32 %v6678_v43, %v534_v31  ;;  %v10495_v10 = vld [vmem:[#allocation184_spill] sm:$0xff] }
 0x252   : > { %10447 = vst [vmem:[#allocation67_spill] sm:$0xff] %v7087_v35  ;;  %10453 = vst [vmem:[#allocation70_spill] sm:$0xff] %v7098_v54  ;;  %v7114_v8 = vadd.f32 %v680_v49, %v6505_v1  ;;  %v7117_v34 = vadd.f32 %v869_v2, %v6507_v48  ;;  %v1814_v3 = vmul.f32 %v6681_v50, %v534_v31  ;;  %v524_v48 = vpop.permute.xlu0 %523 }
 0x253   : > { %10455 = vst [vmem:[#allocation71_spill] sm:$0xff] %v7101_v33  ;;  %v2003_v12 = vmul.f32 %v6684_v18, %v534_v31  ;;  %v7124_v63 = vadd.f32 %v1058_v17, %v6509_v46  ;;  %v7127_v38 = vadd.f32 %v1247_v60, %v6512_v32  ;;  %v7130_v33 = vadd.f32 %v1436_v42, %v6514_v9 }
 0x254   : > { %10456 = vst [vmem:[#allocation72_spill] sm:$0xff] %v7114_v8  ;;  %10457 = vst [vmem:[#allocation73_spill] sm:$0xff] %v7117_v34  ;;  %v7133_v1 = vadd.f32 %v1625_v40, %v6522_v29  ;;  %v7138_v49 = vadd.f32 %v1814_v3, %v6527_v57  ;;  %v2192_v46 = vmul.f32 %v6687_v26, %v534_v31  ;;  %v533_v40 = vsel %vm445_vm0, %v524_v48, 0.0  ;;  %v10494_v34 = vld [vmem:[#allocation138_spill] sm:$0xff] }
 0x255   : > { %10458 = vst [vmem:[#allocation257_spill] sm:$0xff] %v7124_v63  ;;  %10459 = vst [vmem:[#allocation258_spill] sm:$0xff] %v7127_v38  ;;  %v7141_v2 = vadd.f32 %v2003_v12, %v6529_v61  ;;  %v2381_v32 = vmul.f32 %v6690_v58, %v534_v31  ;;  %v2570_v9 = vmul.f32 %v6693_v30, %v534_v31 }
 0x256   : > { %10460 = vst [vmem:[#allocation259_spill] sm:$0xff] %v7130_v33  ;;  %10461 = vst [vmem:[#allocation260_spill] sm:$0xff] %v7133_v1  ;;  %v2759_v29 = vmul.f32 %v6696_v11, %v534_v31  ;;  %v2948_v17 = vmul.f32 %v6699_v25, %v534_v31  ;;  %v3137_v60 = vmul.f32 %v6702_v37, %v534_v31  ;;  %v10493_v33 = vld [vmem:[#allocation183_spill] sm:$0xff] }
 0x257   : > { %10462 = vst [vmem:[#allocation261_spill] sm:$0xff] %v7138_v49  ;;  %10463 = vst [vmem:[#allocation262_spill] sm:$0xff] %v7141_v2  ;;  %v7154_v57 = vadd.f32 %v2192_v46, %v6533_v4  ;;  %v7157_v61 = vadd.f32 %v2381_v32, %v6535_v51  ;;  %v3326_v42 = vmul.f32 %v6705_v36, %v534_v31  ;;  %v10486_v32 = vld [vmem:[#allocation136_spill] sm:$0xff] }
 0x258   : > { %v7165_v3 = vadd.f32 %v2570_v9, %v6541_v15  ;;  %v7168_v12 = vadd.f32 %v2759_v29, %v6548_v16  ;;  %v7171_v2 = vadd.f32 %v2948_v17, %v6555_v45  ;;  %v7174_v4 = vadd.f32 %v3137_v60, %v6562_v59  ;;  %v10490_v17 = vld [vmem:[#allocation137_spill] sm:$0xff] }
 0x259   : > { %10464 = vst [vmem:[#allocation263_spill] sm:$0xff] %v7154_v57  ;;  %10465 = vst [vmem:[#allocation264_spill] sm:$0xff] %v7157_v61  ;;  %v7179_v51 = vadd.f32 %v3326_v42, %v6564_v62  ;;  %v679_v31 = vmul.f32 %v6659_v14, %v533_v40  ;;  %v868_v48 = vmul.f32 %v6662_v24, %v533_v40  ;;  %v4141_v42 = vld [vmem:[#allocation2 + $0x10] sm:$0xff]  ;;  %v7362_v61 = vstv %s7282_s17  ;;  %s8529_s17 = sld [smem:[#allocation3 + $0x3e]] }
 0x25a   : > { %10466 = vst [vmem:[#allocation265_spill] sm:$0xff] %v7165_v3  ;;  %10467 = vst [vmem:[#allocation74_spill] sm:$0xff] %v7168_v12  ;;  %v1057_v15 = vmul.f32 %v6667_v0, %v533_v40  ;;  %v1246_v16 = vmul.f32 %v6670_v7, %v533_v40  ;;  %v1435_v45 = vmul.f32 %v6673_v55, %v533_v40  ;;  %v7358_v12 = vstv %s7270_s27  ;;  %s8519_s27 = sld [smem:[#allocation3 + $0x35]] }
 0x25b   : > { %10468 = vst [vmem:[#allocation75_spill] sm:$0xff] %v7171_v2  ;;  %10469 = vst [vmem:[#allocation76_spill] sm:$0xff] %v7174_v4  ;;  %v1624_v59 = vmul.f32 %v6678_v43, %v533_v40  ;;  %v1813_v46 = vmul.f32 %v6681_v50, %v533_v40  ;;  %v7193_v62 = vadd.f32 %v679_v31, %v6601_v52  ;;  %v7262_v31 = vstv %s7072_s15  ;;  %s7935_s15 = sld [smem:[#allocation3 + $0x57]] }
 0x25c   : > { %10470 = vst [vmem:[#allocation107_spill] sm:$0xff] %v7179_v51  ;;  %v7196_v14 = vadd.f32 %v868_v48, %v6603_v28  ;;  %v7199_v24 = vadd.f32 %v1057_v15, %v6609_v44  ;;  %v2002_v0 = vmul.f32 %v6684_v18, %v533_v40  ;;  %v7205_v7 = vadd.f32 %v1246_v16, %v6611_v22 }
 0x25d   : > { %10471 = vst [vmem:[#allocation62_spill] sm:$0xff] %v7193_v62  ;;  %v7208_v55 = vadd.f32 %v1435_v45, %v6617_v41  ;;  %v7211_v43 = vadd.f32 %v1624_v59, %v6624_v21  ;;  %v7214_v52 = vadd.f32 %v1813_v46, %v6631_v20  ;;  %v2191_v44 = vmul.f32 %v6687_v26, %v533_v40  ;;  %v10480_v26 = vld [vmem:[#allocation180_spill] sm:$0xff] }
 0x25e   : > { %10472 = vst [vmem:[#allocation266_spill] sm:$0xff] %v7196_v14  ;;  %10473 = vst [vmem:[#allocation267_spill] sm:$0xff] %v7199_v24  ;;  %v7219_v28 = vadd.f32 %v2002_v0, %v6633_v23  ;;  %v2380_v22 = vmul.f32 %v6690_v58, %v533_v40  ;;  %v2569_v50 = vmul.f32 %v6693_v30, %v533_v40  ;;  %v10482_v30 = vld [vmem:[#allocation135_spill] sm:$0xff]  ;;  %v7265_v48 = vstv %s7000_s9  ;;  %s7889_s9 = sld [smem:[#allocation3 + $0x18]] }
 0x25f   : > { %10474 = vst [vmem:[#allocation81_spill] sm:$0xff] %v7205_v7  ;;  %10475 = vst [vmem:[#allocation268_spill] sm:$0xff] %v7208_v55  ;;  %v2758_v41 = vmul.f32 %v6696_v11, %v533_v40  ;;  %v2947_v21 = vmul.f32 %v6699_v25, %v533_v40  ;;  %v3136_v20 = vmul.f32 %v6702_v37, %v533_v40  ;;  %v7242_v25 = vstv %s6993_s20  ;;  %v10484_v37 = vld [vmem:[#allocation181_spill] sm:$0xff]  ;;  %v538_v55 = vpop.permute.xlu1 %537  ;;  %s7881_s20 = sld [smem:[#allocation3 + $0xf]] }
 0x260   : > { %10476 = vst [vmem:[#allocation269_spill] sm:$0xff] %v7211_v43  ;;  %10477 = vst [vmem:[#allocation270_spill] sm:$0xff] %v7214_v52  ;;  %v3325_v18 = vmul.f32 %v6705_v36, %v533_v40  ;;  %v7233_v23 = vadd.f32 %v2191_v44, %v6639_v5  ;;  %v7236_v58 = vadd.f32 %v2380_v22, %v10480_v26  ;;  %v10488_v5 = vld [vmem:[#allocation182_spill] sm:$0xff]  ;;  %v7268_v15 = vstv %s7081_s6  ;;  %s7943_s6 = sld [smem:[#allocation3 + $0x60]] }
 0x261   : > { %10478 = vst [vmem:[#allocation89_spill] sm:$0xff] %v7219_v28  ;;  %v7239_v11 = vadd.f32 %v2569_v50, %v10482_v30  ;;  %v7247_v36 = vadd.f32 %v2758_v41, %v10484_v37  ;;  %v7250_v9 = vadd.f32 %v2947_v21, %v10486_v32  ;;  %v7253_v29 = vadd.f32 %v3136_v20, %v10488_v5 }
 0x262   : > { %10479 = vst [vmem:[#allocation271_spill] sm:$0xff] %v7233_v23  ;;  %10481 = vst [vmem:[#allocation272_spill] sm:$0xff] %v7236_v58  ;;  %v7256_v60 = vadd.f32 %v3325_v18, %v10490_v17  ;;  %v692_v40 = vmul.f32 %v4141_v42, %v7242_v25  ;;  %v881_v16 = vmul.f32 %v4141_v42, %v7265_v48  ;;  %v7274_v45 = vstv %s7014_s5  ;;  %s7896_s5 = sld [smem:[#allocation3 + $0x21]] }
 0x263   : > { %10483 = vst [vmem:[#allocation273_spill] sm:$0xff] %v7239_v11  ;;  %10485 = vst [vmem:[#allocation274_spill] sm:$0xff] %v7247_v36  ;;  %v7277_v59 = vstv %s7095_s7  ;;  %v7280_v46 = vstv %s7026_s21  ;;  %v1070_v0 = vmul.f32 %v4141_v42, %v7274_v45  ;;  %v7287_v22 = vstv %s7105_s16  ;;  %s7903_s21 = sld [smem:[#allocation3 + $0x2a]] }
 0x264   : > { %10487 = vst [vmem:[#allocation275_spill] sm:$0xff] %v7250_v9  ;;  %10489 = vst [vmem:[#allocation276_spill] sm:$0xff] %v7253_v29  ;;  %v1259_v44 = vmul.f32 %v4141_v42, %v7280_v46  ;;  %v7290_v50 = vstv %s7032_s1  ;;  %v7296_v21 = vstv %s7111_s25  ;;  %v7299_v20 = vstv %s7040_s4  ;;  %s7910_s1 = sld [smem:[#allocation3 + $0x33]] }
 0x265   : > { %10491 = vst [vmem:[#allocation277_spill] sm:$0xff] %v7256_v60  ;;  %v1448_v41 = vmul.f32 %v4141_v42, %v7290_v50  ;;  %10492 = vst [vmem:[#allocation278_spill] sm:$0xff] %v7296_v21  ;;  %v7302_v18 = vstv %s7121_s2  ;;  %v1637_v26 = vmul.f32 %v4141_v42, %v7299_v20  ;;  %v7306_v30 = vstv %s7054_s0  ;;  %s7916_s4 = sld [smem:[#allocation3 + $0x3c]] }
 0x266   : > { %v7309_v37 = vstv %s7135_s28  ;;  %v7312_v32 = vstv %s7066_s11  ;;  %v1826_v5 = vmul.f32 %v4141_v42, %v7306_v30  ;;  %v7317_v60 = vstv %s7145_s10  ;;  %s7923_s0 = sld [smem:[#allocation3 + $0x45]] }
 0x267   : > { %v2015_v17 = vmul.f32 %v4141_v42, %v7312_v32  ;;  %v7320_v29 = vstv %s7151_s22  ;;  %v7324_v36 = vstv %s7162_s19  ;;  %v7327_v11 = vstv %s7176_s23  ;;  %s7929_s11 = sld [smem:[#allocation3 + $0x4e]] }
 0x268   : > { %v2204_v9 = vmul.f32 %v4141_v42, %v7320_v29  ;;  %v7330_v58 = vstv %s7184_s14  ;;  %v2393_v23 = vmul.f32 %v4141_v42, %v7327_v11  ;;  %v7334_v28 = vstv %s7190_s24  ;;  %s7951_s7 = sld [smem:[#allocation3 + $0x69]] }
 0x269   : > { %v7337_v52 = vstv %s7202_s26  ;;  %v7340_v43 = vstv %s7216_s29  ;;  %v2582_v7 = vmul.f32 %v4141_v42, %v7334_v28  ;;  %v7345_v14 = vstv %s7224_s8  ;;  %s7958_s16 = sld [smem:[#allocation3 + $0x72]] }
 0x26a   : > { %v2771_v24 = vmul.f32 %v4141_v42, %v7340_v43  ;;  %v7348_v62 = vstv %s7230_s13  ;;  %v7352_v4 = vstv %s7244_s30  ;;  %v7355_v2 = vstv %s7258_s18  ;;  %s7965_s25 = sld [smem:[#allocation3 + $0x7b]] }
 0x26b   : > { %v2960_v51 = vmul.f32 %v4141_v42, %v7348_v62  ;;  %v3149_v3 = vmul.f32 %v4141_v42, %v7355_v2  ;;  %v7365_v57 = vstv %s7292_s12  ;;  %v552_v49 = vsel %vm446_vm1, %v538_v55, 0.0  ;;  %s7972_s2 = sld [smem:[#allocation3 + $0x84]] }
 0x26c   : > { %v3338_v1 = vmul.f32 %v4141_v42, %v7362_v61  ;;  %v700_v38 = vadd.f32 %v692_v40, %v10493_v33  ;;  %v710_v63 = vmul.f32 %v7262_v31, %v552_v49  ;;  %v889_v8 = vadd.f32 %v881_v16, %v10494_v34  ;;  %v10501_v34 = vld [vmem:[#allocation140_spill] sm:$0xff]  ;;  %s8372_s28 = sld [smem:[#allocation3 + $0x7]] }
 0x26d   : > { %v899_v54 = vmul.f32 %v7268_v15, %v552_v49  ;;  %v1078_v13 = vadd.f32 %v1070_v0, %v10495_v10  ;;  %v1088_v35 = vmul.f32 %v7277_v59, %v552_v49  ;;  %v1267_v19 = vadd.f32 %v1259_v44, %v10496_v27  ;;  %v10504_v27 = vld [vmem:[#allocation186_spill] sm:$0xff]  ;;  %s8378_s10 = sld [smem:[#allocation3 + $0x10]] }
 0x26e   : > { %v7377_v53 = vadd.f32 %v710_v63, %v700_v38  ;;  %v1277_v55 = vmul.f32 %v7287_v22, %v552_v49  ;;  %v1456_v42 = vadd.f32 %v1448_v41, %v10498_v39  ;;  %v1466_v33 = vmul.f32 %v7296_v21, %v552_v49  ;;  %v10506_v39 = vld [vmem:[#allocation141_spill] sm:$0xff]  ;;  %s8385_s22 = sld [smem:[#allocation3 + $0x19]] }
 0x26f   : > { %v7382_v40 = vadd.f32 %v899_v54, %v889_v8  ;;  %v7384_v6 = vadd.f32 %v1088_v35, %v1078_v13  ;;  %v1645_v16 = vadd.f32 %v1637_v26, %v10501_v34  ;;  %v1655_v10 = vmul.f32 %v7302_v18, %v552_v49  ;;  %v10507_v35 = vld [vmem:[#allocation187_spill] sm:$0xff]  ;;  %s8399_s19 = sld [smem:[#allocation3 + $0x22]] }
 0x270   : > { %10497 = vst [vmem:[#allocation279_spill] sm:$0xff] %v7377_v53  ;;  %v7388_v0 = vadd.f32 %v1277_v55, %v1267_v19  ;;  %v7390_v47 = vadd.f32 %v1466_v33, %v1456_v42  ;;  %v1834_v63 = vadd.f32 %v1826_v5, %v10504_v27  ;;  %v1844_v38 = vmul.f32 %v7309_v37, %v552_v49  ;;  %v10509_v19 = vld [vmem:[#allocation142_spill] sm:$0xff]  ;;  %v10511_v5 = vld [vmem:[#allocation188_spill] sm:$0xff]  ;;  %s8413_s23 = sld [smem:[#allocation3 + $0x2b]] }
 0x271   : > { %10499 = vst [vmem:[#allocation280_spill] sm:$0xff] %v7382_v40  ;;  %10500 = vst [vmem:[#allocation82_spill] sm:$0xff] %v7384_v6  ;;  %v7394_v44 = vadd.f32 %v1655_v10, %v1645_v16  ;;  %v2023_v41 = vadd.f32 %v2015_v17, %v10506_v39  ;;  %v2033_v54 = vmul.f32 %v7317_v60, %v552_v49  ;;  %v10512_v10 = vld [vmem:[#allocation143_spill] sm:$0xff]  ;;  %s8423_s14 = sld [smem:[#allocation3 + $0x34]] }
 0x272   : > { %10502 = vst [vmem:[#allocation77_spill] sm:$0xff] %v7388_v0  ;;  %10503 = vst [vmem:[#allocation85_spill] sm:$0xff] %v7390_v47  ;;  %v2212_v13 = vadd.f32 %v2204_v9, %v10507_v35  ;;  %v7399_v8 = vadd.f32 %v1844_v38, %v1834_v63  ;;  %v2222_v26 = vmul.f32 %v7324_v36, %v552_v49  ;;  %v10515_v63 = vld [vmem:[#allocation189_spill] sm:$0xff]  ;;  %s8433_s24 = sld [smem:[#allocation3 + $0x3d]] }
 0x273   : > { %10505 = vst [vmem:[#allocation78_spill] sm:$0xff] %v7394_v44  ;;  %v2401_v55 = vadd.f32 %v2393_v23, %v10509_v19  ;;  %v2411_v42 = vmul.f32 %v7330_v58, %v552_v49  ;;  %v7404_v33 = vadd.f32 %v2033_v54, %v2023_v41  ;;  %v2590_v34 = vadd.f32 %v2582_v7, %v10511_v5  ;;  %v10517_v41 = vld [vmem:[#allocation144_spill] sm:$0xff]  ;;  %v10519_v5 = vld [vmem:[#allocation190_spill] sm:$0xff]  ;;  %s8447_s26 = sld [smem:[#allocation3 + $0x46]] }
 0x274   : > { %10508 = vst [vmem:[#allocation79_spill] sm:$0xff] %v7399_v8  ;;  %v2600_v16 = vmul.f32 %v7337_v52, %v552_v49  ;;  %v2779_v17 = vadd.f32 %v2771_v24, %v10512_v10  ;;  %v7409_v27 = vadd.f32 %v2222_v26, %v2212_v13  ;;  %v2789_v9 = vmul.f32 %v7345_v14, %v552_v49  ;;  %v4142_v26 = vld [vmem:[#allocation2 + $0x8] sm:$0xff]  ;;  %v10526_v44 = vld [vmem:[#allocation192_spill] sm:$0xff]  ;;  %s8461_s29 = sld [smem:[#allocation3 + $0x8]] }
 0x275   : > { %10510 = vst [vmem:[#allocation90_spill] sm:$0xff] %v7404_v33  ;;  %v7411_v39 = vadd.f32 %v2411_v42, %v2401_v55  ;;  %v2968_v38 = vadd.f32 %v2960_v51, %v10515_v63  ;;  %v2978_v23 = vmul.f32 %v7352_v4, %v552_v49  ;;  %v3157_v54 = vadd.f32 %v3149_v3, %v10517_v41  ;;  %s8471_s8 = sld [smem:[#allocation3 + $0x11]] }
 0x276   : > { %10513 = vst [vmem:[#allocation80_spill] sm:$0xff] %v7409_v27  ;;  %v7415_v35 = vadd.f32 %v2600_v16, %v2590_v34  ;;  %v3167_v7 = vmul.f32 %v7358_v12, %v552_v49  ;;  %v7420_v19 = vadd.f32 %v2789_v9, %v2779_v17  ;;  %v3346_v24 = vadd.f32 %v3338_v1, %v10519_v5  ;;  %v10525_v27 = vld [vmem:[#allocation146_spill] sm:$0xff]  ;;  %s8481_s13 = sld [smem:[#allocation3 + $0x1a]] }
 0x277   : > { %10514 = vst [vmem:[#allocation93_spill] sm:$0xff] %v7411_v39  ;;  %v3356_v13 = vmul.f32 %v7365_v57, %v552_v49  ;;  %v691_v55 = vmul.f32 %v4142_v26, %v7242_v25  ;;  %v7425_v42 = vadd.f32 %v2978_v23, %v2968_v38  ;;  %v880_v34 = vmul.f32 %v4142_v26, %v7265_v48  ;;  %v536_v49 = vpop.permute.xlu0 %535  ;;  %s8495_s30 = sld [smem:[#allocation3 + $0x23]] }
 0x278   : > { %10516 = vst [vmem:[#allocation83_spill] sm:$0xff] %v7415_v35  ;;  %10518 = vst [vmem:[#allocation94_spill] sm:$0xff] %v7420_v19  ;;  %v7427_v51 = vadd.f32 %v3167_v7, %v3157_v54  ;;  %v1069_v16 = vmul.f32 %v4142_v26, %v7274_v45  ;;  %v1258_v10 = vmul.f32 %v4142_v26, %v7280_v46  ;;  %s8509_s18 = sld [smem:[#allocation3 + $0x2c]] }
 0x279   : > { %10520 = vst [vmem:[#allocation84_spill] sm:$0xff] %v7425_v42  ;;  %v7431_v3 = vadd.f32 %v3356_v13, %v3346_v24  ;;  %v1447_v17 = vmul.f32 %v4142_v26, %v7290_v50  ;;  %v1636_v1 = vmul.f32 %v4142_v26, %v7299_v20  ;;  %v1825_v9 = vmul.f32 %v4142_v26, %v7306_v30  ;;  %v10524_v42 = vld [vmem:[#allocation191_spill] sm:$0xff]  ;;  %s8543_s12 = sld [smem:[#allocation3 + $0x47]] }
 0x27a   : > { %10521 = vst [vmem:[#allocation95_spill] sm:$0xff] %v7427_v51  ;;  %v2014_v63 = vmul.f32 %v4142_v26, %v7312_v32  ;;  %v2203_v38 = vmul.f32 %v4142_v26, %v7320_v29  ;;  %v2392_v23 = vmul.f32 %v4142_v26, %v7327_v11  ;;  %v2581_v41 = vmul.f32 %v4142_v26, %v7334_v28 }
 0x27b   : > { %10522 = vst [vmem:[#allocation86_spill] sm:$0xff] %v7431_v3  ;;  %v2770_v54 = vmul.f32 %v4142_v26, %v7340_v43  ;;  %v2959_v7 = vmul.f32 %v4142_v26, %v7348_v62  ;;  %v3148_v5 = vmul.f32 %v4142_v26, %v7355_v2  ;;  %v3337_v24 = vmul.f32 %v4142_v26, %v7362_v61  ;;  %v10523_v3 = vld [vmem:[#allocation145_spill] sm:$0xff]  ;;  %v10527_v26 = vld [vmem:[#allocation147_spill] sm:$0xff] }
 0x27c   : > { %v551_v13 = vsel %vm446_vm1, %v536_v49, 0.0  ;;  %v699_v51 = vadd.f32 %v691_v55, %v10523_v3  ;;  %v888_v19 = vadd.f32 %v880_v34, %v10524_v42  ;;  %v1077_v33 = vadd.f32 %v1069_v16, %v10525_v27  ;;  %v10531_v34 = vld [vmem:[#allocation193_spill] sm:$0xff]  ;;  %v10534_v16 = vld [vmem:[#allocation148_spill] sm:$0xff] }
 0x27d   : > { %v709_v35 = vmul.f32 %v7262_v31, %v551_v13  ;;  %v898_v39 = vmul.f32 %v7268_v15, %v551_v13  ;;  %v1087_v8 = vmul.f32 %v7277_v59, %v551_v13  ;;  %v1266_v47 = vadd.f32 %v1258_v10, %v10526_v44 }
 0x27e   : > { %v1276_v0 = vmul.f32 %v7287_v22, %v551_v13  ;;  %v1455_v6 = vadd.f32 %v1447_v17, %v10527_v26  ;;  %v1465_v49 = vmul.f32 %v7296_v21, %v551_v13  ;;  %v1644_v3 = vadd.f32 %v1636_v1, %v10531_v34  ;;  %v10535_v26 = vld [vmem:[#allocation228_spill] sm:$0xff] }
 0x27f   : > { %v7457_v40 = vadd.f32 %v709_v35, %v699_v51  ;;  %v7459_v55 = vadd.f32 %v898_v39, %v888_v19  ;;  %v7461_v42 = vadd.f32 %v1087_v8, %v1077_v33  ;;  %v1654_v44 = vmul.f32 %v7302_v18, %v551_v13  ;;  %v10536_v39 = vld [vmem:[#allocation149_spill] sm:$0xff] }
 0x280   : > { %v7464_v53 = vadd.f32 %v1276_v0, %v1266_v47  ;;  %v7466_v27 = vadd.f32 %v1465_v49, %v1455_v6  ;;  %v1833_v10 = vadd.f32 %v1825_v9, %v10534_v16  ;;  %v1843_v17 = vmul.f32 %v7309_v37, %v551_v13  ;;  %v10538_v47 = vld [vmem:[#allocation229_spill] sm:$0xff]  ;;  %v10541_v9 = vld [vmem:[#allocation150_spill] sm:$0xff] }
 0x281   : > { %10528 = vst [vmem:[#allocation97_spill] sm:$0xff] %v7457_v40  ;;  %10529 = vst [vmem:[#allocation87_spill] sm:$0xff] %v7459_v55  ;;  %v2022_v21 = vadd.f32 %v2014_v63, %v10535_v26  ;;  %v2032_v35 = vmul.f32 %v7317_v60, %v551_v13  ;;  %v2211_v19 = vadd.f32 %v2203_v38, %v10536_v39  ;;  %v10544_v38 = vld [vmem:[#allocation230_spill] sm:$0xff]  ;;  %v10561_v55 = vld [vmem:[#allocation155_spill] sm:$0xff] }
 0x282   : > { %10530 = vst [vmem:[#allocation98_spill] sm:$0xff] %v7461_v42  ;;  %10532 = vst [vmem:[#allocation224_spill] sm:$0xff] %v7464_v53  ;;  %v7474_v8 = vadd.f32 %v1654_v44, %v1644_v3  ;;  %v2221_v33 = vmul.f32 %v7324_v36, %v551_v13  ;;  %v2400_v0 = vadd.f32 %v2392_v23, %v10538_v47  ;;  %v10546_v23 = vld [vmem:[#allocation151_spill] sm:$0xff] }
 0x283   : > { %10533 = vst [vmem:[#allocation91_spill] sm:$0xff] %v7466_v27  ;;  %v2410_v6 = vmul.f32 %v7330_v58, %v551_v13  ;;  %v7479_v51 = vadd.f32 %v1843_v17, %v1833_v10  ;;  %v7481_v1 = vadd.f32 %v2032_v35, %v2022_v21  ;;  %v2589_v49 = vadd.f32 %v2581_v41, %v10541_v9  ;;  %v10547_v21 = vld [vmem:[#allocation231_spill] sm:$0xff] }
 0x284   : > { %10537 = vst [vmem:[#allocation101_spill] sm:$0xff] %v7474_v8  ;;  %v2599_v63 = vmul.f32 %v7337_v52, %v551_v13  ;;  %v7485_v34 = vadd.f32 %v2221_v33, %v2211_v19  ;;  %v2778_v3 = vadd.f32 %v2770_v54, %v10544_v38  ;;  %v2788_v44 = vmul.f32 %v7345_v14, %v551_v13  ;;  %v10549_v19 = vld [vmem:[#allocation152_spill] sm:$0xff] }
 0x285   : > { %10539 = vst [vmem:[#allocation225_spill] sm:$0xff] %v7479_v51  ;;  %10540 = vst [vmem:[#allocation92_spill] sm:$0xff] %v7481_v1  ;;  %v7487_v16 = vadd.f32 %v2410_v6, %v2400_v0  ;;  %v2967_v39 = vadd.f32 %v2959_v7, %v10546_v23  ;;  %v2977_v10 = vmul.f32 %v7352_v4, %v551_v13  ;;  %v4143_v54 = vld [vmem:[#allocation2 + $0x20] sm:$0xff]  ;;  %v10556_v51 = vld [vmem:[#allocation154_spill] sm:$0xff] }
 0x286   : > { %10542 = vst [vmem:[#allocation105_spill] sm:$0xff] %v7485_v34  ;;  %v7491_v26 = vadd.f32 %v2599_v63, %v2589_v49  ;;  %v3156_v17 = vadd.f32 %v3148_v5, %v10547_v21  ;;  %v7496_v35 = vadd.f32 %v2788_v44, %v2778_v3  ;;  %v3166_v41 = vmul.f32 %v7358_v12, %v551_v13 }
 0x287   : > { %10543 = vst [vmem:[#allocation226_spill] sm:$0xff] %v7487_v16  ;;  %v3345_v33 = vadd.f32 %v3337_v24, %v10549_v19  ;;  %v3355_v47 = vmul.f32 %v7365_v57, %v551_v13  ;;  %v7501_v0 = vadd.f32 %v2977_v10, %v2967_v39  ;;  %v694_v6 = vmul.f32 %v4143_v54, %v7242_v25  ;;  %v542_v24 = vpop.permute.xlu1 %541  ;;  %v10555_v16 = vld [vmem:[#allocation233_spill] sm:$0xff] }
 0x288   : > { %10545 = vst [vmem:[#allocation96_spill] sm:$0xff] %v7491_v26  ;;  %10548 = vst [vmem:[#allocation106_spill] sm:$0xff] %v7496_v35  ;;  %v883_v9 = vmul.f32 %v4143_v54, %v7265_v48  ;;  %v1072_v7 = vmul.f32 %v4143_v54, %v7274_v45  ;;  %v7506_v49 = vadd.f32 %v3166_v41, %v3156_v17 }
 0x289   : > { %10550 = vst [vmem:[#allocation227_spill] sm:$0xff] %v7501_v0  ;;  %v7508_v5 = vadd.f32 %v3355_v47, %v3345_v33  ;;  %v1261_v63 = vmul.f32 %v4143_v54, %v7280_v46  ;;  %v1450_v38 = vmul.f32 %v4143_v54, %v7290_v50  ;;  %v1639_v13 = vmul.f32 %v4143_v54, %v7299_v20  ;;  %v10553_v47 = vld [vmem:[#allocation232_spill] sm:$0xff]  ;;  %v10554_v0 = vld [vmem:[#allocation153_spill] sm:$0xff] }
 0x28a   : > { %10551 = vst [vmem:[#allocation113_spill] sm:$0xff] %v7506_v49  ;;  %v1828_v3 = vmul.f32 %v4143_v54, %v7306_v30  ;;  %v2017_v44 = vmul.f32 %v4143_v54, %v7312_v32  ;;  %v2206_v23 = vmul.f32 %v4143_v54, %v7320_v29  ;;  %v2395_v39 = vmul.f32 %v4143_v54, %v7327_v11 }
 0x28b   : > { %10552 = vst [vmem:[#allocation109_spill] sm:$0xff] %v7508_v5  ;;  %v2584_v10 = vmul.f32 %v4143_v54, %v7334_v28  ;;  %v2773_v21 = vmul.f32 %v4143_v54, %v7340_v43  ;;  %v2962_v17 = vmul.f32 %v4143_v54, %v7348_v62  ;;  %v3151_v41 = vmul.f32 %v4143_v54, %v7355_v2 }
 0x28c   : > { %v3340_v19 = vmul.f32 %v4143_v54, %v7362_v61  ;;  %v554_v33 = vsel %vm446_vm1, %v542_v24, 0.0  ;;  %v702_v5 = vadd.f32 %v694_v6, %v10553_v47  ;;  %v891_v35 = vadd.f32 %v883_v9, %v10554_v0  ;;  %v10557_v54 = vld [vmem:[#allocation234_spill] sm:$0xff] }
 0x28d   : > { %v712_v49 = vmul.f32 %v7262_v31, %v554_v33  ;;  %v901_v26 = vmul.f32 %v7268_v15, %v554_v33  ;;  %v1080_v34 = vadd.f32 %v1072_v7, %v10555_v16  ;;  %v1090_v1 = vmul.f32 %v7277_v59, %v554_v33  ;;  %v10560_v6 = vld [vmem:[#allocation278_spill] sm:$0xff]  ;;  %v10564_v7 = vld [vmem:[#allocation235_spill] sm:$0xff] }
 0x28e   : > { %v1269_v8 = vadd.f32 %v1261_v63, %v10556_v51  ;;  %v1279_v27 = vmul.f32 %v7287_v22, %v554_v33  ;;  %v1458_v53 = vadd.f32 %v1450_v38, %v10557_v54  ;;  %v1468_v47 = vmul.f32 %v10560_v6, %v554_v33  ;;  %v10568_v54 = vld [vmem:[#allocation236_spill] sm:$0xff] }
 0x28f   : > { %v7533_v42 = vadd.f32 %v712_v49, %v702_v5  ;;  %v7535_v24 = vadd.f32 %v901_v26, %v891_v35  ;;  %v1647_v0 = vadd.f32 %v1639_v13, %v10561_v55  ;;  %v7539_v9 = vadd.f32 %v1090_v1, %v1080_v34  ;;  %v10566_v49 = vld [vmem:[#allocation156_spill] sm:$0xff] }
 0x290   : > { %v7541_v40 = vadd.f32 %v1279_v27, %v1269_v8  ;;  %v1657_v16 = vmul.f32 %v7302_v18, %v554_v33  ;;  %v1836_v51 = vadd.f32 %v1828_v3, %v10564_v7  ;;  %v7545_v63 = vadd.f32 %v1468_v47, %v1458_v53  ;;  %v10569_v27 = vld [vmem:[#allocation157_spill] sm:$0xff] }
 0x291   : > { %10558 = vst [vmem:[#allocation194_spill] sm:$0xff] %v7533_v42  ;;  %10559 = vst [vmem:[#allocation88_spill] sm:$0xff] %v7535_v24  ;;  %v1846_v38 = vmul.f32 %v7309_v37, %v554_v33  ;;  %v2025_v5 = vadd.f32 %v2017_v44, %v10566_v49  ;;  %v2035_v26 = vmul.f32 %v7317_v60, %v554_v33  ;;  %v10572_v3 = vld [vmem:[#allocation237_spill] sm:$0xff] }
 0x292   : > { %10562 = vst [vmem:[#allocation195_spill] sm:$0xff] %v7539_v9  ;;  %10563 = vst [vmem:[#allocation99_spill] sm:$0xff] %v7541_v40  ;;  %v7550_v35 = vadd.f32 %v1657_v16, %v1647_v0  ;;  %v2214_v55 = vadd.f32 %v2206_v23, %v10568_v54  ;;  %v2224_v1 = vmul.f32 %v7324_v36, %v554_v33  ;;  %v10574_v0 = vld [vmem:[#allocation158_spill] sm:$0xff] }
 0x293   : > { %10565 = vst [vmem:[#allocation196_spill] sm:$0xff] %v7545_v63  ;;  %v2403_v8 = vadd.f32 %v2395_v39, %v10569_v27  ;;  %v7555_v34 = vadd.f32 %v1846_v38, %v1836_v51  ;;  %v7557_v13 = vadd.f32 %v2035_v26, %v2025_v5  ;;  %v2413_v53 = vmul.f32 %v7330_v58, %v554_v33  ;;  %v10576_v54 = vld [vmem:[#allocation238_spill] sm:$0xff]  ;;  %v10577_v38 = vld [vmem:[#allocation159_spill] sm:$0xff] }
 0x294   : > { %10567 = vst [vmem:[#allocation100_spill] sm:$0xff] %v7550_v35  ;;  %v2592_v47 = vadd.f32 %v2584_v10, %v10572_v3  ;;  %v7561_v7 = vadd.f32 %v2224_v1, %v2214_v55  ;;  %v2602_v44 = vmul.f32 %v7337_v52, %v554_v33  ;;  %v2781_v16 = vadd.f32 %v2773_v21, %v10574_v0  ;;  %v10580_v55 = vld [vmem:[#allocation239_spill] sm:$0xff]  ;;  %v10587_v35 = vld [vmem:[#allocation241_spill] sm:$0xff] }
 0x295   : > { %10570 = vst [vmem:[#allocation197_spill] sm:$0xff] %v7555_v34  ;;  %10571 = vst [vmem:[#allocation102_spill] sm:$0xff] %v7557_v13  ;;  %v2791_v23 = vmul.f32 %v7345_v14, %v554_v33  ;;  %v7566_v49 = vadd.f32 %v2413_v53, %v2403_v8  ;;  %v2970_v39 = vadd.f32 %v2962_v17, %v10576_v54  ;;  %v4144_v8 = vld [vmem:[#allocation2 + $0x18] sm:$0xff] }
 0x296   : > { %10573 = vst [vmem:[#allocation198_spill] sm:$0xff] %v7561_v7  ;;  %v2980_v51 = vmul.f32 %v7352_v4, %v554_v33  ;;  %v3159_v5 = vadd.f32 %v3151_v41, %v10577_v38  ;;  %v7571_v26 = vadd.f32 %v2602_v44, %v2592_v47  ;;  %v3169_v10 = vmul.f32 %v7358_v12, %v554_v33  ;;  %v10586_v7 = vld [vmem:[#allocation161_spill] sm:$0xff] }
 0x297   : > { %10575 = vst [vmem:[#allocation103_spill] sm:$0xff] %v7566_v49  ;;  %v7573_v27 = vadd.f32 %v2791_v23, %v2781_v16  ;;  %v3348_v1 = vadd.f32 %v3340_v19, %v10580_v55  ;;  %v3358_v21 = vmul.f32 %v7365_v57, %v554_v33  ;;  %v693_v53 = vmul.f32 %v4144_v8, %v7242_v25  ;;  %v540_v16 = vpop.permute.xlu0 %539 }
 0x298   : > { %10578 = vst [vmem:[#allocation199_spill] sm:$0xff] %v7571_v26  ;;  %v7577_v3 = vadd.f32 %v2980_v51, %v2970_v39  ;;  %v882_v17 = vmul.f32 %v4144_v8, %v7265_v48  ;;  %v7582_v0 = vadd.f32 %v3169_v10, %v3159_v5  ;;  %v1071_v41 = vmul.f32 %v4144_v8, %v7274_v45 }
 0x299   : > { %10579 = vst [vmem:[#allocation104_spill] sm:$0xff] %v7573_v27  ;;  %v1260_v47 = vmul.f32 %v4144_v8, %v7280_v46  ;;  %v1449_v44 = vmul.f32 %v4144_v8, %v7290_v50  ;;  %v7587_v23 = vadd.f32 %v3358_v21, %v3348_v1  ;;  %v1638_v19 = vmul.f32 %v4144_v8, %v7299_v20  ;;  %v10585_v27 = vld [vmem:[#allocation240_spill] sm:$0xff] }
 0x29a   : > { %10581 = vst [vmem:[#allocation200_spill] sm:$0xff] %v7577_v3  ;;  %10582 = vst [vmem:[#allocation108_spill] sm:$0xff] %v7582_v0  ;;  %v1827_v33 = vmul.f32 %v4144_v8, %v7306_v30  ;;  %v2016_v54 = vmul.f32 %v4144_v8, %v7312_v32  ;;  %v2205_v39 = vmul.f32 %v4144_v8, %v7320_v29  ;;  %v553_v21 = vsel %vm446_vm1, %v540_v16, 0.0  ;;  %v10590_v16 = vld [vmem:[#allocation162_spill] sm:$0xff] }
 0x29b   : > { %10583 = vst [vmem:[#allocation201_spill] sm:$0xff] %v7587_v23  ;;  %v2394_v51 = vmul.f32 %v4144_v8, %v7327_v11  ;;  %v2583_v38 = vmul.f32 %v4144_v8, %v7334_v28  ;;  %v2772_v5 = vmul.f32 %v4144_v8, %v7340_v43  ;;  %v2961_v10 = vmul.f32 %v4144_v8, %v7348_v62  ;;  %v10584_v23 = vld [vmem:[#allocation160_spill] sm:$0xff] }
 0x29c   : > { %v3150_v55 = vmul.f32 %v4144_v8, %v7355_v2  ;;  %v3339_v1 = vmul.f32 %v4144_v8, %v7362_v61  ;;  %v701_v0 = vadd.f32 %v693_v53, %v10584_v23  ;;  %v711_v3 = vmul.f32 %v7262_v31, %v553_v21 }
 0x29d   : > { %v890_v26 = vadd.f32 %v882_v17, %v10585_v27  ;;  %v900_v49 = vmul.f32 %v7268_v15, %v553_v21  ;;  %v1079_v13 = vadd.f32 %v1071_v41, %v10586_v7  ;;  %v1089_v34 = vmul.f32 %v7277_v59, %v553_v21  ;;  %v10593_v17 = vld [vmem:[#allocation242_spill] sm:$0xff] }
 0x29e   : > { %v1268_v63 = vadd.f32 %v1260_v47, %v10587_v35  ;;  %v1278_v40 = vmul.f32 %v7287_v22, %v553_v21  ;;  %v7609_v8 = vadd.f32 %v711_v3, %v701_v0  ;;  %v1457_v53 = vadd.f32 %v1449_v44, %v10590_v16  ;;  %v10595_v35 = vld [vmem:[#allocation163_spill] sm:$0xff] }
 0x29f   : > { %v7611_v9 = vadd.f32 %v900_v49, %v890_v26  ;;  %v1467_v23 = vmul.f32 %v10560_v6, %v553_v21  ;;  %v7615_v24 = vadd.f32 %v1089_v34, %v1079_v13  ;;  %v1646_v7 = vadd.f32 %v1638_v19, %v10593_v17  ;;  %v10596_v49 = vld [vmem:[#allocation243_spill] sm:$0xff]  ;;  %v10598_v34 = vld [vmem:[#allocation164_spill] sm:$0xff]  ;;  %v10600_v19 = vld [vmem:[#allocation165_spill] sm:$0xff] }
 0x2a0   : > { %10588 = vst [vmem:[#allocation110_spill] sm:$0xff] %v7609_v8  ;;  %v7617_v27 = vadd.f32 %v1278_v40, %v1268_v63  ;;  %v1656_v41 = vmul.f32 %v7302_v18, %v553_v21  ;;  %v1835_v47 = vadd.f32 %v1827_v33, %v10595_v35  ;;  %v1845_v3 = vmul.f32 %v7309_v37, %v553_v21 }
 0x2a1   : > { %10589 = vst [vmem:[#allocation202_spill] sm:$0xff] %v7611_v9  ;;  %10591 = vst [vmem:[#allocation111_spill] sm:$0xff] %v7615_v24  ;;  %v7621_v42 = vadd.f32 %v1467_v23, %v1457_v53  ;;  %v2024_v26 = vadd.f32 %v2016_v54, %v10596_v49  ;;  %v2034_v44 = vmul.f32 %v7317_v60, %v553_v21  ;;  %v10601_v23 = vld [vmem:[#allocation244_spill] sm:$0xff]  ;;  %v10619_v9 = vld [vmem:[#allocation249_spill] sm:$0xff] }
 0x2a2   : > { %10592 = vst [vmem:[#allocation203_spill] sm:$0xff] %v7617_v27  ;;  %v7626_v0 = vadd.f32 %v1656_v41, %v1646_v7  ;;  %v2213_v13 = vadd.f32 %v2205_v39, %v10598_v34  ;;  %v2223_v40 = vmul.f32 %v7324_v36, %v553_v21  ;;  %v7631_v63 = vadd.f32 %v1845_v3, %v1835_v47  ;;  %v10604_v7 = vld [vmem:[#allocation166_spill] sm:$0xff]  ;;  %v10606_v47 = vld [vmem:[#allocation245_spill] sm:$0xff] }
 0x2a3   : > { %10594 = vst [vmem:[#allocation112_spill] sm:$0xff] %v7621_v42  ;;  %v2402_v16 = vadd.f32 %v2394_v51, %v10600_v19  ;;  %v2412_v53 = vmul.f32 %v7330_v58, %v553_v21  ;;  %v2591_v33 = vadd.f32 %v2583_v38, %v10601_v23  ;;  %v7636_v17 = vadd.f32 %v2034_v44, %v2024_v26  ;;  %v10608_v19 = vld [vmem:[#allocation167_spill] sm:$0xff]  ;;  %v10609_v44 = vld [vmem:[#allocation246_spill] sm:$0xff] }
 0x2a4   : > { %10597 = vst [vmem:[#allocation204_spill] sm:$0xff] %v7626_v0  ;;  %10599 = vst [vmem:[#allocation114_spill] sm:$0xff] %v7631_v63  ;;  %v7638_v35 = vadd.f32 %v2223_v40, %v2213_v13  ;;  %v2601_v54 = vmul.f32 %v7337_v52, %v553_v21  ;;  %v2780_v41 = vadd.f32 %v2772_v5, %v10604_v7  ;;  %v10617_v0 = vld [vmem:[#allocation248_spill] sm:$0xff] }
 0x2a5   : > { %10602 = vst [vmem:[#allocation205_spill] sm:$0xff] %v7636_v17  ;;  %v7642_v49 = vadd.f32 %v2412_v53, %v2402_v16  ;;  %v2790_v39 = vmul.f32 %v7345_v14, %v553_v21  ;;  %v2969_v3 = vadd.f32 %v2961_v10, %v10606_v47  ;;  %v2979_v51 = vmul.f32 %v7352_v4, %v553_v21  ;;  %v4145_v16 = vld [vmem:[#allocation2 + $0x30] sm:$0xff] }
 0x2a6   : > { %10603 = vst [vmem:[#allocation115_spill] sm:$0xff] %v7638_v35  ;;  %v7647_v34 = vadd.f32 %v2601_v54, %v2591_v33  ;;  %v3158_v38 = vadd.f32 %v3150_v55, %v10608_v19  ;;  %v3168_v26 = vmul.f32 %v7358_v12, %v553_v21  ;;  %v3347_v13 = vadd.f32 %v3339_v1, %v10609_v44 }
 0x2a7   : > { %10605 = vst [vmem:[#allocation206_spill] sm:$0xff] %v7642_v49  ;;  %v7652_v40 = vadd.f32 %v2790_v39, %v2780_v41  ;;  %v7654_v23 = vadd.f32 %v2979_v51, %v2969_v3  ;;  %v3357_v5 = vmul.f32 %v7365_v57, %v553_v21  ;;  %v696_v53 = vmul.f32 %v4145_v16, %v7242_v25  ;;  %v546_v21 = vpop.permute.xlu1 %545 }
 0x2a8   : > { %10607 = vst [vmem:[#allocation116_spill] sm:$0xff] %v7647_v34  ;;  %v7658_v10 = vadd.f32 %v3168_v26, %v3158_v38  ;;  %v885_v33 = vmul.f32 %v4145_v16, %v7265_v48  ;;  %v1074_v54 = vmul.f32 %v4145_v16, %v7274_v45  ;;  %v1263_v55 = vmul.f32 %v4145_v16, %v7280_v46  ;;  %v10616_v34 = vld [vmem:[#allocation169_spill] sm:$0xff] }
 0x2a9   : > { %10610 = vst [vmem:[#allocation207_spill] sm:$0xff] %v7652_v40  ;;  %10611 = vst [vmem:[#allocation117_spill] sm:$0xff] %v7654_v23  ;;  %v7663_v7 = vadd.f32 %v3357_v5, %v3347_v13  ;;  %v1452_v1 = vmul.f32 %v4145_v16, %v7290_v50  ;;  %v1641_v41 = vmul.f32 %v4145_v16, %v7299_v20  ;;  %v556_v5 = vsel %vm446_vm1, %v546_v21, 0.0  ;;  %v10615_v23 = vld [vmem:[#allocation247_spill] sm:$0xff] }
 0x2aa   : > { %10612 = vst [vmem:[#allocation208_spill] sm:$0xff] %v7658_v10  ;;  %v1830_v39 = vmul.f32 %v4145_v16, %v7306_v30  ;;  %v2019_v47 = vmul.f32 %v4145_v16, %v7312_v32  ;;  %v2208_v3 = vmul.f32 %v4145_v16, %v7320_v29  ;;  %v2397_v51 = vmul.f32 %v4145_v16, %v7327_v11 }
 0x2ab   : > { %10613 = vst [vmem:[#allocation118_spill] sm:$0xff] %v7663_v7  ;;  %v2586_v19 = vmul.f32 %v4145_v16, %v7334_v28  ;;  %v2775_v38 = vmul.f32 %v4145_v16, %v7340_v43  ;;  %v2964_v26 = vmul.f32 %v4145_v16, %v7348_v62  ;;  %v3153_v44 = vmul.f32 %v4145_v16, %v7355_v2  ;;  %v10614_v7 = vld [vmem:[#allocation168_spill] sm:$0xff] }
 0x2ac   : > { %v3342_v13 = vmul.f32 %v4145_v16, %v7362_v61  ;;  %v704_v10 = vadd.f32 %v696_v53, %v10614_v7  ;;  %v893_v40 = vadd.f32 %v885_v33, %v10615_v23  ;;  %v1082_v49 = vadd.f32 %v1074_v54, %v10616_v34  ;;  %v10618_v16 = vld [vmem:[#allocation170_spill] sm:$0xff] }
 0x2ad   : > { %v714_v35 = vmul.f32 %v7262_v31, %v556_v5  ;;  %v903_v17 = vmul.f32 %v7268_v15, %v556_v5  ;;  %v1092_v63 = vmul.f32 %v7277_v59, %v556_v5  ;;  %v1271_v42 = vadd.f32 %v1263_v55, %v10617_v0  ;;  %v10625_v0 = vld [vmem:[#allocation171_spill] sm:$0xff] }
 0x2ae   : > { %v1281_v27 = vmul.f32 %v7287_v22, %v556_v5  ;;  %v1460_v24 = vadd.f32 %v1452_v1, %v10618_v16  ;;  %v1470_v21 = vmul.f32 %v10560_v6, %v556_v5  ;;  %v1649_v53 = vadd.f32 %v1641_v41, %v10619_v9  ;;  %v10627_v6 = vld [vmem:[#allocation250_spill] sm:$0xff]  ;;  %v10632_v41 = vld [vmem:[#allocation173_spill] sm:$0xff] }
 0x2af   : > { %v7689_v7 = vadd.f32 %v714_v35, %v704_v10  ;;  %v7691_v23 = vadd.f32 %v903_v17, %v893_v40  ;;  %v7693_v34 = vadd.f32 %v1092_v63, %v1082_v49  ;;  %v1659_v33 = vmul.f32 %v7302_v18, %v556_v5  ;;  %v10628_v17 = vld [vmem:[#allocation172_spill] sm:$0xff] }
 0x2b0   : > { %v7696_v54 = vadd.f32 %v1281_v27, %v1271_v42  ;;  %v7698_v8 = vadd.f32 %v1470_v21, %v1460_v24  ;;  %v1838_v55 = vadd.f32 %v1830_v39, %v10625_v0  ;;  %v1848_v1 = vmul.f32 %v7309_v37, %v556_v5  ;;  %v10630_v42 = vld [vmem:[#allocation251_spill] sm:$0xff]  ;;  %v10636_v0 = vld [vmem:[#allocation174_spill] sm:$0xff] }
 0x2b1   : > { %10620 = vst [vmem:[#allocation209_spill] sm:$0xff] %v7689_v7  ;;  %10621 = vst [vmem:[#allocation119_spill] sm:$0xff] %v7691_v23  ;;  %v7702_v16 = vadd.f32 %v1659_v33, %v1649_v53  ;;  %v2027_v9 = vadd.f32 %v2019_v47, %v10627_v6  ;;  %v2037_v35 = vmul.f32 %v7317_v60, %v556_v5  ;;  %v10633_v53 = vld [vmem:[#allocation252_spill] sm:$0xff] }
 0x2b2   : > { %10622 = vst [vmem:[#allocation210_spill] sm:$0xff] %v7693_v34  ;;  %10623 = vst [vmem:[#allocation120_spill] sm:$0xff] %v7696_v54  ;;  %v2216_v40 = vadd.f32 %v2208_v3, %v10628_v17  ;;  %v7707_v63 = vadd.f32 %v1848_v1, %v1838_v55  ;;  %v2226_v49 = vmul.f32 %v7324_v36, %v556_v5  ;;  %v10649_v34 = vld [vmem:[#allocation278_spill] sm:$0xff] }
 0x2b3   : > { %10624 = vst [vmem:[#allocation211_spill] sm:$0xff] %v7698_v8  ;;  %10626 = vst [vmem:[#allocation121_spill] sm:$0xff] %v7702_v16  ;;  %v2405_v27 = vadd.f32 %v2397_v51, %v10630_v42  ;;  %v2415_v24 = vmul.f32 %v7330_v58, %v556_v5  ;;  %v7712_v10 = vadd.f32 %v2037_v35, %v2027_v9  ;;  %v10638_v9 = vld [vmem:[#allocation253_spill] sm:$0xff]  ;;  %v10640_v42 = vld [vmem:[#allocation175_spill] sm:$0xff] }
 0x2b4   : > { %10629 = vst [vmem:[#allocation212_spill] sm:$0xff] %v7707_v63  ;;  %v2594_v39 = vadd.f32 %v2586_v19, %v10632_v41  ;;  %v2604_v21 = vmul.f32 %v7337_v52, %v556_v5  ;;  %v2783_v6 = vadd.f32 %v2775_v38, %v10633_v53  ;;  %v7717_v47 = vadd.f32 %v2226_v49, %v2216_v40  ;;  %v4146_v49 = vld [vmem:[#allocation2 + $0x28] sm:$0xff] }
 0x2b5   : > { %10631 = vst [vmem:[#allocation122_spill] sm:$0xff] %v7712_v10  ;;  %v7719_v33 = vadd.f32 %v2415_v24, %v2405_v27  ;;  %v2793_v3 = vmul.f32 %v7345_v14, %v556_v5  ;;  %v2972_v55 = vadd.f32 %v2964_v26, %v10636_v0  ;;  %v2982_v51 = vmul.f32 %v7352_v4, %v556_v5  ;;  %v10647_v63 = vld [vmem:[#allocation177_spill] sm:$0xff] }
 0x2b6   : > { %10634 = vst [vmem:[#allocation213_spill] sm:$0xff] %v7717_v47  ;;  %v7723_v1 = vadd.f32 %v2604_v21, %v2594_v39  ;;  %v3161_v35 = vadd.f32 %v3153_v44, %v10638_v9  ;;  %v3171_v19 = vmul.f32 %v7358_v12, %v556_v5  ;;  %v3350_v38 = vadd.f32 %v3342_v13, %v10640_v42 }
 0x2b7   : > { %10635 = vst [vmem:[#allocation123_spill] sm:$0xff] %v7719_v33  ;;  %v7728_v17 = vadd.f32 %v2793_v3, %v2783_v6  ;;  %v3360_v40 = vmul.f32 %v7365_v57, %v556_v5  ;;  %v695_v27 = vmul.f32 %v4146_v49, %v7242_v25  ;;  %v7733_v24 = vadd.f32 %v2982_v51, %v2972_v55  ;;  %v544_v5 = vpop.permute.xlu0 %543  ;;  %v10646_v33 = vld [vmem:[#allocation255_spill] sm:$0xff] }
 0x2b8   : > { %10637 = vst [vmem:[#allocation214_spill] sm:$0xff] %v7723_v1  ;;  %v7735_v26 = vadd.f32 %v3171_v19, %v3161_v35  ;;  %v884_v41 = vmul.f32 %v4146_v49, %v7265_v48  ;;  %v1073_v39 = vmul.f32 %v4146_v49, %v7274_v45  ;;  %v1262_v21 = vmul.f32 %v4146_v49, %v7280_v46 }
 0x2b9   : > { %10639 = vst [vmem:[#allocation124_spill] sm:$0xff] %v7728_v17  ;;  %10641 = vst [vmem:[#allocation215_spill] sm:$0xff] %v7733_v24  ;;  %v7739_v44 = vadd.f32 %v3360_v40, %v3350_v38  ;;  %v1451_v53 = vmul.f32 %v4146_v49, %v7290_v50  ;;  %v1640_v13 = vmul.f32 %v4146_v49, %v7299_v20  ;;  %v555_v38 = vsel %vm446_vm1, %v544_v5, 0.0  ;;  %v10644_v40 = vld [vmem:[#allocation254_spill] sm:$0xff] }
 0x2ba   : > { %10642 = vst [vmem:[#allocation125_spill] sm:$0xff] %v7735_v26  ;;  %v1829_v6 = vmul.f32 %v4146_v49, %v7306_v30  ;;  %v2018_v3 = vmul.f32 %v4146_v49, %v7312_v32  ;;  %v2207_v0 = vmul.f32 %v4146_v49, %v7320_v29  ;;  %v2396_v55 = vmul.f32 %v4146_v49, %v7327_v11  ;;  %v10645_v26 = vld [vmem:[#allocation176_spill] sm:$0xff] }
 0x2bb   : > { %10643 = vst [vmem:[#allocation216_spill] sm:$0xff] %v7739_v44  ;;  %v2585_v51 = vmul.f32 %v4146_v49, %v7334_v28  ;;  %v2774_v9 = vmul.f32 %v4146_v49, %v7340_v43  ;;  %v2963_v35 = vmul.f32 %v4146_v49, %v7348_v62  ;;  %v3152_v19 = vmul.f32 %v4146_v49, %v7355_v2 }
 0x2bc   : > { %v3341_v42 = vmul.f32 %v4146_v49, %v7362_v61  ;;  %v703_v44 = vadd.f32 %v695_v27, %v10644_v40  ;;  %v892_v24 = vadd.f32 %v884_v41, %v10645_v26  ;;  %v713_v17 = vmul.f32 %v7262_v31, %v555_v38  ;;  %v10648_v49 = vld [vmem:[#allocation256_spill] sm:$0xff]  ;;  %v10653_v41 = vld [vmem:[#allocation178_spill] sm:$0xff] }
 0x2bd   : > { %v902_v1 = vmul.f32 %v7268_v15, %v555_v38  ;;  %v1081_v47 = vadd.f32 %v1073_v39, %v10646_v33  ;;  %v1091_v10 = vmul.f32 %v7277_v59, %v555_v38  ;;  %v1270_v16 = vadd.f32 %v1262_v21, %v10647_v63  ;;  %v10656_v39 = vld [vmem:[#allocation63_spill] sm:$0xff] }
 0x2be   : > { %v1280_v8 = vmul.f32 %v7287_v22, %v555_v38  ;;  %v1459_v54 = vadd.f32 %v1451_v53, %v10648_v49  ;;  %v1469_v5 = vmul.f32 %v10649_v34, %v555_v38  ;;  %v7765_v23 = vadd.f32 %v713_v17, %v703_v44  ;;  %v10657_v49 = vld [vmem:[#allocation64_spill] sm:$0xff] }
 0x2bf   : > { %v7767_v27 = vadd.f32 %v902_v1, %v892_v24  ;;  %v7769_v26 = vadd.f32 %v1091_v10, %v1081_v47  ;;  %v1648_v40 = vadd.f32 %v1640_v13, %v10653_v41  ;;  %v1658_v63 = vmul.f32 %v7302_v18, %v555_v38  ;;  %v10658_v1 = vld [vmem:[#allocation65_spill] sm:$0xff] }
 0x2c0   : > { %10650 = vst [vmem:[#allocation126_spill] sm:$0xff] %v7765_v23  ;;  %v7772_v7 = vadd.f32 %v1280_v8, %v1270_v16  ;;  %v7774_v33 = vadd.f32 %v1469_v5, %v1459_v54  ;;  %v1837_v21 = vadd.f32 %v1829_v6, %v10656_v39  ;;  %v1847_v53 = vmul.f32 %v7309_v37, %v555_v38  ;;  %v10660_v8 = vld [vmem:[#allocation66_spill] sm:$0xff]  ;;  %v10663_v6 = vld [vmem:[#allocation67_spill] sm:$0xff] }
 0x2c1   : > { %10651 = vst [vmem:[#allocation217_spill] sm:$0xff] %v7767_v27  ;;  %10652 = vst [vmem:[#allocation127_spill] sm:$0xff] %v7769_v26  ;;  %v2026_v34 = vadd.f32 %v2018_v3, %v10657_v49  ;;  %v2036_v17 = vmul.f32 %v7317_v60, %v555_v38  ;;  %v2215_v24 = vadd.f32 %v2207_v0, %v10658_v1  ;;  %v10666_v0 = vld [vmem:[#allocation68_spill] sm:$0xff] }
 0x2c2   : > { %10654 = vst [vmem:[#allocation218_spill] sm:$0xff] %v7772_v7  ;;  %10655 = vst [vmem:[#allocation128_spill] sm:$0xff] %v7774_v33  ;;  %v7782_v10 = vadd.f32 %v1658_v63, %v1648_v40  ;;  %v2225_v47 = vmul.f32 %v7324_v36, %v555_v38  ;;  %v2404_v16 = vadd.f32 %v2396_v55, %v10660_v8  ;;  %v10668_v55 = vld [vmem:[#allocation69_spill] sm:$0xff]  ;;  %v10681_v27 = vld [vmem:[#allocation260_spill] sm:$0xff] }
 0x2c3   : > { %v2414_v54 = vmul.f32 %v7330_v58, %v555_v38  ;;  %v7787_v44 = vadd.f32 %v1847_v53, %v1837_v21  ;;  %v7789_v13 = vadd.f32 %v2036_v17, %v2026_v34  ;;  %v2593_v5 = vadd.f32 %v2585_v51, %v10663_v6  ;;  %v10669_v34 = vld [vmem:[#allocation70_spill] sm:$0xff] }
 0x2c4   : > { %10659 = vst [vmem:[#allocation219_spill] sm:$0xff] %v7782_v10  ;;  %v2603_v3 = vmul.f32 %v7337_v52, %v555_v38  ;;  %v7793_v41 = vadd.f32 %v2225_v47, %v2215_v24  ;;  %v2782_v40 = vadd.f32 %v2774_v9, %v10666_v0  ;;  %v2792_v63 = vmul.f32 %v7345_v14, %v555_v38  ;;  %v10671_v24 = vld [vmem:[#allocation71_spill] sm:$0xff]  ;;  %v4147_v9 = vld [vmem:[#allocation2 + $0x40] sm:$0xff] }
 0x2c5   : > { %10661 = vst [vmem:[#allocation129_spill] sm:$0xff] %v7787_v44  ;;  %10662 = vst [vmem:[#allocation220_spill] sm:$0xff] %v7789_v13  ;;  %v7795_v39 = vadd.f32 %v2414_v54, %v2404_v16  ;;  %v2971_v1 = vadd.f32 %v2963_v35, %v10668_v55  ;;  %v2981_v21 = vmul.f32 %v7352_v4, %v555_v38  ;;  %v10678_v44 = vld [vmem:[#allocation258_spill] sm:$0xff] }
 0x2c6   : > { %10664 = vst [vmem:[#allocation130_spill] sm:$0xff] %v7793_v41  ;;  %v7799_v49 = vadd.f32 %v2603_v3, %v2593_v5  ;;  %v3160_v53 = vadd.f32 %v3152_v19, %v10669_v34  ;;  %v7804_v17 = vadd.f32 %v2792_v63, %v2782_v40  ;;  %v3170_v51 = vmul.f32 %v7358_v12, %v555_v38 }
 0x2c7   : > { %10665 = vst [vmem:[#allocation221_spill] sm:$0xff] %v7795_v39  ;;  %v3349_v47 = vadd.f32 %v3341_v42, %v10671_v24  ;;  %v3359_v8 = vmul.f32 %v7365_v57, %v555_v38  ;;  %v7809_v16 = vadd.f32 %v2981_v21, %v2971_v1  ;;  %v698_v54 = vmul.f32 %v4147_v9, %v7242_v25  ;;  %v550_v42 = vpop.permute.xlu1 %549  ;;  %v10677_v39 = vld [vmem:[#allocation257_spill] sm:$0xff] }
 0x2c8   : > { %10667 = vst [vmem:[#allocation131_spill] sm:$0xff] %v7799_v49  ;;  %10670 = vst [vmem:[#allocation222_spill] sm:$0xff] %v7804_v17  ;;  %v887_v6 = vmul.f32 %v4147_v9, %v7265_v48  ;;  %v1076_v35 = vmul.f32 %v4147_v9, %v7274_v45  ;;  %v7814_v5 = vadd.f32 %v3170_v51, %v3160_v53 }
 0x2c9   : > { %10672 = vst [vmem:[#allocation132_spill] sm:$0xff] %v7809_v16  ;;  %v7816_v19 = vadd.f32 %v3359_v8, %v3349_v47  ;;  %v1265_v3 = vmul.f32 %v4147_v9, %v7280_v46  ;;  %v1454_v0 = vmul.f32 %v4147_v9, %v7290_v50  ;;  %v1643_v38 = vmul.f32 %v4147_v9, %v7299_v20  ;;  %v10675_v8 = vld [vmem:[#allocation72_spill] sm:$0xff]  ;;  %v10676_v16 = vld [vmem:[#allocation73_spill] sm:$0xff] }
 0x2ca   : > { %10673 = vst [vmem:[#allocation223_spill] sm:$0xff] %v7814_v5  ;;  %v1832_v40 = vmul.f32 %v4147_v9, %v7306_v30  ;;  %v2021_v63 = vmul.f32 %v4147_v9, %v7312_v32  ;;  %v2210_v55 = vmul.f32 %v4147_v9, %v7320_v29  ;;  %v2399_v1 = vmul.f32 %v4147_v9, %v7327_v11 }
 0x2cb   : > { %10674 = vst [vmem:[#allocation133_spill] sm:$0xff] %v7816_v19  ;;  %v2588_v21 = vmul.f32 %v4147_v9, %v7334_v28  ;;  %v2777_v34 = vmul.f32 %v4147_v9, %v7340_v43  ;;  %v2966_v53 = vmul.f32 %v4147_v9, %v7348_v62  ;;  %v3155_v51 = vmul.f32 %v4147_v9, %v7355_v2 }
 0x2cc   : > { %v3344_v24 = vmul.f32 %v4147_v9, %v7362_v61  ;;  %v558_v47 = vsel %vm446_vm1, %v550_v42, 0.0  ;;  %v706_v19 = vadd.f32 %v698_v54, %v10675_v8  ;;  %v895_v17 = vadd.f32 %v887_v6, %v10676_v16  ;;  %v10679_v9 = vld [vmem:[#allocation259_spill] sm:$0xff]  ;;  %v10680_v54 = vld [vmem:[#allocation278_spill] sm:$0xff] }
 0x2cd   : > { %v716_v5 = vmul.f32 %v7262_v31, %v558_v47  ;;  %v905_v49 = vmul.f32 %v7268_v15, %v558_v47  ;;  %v1084_v41 = vadd.f32 %v1076_v35, %v10677_v39  ;;  %v1094_v13 = vmul.f32 %v7277_v59, %v558_v47  ;;  %v10682_v35 = vld [vmem:[#allocation261_spill] sm:$0xff] }
 0x2ce   : > { %v1273_v10 = vadd.f32 %v1265_v3, %v10678_v44  ;;  %v1283_v33 = vmul.f32 %v7287_v22, %v558_v47  ;;  %v1462_v7 = vadd.f32 %v1454_v0, %v10679_v9  ;;  %v1472_v8 = vmul.f32 %v10680_v54, %v558_v47  ;;  %v10684_v9 = vld [vmem:[#allocation263_spill] sm:$0xff] }
 0x2cf   : > { %v7841_v26 = vadd.f32 %v716_v5, %v706_v19  ;;  %v7843_v42 = vadd.f32 %v905_v49, %v895_v17  ;;  %v1651_v16 = vadd.f32 %v1643_v38, %v10681_v27  ;;  %v7847_v6 = vadd.f32 %v1094_v13, %v1084_v41  ;;  %v10683_v5 = vld [vmem:[#allocation262_spill] sm:$0xff] }
 0x2d0   : > { %v7849_v23 = vadd.f32 %v1283_v33, %v1273_v10  ;;  %v1661_v39 = vmul.f32 %v7302_v18, %v558_v47  ;;  %v1840_v44 = vadd.f32 %v1832_v40, %v10682_v35  ;;  %v7853_v3 = vadd.f32 %v1472_v8, %v1462_v7  ;;  %v10685_v33 = vld [vmem:[#allocation264_spill] sm:$0xff]  ;;  %v10686_v40 = vld [vmem:[#allocation265_spill] sm:$0xff] }
 0x2d1   : > { %v1850_v0 = vmul.f32 %v7309_v37, %v558_v47  ;;  %v2029_v19 = vadd.f32 %v2021_v63, %v10683_v5  ;;  %v2039_v49 = vmul.f32 %v7317_v60, %v558_v47  ;;  %v2218_v27 = vadd.f32 %v2210_v55, %v10684_v9 }
 0x2d2   : > { %v7858_v17 = vadd.f32 %v1661_v39, %v1651_v16  ;;  %v2228_v13 = vmul.f32 %v7324_v36, %v558_v47  ;;  %v2407_v10 = vadd.f32 %v2399_v1, %v10685_v33  ;;  %v2417_v7 = vmul.f32 %v7330_v58, %v558_v47  ;;  %v10687_v16 = vld [vmem:[#allocation74_spill] sm:$0xff]  ;;  %v10688_v1 = vld [vmem:[#allocation75_spill] sm:$0xff] }
 0x2d3   : > { %v7863_v41 = vadd.f32 %v1850_v0, %v1840_v44  ;;  %v7865_v38 = vadd.f32 %v2039_v49, %v2029_v19  ;;  %v2596_v8 = vadd.f32 %v2588_v21, %v10686_v40  ;;  %v2606_v63 = vmul.f32 %v7337_v52, %v558_v47  ;;  %v10689_v19 = vld [vmem:[#allocation76_spill] sm:$0xff] }
 0x2d4   : > { %v7869_v35 = vadd.f32 %v2228_v13, %v2218_v27  ;;  %v2785_v39 = vadd.f32 %v2777_v34, %v10687_v16  ;;  %v2795_v55 = vmul.f32 %v7345_v14, %v558_v47  ;;  %v7876_v5 = vadd.f32 %v2417_v7, %v2407_v10  ;;  %v10690_v27 = vld [vmem:[#allocation107_spill] sm:$0xff]  ;;  %v548_v16 = vpop.permute.xlu0 %547 }
 0x2d5   : > { %v2974_v44 = vadd.f32 %v2966_v53, %v10688_v1  ;;  %v2984_v0 = vmul.f32 %v7352_v4, %v558_v47  ;;  %v3163_v49 = vadd.f32 %v3155_v51, %v10689_v19  ;;  %v7883_v21 = vadd.f32 %v2606_v63, %v2596_v8  ;;  %v4148_v10 = vld [vmem:[#allocation2 + $0x38] sm:$0xff] }
 0x2d6   : > { %v7885_v9 = vadd.f32 %v2795_v55, %v2785_v39  ;;  %v3173_v34 = vmul.f32 %v7358_v12, %v558_v47  ;;  %v3352_v13 = vadd.f32 %v3344_v24, %v10690_v27  ;;  %v3362_v53 = vmul.f32 %v7365_v57, %v558_v47 }
 0x2d7   : > { %v7891_v33 = vadd.f32 %v2984_v0, %v2974_v44  ;;  %v697_v7 = vmul.f32 %v4148_v10, %v7242_v25  ;;  %v886_v51 = vmul.f32 %v4148_v10, %v7265_v48  ;;  %v1075_v8 = vmul.f32 %v4148_v10, %v7274_v45 }
 0x2d8   : > { %v7898_v40 = vadd.f32 %v3173_v34, %v3163_v49  ;;  %v1264_v63 = vmul.f32 %v4148_v10, %v7280_v46  ;;  %v1453_v24 = vmul.f32 %v4148_v10, %v7290_v50  ;;  %v7905_v39 = vadd.f32 %v3362_v53, %v3352_v13 }
 0x2d9   : > { %v1642_v47 = vmul.f32 %v4148_v10, %v7299_v20  ;;  %v1831_v25 = vmul.f32 %v4148_v10, %v7306_v30  ;;  %v2020_v48 = vmul.f32 %v4148_v10, %v7312_v32  ;;  %v2209_v55 = vmul.f32 %v4148_v10, %v7320_v29  ;;  %v10691_v29 = vld [vmem:[#allocation62_spill] sm:$0xff] }
 0x2da   : > { %v2398_v45 = vmul.f32 %v4148_v10, %v7327_v11  ;;  %v2587_v46 = vmul.f32 %v4148_v10, %v7334_v28  ;;  %v2776_v50 = vmul.f32 %v4148_v10, %v7340_v43  ;;  %v2965_v1 = vmul.f32 %v4148_v10, %v7348_v62  ;;  %v10692_v28 = vld [vmem:[#allocation266_spill] sm:$0xff]  ;;  %v10693_v62 = vld [vmem:[#allocation267_spill] sm:$0xff] }
 0x2db   : > { %v3154_v20 = vmul.f32 %v4148_v10, %v7355_v2  ;;  %v3343_v30 = vmul.f32 %v4148_v10, %v7362_v61  ;;  %v557_v32 = vsel %vm446_vm1, %v548_v16, 0.0  ;;  %v705_v44 = vadd.f32 %v697_v7, %v10691_v29  ;;  %v10694_v61 = vld [vmem:[#allocation81_spill] sm:$0xff] }
 0x2dc   : > { %v715_v11 = vmul.f32 %v7262_v31, %v557_v32  ;;  %v894_v0 = vadd.f32 %v886_v51, %v10692_v28  ;;  %v904_v43 = vmul.f32 %v7268_v15, %v557_v32  ;;  %v1083_v19 = vadd.f32 %v1075_v8, %v10693_v62  ;;  %v10695_v31 = vld [vmem:[#allocation268_spill] sm:$0xff]  ;;  %v10698_v29 = vld [vmem:[#allocation89_spill] sm:$0xff]  ;;  %v10699_v28 = vld [vmem:[#allocation271_spill] sm:$0xff] }
 0x2dd   : > { %v1093_v2 = vmul.f32 %v7277_v59, %v557_v32  ;;  %v1272_v49 = vadd.f32 %v1264_v63, %v10694_v61  ;;  %v1282_v34 = vmul.f32 %v7287_v22, %v557_v32  ;;  %v1461_v53 = vadd.f32 %v1453_v24, %v10695_v31  ;;  %v10696_v59 = vld [vmem:[#allocation269_spill] sm:$0xff]  ;;  %v10697_v63 = vld [vmem:[#allocation270_spill] sm:$0xff] }
 0x2de   : > { %v7937_v27 = vadd.f32 %v715_v11, %v705_v44  ;;  %v7939_v13 = vadd.f32 %v904_v43, %v894_v0  ;;  %v1471_v15 = vmul.f32 %v10680_v54, %v557_v32  ;;  %v1650_v51 = vadd.f32 %v1642_v47, %v10696_v59  ;;  %v10700_v43 = vld [vmem:[#allocation272_spill] sm:$0xff]  ;;  %v10701_v62 = vld [vmem:[#allocation273_spill] sm:$0xff]  ;;  %v10704_v61 = vld [vmem:[#allocation274_spill] sm:$0xff] }
 0x2df   : > { %v7945_v10 = vadd.f32 %v1093_v2, %v1083_v19  ;;  %v7947_v7 = vadd.f32 %v1282_v34, %v1272_v49  ;;  %v1660_v22 = vmul.f32 %v7302_v18, %v557_v32  ;;  %v1839_v16 = vadd.f32 %v1831_v25, %v10697_v63  ;;  %v570_v19 = vpop.permute.xlu1 %569  ;;  %v568_v2 = vpop.permute.xlu0 %567 }
 0x2e0   : > { %v7953_v8 = vadd.f32 %v1471_v15, %v1461_v53  ;;  %v1849_v24 = vmul.f32 %v7309_v37, %v557_v32  ;;  %v2028_v54 = vadd.f32 %v2020_v48, %v10698_v29  ;;  %v2038_v11 = vmul.f32 %v7317_v60, %v557_v32  ;;  %v10708_v15 = vld [vmem:[#allocation276_spill] sm:$0xff] }
 0x2e1   : > { %v7960_v44 = vadd.f32 %v1660_v22, %v1650_v51  ;;  %v2217_v47 = vadd.f32 %v2209_v55, %v10699_v28  ;;  %v2227_v18 = vmul.f32 %v7324_v36, %v557_v32  ;;  %v2406_v25 = vadd.f32 %v2398_v45, %v10700_v43  ;;  %v10709_v51 = vld [vmem:[#allocation277_spill] sm:$0xff] }
 0x2e2   : > { %v7967_v0 = vadd.f32 %v1849_v24, %v1839_v16  ;;  %v2416_v37 = vmul.f32 %v7330_v58, %v557_v32  ;;  %v2595_v48 = vadd.f32 %v2587_v46, %v10701_v62  ;;  %v7974_v60 = vadd.f32 %v2038_v11, %v2028_v54  ;;  %v10706_v46 = vld [vmem:[#allocation275_spill] sm:$0xff] }
 0x2e3   : > { %v7976_v55 = vadd.f32 %v2227_v18, %v2217_v47  ;;  %v2605_v36 = vmul.f32 %v7337_v52, %v557_v32  ;;  %v2784_v49 = vadd.f32 %v2776_v50, %v10704_v61  ;;  %v2794_v58 = vmul.f32 %v7345_v14, %v557_v32  ;;  %v572_v54 = vpop.permute.xlu0 %571 }
 0x2e4   : > { %10702 = vst [vmem:[#allocation179_spill] sm:$0xff] %v7974_v60  ;;  %v7980_v45 = vadd.f32 %v2416_v37, %v2406_v25  ;;  %v2973_v34 = vadd.f32 %v2965_v1, %v10706_v46  ;;  %v2983_v31 = vmul.f32 %v7352_v4, %v557_v32  ;;  %v3162_v59 = vadd.f32 %v3154_v20, %v10708_v15 }
 0x2e5   : > { %10703 = vst [vmem:[#allocation134_spill] sm:$0xff] %v7976_v55  ;;  %v7985_v53 = vadd.f32 %v2605_v36, %v2595_v48  ;;  %v3172_v52 = vmul.f32 %v7358_v12, %v557_v32  ;;  %v3351_v50 = vadd.f32 %v3343_v30, %v10709_v51  ;;  %v7990_v22 = vadd.f32 %v2794_v58, %v2784_v49  ;;  %v10726_v55 = vld [vmem:[#allocation79_spill] sm:$0xff] }
 0x2e6   : > { %10705 = vst [vmem:[#allocation180_spill] sm:$0xff] %v7980_v45  ;;  %v7992_v14 = vadd.f32 %v2983_v31, %v2973_v34  ;;  %v3361_v1 = vmul.f32 %v7365_v57, %v557_v32  ;;  %v7996_v4 = vstv %s7874_s3  ;;  %v8001_v12 = vstv %s7881_s20  ;;  %v574_v32 = vpop.permute.xlu1 %573  ;;  %s8557_s3 = sld [smem:[#allocation3 + $0x4f]] }
 0x2e7   : > { %10707 = vst [vmem:[#allocation135_spill] sm:$0xff] %v7985_v53  ;;  %10710 = vst [vmem:[#allocation181_spill] sm:$0xff] %v7990_v22  ;;  %v7998_v63 = vadd.f32 %v3172_v52, %v3162_v59  ;;  %v8004_v20 = vstv %s7889_s9  ;;  %v8007_v30 = vstv %s7896_s5  ;;  %v8012_v24 = vstv %s7903_s21  ;;  %v10714_v52 = vld [vmem:[#allocation279_spill] sm:$0xff]  ;;  %v10724_v53 = vld [vmem:[#allocation78_spill] sm:$0xff]  ;;  %s8567_s20 = sld [smem:[#allocation3 + $0x50]] }
 0x2e8   : > { %10711 = vst [vmem:[#allocation136_spill] sm:$0xff] %v7992_v14  ;;  %v8009_v16 = vadd.f32 %v3361_v1, %v3351_v50  ;;  %v8015_v29 = vstv %s7910_s1  ;;  %v8018_v57 = vstv %s7916_s4  ;;  %v8021_v11 = vstv %s7923_s0  ;;  %v10716_v50 = vld [vmem:[#allocation280_spill] sm:$0xff]  ;;  %v10722_v14 = vld [vmem:[#allocation85_spill] sm:$0xff]  ;;  %s8577_s9 = sld [smem:[#allocation3 + $0x58]] }
 0x2e9   : > { %10712 = vst [vmem:[#allocation182_spill] sm:$0xff] %v7998_v63  ;;  %v8024_v28 = vstv %s7929_s11  ;;  %v8027_v47 = vstv %s7935_s15  ;;  %v8030_v18 = vstv %s7943_s6  ;;  %v8033_v43 = vstv %s7951_s7  ;;  %s8591_s5 = sld [smem:[#allocation3 + $0x59]] }
 0x2ea   : > { %10713 = vst [vmem:[#allocation137_spill] sm:$0xff] %v8009_v16  ;;  %v8036_v25 = vstv %s7958_s16  ;;  %v8039_v37 = vstv %s7965_s25  ;;  %v8042_v62 = vstv %s7972_s2  ;;  %v584_v48 = vsel %vm445_vm0, %v570_v19, 0.0  ;;  %v10720_v16 = vld [vmem:[#allocation77_spill] sm:$0xff]  ;;  %s8605_s21 = sld [smem:[#allocation3 + $0x61]] }
 0x2eb   : > { %v583_v36 = vsel %vm445_vm0, %v568_v2, 0.0  ;;  %v8050_v61 = vsel %vm445_vm0, %v574_v32, 0.0  ;;  %v8054_v49 = vsel %vm445_vm0, %v572_v54, 0.0  ;;  %v728_v58 = vmul.f32 %v7996_v4, %v584_v48  ;;  %v10718_v32 = vld [vmem:[#allocation82_spill] sm:$0xff]  ;;  %s8615_s1 = sld [smem:[#allocation3 + $0x62]] }
 0x2ec   : > { %v917_v46 = vmul.f32 %v8001_v12, %v584_v48  ;;  %v1106_v34 = vmul.f32 %v8004_v20, %v584_v48  ;;  %v1295_v31 = vmul.f32 %v8007_v30, %v584_v48  ;;  %v1484_v19 = vmul.f32 %v8012_v24, %v584_v48  ;;  %s8625_s4 = sld [smem:[#allocation3 + $0x6a]] }
 0x2ed   : > { %v1673_v2 = vmul.f32 %v8015_v29, %v584_v48  ;;  %v1862_v15 = vmul.f32 %v8018_v57, %v584_v48  ;;  %v2051_v59 = vmul.f32 %v8021_v11, %v584_v48  ;;  %v8065_v51 = vadd.f32 %v728_v58, %v10714_v52  ;;  %v10728_v58 = vld [vmem:[#allocation90_spill] sm:$0xff]  ;;  %s8639_s0 = sld [smem:[#allocation3 + $0x6b]] }
 0x2ee   : > { %v8068_v1 = vadd.f32 %v917_v46, %v10716_v50  ;;  %v8071_v54 = vadd.f32 %v1106_v34, %v10718_v32  ;;  %v8074_v63 = vadd.f32 %v1295_v31, %v10720_v16  ;;  %v8077_v22 = vadd.f32 %v1484_v19, %v10722_v14  ;;  %v10730_v19 = vld [vmem:[#allocation80_spill] sm:$0xff]  ;;  %v10734_v32 = vld [vmem:[#allocation83_spill] sm:$0xff]  ;;  %s8653_s11 = sld [smem:[#allocation3 + $0x73]] }
 0x2ef   : > { %10715 = vst [vmem:[#allocation183_spill] sm:$0xff] %v8065_v51  ;;  %v8080_v45 = vadd.f32 %v1673_v2, %v10724_v53  ;;  %v8083_v60 = vadd.f32 %v1862_v15, %v10726_v55  ;;  %v8086_v52 = vadd.f32 %v2051_v59, %v10728_v58  ;;  %v2240_v46 = vmul.f32 %v8024_v28, %v584_v48  ;;  %v10732_v15 = vld [vmem:[#allocation93_spill] sm:$0xff]  ;;  %v10822_v51 = vld [vmem:[#allocation206_spill] sm:$0xff]  ;;  %s8663_s15 = sld [smem:[#allocation3 + $0x74]] }
 0x2f0   : > { %10717 = vst [vmem:[#allocation138_spill] sm:$0xff] %v8068_v1  ;;  %10719 = vst [vmem:[#allocation184_spill] sm:$0xff] %v8071_v54  ;;  %v2429_v34 = vmul.f32 %v8027_v47, %v584_v48  ;;  %v2618_v50 = vmul.f32 %v8030_v18, %v584_v48  ;;  %v2807_v16 = vmul.f32 %v8033_v43, %v584_v48  ;;  %s8677_s6 = sld [smem:[#allocation3 + $0x7c]] }
 0x2f1   : > { %10721 = vst [vmem:[#allocation139_spill] sm:$0xff] %v8074_v63  ;;  %10723 = vst [vmem:[#allocation185_spill] sm:$0xff] %v8077_v22  ;;  %v2996_v14 = vmul.f32 %v8036_v25, %v584_v48  ;;  %v3185_v31 = vmul.f32 %v8039_v37, %v584_v48  ;;  %v3374_v53 = vmul.f32 %v8042_v62, %v584_v48  ;;  %v10740_v63 = vld [vmem:[#allocation95_spill] sm:$0xff]  ;;  %v10742_v48 = vld [vmem:[#allocation86_spill] sm:$0xff]  ;;  %s8691_s7 = sld [smem:[#allocation3 + $0x7d]] }
 0x2f2   : > { %10725 = vst [vmem:[#allocation140_spill] sm:$0xff] %v8080_v45  ;;  %10727 = vst [vmem:[#allocation186_spill] sm:$0xff] %v8083_v60  ;;  %v727_v55 = vmul.f32 %v7996_v4, %v583_v36  ;;  %v8097_v2 = vadd.f32 %v2240_v46, %v10730_v19  ;;  %v8100_v59 = vadd.f32 %v2429_v34, %v10732_v15  ;;  %v10738_v45 = vld [vmem:[#allocation84_spill] sm:$0xff]  ;;  %v10744_v46 = vld [vmem:[#allocation97_spill] sm:$0xff]  ;;  %s8701_s16 = sld [smem:[#allocation3 + $0x85]] }
 0x2f3   : > { %10729 = vst [vmem:[#allocation141_spill] sm:$0xff] %v8086_v52  ;;  %v8103_v58 = vadd.f32 %v2618_v50, %v10734_v32  ;;  %v10736_v52 = vld [vmem:[#allocation94_spill] sm:$0xff]  ;;  %v8109_v22 = vadd.f32 %v2996_v14, %v10738_v45  ;;  %v8112_v54 = vadd.f32 %v3185_v31, %v10740_v63  ;;  %v8115_v1 = vadd.f32 %v3374_v53, %v10742_v48  ;;  %v10746_v31 = vld [vmem:[#allocation87_spill] sm:$0xff]  ;;  %v10750_v48 = vld [vmem:[#allocation224_spill] sm:$0xff]  ;;  %s8713_s25 = sld [smem:[#allocation3 + $0x86]] }
 0x2f4   : > { %10731 = vst [vmem:[#allocation187_spill] sm:$0xff] %v8097_v2  ;;  %10733 = vst [vmem:[#allocation142_spill] sm:$0xff] %v8100_v59  ;;  %v8106_v60 = vadd.f32 %v2807_v16, %v10736_v52  ;;  %v8118_v19 = vadd.f32 %v727_v55, %v10744_v46  ;;  %v916_v34 = vmul.f32 %v8001_v12, %v583_v36  ;;  %v10748_v55 = vld [vmem:[#allocation98_spill] sm:$0xff]  ;;  %v10758_v59 = vld [vmem:[#allocation92_spill] sm:$0xff]  ;;  %s10942_s2 = sld [smem:[#allocation44_spill]] }
 0x2f5   : > { %10735 = vst [vmem:[#allocation188_spill] sm:$0xff] %v8103_v58  ;;  %10739 = vst [vmem:[#allocation189_spill] sm:$0xff] %v8109_v22  ;;  %v1105_v50 = vmul.f32 %v8004_v20, %v583_v36  ;;  %v1294_v15 = vmul.f32 %v8007_v30, %v583_v36  ;;  %v1483_v52 = vmul.f32 %v8012_v24, %v583_v36 }
 0x2f6   : > { %10737 = vst [vmem:[#allocation143_spill] sm:$0xff] %v8106_v60  ;;  %10741 = vst [vmem:[#allocation144_spill] sm:$0xff] %v8112_v54  ;;  %v1672_v45 = vmul.f32 %v8015_v29, %v583_v36  ;;  %v1861_v16 = vmul.f32 %v8018_v57, %v583_v36  ;;  %v2050_v63 = vmul.f32 %v8021_v11, %v583_v36  ;;  %v10754_v54 = vld [vmem:[#allocation101_spill] sm:$0xff] }
 0x2f7   : > { %10743 = vst [vmem:[#allocation190_spill] sm:$0xff] %v8115_v1  ;;  %10745 = vst [vmem:[#allocation145_spill] sm:$0xff] %v8118_v19  ;;  %v2239_v14 = vmul.f32 %v8024_v28, %v583_v36  ;;  %v8129_v53 = vadd.f32 %v916_v34, %v10746_v31  ;;  %v8132_v32 = vadd.f32 %v1105_v50, %v10748_v55  ;;  %v10752_v19 = vld [vmem:[#allocation91_spill] sm:$0xff]  ;;  %v10756_v60 = vld [vmem:[#allocation225_spill] sm:$0xff] }
 0x2f8   : > { %v8135_v46 = vadd.f32 %v1294_v15, %v10750_v48  ;;  %v8138_v1 = vadd.f32 %v1483_v52, %v10752_v19  ;;  %v8141_v22 = vadd.f32 %v1672_v45, %v10754_v54  ;;  %v8144_v58 = vadd.f32 %v1861_v16, %v10756_v60  ;;  %v10760_v34 = vld [vmem:[#allocation105_spill] sm:$0xff]  ;;  %v10762_v45 = vld [vmem:[#allocation226_spill] sm:$0xff] }
 0x2f9   : > { %10747 = vst [vmem:[#allocation191_spill] sm:$0xff] %v8129_v53  ;;  %10749 = vst [vmem:[#allocation146_spill] sm:$0xff] %v8132_v32  ;;  %v8147_v2 = vadd.f32 %v2050_v63, %v10758_v59  ;;  %v8150_v31 = vadd.f32 %v2239_v14, %v10760_v34  ;;  %v2428_v50 = vmul.f32 %v8027_v47, %v583_v36  ;;  %v10764_v63 = vld [vmem:[#allocation96_spill] sm:$0xff]  ;;  %v10766_v48 = vld [vmem:[#allocation106_spill] sm:$0xff] }
 0x2fa   : > { %10751 = vst [vmem:[#allocation192_spill] sm:$0xff] %v8135_v46  ;;  %10753 = vst [vmem:[#allocation147_spill] sm:$0xff] %v8138_v1  ;;  %v2617_v15 = vmul.f32 %v8030_v18, %v583_v36  ;;  %v2806_v55 = vmul.f32 %v8033_v43, %v583_v36  ;;  %v2995_v19 = vmul.f32 %v8036_v25, %v583_v36  ;;  %v10774_v46 = vld [vmem:[#allocation194_spill] sm:$0xff] }
 0x2fb   : > { %10755 = vst [vmem:[#allocation193_spill] sm:$0xff] %v8141_v22  ;;  %10757 = vst [vmem:[#allocation148_spill] sm:$0xff] %v8144_v58  ;;  %v3184_v54 = vmul.f32 %v8039_v37, %v583_v36  ;;  %v3373_v52 = vmul.f32 %v8042_v62, %v583_v36  ;;  %v730_v60 = vmul.f32 %v7996_v4, %v8050_v61  ;;  %v10770_v58 = vld [vmem:[#allocation113_spill] sm:$0xff] }
 0x2fc   : > { %10759 = vst [vmem:[#allocation228_spill] sm:$0xff] %v8147_v2  ;;  %10761 = vst [vmem:[#allocation149_spill] sm:$0xff] %v8150_v31  ;;  %v919_v59 = vmul.f32 %v8001_v12, %v8050_v61  ;;  %v8163_v16 = vadd.f32 %v2428_v50, %v10762_v45  ;;  %v8166_v14 = vadd.f32 %v2617_v15, %v10764_v63  ;;  %v10768_v31 = vld [vmem:[#allocation227_spill] sm:$0xff]  ;;  %v10772_v22 = vld [vmem:[#allocation109_spill] sm:$0xff] }
 0x2fd   : > { %v8169_v34 = vadd.f32 %v2806_v55, %v10766_v48  ;;  %v8172_v2 = vadd.f32 %v2995_v19, %v10768_v31  ;;  %v8175_v36 = vadd.f32 %v3184_v54, %v10770_v58  ;;  %v8178_v1 = vadd.f32 %v3373_v52, %v10772_v22  ;;  %v10776_v50 = vld [vmem:[#allocation88_spill] sm:$0xff]  ;;  %v10778_v52 = vld [vmem:[#allocation195_spill] sm:$0xff] }
 0x2fe   : > { %10763 = vst [vmem:[#allocation229_spill] sm:$0xff] %v8163_v16  ;;  %10765 = vst [vmem:[#allocation150_spill] sm:$0xff] %v8166_v14  ;;  %v8181_v32 = vadd.f32 %v730_v60, %v10774_v46  ;;  %v8184_v45 = vadd.f32 %v919_v59, %v10776_v50  ;;  %v1108_v15 = vmul.f32 %v8004_v20, %v8050_v61  ;;  %v10780_v59 = vld [vmem:[#allocation99_spill] sm:$0xff]  ;;  %v10782_v48 = vld [vmem:[#allocation196_spill] sm:$0xff] }
 0x2ff   : > { %10767 = vst [vmem:[#allocation230_spill] sm:$0xff] %v8169_v34  ;;  %10769 = vst [vmem:[#allocation151_spill] sm:$0xff] %v8172_v2  ;;  %v1297_v55 = vmul.f32 %v8007_v30, %v8050_v61  ;;  %v1486_v31 = vmul.f32 %v8012_v24, %v8050_v61  ;;  %v1675_v58 = vmul.f32 %v8015_v29, %v8050_v61  ;;  %v10788_v2 = vld [vmem:[#allocation102_spill] sm:$0xff] }
 0x300   : > { %10771 = vst [vmem:[#allocation231_spill] sm:$0xff] %v8175_v36  ;;  %10773 = vst [vmem:[#allocation152_spill] sm:$0xff] %v8178_v1  ;;  %v1864_v22 = vmul.f32 %v8018_v57, %v8050_v61  ;;  %v2053_v46 = vmul.f32 %v8021_v11, %v8050_v61  ;;  %v2242_v19 = vmul.f32 %v8024_v28, %v8050_v61  ;;  %v10786_v1 = vld [vmem:[#allocation197_spill] sm:$0xff]  ;;  %v10790_v14 = vld [vmem:[#allocation198_spill] sm:$0xff] }
 0x301   : > { %10775 = vst [vmem:[#allocation232_spill] sm:$0xff] %v8181_v32  ;;  %10777 = vst [vmem:[#allocation153_spill] sm:$0xff] %v8184_v45  ;;  %v2431_v54 = vmul.f32 %v8027_v47, %v8050_v61  ;;  %v8203_v60 = vadd.f32 %v1108_v15, %v10778_v52  ;;  %v8206_v63 = vadd.f32 %v1297_v55, %v10780_v59  ;;  %v10784_v45 = vld [vmem:[#allocation100_spill] sm:$0xff]  ;;  %v10792_v15 = vld [vmem:[#allocation103_spill] sm:$0xff] }
 0x302   : > { %v8209_v50 = vadd.f32 %v1486_v31, %v10782_v48  ;;  %v8212_v32 = vadd.f32 %v1675_v58, %v10784_v45  ;;  %v8215_v36 = vadd.f32 %v1864_v22, %v10786_v1  ;;  %v8218_v34 = vadd.f32 %v2053_v46, %v10788_v2  ;;  %v578_v2 = vpop.permute.xlu1 %577  ;;  %v576_v58 = vpop.permute.xlu0 %575  ;;  %v10796_v48 = vld [vmem:[#allocation104_spill] sm:$0xff] }
 0x303   : > { %10779 = vst [vmem:[#allocation233_spill] sm:$0xff] %v8203_v60  ;;  %10781 = vst [vmem:[#allocation154_spill] sm:$0xff] %v8206_v63  ;;  %v8221_v16 = vadd.f32 %v2242_v19, %v10790_v14  ;;  %v8224_v52 = vadd.f32 %v2431_v54, %v10792_v15  ;;  %v2620_v55 = vmul.f32 %v8030_v18, %v8050_v61  ;;  %v10794_v54 = vld [vmem:[#allocation199_spill] sm:$0xff]  ;;  %v10806_v60 = vld [vmem:[#allocation202_spill] sm:$0xff] }
 0x304   : > { %10783 = vst [vmem:[#allocation234_spill] sm:$0xff] %v8209_v50  ;;  %10785 = vst [vmem:[#allocation155_spill] sm:$0xff] %v8212_v32  ;;  %v2809_v31 = vmul.f32 %v8033_v43, %v8050_v61  ;;  %v2998_v45 = vmul.f32 %v8036_v25, %v8050_v61  ;;  %v3187_v1 = vmul.f32 %v8039_v37, %v8050_v61  ;;  %v10804_v50 = vld [vmem:[#allocation110_spill] sm:$0xff] }
 0x305   : > { %10787 = vst [vmem:[#allocation235_spill] sm:$0xff] %v8215_v36  ;;  %10789 = vst [vmem:[#allocation156_spill] sm:$0xff] %v8218_v34  ;;  %v3376_v14 = vmul.f32 %v8042_v62, %v8050_v61  ;;  %v729_v22 = vmul.f32 %v7996_v4, %v8054_v49  ;;  %v918_v46 = vmul.f32 %v8001_v12, %v8054_v49  ;;  %v10800_v34 = vld [vmem:[#allocation108_spill] sm:$0xff]  ;;  %v10802_v36 = vld [vmem:[#allocation201_spill] sm:$0xff] }
 0x306   : > { %10791 = vst [vmem:[#allocation236_spill] sm:$0xff] %v8221_v16  ;;  %10793 = vst [vmem:[#allocation157_spill] sm:$0xff] %v8224_v52  ;;  %v1107_v19 = vmul.f32 %v8004_v20, %v8054_v49  ;;  %v8243_v59 = vadd.f32 %v2620_v55, %v10794_v54  ;;  %v8246_v15 = vadd.f32 %v2809_v31, %v10796_v48  ;;  %v10798_v52 = vld [vmem:[#allocation200_spill] sm:$0xff]  ;;  %v10808_v55 = vld [vmem:[#allocation111_spill] sm:$0xff] }
 0x307   : > { %v8249_v16 = vadd.f32 %v2998_v45, %v10798_v52  ;;  %v8252_v61 = vadd.f32 %v3187_v1, %v10800_v34  ;;  %v8255_v32 = vadd.f32 %v3376_v14, %v10802_v36  ;;  %v8258_v63 = vadd.f32 %v729_v22, %v10804_v50  ;;  %v10810_v14 = vld [vmem:[#allocation203_spill] sm:$0xff]  ;;  %v10814_v48 = vld [vmem:[#allocation204_spill] sm:$0xff] }
 0x308   : > { %10795 = vst [vmem:[#allocation237_spill] sm:$0xff] %v8243_v59  ;;  %10797 = vst [vmem:[#allocation158_spill] sm:$0xff] %v8246_v15  ;;  %v8261_v53 = vadd.f32 %v918_v46, %v10806_v60  ;;  %v8264_v54 = vadd.f32 %v1107_v19, %v10808_v55  ;;  %v1296_v31 = vmul.f32 %v8007_v30, %v8054_v49  ;;  %v10812_v46 = vld [vmem:[#allocation112_spill] sm:$0xff]  ;;  %v10820_v15 = vld [vmem:[#allocation115_spill] sm:$0xff] }
 0x309   : > { %10799 = vst [vmem:[#allocation238_spill] sm:$0xff] %v8249_v16  ;;  %10801 = vst [vmem:[#allocation159_spill] sm:$0xff] %v8252_v61  ;;  %v1485_v52 = vmul.f32 %v8012_v24, %v8054_v49  ;;  %v1674_v34 = vmul.f32 %v8015_v29, %v8054_v49  ;;  %v1863_v36 = vmul.f32 %v8018_v57, %v8054_v49  ;;  %v10818_v61 = vld [vmem:[#allocation205_spill] sm:$0xff] }
 0x30a   : > { %10803 = vst [vmem:[#allocation239_spill] sm:$0xff] %v8255_v32  ;;  %10805 = vst [vmem:[#allocation160_spill] sm:$0xff] %v8258_v63  ;;  %v2052_v50 = vmul.f32 %v8021_v11, %v8054_v49  ;;  %v2241_v60 = vmul.f32 %v8024_v28, %v8054_v49  ;;  %v2430_v45 = vmul.f32 %v8027_v47, %v8054_v49  ;;  %v582_v63 = vpop.permute.xlu1 %581  ;;  %v580_v32 = vpop.permute.xlu0 %579 }
 0x30b   : > { %10807 = vst [vmem:[#allocation240_spill] sm:$0xff] %v8261_v53  ;;  %10809 = vst [vmem:[#allocation161_spill] sm:$0xff] %v8264_v54  ;;  %v2619_v1 = vmul.f32 %v8030_v18, %v8054_v49  ;;  %v8283_v22 = vadd.f32 %v1296_v31, %v10810_v14  ;;  %v8286_v19 = vadd.f32 %v1485_v52, %v10812_v46  ;;  %v10816_v54 = vld [vmem:[#allocation114_spill] sm:$0xff]  ;;  %v10824_v14 = vld [vmem:[#allocation116_spill] sm:$0xff] }
 0x30c   : > { %v8289_v55 = vadd.f32 %v1674_v34, %v10814_v48  ;;  %v8292_v53 = vadd.f32 %v1863_v36, %v10816_v54  ;;  %v8295_v16 = vadd.f32 %v2052_v50, %v10818_v61  ;;  %v8298_v59 = vadd.f32 %v2241_v60, %v10820_v15  ;;  %v10828_v46 = vld [vmem:[#allocation117_spill] sm:$0xff]  ;;  %v10830_v48 = vld [vmem:[#allocation208_spill] sm:$0xff] }
 0x30d   : > { %10811 = vst [vmem:[#allocation241_spill] sm:$0xff] %v8283_v22  ;;  %10813 = vst [vmem:[#allocation162_spill] sm:$0xff] %v8286_v19  ;;  %v8301_v31 = vadd.f32 %v2430_v45, %v10822_v51  ;;  %v8304_v52 = vadd.f32 %v2619_v1, %v10824_v14  ;;  %v2808_v34 = vmul.f32 %v8033_v43, %v8054_v49  ;;  %v588_v15 = vsel %vm445_vm0, %v578_v2, 0.0  ;;  %v10826_v45 = vld [vmem:[#allocation207_spill] sm:$0xff]  ;;  %v10832_v14 = vld [vmem:[#allocation118_spill] sm:$0xff] }
 0x30e   : > { %10815 = vst [vmem:[#allocation242_spill] sm:$0xff] %v8289_v55  ;;  %10817 = vst [vmem:[#allocation163_spill] sm:$0xff] %v8292_v53  ;;  %v2997_v54 = vmul.f32 %v8036_v25, %v8054_v49  ;;  %v3186_v36 = vmul.f32 %v8039_v37, %v8054_v49  ;;  %v3375_v61 = vmul.f32 %v8042_v62, %v8054_v49  ;;  %v8318_v51 = vsel %vm445_vm0, %v576_v58, 0.0  ;;  %v10844_v53 = vld [vmem:[#allocation121_spill] sm:$0xff]  ;;  %v10846_v19 = vld [vmem:[#allocation212_spill] sm:$0xff] }
 0x30f   : > { %10819 = vst [vmem:[#allocation243_spill] sm:$0xff] %v8295_v16  ;;  %10821 = vst [vmem:[#allocation164_spill] sm:$0xff] %v8298_v59  ;;  %v8322_v50 = vsel %vm445_vm0, %v582_v63, 0.0  ;;  %v8326_v60 = vsel %vm445_vm0, %v580_v32, 0.0  ;;  %v8329_v1 = vadd.f32 %v2808_v34, %v10826_v45  ;;  %v921_v63 = vmul.f32 %v8001_v12, %v588_v15  ;;  %v10842_v59 = vld [vmem:[#allocation211_spill] sm:$0xff] }
 0x310   : > { %10823 = vst [vmem:[#allocation165_spill] sm:$0xff] %v8301_v31  ;;  %10825 = vst [vmem:[#allocation244_spill] sm:$0xff] %v8304_v52  ;;  %v8332_v49 = vadd.f32 %v2997_v54, %v10828_v46  ;;  %v8335_v2 = vadd.f32 %v3186_v36, %v10830_v48  ;;  %v8338_v58 = vadd.f32 %v3375_v61, %v10832_v14  ;;  %v10834_v46 = vld [vmem:[#allocation209_spill] sm:$0xff]  ;;  %v10836_v61 = vld [vmem:[#allocation119_spill] sm:$0xff] }
 0x311   : > { %10827 = vst [vmem:[#allocation166_spill] sm:$0xff] %v8329_v1  ;;  %v732_v52 = vmul.f32 %v7996_v4, %v588_v15  ;;  %v1110_v31 = vmul.f32 %v8004_v20, %v588_v15  ;;  %v1299_v32 = vmul.f32 %v8007_v30, %v588_v15  ;;  %v1488_v34 = vmul.f32 %v8012_v24, %v588_v15 }
 0x312   : > { %10829 = vst [vmem:[#allocation245_spill] sm:$0xff] %v8332_v49  ;;  %10831 = vst [vmem:[#allocation167_spill] sm:$0xff] %v8335_v2  ;;  %v1677_v45 = vmul.f32 %v8015_v29, %v588_v15  ;;  %v1866_v54 = vmul.f32 %v8018_v57, %v588_v15  ;;  %v2055_v36 = vmul.f32 %v8021_v11, %v588_v15  ;;  %v10840_v49 = vld [vmem:[#allocation120_spill] sm:$0xff] }
 0x313   : > { %10833 = vst [vmem:[#allocation246_spill] sm:$0xff] %v8338_v58  ;;  %v8349_v48 = vadd.f32 %v732_v52, %v10834_v46  ;;  %v8352_v14 = vadd.f32 %v921_v63, %v10836_v61  ;;  %v10838_v58 = vld [vmem:[#allocation210_spill] sm:$0xff]  ;;  %v8358_v1 = vadd.f32 %v1299_v32, %v10840_v49  ;;  %v8361_v16 = vadd.f32 %v1488_v34, %v10842_v59  ;;  %v10850_v34 = vld [vmem:[#allocation213_spill] sm:$0xff] }
 0x314   : > { %v8355_v2 = vadd.f32 %v1110_v31, %v10838_v58  ;;  %v8364_v55 = vadd.f32 %v1677_v45, %v10844_v53  ;;  %v8367_v22 = vadd.f32 %v1866_v54, %v10846_v19  ;;  %v10848_v52 = vld [vmem:[#allocation122_spill] sm:$0xff]  ;;  %v2244_v31 = vmul.f32 %v8024_v28, %v588_v15  ;;  %v10852_v54 = vld [vmem:[#allocation123_spill] sm:$0xff] }
 0x315   : > { %10835 = vst [vmem:[#allocation168_spill] sm:$0xff] %v8349_v48  ;;  %10837 = vst [vmem:[#allocation247_spill] sm:$0xff] %v8352_v14  ;;  %v8370_v46 = vadd.f32 %v2055_v36, %v10848_v52  ;;  %v2433_v58 = vmul.f32 %v8027_v47, %v588_v15  ;;  %v2622_v49 = vmul.f32 %v8030_v18, %v588_v15  ;;  %v10854_v61 = vld [vmem:[#allocation214_spill] sm:$0xff] }
 0x316   : > { %10839 = vst [vmem:[#allocation169_spill] sm:$0xff] %v8355_v2  ;;  %10841 = vst [vmem:[#allocation248_spill] sm:$0xff] %v8358_v1  ;;  %v2811_v59 = vmul.f32 %v8033_v43, %v588_v15  ;;  %v3000_v53 = vmul.f32 %v8036_v25, %v588_v15  ;;  %v3189_v19 = vmul.f32 %v8039_v37, %v588_v15  ;;  %v10862_v2 = vld [vmem:[#allocation216_spill] sm:$0xff] }
 0x317   : > { %10843 = vst [vmem:[#allocation170_spill] sm:$0xff] %v8361_v16  ;;  %10845 = vst [vmem:[#allocation249_spill] sm:$0xff] %v8364_v55  ;;  %v3378_v63 = vmul.f32 %v8042_v62, %v588_v15  ;;  %v731_v32 = vmul.f32 %v7996_v4, %v8318_v51  ;;  %v8388_v45 = vadd.f32 %v2244_v31, %v10850_v34  ;;  %v10858_v15 = vld [vmem:[#allocation215_spill] sm:$0xff]  ;;  %v10860_v16 = vld [vmem:[#allocation125_spill] sm:$0xff] }
 0x318   : > { %10847 = vst [vmem:[#allocation171_spill] sm:$0xff] %v8367_v22  ;;  %10849 = vst [vmem:[#allocation250_spill] sm:$0xff] %v8370_v46  ;;  %v8391_v36 = vadd.f32 %v2433_v58, %v10852_v54  ;;  %v8394_v52 = vadd.f32 %v2622_v49, %v10854_v61  ;;  %v10856_v46 = vld [vmem:[#allocation124_spill] sm:$0xff]  ;;  %v8402_v55 = vadd.f32 %v3000_v53, %v10858_v15  ;;  %v10864_v34 = vld [vmem:[#allocation126_spill] sm:$0xff] }
 0x319   : > { %10851 = vst [vmem:[#allocation172_spill] sm:$0xff] %v8388_v45  ;;  %v8397_v22 = vadd.f32 %v2811_v59, %v10856_v46  ;;  %v8405_v1 = vadd.f32 %v3189_v19, %v10860_v16  ;;  %v8408_v31 = vadd.f32 %v3378_v63, %v10862_v2  ;;  %v8411_v58 = vadd.f32 %v731_v32, %v10864_v34  ;;  %v10866_v32 = vld [vmem:[#allocation217_spill] sm:$0xff]  ;;  %v10868_v61 = vld [vmem:[#allocation127_spill] sm:$0xff]  ;;  %v10870_v34 = vld [vmem:[#allocation218_spill] sm:$0xff] }
 0x31a   : > { %10853 = vst [vmem:[#allocation251_spill] sm:$0xff] %v8391_v36  ;;  %10855 = vst [vmem:[#allocation173_spill] sm:$0xff] %v8394_v52  ;;  %v920_v46 = vmul.f32 %v8001_v12, %v8318_v51  ;;  %v1109_v49 = vmul.f32 %v8004_v20, %v8318_v51  ;;  %v1298_v59 = vmul.f32 %v8007_v30, %v8318_v51  ;;  %v10876_v52 = vld [vmem:[#allocation129_spill] sm:$0xff]  ;;  %v10878_v45 = vld [vmem:[#allocation220_spill] sm:$0xff] }
 0x31b   : > { %10857 = vst [vmem:[#allocation252_spill] sm:$0xff] %v8397_v22  ;;  %10859 = vst [vmem:[#allocation174_spill] sm:$0xff] %v8402_v55  ;;  %v1487_v16 = vmul.f32 %v8012_v24, %v8318_v51  ;;  %v1676_v2 = vmul.f32 %v8015_v29, %v8318_v51  ;;  %v1865_v53 = vmul.f32 %v8018_v57, %v8318_v51  ;;  %v10874_v55 = vld [vmem:[#allocation219_spill] sm:$0xff] }
 0x31c   : > { %10861 = vst [vmem:[#allocation253_spill] sm:$0xff] %v8405_v1  ;;  %10863 = vst [vmem:[#allocation175_spill] sm:$0xff] %v8408_v31  ;;  %v2054_v19 = vmul.f32 %v8021_v11, %v8318_v51  ;;  %v2243_v63 = vmul.f32 %v8024_v28, %v8318_v51  ;;  %v8436_v54 = vadd.f32 %v920_v46, %v10866_v32  ;;  %v10872_v31 = vld [vmem:[#allocation128_spill] sm:$0xff]  ;;  %v10880_v32 = vld [vmem:[#allocation130_spill] sm:$0xff] }
 0x31d   : > { %10865 = vst [vmem:[#allocation254_spill] sm:$0xff] %v8411_v58  ;;  %v8439_v15 = vadd.f32 %v1109_v49, %v10868_v61  ;;  %v8442_v58 = vadd.f32 %v1298_v59, %v10870_v34  ;;  %v8445_v1 = vadd.f32 %v1487_v16, %v10872_v31  ;;  %v8450_v22 = vadd.f32 %v1676_v2, %v10874_v55  ;;  %v10884_v61 = vld [vmem:[#allocation131_spill] sm:$0xff] }
 0x31e   : > { %10867 = vst [vmem:[#allocation176_spill] sm:$0xff] %v8436_v54  ;;  %v8453_v36 = vadd.f32 %v1865_v53, %v10876_v52  ;;  %v8456_v46 = vadd.f32 %v2054_v19, %v10878_v45  ;;  %v8459_v49 = vadd.f32 %v2243_v63, %v10880_v32  ;;  %v2432_v31 = vmul.f32 %v8027_v47, %v8318_v51  ;;  %v10882_v19 = vld [vmem:[#allocation221_spill] sm:$0xff]  ;;  %v10886_v32 = vld [vmem:[#allocation222_spill] sm:$0xff]  ;;  %v10940_v54 = vld [vmem:[#allocation140_spill] sm:$0xff] }
 0x31f   : > { %10869 = vst [vmem:[#allocation255_spill] sm:$0xff] %v8439_v15  ;;  %10871 = vst [vmem:[#allocation177_spill] sm:$0xff] %v8442_v58  ;;  %v2621_v59 = vmul.f32 %v8030_v18, %v8318_v51  ;;  %v2810_v55 = vmul.f32 %v8033_v43, %v8318_v51  ;;  %v2999_v52 = vmul.f32 %v8036_v25, %v8318_v51 }
 0x320   : > { %10873 = vst [vmem:[#allocation256_spill] sm:$0xff] %v8445_v1  ;;  %10875 = vst [vmem:[#allocation178_spill] sm:$0xff] %v8450_v22  ;;  %v3188_v45 = vmul.f32 %v8039_v37, %v8318_v51  ;;  %v3377_v16 = vmul.f32 %v8042_v62, %v8318_v51  ;;  %v734_v2 = vmul.f32 %v7996_v4, %v8322_v50  ;;  %v10890_v51 = vld [vmem:[#allocation223_spill] sm:$0xff]  ;;  %v10892_v1 = vld [vmem:[#allocation133_spill] sm:$0xff] }
 0x321   : > { %10877 = vst [vmem:[#allocation63_spill] sm:$0xff] %v8453_v36  ;;  %10879 = vst [vmem:[#allocation64_spill] sm:$0xff] %v8456_v46  ;;  %v923_v53 = vmul.f32 %v8001_v12, %v8322_v50  ;;  %v8484_v63 = vadd.f32 %v2432_v31, %v10882_v19  ;;  %v8487_v34 = vadd.f32 %v2621_v59, %v10884_v61  ;;  %v10888_v46 = vld [vmem:[#allocation132_spill] sm:$0xff] }
 0x322   : > { %10881 = vst [vmem:[#allocation65_spill] sm:$0xff] %v8459_v49  ;;  %v8490_v49 = vadd.f32 %v2810_v55, %v10886_v32  ;;  %v8493_v36 = vadd.f32 %v2999_v52, %v10888_v46  ;;  %v8498_v22 = vadd.f32 %v3188_v45, %v10890_v51  ;;  %v8501_v58 = vadd.f32 %v3377_v16, %v10892_v1 }
 0x323   : > { %10883 = vst [vmem:[#allocation66_spill] sm:$0xff] %v8484_v63  ;;  %10885 = vst [vmem:[#allocation67_spill] sm:$0xff] %v8487_v34  ;;  %v8504_v31 = vadd.f32 %v734_v2, %v7841_v26  ;;  %v8507_v59 = vadd.f32 %v923_v53, %v7843_v42  ;;  %v1112_v46 = vmul.f32 %v8004_v20, %v8322_v50  ;;  %v10939_v63 = vld [vmem:[#allocation185_spill] sm:$0xff] }
 0x324   : > { %10887 = vst [vmem:[#allocation68_spill] sm:$0xff] %v8490_v49  ;;  %10889 = vst [vmem:[#allocation69_spill] sm:$0xff] %v8493_v36  ;;  %v1301_v55 = vmul.f32 %v8007_v30, %v8322_v50  ;;  %v1490_v52 = vmul.f32 %v8012_v24, %v8322_v50  ;;  %v1679_v1 = vmul.f32 %v8015_v29, %v8322_v50  ;;  %v10938_v49 = vld [vmem:[#allocation139_spill] sm:$0xff] }
 0x325   : > { %10891 = vst [vmem:[#allocation70_spill] sm:$0xff] %v8498_v22  ;;  %10893 = vst [vmem:[#allocation71_spill] sm:$0xff] %v8501_v58  ;;  %v1868_v26 = vmul.f32 %v8018_v57, %v8322_v50  ;;  %v2057_v42 = vmul.f32 %v8021_v11, %v8322_v50  ;;  %v2246_v45 = vmul.f32 %v8024_v28, %v8322_v50  ;;  %v10937_v22 = vld [vmem:[#allocation184_spill] sm:$0xff] }
 0x326   : > { %10894 = vst [vmem:[#allocation72_spill] sm:$0xff] %v8504_v31  ;;  %10895 = vst [vmem:[#allocation73_spill] sm:$0xff] %v8507_v59  ;;  %v2435_v16 = vmul.f32 %v8027_v47, %v8322_v50  ;;  %v8532_v2 = vadd.f32 %v1112_v46, %v7847_v6  ;;  %v8535_v53 = vadd.f32 %v1301_v55, %v7849_v23 }
 0x327   : > { %v8538_v19 = vadd.f32 %v1490_v52, %v7853_v3  ;;  %v8541_v61 = vadd.f32 %v1679_v1, %v7858_v17  ;;  %v8546_v32 = vadd.f32 %v1868_v26, %v7863_v41  ;;  %v8549_v51 = vadd.f32 %v2057_v42, %v7865_v38  ;;  %v10920_v42 = vld [vmem:[#allocation180_spill] sm:$0xff] }
 0x328   : > { %10896 = vst [vmem:[#allocation257_spill] sm:$0xff] %v8532_v2  ;;  %10897 = vst [vmem:[#allocation258_spill] sm:$0xff] %v8535_v53  ;;  %v8552_v6 = vadd.f32 %v2246_v45, %v7869_v35  ;;  %v8555_v23 = vadd.f32 %v2435_v16, %v7876_v5  ;;  %v2624_v3 = vmul.f32 %v8030_v18, %v8322_v50  ;;  %v10936_v2 = vld [vmem:[#allocation138_spill] sm:$0xff] }
 0x329   : > { %10898 = vst [vmem:[#allocation259_spill] sm:$0xff] %v8538_v19  ;;  %10899 = vst [vmem:[#allocation278_spill] sm:$0xff] %v8541_v61  ;;  %v2813_v17 = vmul.f32 %v8033_v43, %v8322_v50  ;;  %v3002_v41 = vmul.f32 %v8036_v25, %v8322_v50  ;;  %v3191_v38 = vmul.f32 %v8039_v37, %v8322_v50  ;;  %v10935_v19 = vld [vmem:[#allocation183_spill] sm:$0xff] }
 0x32a   : > { %10900 = vst [vmem:[#allocation260_spill] sm:$0xff] %v8546_v32  ;;  %10901 = vst [vmem:[#allocation261_spill] sm:$0xff] %v8549_v51  ;;  %v3380_v35 = vmul.f32 %v8042_v62, %v8322_v50  ;;  %v733_v5 = vmul.f32 %v7996_v4, %v8326_v60  ;;  %v922_v46 = vmul.f32 %v8001_v12, %v8326_v60  ;;  %v8791_v51 = vstv %s8713_s25 }
 0x32b   : > { %10902 = vst [vmem:[#allocation262_spill] sm:$0xff] %v8552_v6  ;;  %10903 = vst [vmem:[#allocation263_spill] sm:$0xff] %v8555_v23  ;;  %v1111_v55 = vmul.f32 %v8004_v20, %v8326_v60  ;;  %v8580_v52 = vadd.f32 %v2624_v3, %v7883_v21  ;;  %v8583_v1 = vadd.f32 %v2813_v17, %v7885_v9  ;;  %v8785_v23 = vstv %s8691_s7 }
 0x32c   : > { %v8586_v26 = vadd.f32 %v3002_v41, %v7891_v33  ;;  %v8589_v50 = vadd.f32 %v3191_v38, %v7898_v40  ;;  %v8594_v4 = vadd.f32 %v3380_v35, %v7905_v39  ;;  %v8597_v12 = vadd.f32 %v733_v5, %v7937_v27  ;;  %v10928_v5 = vld [vmem:[#allocation182_spill] sm:$0xff] }
 0x32d   : > { %10904 = vst [vmem:[#allocation264_spill] sm:$0xff] %v8580_v52  ;;  %10905 = vst [vmem:[#allocation265_spill] sm:$0xff] %v8583_v1  ;;  %v8600_v21 = vadd.f32 %v922_v46, %v7939_v13  ;;  %v8603_v9 = vadd.f32 %v1111_v55, %v7945_v10  ;;  %v1300_v33 = vmul.f32 %v8007_v30, %v8326_v60  ;;  %v8666_v41 = vstv %s8372_s28  ;;  %v10930_v55 = vld [vmem:[#allocation137_spill] sm:$0xff]  ;;  %s11070_s28 = sld [smem:[#allocation43_spill]] }
 0x32e   : > { %10906 = vst [vmem:[#allocation74_spill] sm:$0xff] %v8586_v26  ;;  %10907 = vst [vmem:[#allocation75_spill] sm:$0xff] %v8589_v50  ;;  %v1489_v40 = vmul.f32 %v8012_v24, %v8326_v60  ;;  %v1678_v39 = vmul.f32 %v8015_v29, %v8326_v60  ;;  %v1867_v27 = vmul.f32 %v8018_v57, %v8326_v60  ;;  %v8669_v38 = vstv %s8461_s29 }
 0x32f   : > { %10908 = vst [vmem:[#allocation76_spill] sm:$0xff] %v8594_v4  ;;  %10909 = vst [vmem:[#allocation107_spill] sm:$0xff] %v8597_v12  ;;  %v2056_v13 = vmul.f32 %v8021_v11, %v8326_v60  ;;  %v2245_v10 = vmul.f32 %v8024_v28, %v8326_v60  ;;  %v2434_v20 = vmul.f32 %v8027_v47, %v8326_v60  ;;  %v10916_v28 = vld [vmem:[#allocation179_spill] sm:$0xff]  ;;  %v8672_v35 = vstv %s8378_s10  ;;  %v594_v12 = vpop.permute.xlu1 %593 }
 0x330   : > { %10910 = vst [vmem:[#allocation62_spill] sm:$0xff] %v8600_v21  ;;  %10911 = vst [vmem:[#allocation266_spill] sm:$0xff] %v8603_v9  ;;  %v2623_v30 = vmul.f32 %v8030_v18, %v8326_v60  ;;  %v8628_v24 = vadd.f32 %v1300_v33, %v7947_v7  ;;  %v8631_v29 = vadd.f32 %v1489_v40, %v7953_v8  ;;  %v10918_v18 = vld [vmem:[#allocation134_spill] sm:$0xff]  ;;  %v10922_v8 = vld [vmem:[#allocation135_spill] sm:$0xff]  ;;  %v8766_v9 = vstv %s8639_s0 }
 0x331   : > { %v8634_v57 = vadd.f32 %v1678_v39, %v7960_v44  ;;  %v8637_v11 = vadd.f32 %v1867_v27, %v7967_v0  ;;  %v8642_v47 = vadd.f32 %v2056_v13, %v10916_v28  ;;  %v8645_v7 = vadd.f32 %v2245_v10, %v10918_v18  ;;  %v4149_v40 = vld [vmem:[#allocation2 + $0x11] sm:$0xff] }
 0x332   : > { %10912 = vst [vmem:[#allocation267_spill] sm:$0xff] %v8628_v24  ;;  %10913 = vst [vmem:[#allocation81_spill] sm:$0xff] %v8631_v29  ;;  %v8648_v45 = vadd.f32 %v2434_v20, %v10920_v42  ;;  %v8651_v16 = vadd.f32 %v2623_v30, %v10922_v8  ;;  %v2812_v44 = vmul.f32 %v8033_v43, %v8326_v60  ;;  %v8675_v43 = vstv %s8471_s8 }
 0x333   : > { %10914 = vst [vmem:[#allocation268_spill] sm:$0xff] %v8634_v57  ;;  %10915 = vst [vmem:[#allocation269_spill] sm:$0xff] %v8637_v11  ;;  %v3001_v0 = vmul.f32 %v8036_v25, %v8326_v60  ;;  %v3190_v3 = vmul.f32 %v8039_v37, %v8326_v60  ;;  %v3379_v17 = vmul.f32 %v8042_v62, %v8326_v60  ;;  %v10924_v25 = vld [vmem:[#allocation181_spill] sm:$0xff]  ;;  %v10926_v62 = vld [vmem:[#allocation136_spill] sm:$0xff]  ;;  %v8696_v13 = vstv %s8385_s22  ;;  %s3451_s10 = scalar_lea.sflag [#allocation5], %s11070_s28 }
 0x334   : > { %10917 = vst [vmem:[#allocation270_spill] sm:$0xff] %v8642_v47  ;;  %10919 = vst [vmem:[#allocation89_spill] sm:$0xff] %v8645_v7  ;;  %v8680_v37 = vadd.f32 %v2812_v44, %v10924_v25  ;;  %v746_v39 = vmul.f32 %v4149_v40, %v8666_v41  ;;  %v935_v27 = vmul.f32 %v4149_v40, %v8672_v35  ;;  %v8699_v10 = vstv %s8481_s13 }
 0x335   : > { %10921 = vst [vmem:[#allocation271_spill] sm:$0xff] %v8648_v45  ;;  %10923 = vst [vmem:[#allocation272_spill] sm:$0xff] %v8651_v16  ;;  %v8683_v60 = vadd.f32 %v3001_v0, %v10926_v62  ;;  %v8686_v46 = vadd.f32 %v3190_v3, %v10928_v5  ;;  %v8689_v33 = vadd.f32 %v3379_v17, %v10930_v55  ;;  %v8705_v30 = vstv %s8399_s19 }
 0x336   : > { %10925 = vst [vmem:[#allocation273_spill] sm:$0xff] %v8680_v37  ;;  %10932 = vst [vmem:[#allocation277_spill] sm:$0xff] %v8699_v10  ;;  %v1124_v20 = vmul.f32 %v4149_v40, %v8696_v13  ;;  %v8708_v28 = vstv %s8495_s30  ;;  %v8711_v18 = vstv %s8413_s23  ;;  %v1313_v42 = vmul.f32 %v4149_v40, %v8705_v30 }
 0x337   : > { %10927 = vst [vmem:[#allocation274_spill] sm:$0xff] %v8683_v60  ;;  %10929 = vst [vmem:[#allocation275_spill] sm:$0xff] %v8686_v46  ;;  %v1502_v8 = vmul.f32 %v4149_v40, %v8711_v18  ;;  %v8718_v44 = vstv %s8509_s18  ;;  %v8721_v0 = vstv %s8423_s14  ;;  %v8725_v17 = vstv %s8519_s27 }
 0x338   : > { %10931 = vst [vmem:[#allocation276_spill] sm:$0xff] %v8689_v33  ;;  %10933 = vst [vmem:[#allocation279_spill] sm:$0xff] %v8708_v28  ;;  %v1691_v3 = vmul.f32 %v4149_v40, %v8721_v0  ;;  %v8728_v25 = vstv %s8433_s24  ;;  %v8731_v62 = vstv %s8529_s17  ;;  %v8735_v55 = vstv %s8447_s26 }
 0x339   : > { %10934 = vst [vmem:[#allocation280_spill] sm:$0xff] %v8725_v17  ;;  %v1880_v5 = vmul.f32 %v4149_v40, %v8728_v25  ;;  %v8738_v33 = vstv %s8543_s12  ;;  %v8741_v46 = vstv %s8557_s3  ;;  %v2069_v60 = vmul.f32 %v4149_v40, %v8735_v55 }
 0x33a   : > { %v2258_v37 = vmul.f32 %v4149_v40, %v8741_v46  ;;  %v8746_v16 = vstv %s8567_s20  ;;  %v8749_v45 = vstv %s8577_s9  ;;  %v8753_v47 = vstv %s8591_s5 }
 0x33b   : > { %v2447_v7 = vmul.f32 %v4149_v40, %v8749_v45  ;;  %v8756_v11 = vstv %s8605_s21  ;;  %v8759_v57 = vstv %s8615_s1  ;;  %v8763_v24 = vstv %s8625_s4 }
 0x33c   : > { %v2636_v29 = vmul.f32 %v4149_v40, %v8756_v11  ;;  %v8769_v21 = vstv %s8653_s11  ;;  %v2825_v4 = vmul.f32 %v4149_v40, %v8763_v24  ;;  %v8776_v26 = vstv %s8663_s15 }
 0x33d   : > { %v8773_v50 = vmul.f32 %v4149_v40, %v8769_v21  ;;  %v8779_v1 = vstv %s8677_s6  ;;  %v8788_v6 = vstv %s8701_s16  ;;  %v8798_v61 = vsel %vm446_vm1, %v594_v12, 0.0 }
 0x33e   : > { %v8782_v52 = vmul.f32 %v4149_v40, %v8779_v1  ;;  %v8794_v32 = vmul.f32 %v4149_v40, %v8788_v6  ;;  %v754_v53 = vadd.f32 %v746_v39, %v10935_v19  ;;  %v943_v59 = vadd.f32 %v935_v27, %v10936_v2 }
 0x33f   : > { %v764_v31 = vmul.f32 %v8669_v38, %v8798_v61  ;;  %v953_v58 = vmul.f32 %v8675_v43, %v8798_v61  ;;  %v1132_v36 = vadd.f32 %v1124_v20, %v10937_v22  ;;  %v1142_v40 = vmul.f32 %v8699_v10, %v8798_v61  ;;  %v10941_v10 = vld [vmem:[#allocation186_spill] sm:$0xff] }
 0x340   : > { %v1321_v34 = vadd.f32 %v1313_v42, %v10938_v49  ;;  %v1331_v12 = vmul.f32 %v8708_v28, %v8798_v61  ;;  %v1510_v19 = vadd.f32 %v1502_v8, %v10939_v63  ;;  %v1520_v2 = vmul.f32 %v8718_v44, %v8798_v61 }
 0x341   : > { %v772_v39 = vadd.f32 %v764_v31, %v754_v53  ;;  %v961_v27 = vadd.f32 %v953_v58, %v943_v59  ;;  %v1150_v15 = vadd.f32 %v1142_v40, %v1132_v36  ;;  %v1699_v14 = vadd.f32 %v1691_v3, %v10940_v54  ;;  %v10943_v54 = vld [vmem:[#allocation141_spill] sm:$0xff] }
 0x342   : > { %v1339_v48 = vadd.f32 %v1331_v12, %v1321_v34  ;;  %v1528_v22 = vadd.f32 %v1520_v2, %v1510_v19  ;;  %v1709_v20 = vmul.f32 %v8725_v17, %v8798_v61  ;;  %v1888_v49 = vadd.f32 %v1880_v5, %v10941_v10 }
 0x343   : > { %v780_v42 = vmul.f32 0.1, %v772_v39  ;;  %v969_v28 = vmul.f32 0.1, %v961_v27  ;;  %v1158_v63 = vmul.f32 0.1, %v1150_v15  ;;  %v1898_v31 = vmul.f32 %v8731_v62, %v8798_v61 }
 0x344   : > { %v1347_v58 = vmul.f32 0.1, %v1339_v48  ;;  %v1536_v36 = vmul.f32 0.1, %v1528_v22  ;;  %v1717_v59 = vadd.f32 %v1709_v20, %v1699_v14  ;;  %v2077_v34 = vadd.f32 %v2069_v60, %v10943_v54  ;;  %v10944_v14 = vld [vmem:[#allocation187_spill] sm:$0xff]  ;;  %v10948_v54 = vld [vmem:[#allocation189_spill] sm:$0xff] }
 0x345   : > { %v788_v53 = vmax.f32 %v772_v39, %v780_v42  ;;  %v977_v8 = vmax.f32 %v961_v27, %v969_v28  ;;  %v1166_v3 = vmax.f32 %v1150_v15, %v1158_v63  ;;  %v1906_v10 = vadd.f32 %v1898_v31, %v1888_v49  ;;  %v10945_v39 = vld [vmem:[#allocation142_spill] sm:$0xff]  ;;  %v10947_v31 = vld [vmem:[#allocation143_spill] sm:$0xff] }
 0x346   : > { %v1355_v5 = vmax.f32 %v1339_v48, %v1347_v58  ;;  %v1544_v40 = vmax.f32 %v1528_v22, %v1536_v36  ;;  %v1725_v12 = vmul.f32 0.1, %v1717_v59  ;;  %v2087_v19 = vmul.f32 %v8738_v33, %v8798_v61  ;;  %v10946_v22 = vld [vmem:[#allocation188_spill] sm:$0xff] }
 0x347   : > { %3693 = vst [vmem:[%s10942_s2 + $0x48] sm:$0xff] %v788_v53  ;;  %3711 = vst [vmem:[%s10942_s2 + $0x88] sm:$0xff] %v977_v8  ;;  %v1914_v2 = vmul.f32 0.1, %v1906_v10  ;;  %v2266_v20 = vadd.f32 %v2258_v37, %v10944_v14  ;;  %v2276_v60 = vmul.f32 %v8746_v16, %v8798_v61  ;;  %v2455_v28 = vadd.f32 %v2447_v7, %v10945_v39  ;;  %v10950_v14 = vld [vmem:[#allocation190_spill] sm:$0xff] }
 0x348   : > { %3729 = vst [vmem:[%s10942_s2 + $0xc8] sm:$0xff] %v1166_v3  ;;  %3747 = vst [vmem:[%s10942_s2 + $0x108] sm:$0xff] %v1355_v5  ;;  %v1733_v48 = vmax.f32 %v1717_v59, %v1725_v12  ;;  %v2095_v15 = vadd.f32 %v2087_v19, %v2077_v34  ;;  %v2465_v27 = vmul.f32 %v8753_v47, %v8798_v61  ;;  %v10949_v3 = vld [vmem:[#allocation144_spill] sm:$0xff] }
 0x349   : > { %3765 = vst [vmem:[%s10942_s2 + $0x148] sm:$0xff] %v1544_v40  ;;  %v2644_v49 = vadd.f32 %v2636_v29, %v10946_v22  ;;  %v1922_v42 = vmax.f32 %v1906_v10, %v1914_v2  ;;  %v2284_v63 = vadd.f32 %v2276_v60, %v2266_v20  ;;  %v2654_v37 = vmul.f32 %v8759_v57, %v8798_v61 }
 0x34a   : > { %v2833_v58 = vadd.f32 %v2825_v4, %v10947_v31  ;;  %3783 = vst [vmem:[%s10942_s2 + $0x188] sm:$0xff] %v1733_v48  ;;  %v2103_v36 = vmul.f32 0.1, %v2095_v15  ;;  %v2473_v7 = vadd.f32 %v2465_v27, %v2455_v28  ;;  %v2843_v59 = vmul.f32 %v8766_v9, %v8798_v61  ;;  %v4150_v27 = vld [vmem:[#allocation2 + $0x9] sm:$0xff] }
 0x34b   : > { %v3022_v34 = vadd.f32 %v8773_v50, %v10948_v54  ;;  %3801 = vst [vmem:[%s10942_s2 + $0x1c8] sm:$0xff] %v1922_v42  ;;  %v2292_v53 = vmul.f32 0.1, %v2284_v63  ;;  %v2662_v29 = vadd.f32 %v2654_v37, %v2644_v49  ;;  %v3032_v8 = vmul.f32 %v8776_v26, %v8798_v61 }
 0x34c   : > { %v3211_v4 = vadd.f32 %v8782_v52, %v10949_v3  ;;  %v2111_v10 = vmax.f32 %v2095_v15, %v2103_v36  ;;  %v2481_v5 = vmul.f32 0.1, %v2473_v7  ;;  %v2851_v40 = vadd.f32 %v2843_v59, %v2833_v58 }
 0x34d   : > { %v3221_v12 = vmul.f32 %v8785_v23, %v8798_v61  ;;  %v2300_v19 = vmax.f32 %v2284_v63, %v2292_v53  ;;  %v2670_v2 = vmul.f32 0.1, %v2662_v29  ;;  %v3040_v50 = vadd.f32 %v3032_v8, %v3022_v34  ;;  %v592_v53 = vpop.permute.xlu0 %591 }
 0x34e   : > { %v3400_v20 = vadd.f32 %v8794_v32, %v10950_v14  ;;  %3819 = vst [vmem:[%s10942_s2 + $0x208] sm:$0xff] %v2111_v10  ;;  %v2489_v60 = vmax.f32 %v2473_v7, %v2481_v5  ;;  %v2859_v39 = vmul.f32 0.1, %v2851_v40  ;;  %v3410_v52 = vmul.f32 %v8791_v51, %v8798_v61  ;;  %v10952_v14 = vld [vmem:[#allocation191_spill] sm:$0xff] }
 0x34f   : > { %v3229_v28 = vadd.f32 %v3221_v12, %v3211_v4  ;;  %3837 = vst [vmem:[%s10942_s2 + $0x248] sm:$0xff] %v2300_v19  ;;  %v2678_v48 = vmax.f32 %v2662_v29, %v2670_v2  ;;  %v3048_v15 = vmul.f32 0.1, %v3040_v50  ;;  %v745_v22 = vmul.f32 %v4150_v27, %v8666_v41  ;;  %v10951_v2 = vld [vmem:[#allocation145_spill] sm:$0xff] }
 0x350   : > { %v934_v49 = vmul.f32 %v4150_v27, %v8672_v35  ;;  %3855 = vst [vmem:[%s10942_s2 + $0x288] sm:$0xff] %v2489_v60  ;;  %v2867_v32 = vmax.f32 %v2851_v40, %v2859_v39  ;;  %v3418_v63 = vadd.f32 %v3410_v52, %v3400_v20  ;;  %v1123_v37 = vmul.f32 %v4150_v27, %v8696_v13  ;;  %v10953_v60 = vld [vmem:[#allocation146_spill] sm:$0xff] }
 0x351   : > { %v3237_v42 = vmul.f32 0.1, %v3229_v28  ;;  %3873 = vst [vmem:[%s10942_s2 + $0x2c8] sm:$0xff] %v2678_v48  ;;  %v3056_v31 = vmax.f32 %v3040_v50, %v3048_v15  ;;  %v1312_v61 = vmul.f32 %v4150_v27, %v8705_v30  ;;  %v1501_v58 = vmul.f32 %v4150_v27, %v8711_v18  ;;  %v10954_v48 = vld [vmem:[#allocation277_spill] sm:$0xff] }
 0x352   : > { %v1690_v36 = vmul.f32 %v4150_v27, %v8721_v0  ;;  %3891 = vst [vmem:[%s10942_s2 + $0x308] sm:$0xff] %v2867_v32  ;;  %v3426_v59 = vmul.f32 0.1, %v3418_v63  ;;  %v1879_v54 = vmul.f32 %v4150_v27, %v8728_v25  ;;  %v2068_v34 = vmul.f32 %v4150_v27, %v8735_v55 }
 0x353   : > { %v3245_v7 = vmax.f32 %v3229_v28, %v3237_v42  ;;  %3909 = vst [vmem:[%s10942_s2 + $0x348] sm:$0xff] %v3056_v31  ;;  %v2257_v29 = vmul.f32 %v4150_v27, %v8741_v46  ;;  %v2446_v8 = vmul.f32 %v4150_v27, %v8749_v45  ;;  %v2635_v3 = vmul.f32 %v4150_v27, %v8756_v11  ;;  %v10956_v42 = vld [vmem:[#allocation279_spill] sm:$0xff] }
 0x354   : > { %v2824_v4 = vmul.f32 %v4150_v27, %v8763_v24  ;;  %v3434_v10 = vmax.f32 %v3418_v63, %v3426_v59  ;;  %v3013_v5 = vmul.f32 %v4150_v27, %v8769_v21  ;;  %v8876_v40 = vmul.f32 %v4150_v27, %v8779_v1 }
 0x355   : > { %3927 = vst [vmem:[%s10942_s2 + $0x388] sm:$0xff] %v3245_v7  ;;  %v8879_v12 = vmul.f32 %v4150_v27, %v8788_v6  ;;  %v8883_v19 = vsel %vm446_vm1, %v592_v53, 0.0  ;;  %v753_v50 = vadd.f32 %v745_v22, %v10951_v2  ;;  %v942_v20 = vadd.f32 %v934_v49, %v10952_v14  ;;  %v10955_v27 = vld [vmem:[#allocation192_spill] sm:$0xff]  ;;  %v10957_v22 = vld [vmem:[#allocation147_spill] sm:$0xff] }
 0x356   : > { %v1131_v39 = vadd.f32 %v1123_v37, %v10953_v60  ;;  %3945 = vst [vmem:[%s10942_s2 + $0x3c8] sm:$0xff] %v3434_v10  ;;  %v763_v28 = vmul.f32 %v8669_v38, %v8883_v19  ;;  %v952_v52 = vmul.f32 %v8675_v43, %v8883_v19  ;;  %v1141_v15 = vmul.f32 %v10954_v48, %v8883_v19  ;;  %v10958_v37 = vld [vmem:[#allocation193_spill] sm:$0xff]  ;;  %v10959_v48 = vld [vmem:[#allocation148_spill] sm:$0xff] }
 0x357   : > { %v1320_v32 = vadd.f32 %v1312_v61, %v10955_v27  ;;  %v1330_v63 = vmul.f32 %v10956_v42, %v8883_v19  ;;  %v1509_v31 = vadd.f32 %v1501_v58, %v10957_v22  ;;  %v1519_v49 = vmul.f32 %v8718_v44, %v8883_v19 }
 0x358   : > { %v1698_v7 = vadd.f32 %v1690_v36, %v10958_v37  ;;  %v771_v59 = vadd.f32 %v763_v28, %v753_v50  ;;  %v960_v53 = vadd.f32 %v952_v52, %v942_v20  ;;  %v1149_v10 = vadd.f32 %v1141_v15, %v1131_v39  ;;  %v10960_v28 = vld [vmem:[#allocation228_spill] sm:$0xff] }
 0x359   : > { %v1708_v2 = vmul.f32 %v8725_v17, %v8883_v19  ;;  %v1338_v14 = vadd.f32 %v1330_v63, %v1320_v32  ;;  %v1527_v60 = vadd.f32 %v1519_v49, %v1509_v31  ;;  %v1887_v61 = vadd.f32 %v1879_v54, %v10959_v48 }
 0x35a   : > { %v1897_v27 = vmul.f32 %v8731_v62, %v8883_v19  ;;  %v779_v42 = vmul.f32 0.1, %v771_v59  ;;  %v968_v58 = vmul.f32 0.1, %v960_v53  ;;  %v1157_v22 = vmul.f32 0.1, %v1149_v10 }
 0x35b   : > { %v1716_v36 = vadd.f32 %v1708_v2, %v1698_v7  ;;  %v1346_v50 = vmul.f32 0.1, %v1338_v14  ;;  %v1535_v20 = vmul.f32 0.1, %v1527_v60  ;;  %v2076_v52 = vadd.f32 %v2068_v34, %v10960_v28  ;;  %v10961_v2 = vld [vmem:[#allocation149_spill] sm:$0xff] }
 0x35c   : > { %v1905_v39 = vadd.f32 %v1897_v27, %v1887_v61  ;;  %v787_v15 = vmax.f32 %v771_v59, %v779_v42  ;;  %v976_v32 = vmax.f32 %v960_v53, %v968_v58  ;;  %v1165_v54 = vmax.f32 %v1149_v10, %v1157_v22  ;;  %v10962_v59 = vld [vmem:[#allocation229_spill] sm:$0xff]  ;;  %v10963_v61 = vld [vmem:[#allocation150_spill] sm:$0xff] }
 0x35d   : > { %v1724_v48 = vmul.f32 0.1, %v1716_v36  ;;  %v1354_v63 = vmax.f32 %v1338_v14, %v1346_v50  ;;  %v1543_v31 = vmax.f32 %v1527_v60, %v1535_v20  ;;  %v2086_v37 = vmul.f32 %v8738_v33, %v8883_v19 }
 0x35e   : > { %v1913_v49 = vmul.f32 0.1, %v1905_v39  ;;  %3692 = vst [vmem:[%s10942_s2 + $0x40] sm:$0xff] %v787_v15  ;;  %3710 = vst [vmem:[%s10942_s2 + $0x80] sm:$0xff] %v976_v32  ;;  %v2265_v34 = vadd.f32 %v2257_v29, %v10961_v2  ;;  %v2275_v42 = vmul.f32 %v8746_v16, %v8883_v19  ;;  %v2454_v53 = vadd.f32 %v2446_v8, %v10962_v59  ;;  %v10964_v29 = vld [vmem:[#allocation230_spill] sm:$0xff]  ;;  %v10967_v2 = vld [vmem:[#allocation152_spill] sm:$0xff] }
 0x35f   : > { %3728 = vst [vmem:[%s10942_s2 + $0xc0] sm:$0xff] %v1165_v54  ;;  %v1732_v7 = vmax.f32 %v1716_v36, %v1724_v48  ;;  %3746 = vst [vmem:[%s10942_s2 + $0x100] sm:$0xff] %v1354_v63  ;;  %v2094_v14 = vadd.f32 %v2086_v37, %v2076_v52  ;;  %v2464_v60 = vmul.f32 %v8753_v47, %v8883_v19  ;;  %v10966_v54 = vld [vmem:[#allocation231_spill] sm:$0xff] }
 0x360   : > { %3764 = vst [vmem:[%s10942_s2 + $0x140] sm:$0xff] %v1543_v31  ;;  %v1921_v10 = vmax.f32 %v1905_v39, %v1913_v49  ;;  %v2643_v27 = vadd.f32 %v2635_v3, %v10963_v61  ;;  %v2283_v58 = vadd.f32 %v2275_v42, %v2265_v34  ;;  %v2653_v22 = vmul.f32 %v8759_v57, %v8883_v19  ;;  %v10965_v39 = vld [vmem:[#allocation151_spill] sm:$0xff] }
 0x361   : > { %3782 = vst [vmem:[%s10942_s2 + $0x180] sm:$0xff] %v1732_v7  ;;  %v2832_v36 = vadd.f32 %v2824_v4, %v10964_v29  ;;  %v2842_v50 = vmul.f32 %v8766_v9, %v8883_v19  ;;  %v2102_v8 = vmul.f32 0.1, %v2094_v14  ;;  %v2472_v20 = vadd.f32 %v2464_v60, %v2454_v53  ;;  %v4151_v60 = vld [vmem:[#allocation2 + $0x21] sm:$0xff] }
 0x362   : > { %3800 = vst [vmem:[%s10942_s2 + $0x1c0] sm:$0xff] %v1921_v10  ;;  %v3021_v28 = vadd.f32 %v3013_v5, %v10965_v39  ;;  %v3031_v52 = vmul.f32 %v8776_v26, %v8883_v19  ;;  %v2291_v3 = vmul.f32 0.1, %v2283_v58  ;;  %v2661_v15 = vadd.f32 %v2653_v22, %v2643_v27 }
 0x363   : > { %v2850_v32 = vadd.f32 %v2842_v50, %v2832_v36  ;;  %v3210_v48 = vadd.f32 %v8876_v40, %v10966_v54  ;;  %v2110_v4 = vmax.f32 %v2094_v14, %v2102_v8  ;;  %v2480_v63 = vmul.f32 0.1, %v2472_v20 }
 0x364   : > { %v3039_v31 = vadd.f32 %v3031_v52, %v3021_v28  ;;  %v3220_v49 = vmul.f32 %v8785_v23, %v8883_v19  ;;  %v2299_v37 = vmax.f32 %v2283_v58, %v2291_v3  ;;  %v2669_v7 = vmul.f32 0.1, %v2661_v15 }
 0x365   : > { %v2858_v5 = vmul.f32 0.1, %v2850_v32  ;;  %v3399_v34 = vadd.f32 %v8879_v12, %v10967_v2  ;;  %3818 = vst [vmem:[%s10942_s2 + $0x200] sm:$0xff] %v2110_v4  ;;  %v2488_v42 = vmax.f32 %v2472_v20, %v2480_v63  ;;  %v3409_v40 = vmul.f32 %v8791_v51, %v8883_v19  ;;  %v598_v20 = vpop.permute.xlu1 %597  ;;  %v10969_v2 = vld [vmem:[#allocation153_spill] sm:$0xff] }
 0x366   : > { %v3047_v59 = vmul.f32 0.1, %v3039_v31  ;;  %v3228_v53 = vadd.f32 %v3220_v49, %v3210_v48  ;;  %3836 = vst [vmem:[%s10942_s2 + $0x240] sm:$0xff] %v2299_v37  ;;  %v2677_v10 = vmax.f32 %v2661_v15, %v2669_v7  ;;  %v748_v61 = vmul.f32 %v4151_v60, %v8666_v41  ;;  %v10968_v37 = vld [vmem:[#allocation232_spill] sm:$0xff] }
 0x367   : > { %v2866_v14 = vmax.f32 %v2850_v32, %v2858_v5  ;;  %v937_v27 = vmul.f32 %v4151_v60, %v8672_v35  ;;  %3854 = vst [vmem:[%s10942_s2 + $0x280] sm:$0xff] %v2488_v42  ;;  %v3417_v22 = vadd.f32 %v3409_v40, %v3399_v34  ;;  %v1126_v29 = vmul.f32 %v4151_v60, %v8696_v13  ;;  %v10971_v40 = vld [vmem:[#allocation277_spill] sm:$0xff] }
 0x368   : > { %v3055_v12 = vmax.f32 %v3039_v31, %v3047_v59  ;;  %v3236_v58 = vmul.f32 0.1, %v3228_v53  ;;  %3872 = vst [vmem:[%s10942_s2 + $0x2c0] sm:$0xff] %v2677_v10  ;;  %v1315_v19 = vmul.f32 %v4151_v60, %v8705_v30  ;;  %v1504_v36 = vmul.f32 %v4151_v60, %v8711_v18  ;;  %v10970_v59 = vld [vmem:[#allocation233_spill] sm:$0xff] }
 0x369   : > { %3890 = vst [vmem:[%s10942_s2 + $0x300] sm:$0xff] %v2866_v14  ;;  %v1693_v50 = vmul.f32 %v4151_v60, %v8721_v0  ;;  %v1882_v8 = vmul.f32 %v4151_v60, %v8728_v25  ;;  %v3425_v28 = vmul.f32 0.1, %v3417_v22  ;;  %v2071_v52 = vmul.f32 %v4151_v60, %v8735_v55  ;;  %v10972_v14 = vld [vmem:[#allocation154_spill] sm:$0xff] }
 0x36a   : > { %3908 = vst [vmem:[%s10942_s2 + $0x340] sm:$0xff] %v3055_v12  ;;  %v3244_v39 = vmax.f32 %v3228_v53, %v3236_v58  ;;  %v2260_v3 = vmul.f32 %v4151_v60, %v8741_v46  ;;  %v2449_v15 = vmul.f32 %v4151_v60, %v8749_v45  ;;  %v2638_v32 = vmul.f32 %v4151_v60, %v8756_v11  ;;  %v10973_v12 = vld [vmem:[#allocation279_spill] sm:$0xff] }
 0x36b   : > { %v2827_v54 = vmul.f32 %v4151_v60, %v8763_v24  ;;  %v8959_v48 = vmul.f32 %v4151_v60, %v8769_v21  ;;  %v3433_v4 = vmax.f32 %v3417_v22, %v3425_v28  ;;  %v8963_v63 = vmul.f32 %v4151_v60, %v8779_v1 }
 0x36c   : > { %3926 = vst [vmem:[%s10942_s2 + $0x380] sm:$0xff] %v3244_v39  ;;  %v8966_v31 = vmul.f32 %v4151_v60, %v8788_v6  ;;  %v8970_v49 = vsel %vm446_vm1, %v598_v20, 0.0  ;;  %v756_v7 = vadd.f32 %v748_v61, %v10968_v37  ;;  %v945_v34 = vadd.f32 %v937_v27, %v10969_v2  ;;  %v10974_v20 = vld [vmem:[#allocation234_spill] sm:$0xff] }
 0x36d   : > { %v766_v5 = vmul.f32 %v8669_v38, %v8970_v49  ;;  %v955_v42 = vmul.f32 %v8675_v43, %v8970_v49  ;;  %3944 = vst [vmem:[%s10942_s2 + $0x3c0] sm:$0xff] %v3433_v4  ;;  %v1134_v53 = vadd.f32 %v1126_v29, %v10970_v59  ;;  %v1144_v10 = vmul.f32 %v10971_v40, %v8970_v49  ;;  %v10975_v4 = vld [vmem:[#allocation155_spill] sm:$0xff] }
 0x36e   : > { %v1323_v60 = vadd.f32 %v1315_v19, %v10972_v14  ;;  %v1333_v58 = vmul.f32 %v10973_v12, %v8970_v49  ;;  %v1512_v39 = vadd.f32 %v1504_v36, %v10974_v20  ;;  %v1522_v27 = vmul.f32 %v8718_v44, %v8970_v49  ;;  %v10976_v12 = vld [vmem:[#allocation235_spill] sm:$0xff] }
 0x36f   : > { %v774_v61 = vadd.f32 %v766_v5, %v756_v7  ;;  %v963_v22 = vadd.f32 %v955_v42, %v945_v34  ;;  %v1152_v28 = vadd.f32 %v1144_v10, %v1134_v53  ;;  %v1701_v2 = vadd.f32 %v1693_v50, %v10975_v4 }
 0x370   : > { %v1341_v37 = vadd.f32 %v1333_v58, %v1323_v60  ;;  %v1711_v29 = vmul.f32 %v8725_v17, %v8970_v49  ;;  %v1530_v14 = vadd.f32 %v1522_v27, %v1512_v39  ;;  %v1890_v7 = vadd.f32 %v1882_v8, %v10976_v12  ;;  %v10977_v60 = vld [vmem:[#allocation156_spill] sm:$0xff] }
 0x371   : > { %v782_v59 = vmul.f32 0.1, %v774_v61  ;;  %v971_v19 = vmul.f32 0.1, %v963_v22  ;;  %v1160_v5 = vmul.f32 0.1, %v1152_v28  ;;  %v1900_v42 = vmul.f32 %v8731_v62, %v8970_v49 }
 0x372   : > { %v1349_v34 = vmul.f32 0.1, %v1341_v37  ;;  %v1719_v36 = vadd.f32 %v1711_v29, %v1701_v2  ;;  %v1538_v10 = vmul.f32 0.1, %v1530_v14  ;;  %v2079_v58 = vadd.f32 %v2071_v52, %v10977_v60  ;;  %v10978_v27 = vld [vmem:[#allocation236_spill] sm:$0xff] }
 0x373   : > { %v790_v53 = vmax.f32 %v774_v61, %v782_v59  ;;  %v979_v50 = vmax.f32 %v963_v22, %v971_v19  ;;  %v1168_v20 = vmax.f32 %v1152_v28, %v1160_v5  ;;  %v1908_v39 = vadd.f32 %v1900_v42, %v1890_v7  ;;  %v10979_v28 = vld [vmem:[#allocation157_spill] sm:$0xff]  ;;  %v10981_v42 = vld [vmem:[#allocation158_spill] sm:$0xff] }
 0x374   : > { %v1357_v4 = vmax.f32 %v1341_v37, %v1349_v34  ;;  %v1727_v17 = vmul.f32 0.1, %v1719_v36  ;;  %v1546_v8 = vmax.f32 %v1530_v14, %v1538_v10  ;;  %v2089_v12 = vmul.f32 %v8738_v33, %v8970_v49  ;;  %v10980_v14 = vld [vmem:[#allocation237_spill] sm:$0xff]  ;;  %v10982_v10 = vld [vmem:[#allocation238_spill] sm:$0xff] }
 0x375   : > { %3695 = vst [vmem:[%s10942_s2 + $0x58] sm:$0xff] %v790_v53  ;;  %3713 = vst [vmem:[%s10942_s2 + $0x98] sm:$0xff] %v979_v50  ;;  %v2268_v2 = vadd.f32 %v2260_v3, %v10978_v27  ;;  %v2278_v61 = vmul.f32 %v8746_v16, %v8970_v49  ;;  %v1916_v22 = vmul.f32 0.1, %v1908_v39  ;;  %v2457_v37 = vadd.f32 %v2449_v15, %v10979_v28 }
 0x376   : > { %3731 = vst [vmem:[%s10942_s2 + $0xd8] sm:$0xff] %v1168_v20  ;;  %3749 = vst [vmem:[%s10942_s2 + $0x118] sm:$0xff] %v1357_v4  ;;  %v1735_v52 = vmax.f32 %v1719_v36, %v1727_v17  ;;  %v2467_v29 = vmul.f32 %v8753_v47, %v8970_v49  ;;  %v2097_v59 = vadd.f32 %v2089_v12, %v2079_v58  ;;  %v10983_v4 = vld [vmem:[#allocation159_spill] sm:$0xff] }
 0x377   : > { %3767 = vst [vmem:[%s10942_s2 + $0x158] sm:$0xff] %v1546_v8  ;;  %v2286_v19 = vadd.f32 %v2278_v61, %v2268_v2  ;;  %v2646_v7 = vadd.f32 %v2638_v32, %v10980_v14  ;;  %v2656_v3 = vmul.f32 %v8759_v57, %v8970_v49  ;;  %v1924_v5 = vmax.f32 %v1908_v39, %v1916_v22 }
 0x378   : > { %3785 = vst [vmem:[%s10942_s2 + $0x198] sm:$0xff] %v1735_v52  ;;  %v2475_v34 = vadd.f32 %v2467_v29, %v2457_v37  ;;  %v2835_v17 = vadd.f32 %v2827_v54, %v10981_v42  ;;  %v2845_v15 = vmul.f32 %v8766_v9, %v8970_v49  ;;  %v2105_v36 = vmul.f32 0.1, %v2097_v59  ;;  %v10984_v52 = vld [vmem:[#allocation239_spill] sm:$0xff] }
 0x379   : > { %v2294_v53 = vmul.f32 0.1, %v2286_v19  ;;  %v2664_v50 = vadd.f32 %v2656_v3, %v2646_v7  ;;  %v3024_v60 = vadd.f32 %v8959_v48, %v10982_v10  ;;  %3803 = vst [vmem:[%s10942_s2 + $0x1d8] sm:$0xff] %v1924_v5  ;;  %v3034_v20 = vmul.f32 %v8776_v26, %v8970_v49  ;;  %v4152_v29 = vld [vmem:[#allocation2 + $0x19] sm:$0xff] }
 0x37a   : > { %v2483_v32 = vmul.f32 0.1, %v2475_v34  ;;  %v2853_v58 = vadd.f32 %v2845_v15, %v2835_v17  ;;  %v3213_v54 = vadd.f32 %v8963_v63, %v10983_v4  ;;  %v2113_v39 = vmax.f32 %v2097_v59, %v2105_v36 }
 0x37b   : > { %v2302_v8 = vmax.f32 %v2286_v19, %v2294_v53  ;;  %v2672_v12 = vmul.f32 0.1, %v2664_v50  ;;  %v3223_v27 = vmul.f32 %v8785_v23, %v8970_v49  ;;  %v3042_v48 = vadd.f32 %v3034_v20, %v3024_v60  ;;  %v596_v53 = vpop.permute.xlu0 %595 }
 0x37c   : > { %v2491_v2 = vmax.f32 %v2475_v34, %v2483_v32  ;;  %v2861_v61 = vmul.f32 0.1, %v2853_v58  ;;  %v3402_v22 = vadd.f32 %v8966_v31, %v10984_v52  ;;  %3821 = vst [vmem:[%s10942_s2 + $0x218] sm:$0xff] %v2113_v39  ;;  %v3412_v63 = vmul.f32 %v8791_v51, %v8970_v49 }
 0x37d   : > { %3839 = vst [vmem:[%s10942_s2 + $0x258] sm:$0xff] %v2302_v8  ;;  %v2680_v28 = vmax.f32 %v2664_v50, %v2672_v12  ;;  %v3231_v37 = vadd.f32 %v3223_v27, %v3213_v54  ;;  %v747_v59 = vmul.f32 %v4152_v29, %v8666_v41  ;;  %v3050_v14 = vmul.f32 0.1, %v3042_v48  ;;  %v10985_v27 = vld [vmem:[#allocation160_spill] sm:$0xff] }
 0x37e   : > { %3857 = vst [vmem:[%s10942_s2 + $0x298] sm:$0xff] %v2491_v2  ;;  %v2869_v19 = vmax.f32 %v2853_v58, %v2861_v61  ;;  %v936_v7 = vmul.f32 %v4152_v29, %v8672_v35  ;;  %v1125_v3 = vmul.f32 %v4152_v29, %v8696_v13  ;;  %v3420_v5 = vadd.f32 %v3412_v63, %v3402_v22 }
 0x37f   : > { %3875 = vst [vmem:[%s10942_s2 + $0x2d8] sm:$0xff] %v2680_v28  ;;  %v3239_v31 = vmul.f32 0.1, %v3231_v37  ;;  %v1314_v34 = vmul.f32 %v4152_v29, %v8705_v30  ;;  %v1503_v42 = vmul.f32 %v4152_v29, %v8711_v18  ;;  %v3058_v49 = vmax.f32 %v3042_v48, %v3050_v14  ;;  %v10986_v48 = vld [vmem:[#allocation240_spill] sm:$0xff]  ;;  %v10987_v28 = vld [vmem:[#allocation161_spill] sm:$0xff]  ;;  %v10989_v14 = vld [vmem:[#allocation279_spill] sm:$0xff] }
 0x380   : > { %3893 = vst [vmem:[%s10942_s2 + $0x318] sm:$0xff] %v2869_v19  ;;  %v1692_v17 = vmul.f32 %v4152_v29, %v8721_v0  ;;  %v1881_v15 = vmul.f32 %v4152_v29, %v8728_v25  ;;  %v2070_v36 = vmul.f32 %v4152_v29, %v8735_v55  ;;  %v3428_v10 = vmul.f32 0.1, %v3420_v5 }
 0x381   : > { %v3247_v50 = vmax.f32 %v3231_v37, %v3239_v31  ;;  %v2259_v60 = vmul.f32 %v4152_v29, %v8741_v46  ;;  %v2448_v32 = vmul.f32 %v4152_v29, %v8749_v45  ;;  %3911 = vst [vmem:[%s10942_s2 + $0x358] sm:$0xff] %v3058_v49  ;;  %v2637_v58 = vmul.f32 %v4152_v29, %v8756_v11 }
 0x382   : > { %v2826_v20 = vmul.f32 %v4152_v29, %v8763_v24  ;;  %v9047_v4 = vmul.f32 %v4152_v29, %v8769_v21  ;;  %v9050_v54 = vmul.f32 %v4152_v29, %v8779_v1  ;;  %v3436_v39 = vmax.f32 %v3420_v5, %v3428_v10 }
 0x383   : > { %3929 = vst [vmem:[%s10942_s2 + $0x398] sm:$0xff] %v3247_v50  ;;  %v9054_v8 = vmul.f32 %v4152_v29, %v8788_v6  ;;  %v9058_v12 = vsel %vm446_vm1, %v596_v53, 0.0  ;;  %v755_v2 = vadd.f32 %v747_v59, %v10985_v27  ;;  %v944_v52 = vadd.f32 %v936_v7, %v10986_v48  ;;  %v10988_v29 = vld [vmem:[#allocation241_spill] sm:$0xff]  ;;  %v10990_v59 = vld [vmem:[#allocation162_spill] sm:$0xff] }
 0x384   : > { %v765_v61 = vmul.f32 %v8669_v38, %v9058_v12  ;;  %v954_v22 = vmul.f32 %v8675_v43, %v9058_v12  ;;  %v1133_v37 = vadd.f32 %v1125_v3, %v10987_v28  ;;  %3947 = vst [vmem:[%s10942_s2 + $0x3d8] sm:$0xff] %v3436_v39  ;;  %v1143_v63 = vmul.f32 %v10971_v40, %v9058_v12  ;;  %v10991_v50 = vld [vmem:[#allocation242_spill] sm:$0xff]  ;;  %v10992_v39 = vld [vmem:[#allocation280_spill] sm:$0xff]  ;;  %v10993_v28 = vld [vmem:[#allocation163_spill] sm:$0xff] }
 0x385   : > { %v1322_v19 = vadd.f32 %v1314_v34, %v10988_v29  ;;  %v1332_v31 = vmul.f32 %v10989_v14, %v9058_v12  ;;  %v1511_v5 = vadd.f32 %v1503_v42, %v10990_v59  ;;  %v1521_v7 = vmul.f32 %v8718_v44, %v9058_v12 }
 0x386   : > { %v773_v49 = vadd.f32 %v765_v61, %v755_v2  ;;  %v962_v53 = vadd.f32 %v954_v22, %v944_v52  ;;  %v1700_v10 = vadd.f32 %v1692_v17, %v10991_v50  ;;  %v1151_v27 = vadd.f32 %v1143_v63, %v1133_v37  ;;  %v10994_v22 = vld [vmem:[#allocation243_spill] sm:$0xff] }
 0x387   : > { %v1340_v3 = vadd.f32 %v1332_v31, %v1322_v19  ;;  %v1710_v48 = vmul.f32 %v10992_v39, %v9058_v12  ;;  %v1889_v40 = vadd.f32 %v1881_v15, %v10993_v28  ;;  %v1529_v14 = vadd.f32 %v1521_v7, %v1511_v5 }
 0x388   : > { %v781_v34 = vmul.f32 0.1, %v773_v49  ;;  %v970_v29 = vmul.f32 0.1, %v962_v53  ;;  %v1899_v42 = vmul.f32 %v8731_v62, %v9058_v12  ;;  %v1159_v2 = vmul.f32 0.1, %v1151_v27 }
 0x389   : > { %v1348_v61 = vmul.f32 0.1, %v1340_v3  ;;  %v1718_v52 = vadd.f32 %v1710_v48, %v1700_v10  ;;  %v2078_v17 = vadd.f32 %v2070_v36, %v10994_v22  ;;  %v1537_v19 = vmul.f32 0.1, %v1529_v14  ;;  %v10995_v48 = vld [vmem:[#allocation164_spill] sm:$0xff]  ;;  %v10998_v22 = vld [vmem:[#allocation166_spill] sm:$0xff] }
 0x38a   : > { %v789_v37 = vmax.f32 %v773_v49, %v781_v34  ;;  %v978_v63 = vmax.f32 %v962_v53, %v970_v29  ;;  %v1907_v31 = vadd.f32 %v1899_v42, %v1889_v40  ;;  %v1167_v15 = vmax.f32 %v1151_v27, %v1159_v2  ;;  %v10996_v53 = vld [vmem:[#allocation165_spill] sm:$0xff] }
 0x38b   : > { %v1356_v59 = vmax.f32 %v1340_v3, %v1348_v61  ;;  %v1726_v50 = vmul.f32 0.1, %v1718_v52  ;;  %v2088_v5 = vmul.f32 %v8738_v33, %v9058_v12  ;;  %v1545_v7 = vmax.f32 %v1529_v14, %v1537_v19  ;;  %v10997_v14 = vld [vmem:[#allocation244_spill] sm:$0xff] }
 0x38c   : > { %3694 = vst [vmem:[%s10942_s2 + $0x50] sm:$0xff] %v789_v37  ;;  %3712 = vst [vmem:[%s10942_s2 + $0x90] sm:$0xff] %v978_v63  ;;  %v1915_v10 = vmul.f32 0.1, %v1907_v31  ;;  %v2267_v28 = vadd.f32 %v2259_v60, %v10995_v48  ;;  %v2277_v36 = vmul.f32 %v8746_v16, %v9058_v12  ;;  %v2456_v27 = vadd.f32 %v2448_v32, %v10996_v53  ;;  %v10999_v63 = vld [vmem:[#allocation245_spill] sm:$0xff] }
 0x38d   : > { %3730 = vst [vmem:[%s10942_s2 + $0xd0] sm:$0xff] %v1167_v15  ;;  %3748 = vst [vmem:[%s10942_s2 + $0x110] sm:$0xff] %v1356_v59  ;;  %v1734_v40 = vmax.f32 %v1718_v52, %v1726_v50  ;;  %v2096_v49 = vadd.f32 %v2088_v5, %v2078_v17  ;;  %v2466_v3 = vmul.f32 %v8753_v47, %v9058_v12  ;;  %v11000_v50 = vld [vmem:[#allocation167_spill] sm:$0xff] }
 0x38e   : > { %3766 = vst [vmem:[%s10942_s2 + $0x150] sm:$0xff] %v1545_v7  ;;  %v1923_v34 = vmax.f32 %v1907_v31, %v1915_v10  ;;  %v2285_v29 = vadd.f32 %v2277_v36, %v2267_v28  ;;  %v2645_v42 = vadd.f32 %v2637_v58, %v10997_v14  ;;  %v2655_v60 = vmul.f32 %v8759_v57, %v9058_v12  ;;  %v11001_v36 = vld [vmem:[#allocation246_spill] sm:$0xff] }
 0x38f   : > { %3784 = vst [vmem:[%s10942_s2 + $0x190] sm:$0xff] %v1734_v40  ;;  %v2104_v2 = vmul.f32 0.1, %v2096_v49  ;;  %v2474_v61 = vadd.f32 %v2466_v3, %v2456_v27  ;;  %v2834_v52 = vadd.f32 %v2826_v20, %v10998_v22  ;;  %v2844_v32 = vmul.f32 %v8766_v9, %v9058_v12  ;;  %v4153_v3 = vld [vmem:[#allocation2 + $0x31] sm:$0xff] }
 0x390   : > { %3802 = vst [vmem:[%s10942_s2 + $0x1d0] sm:$0xff] %v1923_v34  ;;  %v2293_v17 = vmul.f32 0.1, %v2285_v29  ;;  %v2663_v37 = vadd.f32 %v2655_v60, %v2645_v42  ;;  %v3023_v19 = vadd.f32 %v9047_v4, %v10999_v63  ;;  %v3033_v58 = vmul.f32 %v8776_v26, %v9058_v12 }
 0x391   : > { %v2112_v31 = vmax.f32 %v2096_v49, %v2104_v2  ;;  %v2482_v15 = vmul.f32 0.1, %v2474_v61  ;;  %v2852_v59 = vadd.f32 %v2844_v32, %v2834_v52  ;;  %v3212_v5 = vadd.f32 %v9050_v54, %v11000_v50 }
 0x392   : > { %v2301_v20 = vmax.f32 %v2285_v29, %v2293_v17  ;;  %v2671_v7 = vmul.f32 0.1, %v2663_v37  ;;  %v3041_v10 = vadd.f32 %v3033_v58, %v3023_v19  ;;  %v3222_v48 = vmul.f32 %v8785_v23, %v9058_v12 }
 0x393   : > { %3820 = vst [vmem:[%s10942_s2 + $0x210] sm:$0xff] %v2112_v31  ;;  %v2490_v28 = vmax.f32 %v2474_v61, %v2482_v15  ;;  %v2860_v4 = vmul.f32 0.1, %v2852_v59  ;;  %v3401_v40 = vadd.f32 %v9054_v8, %v11001_v36  ;;  %v3411_v49 = vmul.f32 %v8791_v51, %v9058_v12 }
 0x394   : > { %3838 = vst [vmem:[%s10942_s2 + $0x250] sm:$0xff] %v2301_v20  ;;  %v2679_v54 = vmax.f32 %v2663_v37, %v2671_v7  ;;  %v3049_v53 = vmul.f32 0.1, %v3041_v10  ;;  %v3230_v27 = vadd.f32 %v3222_v48, %v3212_v5  ;;  %v750_v34 = vmul.f32 %v4153_v3, %v8666_v41  ;;  %v602_v37 = vpop.permute.xlu1 %601 }
 0x395   : > { %3856 = vst [vmem:[%s10942_s2 + $0x290] sm:$0xff] %v2490_v28  ;;  %v2868_v29 = vmax.f32 %v2852_v59, %v2860_v4  ;;  %v3419_v14 = vadd.f32 %v3411_v49, %v3401_v40  ;;  %v939_v42 = vmul.f32 %v4153_v3, %v8672_v35  ;;  %v1128_v60 = vmul.f32 %v4153_v3, %v8696_v13  ;;  %v11003_v28 = vld [vmem:[#allocation247_spill] sm:$0xff]  ;;  %v11004_v49 = vld [vmem:[#allocation169_spill] sm:$0xff] }
 0x396   : > { %3874 = vst [vmem:[%s10942_s2 + $0x2d0] sm:$0xff] %v2679_v54  ;;  %v3057_v8 = vmax.f32 %v3041_v10, %v3049_v53  ;;  %v3238_v2 = vmul.f32 0.1, %v3230_v27  ;;  %v1317_v12 = vmul.f32 %v4153_v3, %v8705_v30  ;;  %v1506_v61 = vmul.f32 %v4153_v3, %v8711_v18  ;;  %v11002_v10 = vld [vmem:[#allocation168_spill] sm:$0xff]  ;;  %v11005_v53 = vld [vmem:[#allocation277_spill] sm:$0xff] }
 0x397   : > { %3892 = vst [vmem:[%s10942_s2 + $0x310] sm:$0xff] %v2868_v29  ;;  %v3427_v22 = vmul.f32 0.1, %v3419_v14  ;;  %v1695_v52 = vmul.f32 %v4153_v3, %v8721_v0  ;;  %v1884_v32 = vmul.f32 %v4153_v3, %v8728_v25  ;;  %v2073_v17 = vmul.f32 %v4153_v3, %v8735_v55 }
 0x398   : > { %3910 = vst [vmem:[%s10942_s2 + $0x350] sm:$0xff] %v3057_v8  ;;  %v3246_v63 = vmax.f32 %v3230_v27, %v3238_v2  ;;  %v2262_v19 = vmul.f32 %v4153_v3, %v8741_v46  ;;  %v2451_v58 = vmul.f32 %v4153_v3, %v8749_v45  ;;  %v2640_v31 = vmul.f32 %v4153_v3, %v8756_v11 }
 0x399   : > { %v3435_v15 = vmax.f32 %v3419_v14, %v3427_v22  ;;  %v2829_v59 = vmul.f32 %v4153_v3, %v8763_v24  ;;  %v3018_v50 = vmul.f32 %v4153_v3, %v8769_v21  ;;  %v9136_v5 = vmul.f32 %v4153_v3, %v8779_v1  ;;  %v11007_v14 = vld [vmem:[#allocation279_spill] sm:$0xff] }
 0x39a   : > { %3928 = vst [vmem:[%s10942_s2 + $0x390] sm:$0xff] %v3246_v63  ;;  %v9140_v20 = vmul.f32 %v4153_v3, %v8788_v6  ;;  %v9144_v7 = vsel %vm446_vm1, %v602_v37, 0.0  ;;  %v758_v48 = vadd.f32 %v750_v34, %v11002_v10  ;;  %v947_v4 = vadd.f32 %v939_v42, %v11003_v28  ;;  %v11006_v3 = vld [vmem:[#allocation248_spill] sm:$0xff]  ;;  %v11008_v34 = vld [vmem:[#allocation170_spill] sm:$0xff] }
 0x39b   : > { %3946 = vst [vmem:[%s10942_s2 + $0x3d0] sm:$0xff] %v3435_v15  ;;  %v768_v36 = vmul.f32 %v8669_v38, %v9144_v7  ;;  %v957_v40 = vmul.f32 %v8675_v43, %v9144_v7  ;;  %v1136_v54 = vadd.f32 %v1128_v60, %v11004_v49  ;;  %v1146_v27 = vmul.f32 %v11005_v53, %v9144_v7  ;;  %v11009_v15 = vld [vmem:[#allocation249_spill] sm:$0xff]  ;;  %v11010_v53 = vld [vmem:[#allocation171_spill] sm:$0xff] }
 0x39c   : > { %v1325_v29 = vadd.f32 %v1317_v12, %v11006_v3  ;;  %v1335_v8 = vmul.f32 %v11007_v14, %v9144_v7  ;;  %v1514_v2 = vadd.f32 %v1506_v61, %v11008_v34  ;;  %v1524_v42 = vmul.f32 %v8718_v44, %v9144_v7 }
 0x39d   : > { %v776_v22 = vadd.f32 %v768_v36, %v758_v48  ;;  %v965_v37 = vadd.f32 %v957_v40, %v947_v4  ;;  %v1154_v63 = vadd.f32 %v1146_v27, %v1136_v54  ;;  %v1703_v10 = vadd.f32 %v1695_v52, %v11009_v15  ;;  %v11011_v52 = vld [vmem:[#allocation250_spill] sm:$0xff] }
 0x39e   : > { %v1343_v28 = vadd.f32 %v1335_v8, %v1325_v29  ;;  %v1532_v60 = vadd.f32 %v1524_v42, %v1514_v2  ;;  %v1713_v49 = vmul.f32 %v10992_v39, %v9144_v7  ;;  %v1892_v12 = vadd.f32 %v1884_v32, %v11010_v53 }
 0x39f   : > { %v784_v3 = vmul.f32 0.1, %v776_v22  ;;  %v973_v14 = vmul.f32 0.1, %v965_v37  ;;  %v1162_v61 = vmul.f32 0.1, %v1154_v63  ;;  %v1902_v48 = vmul.f32 %v8731_v62, %v9144_v7 }
 0x3a0   : > { %v1351_v4 = vmul.f32 0.1, %v1343_v28  ;;  %v1540_v36 = vmul.f32 0.1, %v1532_v60  ;;  %v1721_v40 = vadd.f32 %v1713_v49, %v1703_v10  ;;  %v2081_v54 = vadd.f32 %v2073_v17, %v11011_v52  ;;  %v11012_v10 = vld [vmem:[#allocation172_spill] sm:$0xff]  ;;  %v11016_v52 = vld [vmem:[#allocation174_spill] sm:$0xff] }
 0x3a1   : > { %v792_v27 = vmax.f32 %v776_v22, %v784_v3  ;;  %v981_v29 = vmax.f32 %v965_v37, %v973_v14  ;;  %v1170_v8 = vmax.f32 %v1154_v63, %v1162_v61  ;;  %v1910_v32 = vadd.f32 %v1902_v48, %v1892_v12  ;;  %v11013_v22 = vld [vmem:[#allocation251_spill] sm:$0xff]  ;;  %v11015_v48 = vld [vmem:[#allocation252_spill] sm:$0xff] }
 0x3a2   : > { %v1359_v53 = vmax.f32 %v1343_v28, %v1351_v4  ;;  %v1548_v34 = vmax.f32 %v1532_v60, %v1540_v36  ;;  %v1729_v2 = vmul.f32 0.1, %v1721_v40  ;;  %v2091_v42 = vmul.f32 %v8738_v33, %v9144_v7  ;;  %v11014_v60 = vld [vmem:[#allocation173_spill] sm:$0xff] }
 0x3a3   : > { %3697 = vst [vmem:[%s10942_s2 + $0x68] sm:$0xff] %v792_v27  ;;  %3715 = vst [vmem:[%s10942_s2 + $0xa8] sm:$0xff] %v981_v29  ;;  %v1918_v15 = vmul.f32 0.1, %v1910_v32  ;;  %v2270_v49 = vadd.f32 %v2262_v19, %v11012_v10  ;;  %v2280_v17 = vmul.f32 %v8746_v16, %v9144_v7  ;;  %v2459_v14 = vadd.f32 %v2451_v58, %v11013_v22  ;;  %v11018_v10 = vld [vmem:[#allocation175_spill] sm:$0xff] }
 0x3a4   : > { %3733 = vst [vmem:[%s10942_s2 + $0xe8] sm:$0xff] %v1170_v8  ;;  %3751 = vst [vmem:[%s10942_s2 + $0x128] sm:$0xff] %v1359_v53  ;;  %v1737_v37 = vmax.f32 %v1721_v40, %v1729_v2  ;;  %v2099_v63 = vadd.f32 %v2091_v42, %v2081_v54  ;;  %v2469_v28 = vmul.f32 %v8753_v47, %v9144_v7  ;;  %v11017_v8 = vld [vmem:[#allocation253_spill] sm:$0xff] }
 0x3a5   : > { %3769 = vst [vmem:[%s10942_s2 + $0x168] sm:$0xff] %v1548_v34  ;;  %v2648_v12 = vadd.f32 %v2640_v31, %v11014_v60  ;;  %v1926_v3 = vmax.f32 %v1910_v32, %v1918_v15  ;;  %v2288_v61 = vadd.f32 %v2280_v17, %v2270_v49  ;;  %v2658_v19 = vmul.f32 %v8759_v57, %v9144_v7 }
 0x3a6   : > { %v2837_v4 = vadd.f32 %v2829_v59, %v11015_v48  ;;  %3787 = vst [vmem:[%s10942_s2 + $0x1a8] sm:$0xff] %v1737_v37  ;;  %v2107_v36 = vmul.f32 0.1, %v2099_v63  ;;  %v2477_v58 = vadd.f32 %v2469_v28, %v2459_v14  ;;  %v2847_v40 = vmul.f32 %v8766_v9, %v9144_v7  ;;  %v4154_v28 = vld [vmem:[#allocation2 + $0x29] sm:$0xff] }
 0x3a7   : > { %v3026_v54 = vadd.f32 %v3018_v50, %v11016_v52  ;;  %3805 = vst [vmem:[%s10942_s2 + $0x1e8] sm:$0xff] %v1926_v3  ;;  %v2296_v27 = vmul.f32 0.1, %v2288_v61  ;;  %v2666_v29 = vadd.f32 %v2658_v19, %v2648_v12  ;;  %v3036_v31 = vmul.f32 %v8776_v26, %v9144_v7 }
 0x3a8   : > { %v3215_v32 = vadd.f32 %v9136_v5, %v11017_v8  ;;  %v2115_v59 = vmax.f32 %v2099_v63, %v2107_v36  ;;  %v2485_v53 = vmul.f32 0.1, %v2477_v58  ;;  %v2855_v34 = vadd.f32 %v2847_v40, %v2837_v4 }
 0x3a9   : > { %v3225_v2 = vmul.f32 %v8785_v23, %v9144_v7  ;;  %v2304_v42 = vmax.f32 %v2288_v61, %v2296_v27  ;;  %v2674_v15 = vmul.f32 0.1, %v2666_v29  ;;  %v3044_v50 = vadd.f32 %v3036_v31, %v3026_v54  ;;  %v600_v27 = vpop.permute.xlu0 %599 }
 0x3aa   : > { %v3404_v49 = vadd.f32 %v9140_v20, %v11018_v10  ;;  %3823 = vst [vmem:[%s10942_s2 + $0x228] sm:$0xff] %v2115_v59  ;;  %v2493_v17 = vmax.f32 %v2477_v58, %v2485_v53  ;;  %v2863_v22 = vmul.f32 0.1, %v2855_v34  ;;  %v3414_v5 = vmul.f32 %v8791_v51, %v9144_v7  ;;  %v11020_v10 = vld [vmem:[#allocation176_spill] sm:$0xff] }
 0x3ab   : > { %v3233_v14 = vadd.f32 %v3225_v2, %v3215_v32  ;;  %3841 = vst [vmem:[%s10942_s2 + $0x268] sm:$0xff] %v2304_v42  ;;  %v2682_v37 = vmax.f32 %v2666_v29, %v2674_v15  ;;  %v3052_v63 = vmul.f32 0.1, %v3044_v50  ;;  %v749_v60 = vmul.f32 %v4154_v28, %v8666_v41  ;;  %v11019_v15 = vld [vmem:[#allocation254_spill] sm:$0xff] }
 0x3ac   : > { %v938_v12 = vmul.f32 %v4154_v28, %v8672_v35  ;;  %3859 = vst [vmem:[%s10942_s2 + $0x2a8] sm:$0xff] %v2493_v17  ;;  %v2871_v20 = vmax.f32 %v2855_v34, %v2863_v22  ;;  %v3422_v61 = vadd.f32 %v3414_v5, %v3404_v49  ;;  %v1127_v19 = vmul.f32 %v4154_v28, %v8696_v13  ;;  %v11021_v17 = vld [vmem:[#allocation255_spill] sm:$0xff] }
 0x3ad   : > { %v3241_v3 = vmul.f32 0.1, %v3233_v14  ;;  %3877 = vst [vmem:[%s10942_s2 + $0x2e8] sm:$0xff] %v2682_v37  ;;  %v3060_v48 = vmax.f32 %v3044_v50, %v3052_v63  ;;  %v1316_v7 = vmul.f32 %v4154_v28, %v8705_v30  ;;  %v1505_v4 = vmul.f32 %v4154_v28, %v8711_v18  ;;  %v11022_v37 = vld [vmem:[#allocation277_spill] sm:$0xff] }
 0x3ae   : > { %v1694_v36 = vmul.f32 %v4154_v28, %v8721_v0  ;;  %3895 = vst [vmem:[%s10942_s2 + $0x328] sm:$0xff] %v2871_v20  ;;  %v3430_v40 = vmul.f32 0.1, %v3422_v61  ;;  %v1883_v52 = vmul.f32 %v4154_v28, %v8728_v25  ;;  %v2072_v54 = vmul.f32 %v4154_v28, %v8735_v55 }
 0x3af   : > { %v3249_v58 = vmax.f32 %v3233_v14, %v3241_v3  ;;  %3913 = vst [vmem:[%s10942_s2 + $0x368] sm:$0xff] %v3060_v48  ;;  %v2261_v29 = vmul.f32 %v4154_v28, %v8741_v46  ;;  %v2450_v31 = vmul.f32 %v4154_v28, %v8749_v45  ;;  %v2639_v8 = vmul.f32 %v4154_v28, %v8756_v11  ;;  %v11024_v3 = vld [vmem:[#allocation279_spill] sm:$0xff] }
 0x3b0   : > { %v2828_v32 = vmul.f32 %v4154_v28, %v8763_v24  ;;  %v3438_v59 = vmax.f32 %v3422_v61, %v3430_v40  ;;  %v3017_v53 = vmul.f32 %v4154_v28, %v8769_v21  ;;  %v9222_v34 = vmul.f32 %v4154_v28, %v8779_v1 }
 0x3b1   : > { %3931 = vst [vmem:[%s10942_s2 + $0x3a8] sm:$0xff] %v3249_v58  ;;  %v9225_v2 = vmul.f32 %v4154_v28, %v8788_v6  ;;  %v9229_v42 = vsel %vm446_vm1, %v600_v27, 0.0  ;;  %v757_v50 = vadd.f32 %v749_v60, %v11019_v15  ;;  %v946_v49 = vadd.f32 %v938_v12, %v11020_v10  ;;  %v11023_v28 = vld [vmem:[#allocation177_spill] sm:$0xff]  ;;  %v11025_v60 = vld [vmem:[#allocation256_spill] sm:$0xff] }
 0x3b2   : > { %v1135_v22 = vadd.f32 %v1127_v19, %v11021_v17  ;;  %3949 = vst [vmem:[%s10942_s2 + $0x3e8] sm:$0xff] %v3438_v59  ;;  %v767_v14 = vmul.f32 %v8669_v38, %v9229_v42  ;;  %v956_v5 = vmul.f32 %v8675_v43, %v9229_v42  ;;  %v1145_v63 = vmul.f32 %v11022_v37, %v9229_v42  ;;  %v11026_v19 = vld [vmem:[#allocation178_spill] sm:$0xff]  ;;  %v11027_v37 = vld [vmem:[#allocation63_spill] sm:$0xff] }
 0x3b3   : > { %v1324_v20 = vadd.f32 %v1316_v7, %v11023_v28  ;;  %v1334_v61 = vmul.f32 %v11024_v3, %v9229_v42  ;;  %v1513_v48 = vadd.f32 %v1505_v4, %v11025_v60  ;;  %v1523_v12 = vmul.f32 %v8718_v44, %v9229_v42 }
 0x3b4   : > { %v1702_v58 = vadd.f32 %v1694_v36, %v11026_v19  ;;  %v775_v40 = vadd.f32 %v767_v14, %v757_v50  ;;  %v964_v27 = vadd.f32 %v956_v5, %v946_v49  ;;  %v1153_v59 = vadd.f32 %v1145_v63, %v1135_v22  ;;  %v11028_v14 = vld [vmem:[#allocation64_spill] sm:$0xff] }
 0x3b5   : > { %v1712_v15 = vmul.f32 %v10992_v39, %v9229_v42  ;;  %v1342_v10 = vadd.f32 %v1334_v61, %v1324_v20  ;;  %v1531_v17 = vadd.f32 %v1523_v12, %v1513_v48  ;;  %v1891_v7 = vadd.f32 %v1883_v52, %v11027_v37 }
 0x3b6   : > { %v1901_v28 = vmul.f32 %v8731_v62, %v9229_v42  ;;  %v783_v3 = vmul.f32 0.1, %v775_v40  ;;  %v972_v4 = vmul.f32 0.1, %v964_v27  ;;  %v1161_v60 = vmul.f32 0.1, %v1153_v59 }
 0x3b7   : > { %v1720_v36 = vadd.f32 %v1712_v15, %v1702_v58  ;;  %v1350_v50 = vmul.f32 0.1, %v1342_v10  ;;  %v1539_v49 = vmul.f32 0.1, %v1531_v17  ;;  %v2080_v5 = vadd.f32 %v2072_v54, %v11028_v14  ;;  %v11029_v15 = vld [vmem:[#allocation65_spill] sm:$0xff] }
 0x3b8   : > { %v1909_v22 = vadd.f32 %v1901_v28, %v1891_v7  ;;  %v791_v63 = vmax.f32 %v775_v40, %v783_v3  ;;  %v980_v20 = vmax.f32 %v964_v27, %v972_v4  ;;  %v1169_v52 = vmax.f32 %v1153_v59, %v1161_v60  ;;  %v11030_v40 = vld [vmem:[#allocation66_spill] sm:$0xff]  ;;  %v11031_v7 = vld [vmem:[#allocation67_spill] sm:$0xff] }
 0x3b9   : > { %v1728_v37 = vmul.f32 0.1, %v1720_v36  ;;  %v1358_v61 = vmax.f32 %v1342_v10, %v1350_v50  ;;  %v1547_v48 = vmax.f32 %v1531_v17, %v1539_v49  ;;  %v2090_v19 = vmul.f32 %v8738_v33, %v9229_v42 }
 0x3ba   : > { %v1917_v12 = vmul.f32 0.1, %v1909_v22  ;;  %3696 = vst [vmem:[%s10942_s2 + $0x60] sm:$0xff] %v791_v63  ;;  %3714 = vst [vmem:[%s10942_s2 + $0xa0] sm:$0xff] %v980_v20  ;;  %v2269_v54 = vadd.f32 %v2261_v29, %v11029_v15  ;;  %v2279_v3 = vmul.f32 %v8746_v16, %v9229_v42  ;;  %v2458_v27 = vadd.f32 %v2450_v31, %v11030_v40  ;;  %v11032_v29 = vld [vmem:[#allocation68_spill] sm:$0xff]  ;;  %v11035_v15 = vld [vmem:[#allocation71_spill] sm:$0xff] }
 0x3bb   : > { %3732 = vst [vmem:[%s10942_s2 + $0xe0] sm:$0xff] %v1169_v52  ;;  %v1736_v58 = vmax.f32 %v1720_v36, %v1728_v37  ;;  %3750 = vst [vmem:[%s10942_s2 + $0x120] sm:$0xff] %v1358_v61  ;;  %v2098_v10 = vadd.f32 %v2090_v19, %v2080_v5  ;;  %v2468_v17 = vmul.f32 %v8753_v47, %v9229_v42  ;;  %v11034_v52 = vld [vmem:[#allocation70_spill] sm:$0xff] }
 0x3bc   : > { %3768 = vst [vmem:[%s10942_s2 + $0x160] sm:$0xff] %v1547_v48  ;;  %v1925_v59 = vmax.f32 %v1909_v22, %v1917_v12  ;;  %v2647_v28 = vadd.f32 %v2639_v8, %v11031_v7  ;;  %v2287_v4 = vadd.f32 %v2279_v3, %v2269_v54  ;;  %v2657_v60 = vmul.f32 %v8759_v57, %v9229_v42  ;;  %v11033_v22 = vld [vmem:[#allocation69_spill] sm:$0xff] }
 0x3bd   : > { %3786 = vst [vmem:[%s10942_s2 + $0x1a0] sm:$0xff] %v1736_v58  ;;  %v2836_v36 = vadd.f32 %v2828_v32, %v11032_v29  ;;  %v2846_v50 = vmul.f32 %v8766_v9, %v9229_v42  ;;  %v2106_v31 = vmul.f32 0.1, %v2098_v10  ;;  %v2476_v49 = vadd.f32 %v2468_v17, %v2458_v27  ;;  %v4155_v17 = vld [vmem:[#allocation2 + $0x41] sm:$0xff] }
 0x3be   : > { %3804 = vst [vmem:[%s10942_s2 + $0x1e0] sm:$0xff] %v1925_v59  ;;  %v3025_v14 = vadd.f32 %v3017_v53, %v11033_v22  ;;  %v3035_v5 = vmul.f32 %v8776_v26, %v9229_v42  ;;  %v2295_v8 = vmul.f32 0.1, %v2287_v4  ;;  %v2665_v63 = vadd.f32 %v2657_v60, %v2647_v28 }
 0x3bf   : > { %v2854_v20 = vadd.f32 %v2846_v50, %v2836_v36  ;;  %v3214_v37 = vadd.f32 %v9222_v34, %v11034_v52  ;;  %v2114_v32 = vmax.f32 %v2098_v10, %v2106_v31  ;;  %v2484_v61 = vmul.f32 0.1, %v2476_v49 }
 0x3c0   : > { %v3043_v48 = vadd.f32 %v3035_v5, %v3025_v14  ;;  %v3224_v12 = vmul.f32 %v8785_v23, %v9229_v42  ;;  %v2303_v19 = vmax.f32 %v2287_v4, %v2295_v8  ;;  %v2673_v58 = vmul.f32 0.1, %v2665_v63 }
 0x3c1   : > { %v2862_v53 = vmul.f32 0.1, %v2854_v20  ;;  %v3403_v54 = vadd.f32 %v9225_v2, %v11035_v15  ;;  %3822 = vst [vmem:[%s10942_s2 + $0x220] sm:$0xff] %v2114_v32  ;;  %v2492_v3 = vmax.f32 %v2476_v49, %v2484_v61  ;;  %v3413_v34 = vmul.f32 %v8791_v51, %v9229_v42  ;;  %v606_v49 = vpop.permute.xlu1 %605  ;;  %v11037_v15 = vld [vmem:[#allocation73_spill] sm:$0xff] }
 0x3c2   : > { %v3051_v40 = vmul.f32 0.1, %v3043_v48  ;;  %v3232_v27 = vadd.f32 %v3224_v12, %v3214_v37  ;;  %3840 = vst [vmem:[%s10942_s2 + $0x260] sm:$0xff] %v2303_v19  ;;  %v2681_v59 = vmax.f32 %v2665_v63, %v2673_v58  ;;  %v752_v7 = vmul.f32 %v4155_v17, %v8666_v41  ;;  %v11036_v19 = vld [vmem:[#allocation72_spill] sm:$0xff] }
 0x3c3   : > { %v2870_v10 = vmax.f32 %v2854_v20, %v2862_v53  ;;  %v941_v28 = vmul.f32 %v4155_v17, %v8672_v35  ;;  %3858 = vst [vmem:[%s10942_s2 + $0x2a0] sm:$0xff] %v2492_v3  ;;  %v3421_v60 = vadd.f32 %v3413_v34, %v3403_v54  ;;  %v1130_v29 = vmul.f32 %v4155_v17, %v8696_v13  ;;  %v11039_v34 = vld [vmem:[#allocation277_spill] sm:$0xff] }
 0x3c4   : > { %v3059_v2 = vmax.f32 %v3043_v48, %v3051_v40  ;;  %v3240_v4 = vmul.f32 0.1, %v3232_v27  ;;  %3876 = vst [vmem:[%s10942_s2 + $0x2e0] sm:$0xff] %v2681_v59  ;;  %v1319_v42 = vmul.f32 %v4155_v17, %v8705_v30  ;;  %v1508_v36 = vmul.f32 %v4155_v17, %v8711_v18  ;;  %v11038_v40 = vld [vmem:[#allocation257_spill] sm:$0xff] }
 0x3c5   : > { %3894 = vst [vmem:[%s10942_s2 + $0x320] sm:$0xff] %v2870_v10  ;;  %v1697_v50 = vmul.f32 %v4155_v17, %v8721_v0  ;;  %v1886_v31 = vmul.f32 %v4155_v17, %v8728_v25  ;;  %v3429_v14 = vmul.f32 0.1, %v3421_v60  ;;  %v2075_v5 = vmul.f32 %v4155_v17, %v8735_v55  ;;  %v11040_v10 = vld [vmem:[#allocation258_spill] sm:$0xff] }
 0x3c6   : > { %3912 = vst [vmem:[%s10942_s2 + $0x360] sm:$0xff] %v3059_v2  ;;  %v3248_v22 = vmax.f32 %v3232_v27, %v3240_v4  ;;  %v2264_v8 = vmul.f32 %v4155_v17, %v8741_v46  ;;  %v2453_v63 = vmul.f32 %v4155_v17, %v8749_v45  ;;  %v2642_v20 = vmul.f32 %v4155_v17, %v8756_v11  ;;  %v11041_v2 = vld [vmem:[#allocation279_spill] sm:$0xff] }
 0x3c7   : > { %v2831_v52 = vmul.f32 %v4155_v17, %v8763_v24  ;;  %v9305_v37 = vmul.f32 %v4155_v17, %v8769_v21  ;;  %v3437_v32 = vmax.f32 %v3421_v60, %v3429_v14  ;;  %v9309_v61 = vmul.f32 %v4155_v17, %v8779_v1 }
 0x3c8   : > { %3930 = vst [vmem:[%s10942_s2 + $0x3a0] sm:$0xff] %v3248_v22  ;;  %v9312_v48 = vmul.f32 %v4155_v17, %v8788_v6  ;;  %v9316_v12 = vsel %vm446_vm1, %v606_v49, 0.0  ;;  %v760_v58 = vadd.f32 %v752_v7, %v11036_v19  ;;  %v949_v54 = vadd.f32 %v941_v28, %v11037_v15  ;;  %v11042_v49 = vld [vmem:[#allocation259_spill] sm:$0xff] }
 0x3c9   : > { %v770_v53 = vmul.f32 %v8669_v38, %v9316_v12  ;;  %v959_v3 = vmul.f32 %v8675_v43, %v9316_v12  ;;  %3948 = vst [vmem:[%s10942_s2 + $0x3e0] sm:$0xff] %v3437_v32  ;;  %v1138_v27 = vadd.f32 %v1130_v29, %v11038_v40  ;;  %v1148_v59 = vmul.f32 %v11039_v34, %v9316_v12  ;;  %v11043_v32 = vld [vmem:[#allocation278_spill] sm:$0xff] }
 0x3ca   : > { %v1327_v17 = vadd.f32 %v1319_v42, %v11040_v10  ;;  %v1337_v4 = vmul.f32 %v11041_v2, %v9316_v12  ;;  %v1516_v22 = vadd.f32 %v1508_v36, %v11042_v49  ;;  %v1526_v28 = vmul.f32 %v8718_v44, %v9316_v12  ;;  %v11044_v2 = vld [vmem:[#allocation260_spill] sm:$0xff] }
 0x3cb   : > { %v778_v7 = vadd.f32 %v770_v53, %v760_v58  ;;  %v967_v60 = vadd.f32 %v959_v3, %v949_v54  ;;  %v1156_v14 = vadd.f32 %v1148_v59, %v1138_v27  ;;  %v1705_v15 = vadd.f32 %v1697_v50, %v11043_v32 }
 0x3cc   : > { %v1345_v19 = vadd.f32 %v1337_v4, %v1327_v17  ;;  %v1715_v29 = vmul.f32 %v10992_v39, %v9316_v12  ;;  %v1534_v10 = vadd.f32 %v1526_v28, %v1516_v22  ;;  %v1894_v58 = vadd.f32 %v1886_v31, %v11044_v2  ;;  %v11045_v17 = vld [vmem:[#allocation261_spill] sm:$0xff]  ;;  %v11046_v28 = vld [vmem:[#allocation262_spill] sm:$0xff] }
 0x3cd   : > { %v786_v40 = vmul.f32 0.1, %v778_v7  ;;  %v975_v42 = vmul.f32 0.1, %v967_v60  ;;  %v1164_v53 = vmul.f32 0.1, %v1156_v14  ;;  %v1904_v3 = vmul.f32 %v8731_v62, %v9316_v12 }
 0x3ce   : > { %v1353_v54 = vmul.f32 0.1, %v1345_v19  ;;  %v1723_v36 = vadd.f32 %v1715_v29, %v1705_v15  ;;  %v1542_v59 = vmul.f32 0.1, %v1534_v10  ;;  %v2083_v4 = vadd.f32 %v2075_v5, %v11045_v17 }
 0x3cf   : > { %v794_v27 = vmax.f32 %v778_v7, %v786_v40  ;;  %v983_v50 = vmax.f32 %v967_v60, %v975_v42  ;;  %v1172_v49 = vmax.f32 %v1156_v14, %v1164_v53  ;;  %v1912_v22 = vadd.f32 %v1904_v3, %v1894_v58  ;;  %v11047_v14 = vld [vmem:[#allocation263_spill] sm:$0xff]  ;;  %v11049_v3 = vld [vmem:[#allocation265_spill] sm:$0xff] }
 0x3d0   : > { %v1361_v32 = vmax.f32 %v1345_v19, %v1353_v54  ;;  %v1731_v39 = vmul.f32 0.1, %v1723_v36  ;;  %v1550_v31 = vmax.f32 %v1534_v10, %v1542_v59  ;;  %v2093_v2 = vmul.f32 %v8738_v33, %v9316_v12  ;;  %v11048_v10 = vld [vmem:[#allocation264_spill] sm:$0xff]  ;;  %v11050_v59 = vld [vmem:[#allocation74_spill] sm:$0xff] }
 0x3d1   : > { %3699 = vst [vmem:[%s10942_s2 + $0x78] sm:$0xff] %v794_v27  ;;  %3717 = vst [vmem:[%s10942_s2 + $0xb8] sm:$0xff] %v983_v50  ;;  %v2272_v15 = vadd.f32 %v2264_v8, %v11046_v28  ;;  %v2282_v7 = vmul.f32 %v8746_v16, %v9316_v12  ;;  %v1920_v60 = vmul.f32 0.1, %v1912_v22  ;;  %v2461_v19 = vadd.f32 %v2453_v63, %v11047_v14 }
 0x3d2   : > { %3735 = vst [vmem:[%s10942_s2 + $0xf8] sm:$0xff] %v1172_v49  ;;  %3753 = vst [vmem:[%s10942_s2 + $0x138] sm:$0xff] %v1361_v32  ;;  %v1739_v5 = vmax.f32 %v1723_v36, %v1731_v39  ;;  %v2471_v29 = vmul.f32 %v8753_v47, %v9316_v12  ;;  %v2101_v40 = vadd.f32 %v2093_v2, %v2083_v4  ;;  %v11051_v32 = vld [vmem:[#allocation75_spill] sm:$0xff] }
 0x3d3   : > { %3771 = vst [vmem:[%s10942_s2 + $0x178] sm:$0xff] %v1550_v31  ;;  %v2290_v42 = vadd.f32 %v2282_v7, %v2272_v15  ;;  %v2650_v58 = vadd.f32 %v2642_v20, %v11048_v10  ;;  %v2660_v8 = vmul.f32 %v8759_v57, %v9316_v12  ;;  %v1928_v53 = vmax.f32 %v1912_v22, %v1920_v60 }
 0x3d4   : > { %3789 = vst [vmem:[%s10942_s2 + $0x1b8] sm:$0xff] %v1739_v5  ;;  %v2479_v54 = vadd.f32 %v2471_v29, %v2461_v19  ;;  %v2839_v39 = vadd.f32 %v2831_v52, %v11049_v3  ;;  %v2849_v63 = vmul.f32 %v8766_v9, %v9316_v12  ;;  %v2109_v36 = vmul.f32 0.1, %v2101_v40  ;;  %v11052_v5 = vld [vmem:[#allocation76_spill] sm:$0xff] }
 0x3d5   : > { %v2298_v27 = vmul.f32 0.1, %v2290_v42  ;;  %v2668_v50 = vadd.f32 %v2660_v8, %v2650_v58  ;;  %v3028_v17 = vadd.f32 %v9305_v37, %v11050_v59  ;;  %3807 = vst [vmem:[%s10942_s2 + $0x1f8] sm:$0xff] %v1928_v53  ;;  %v3038_v49 = vmul.f32 %v8776_v26, %v9316_v12  ;;  %v4156_v29 = vld [vmem:[#allocation2 + $0x39] sm:$0xff] }
 0x3d6   : > { %v2487_v20 = vmul.f32 0.1, %v2479_v54  ;;  %v2857_v4 = vadd.f32 %v2849_v63, %v2839_v39  ;;  %v3217_v52 = vadd.f32 %v9309_v61, %v11051_v32  ;;  %v2117_v22 = vmax.f32 %v2101_v40, %v2109_v36  ;;  %v11057_v32 = vld [vmem:[#allocation279_spill] sm:$0xff] }
 0x3d7   : > { %v2306_v31 = vmax.f32 %v2290_v42, %v2298_v27  ;;  %v2676_v2 = vmul.f32 0.1, %v2668_v50  ;;  %v3227_v28 = vmul.f32 %v8785_v23, %v9316_v12  ;;  %v3046_v37 = vadd.f32 %v3038_v49, %v3028_v17  ;;  %v11056_v49 = vld [vmem:[#allocation267_spill] sm:$0xff] }
 0x3d8   : > { %v2495_v15 = vmax.f32 %v2479_v54, %v2487_v20  ;;  %v2865_v7 = vmul.f32 0.1, %v2857_v4  ;;  %v3406_v60 = vadd.f32 %v9312_v48, %v11052_v5  ;;  %3825 = vst [vmem:[%s10942_s2 + $0x238] sm:$0xff] %v2117_v22  ;;  %v3416_v61 = vmul.f32 %v8791_v51, %v9316_v12  ;;  %v11055_v20 = vld [vmem:[#allocation266_spill] sm:$0xff]  ;;  %v11058_v22 = vld [vmem:[#allocation81_spill] sm:$0xff]  ;;  %v11060_v5 = vld [vmem:[#allocation280_spill] sm:$0xff] }
 0x3d9   : > { %3843 = vst [vmem:[%s10942_s2 + $0x278] sm:$0xff] %v2306_v31  ;;  %v2684_v14 = vmax.f32 %v2668_v50, %v2676_v2  ;;  %v3235_v19 = vadd.f32 %v3227_v28, %v3217_v52  ;;  %v751_v40 = vmul.f32 %v4156_v29, %v8666_v41  ;;  %v3054_v10 = vmul.f32 0.1, %v3046_v37 }
 0x3da   : > { %3861 = vst [vmem:[%s10942_s2 + $0x2b8] sm:$0xff] %v2495_v15  ;;  %v2873_v42 = vmax.f32 %v2857_v4, %v2865_v7  ;;  %v940_v58 = vmul.f32 %v4156_v29, %v8672_v35  ;;  %v1129_v8 = vmul.f32 %v4156_v29, %v8696_v13  ;;  %v3424_v53 = vadd.f32 %v3416_v61, %v3406_v60  ;;  %v604_v35 = vpop.permute.xlu0 %603  ;;  %v11059_v15 = vld [vmem:[#allocation268_spill] sm:$0xff] }
 0x3db   : > { %3879 = vst [vmem:[%s10942_s2 + $0x2f8] sm:$0xff] %v2684_v14  ;;  %v3243_v48 = vmul.f32 0.1, %v3235_v19  ;;  %v1318_v54 = vmul.f32 %v4156_v29, %v8705_v30  ;;  %v1507_v3 = vmul.f32 %v4156_v29, %v8711_v18  ;;  %v3062_v12 = vmax.f32 %v3046_v37, %v3054_v10 }
 0x3dc   : > { %3897 = vst [vmem:[%s10942_s2 + $0x338] sm:$0xff] %v2873_v42  ;;  %v1696_v41 = vmul.f32 %v4156_v29, %v8721_v0  ;;  %v1885_v39 = vmul.f32 %v4156_v29, %v8728_v25  ;;  %v2074_v63 = vmul.f32 %v4156_v29, %v8735_v55  ;;  %v3432_v13 = vmul.f32 0.1, %v3424_v53 }
 0x3dd   : > { %v3251_v36 = vmax.f32 %v3235_v19, %v3243_v48  ;;  %v2263_v27 = vmul.f32 %v4156_v29, %v8741_v46  ;;  %v2452_v50 = vmul.f32 %v4156_v29, %v8749_v45  ;;  %3915 = vst [vmem:[%s10942_s2 + $0x378] sm:$0xff] %v3062_v12  ;;  %v2641_v30 = vmul.f32 %v4156_v29, %v8756_v11  ;;  %v11053_v45 = vld [vmem:[#allocation107_spill] sm:$0xff]  ;;  %v11054_v11 = vld [vmem:[#allocation62_spill] sm:$0xff] }
 0x3de   : > { %v2830_v18 = vmul.f32 %v4156_v29, %v8763_v24  ;;  %v9393_v59 = vmul.f32 %v4156_v29, %v8769_v21  ;;  %v9396_v0 = vmul.f32 %v4156_v29, %v8779_v1  ;;  %v3440_v25 = vmax.f32 %v3424_v53, %v3432_v13  ;;  %v11063_v13 = vld [vmem:[#allocation89_spill] sm:$0xff] }
 0x3df   : > { %3933 = vst [vmem:[%s10942_s2 + $0x3b8] sm:$0xff] %v3251_v36  ;;  %v9400_v55 = vmul.f32 %v4156_v29, %v8788_v6  ;;  %v9404_v46 = vsel %vm446_vm1, %v604_v35, 0.0  ;;  %v759_v17 = vadd.f32 %v751_v40, %v11053_v45  ;;  %v948_v21 = vadd.f32 %v940_v58, %v11054_v11  ;;  %v11062_v58 = vld [vmem:[#allocation270_spill] sm:$0xff] }
 0x3e0   : > { %v769_v24 = vmul.f32 %v8669_v38, %v9404_v46  ;;  %v958_v1 = vmul.f32 %v8675_v43, %v9404_v46  ;;  %v1137_v4 = vadd.f32 %v1129_v8, %v11055_v20  ;;  %3951 = vst [vmem:[%s10942_s2 + $0x3f8] sm:$0xff] %v3440_v25  ;;  %v1147_v6 = vmul.f32 %v11039_v34, %v9404_v46  ;;  %v11061_v34 = vld [vmem:[#allocation269_spill] sm:$0xff]  ;;  %v11065_v20 = vld [vmem:[#allocation272_spill] sm:$0xff] }
 0x3e1   : > { %v1326_v56 = vadd.f32 %v1318_v54, %v11056_v49  ;;  %v1336_v52 = vmul.f32 %v11057_v32, %v9404_v46  ;;  %v1515_v31 = vadd.f32 %v1507_v3, %v11058_v22  ;;  %v1525_v28 = vmul.f32 %v8718_v44, %v9404_v46  ;;  %v11066_v49 = vld [vmem:[#allocation273_spill] sm:$0xff] }
 0x3e2   : > { %v777_v2 = vadd.f32 %v769_v24, %v759_v17  ;;  %v966_v38 = vadd.f32 %v958_v1, %v948_v21  ;;  %v1704_v43 = vadd.f32 %v1696_v41, %v11059_v15  ;;  %v1155_v7 = vadd.f32 %v1147_v6, %v1137_v4  ;;  %v11064_v24 = vld [vmem:[#allocation271_spill] sm:$0xff] }
 0x3e3   : > { %v1344_v37 = vadd.f32 %v1336_v52, %v1326_v56  ;;  %v1714_v60 = vmul.f32 %v11060_v5, %v9404_v46  ;;  %v1893_v14 = vadd.f32 %v1885_v39, %v11061_v34  ;;  %v1533_v29 = vadd.f32 %v1525_v28, %v1515_v31  ;;  %v11067_v52 = vld [vmem:[#allocation274_spill] sm:$0xff] }
 0x3e4   : > { %v785_v19 = vmul.f32 0.1, %v777_v2  ;;  %v974_v61 = vmul.f32 0.1, %v966_v38  ;;  %v1903_v40 = vmul.f32 %v8731_v62, %v9404_v46  ;;  %v1163_v42 = vmul.f32 0.1, %v1155_v7 }
 0x3e5   : > { %v1352_v10 = vmul.f32 0.1, %v1344_v37  ;;  %v1722_v44 = vadd.f32 %v1714_v60, %v1704_v43  ;;  %v2082_v8 = vadd.f32 %v2074_v63, %v11062_v58  ;;  %v1541_v54 = vmul.f32 0.1, %v1533_v29 }
 0x3e6   : > { %v793_v48 = vmax.f32 %v777_v2, %v785_v19  ;;  %v982_v53 = vmax.f32 %v966_v38, %v974_v61  ;;  %v1911_v3 = vadd.f32 %v1903_v40, %v1893_v14  ;;  %v1171_v12 = vmax.f32 %v1155_v7, %v1163_v42  ;;  %v11068_v38 = vld [vmem:[#allocation275_spill] sm:$0xff] }
 0x3e7   : > { %v1360_v41 = vmax.f32 %v1344_v37, %v1352_v10  ;;  %v1730_v39 = vmul.f32 0.1, %v1722_v44  ;;  %v2092_v35 = vmul.f32 %v8738_v33, %v9404_v46  ;;  %v1549_v62 = vmax.f32 %v1533_v29, %v1541_v54 }
 0x3e8   : > { %3698 = vst [vmem:[%s10942_s2 + $0x70] sm:$0xff] %v793_v48  ;;  %3716 = vst [vmem:[%s10942_s2 + $0xb0] sm:$0xff] %v982_v53  ;;  %v1919_v36 = vmul.f32 0.1, %v1911_v3  ;;  %v2271_v25 = vadd.f32 %v2263_v27, %v11063_v13  ;;  %v2281_v63 = vmul.f32 %v8746_v16, %v9404_v46  ;;  %v2460_v11 = vadd.f32 %v2452_v50, %v11064_v24 }
 0x3e9   : > { %3734 = vst [vmem:[%s10942_s2 + $0xf0] sm:$0xff] %v1171_v12  ;;  %3752 = vst [vmem:[%s10942_s2 + $0x130] sm:$0xff] %v1360_v41  ;;  %v1738_v45 = vmax.f32 %v1722_v44, %v1730_v39  ;;  %v2100_v17 = vadd.f32 %v2092_v35, %v2082_v8  ;;  %v2470_v33 = vmul.f32 %v8753_v47, %v9404_v46 }
 0x3ea   : > { %3770 = vst [vmem:[%s10942_s2 + $0x170] sm:$0xff] %v1549_v62  ;;  %v1927_v21 = vmax.f32 %v1911_v3, %v1919_v36  ;;  %v2289_v1 = vadd.f32 %v2281_v63, %v2271_v25  ;;  %v2649_v4 = vadd.f32 %v2641_v30, %v11065_v20  ;;  %v2659_v27 = vmul.f32 %v8759_v57, %v9404_v46 }
 0x3eb   : > { %3788 = vst [vmem:[%s10942_s2 + $0x1b0] sm:$0xff] %v1738_v45  ;;  %v2108_v16 = vmul.f32 0.1, %v2100_v17  ;;  %v2478_v6 = vadd.f32 %v2470_v33, %v2460_v11  ;;  %v2838_v56 = vadd.f32 %v2830_v18, %v11066_v49  ;;  %v2848_v50 = vmul.f32 %v8766_v9, %v9404_v46 }
 0x3ec   : > { %3806 = vst [vmem:[%s10942_s2 + $0x1f0] sm:$0xff] %v1927_v21  ;;  %v2297_v32 = vmul.f32 0.1, %v2289_v1  ;;  %v2667_v47 = vadd.f32 %v2659_v27, %v2649_v4  ;;  %v3027_v22 = vadd.f32 %v9393_v59, %v11067_v52  ;;  %v3037_v30 = vmul.f32 %v8776_v26, %v9404_v46  ;;  %v11069_v26 = vld [vmem:[#allocation276_spill] sm:$0xff] }
 0x3ed   : > { %v2116_v57 = vmax.f32 %v2100_v17, %v2108_v16  ;;  %v2486_v31 = vmul.f32 0.1, %v2478_v6  ;;  %v2856_v2 = vadd.f32 %v2848_v50, %v2838_v56  ;;  %v3216_v18 = vadd.f32 %v9396_v0, %v11068_v38 }
 0x3ee   : > { %v2305_v28 = vmax.f32 %v2289_v1, %v2297_v32  ;;  %v2675_v9 = vmul.f32 0.1, %v2667_v47  ;;  %v3045_v15 = vadd.f32 %v3037_v30, %v3027_v22  ;;  %v3226_v43 = vmul.f32 %v8785_v23, %v9404_v46 }
 0x3ef   : > { %3824 = vst [vmem:[%s10942_s2 + $0x230] sm:$0xff] %v2116_v57  ;;  %v2494_v59 = vmax.f32 %v2478_v6, %v2486_v31  ;;  %v2864_v7 = vmul.f32 0.1, %v2856_v2  ;;  %v3405_v37 = vadd.f32 %v9400_v55, %v11069_v26  ;;  %v3415_v5 = vmul.f32 %v8791_v51, %v9404_v46 }
 0x3f0   : > { %3842 = vst [vmem:[%s10942_s2 + $0x270] sm:$0xff] %v2305_v28  ;;  %v2683_v0 = vmax.f32 %v2667_v47, %v2675_v9  ;;  %v3053_v60 = vmul.f32 0.1, %v3045_v15  ;;  %v3234_v34 = vadd.f32 %v3226_v43, %v3216_v18 }
 0x3f1   : > { %3860 = vst [vmem:[%s10942_s2 + $0x2b0] sm:$0xff] %v2494_v59  ;;  %v2872_v23 = vmax.f32 %v2856_v2, %v2864_v7  ;;  %v3423_v14 = vadd.f32 %v3415_v5, %v3405_v37 }
 0x3f2   : > { %3878 = vst [vmem:[%s10942_s2 + $0x2f0] sm:$0xff] %v2683_v0  ;;  %v3061_v19 = vmax.f32 %v3045_v15, %v3053_v60  ;;  %v3242_v61 = vmul.f32 0.1, %v3234_v34 }
 0x3f3   : > { %3896 = vst [vmem:[%s10942_s2 + $0x330] sm:$0xff] %v2872_v23  ;;  %v3431_v29 = vmul.f32 0.1, %v3423_v14 }
 0x3f4   : > { %3914 = vst [vmem:[%s10942_s2 + $0x370] sm:$0xff] %v3061_v19  ;;  %v3250_v55 = vmax.f32 %v3234_v34, %v3242_v61 }
 0x3f5   : > { %v3439_v40 = vmax.f32 %v3423_v14, %v3431_v29 }
 0x3f6   : > { %3932 = vst [vmem:[%s10942_s2 + $0x3b0] sm:$0xff] %v3250_v55 }
 0x3f7   : > { %3950 = vst [vmem:[%s10942_s2 + $0x3f0] sm:$0xff] %v3439_v40 }
 0x3f8   : > { %s11071_s22 = sld [smem:[#allocation30_spill]]  ;;  %s3476_s29 = sshll.u32 %s10942_s2, 4  ;;  %s3477_s29 = int_to_ptr.vmem [resolvable:$true] %s3476_s29 }
 0x3f9   : > { %s11072_s19 = sld [smem:[#allocation31_spill]]  ;;  %s4410_s17 = smov 1024  }
 0x3fa   : > { %s11073_s23 = sld [smem:[#allocation40_spill]]  ;;  %s4411_s12 = smov 2048  }
 0x3fb   : > { %s11074_s18 = sld [smem:[#allocation286_spill]]  ;;  %s4412_s3 = smov 8  }
 0x3fc   : > { %s4413_s20 = smov 128   ;;  %s4414_s9 = smov 131072  }
 0x3fd   : > { %s4415_s5 = smov 0  }
 0x3fe   : > { %s3953_s14 = sshll.u32 %s11071_s22, 3 }
 0x3ff   : > { %s3954_s24 = sshll.u32 %s11072_s19, 8 }
 0x400   : > { %s3463_s26 = sadd.s32 %s3954_s24, %s3953_s14  ;;  %p11075_p1 = scmp.ne.s32.totalorder %s11073_s23, 0 }
 0x401   : > { %s3955_s8 = sshll.u32 %s3463_s26, 7 }
 0x402   : > { %s3465_s27 = scalar_lea.hbm %s11074_s18, %s3955_s8  ;;  %3978 = sst [smem:[#allocation15]] (%p11075_p1), %s4410_s17 }
 0x403   : > { %3979 = sst [smem:[#allocation15 + $0x1]] (%p11075_p1), %s4411_s12 }
 0x404   : > { %3980 = sst [smem:[#allocation15 + $0x2]] (%p11075_p1), %s4412_s3 }
 0x405   : > { %3981 = sst [smem:[#allocation15 + $0x3]] (%p11075_p1), %s4413_s20 }
 0x406   : > { %3982 = sst [smem:[#allocation15 + $0x4]] (%p11075_p1), %s4413_s20 }
 0x407   : > { %3983 = sst [smem:[#allocation15 + $0x5]] (%p11075_p1), %s4412_s3 }
 0x408   : > { %3984 = dma.general (%p11075_p1), %s3477_s29, 16384, %s3465_s27, %s3451_s10, %s4414_s9, [#allocation15], %s4415_s5, 0  }
 0x409 PF: > { %s11076_s21 = sld [smem:[#allocation34_spill]] }
 0x40a   : > { %s11077_s1 = sld [smem:[#allocation27_spill]] }
 0x40b   : > { %s11078_s4 = sld [smem:[#allocation41_spill]] }
 0x40f   : > { %p4012_p6 = scmp.ge.s32.totalorder %s11076_s21, 2 }
 0x410   : > { %s3504_s0 = sand.u32 1, %s11077_s1  }
 0x411   : > { %p11079_p10 = scmp.ne.s32.totalorder %s11078_s4, 0  ;;  %s3505_s11 = scalar_lea.sflag [#allocation5], %s3504_s0 }
 0x413   : > { %p4004_p2 = pnand %p4012_p6, %p11079_p10 }
 0x415   : > { %p4005_p5 = pneg %p4004_p2 }
 0x417   : > { %4340 = dma.done.wait (%p4005_p5), %s3505_s11, 16384  }
 0x418   : > { %4342 = vsyncadd (%p4005_p5), %s3505_s11, 4294950912  ;;  %s26_s6 = sadd.s32 1, %s11076_s21   ;;  %s11081_s18 = sld [smem:[#allocation23_spill]] }
 0x419   : > { %p9496_p7 = scmp.ge.s32.totalorder %s26_s6, 6   ;;  %s11082_s19 = sld [smem:[#allocation24_spill]] }
 0x41a   : > { %s11083_s20 = sld [smem:[#allocation42_spill]] }
 0x41b   : > { %s11084_s21 = sld [smem:[#allocation25_spill]] }
 0x41c   : > { %s11085_s22 = sld [smem:[#allocation26_spill]] }
 0x41d   : > { %s11086_s23 = sld [smem:[#allocation38_spill]] }
 0x41e   : > { %s11087_s24 = sld [smem:[#allocation28_spill]] }
 0x41f   : > { %s11088_s25 = sld [smem:[#allocation29_spill]] }
 0x420   : > { %s11089_s26 = sld [smem:[#allocation39_spill]]  ;;  %25 = sbr.rel (!%p9496_p7) target bundleno = 21 (0x15), region = 154 }
 0x421   : > { %s11090_s27 = sld [smem:[#allocation32_spill]] }
 0x422   : > { %s11091_s28 = sld [smem:[#allocation33_spill]] }
 0x423   : > { %s11092_s29 = sld [smem:[#allocation35_spill]] }
 0x424   : > { %s11093_s30 = sld [smem:[#allocation36_spill]] }
 0x425   :  { %3510 = vsyncpa [#allocation4], 1 }
 0x426   :  { %3512 = vsyncpa [#allocation4 + $0x1], 1 }
 0x427   :  { %3513 = vsyncpa [#allocation11], 1 }
 0x428   :  { %3515 = vsyncpa [#allocation11 + $0x1], 1 }
 0x429   :  { %3516 = vsyncpa [#allocation5], 1 }
 0x42a   :  { %3518 = vsyncpa [#allocation5 + $0x1], 1 }
 0x42b   :  { %3519 = vsyncpa [#allocation6], 1 }
 0x42c   :  { %3521 = vsyncpa [#allocation6 + $0x1], 1 }
 0x42d   :  { %3522 = vsyncpa [#allocation8], 1 }

</bundles_post_ra>
